<compile_context>
chip_gen: v5e
topology: v5e:2x2
jax: 0.10.0
libtpu: 0.0.40
codegen_flags: <defaults>
</compile_context>

<pallas_src>
import jax
import jax.numpy as jnp
from jax.experimental import pallas as pl
from jax.experimental.pallas import tpu as pltpu

NEG_SLOPE = 0.01           # F.leaky_relu default negative_slope
BN_EPS = 1e-5              # nn.BatchNorm2d default eps
KSIZES = (5, 3, 3)
CHANNELS = (1, 128, 512, 64)
FC3_OUT = 3
VMEM_LIMIT = 32 * 1024 * 1024   # safe on v5e/v6e (128 MiB) and v7x (64 MiB)


# ----------------------------------------------------------------------------
# Small helpers
# ----------------------------------------------------------------------------
def _round_up(x, m):
    return (x + m - 1) // m * m


def _pick_tm(mp, cap=256):
    """Largest multiple of 8 (<= cap) that divides mp (mp is a multiple of 8)."""
    tm = 8
    for t in range(8, min(mp, cap) + 1, 8):
        if mp % t == 0:
            tm = t
    return tm


# ----------------------------------------------------------------------------
# Pallas kernels
# ----------------------------------------------------------------------------
def _conv_bn_act_kernel(x_ref, w_ref, scale_ref, shift_ref, o_ref):
    """One grid step: y = leaky_relu((x @ w) * scale + shift), full K in VMEM.

    x_ref: (tm, K) bf16, w_ref: (K, N) bf16, scale/shift: (1, N) f32,
    o_ref: (tm, N) bf16.  No accumulator scratch: K is a single block.
    """
    acc = jnp.dot(x_ref[...], w_ref[...], preferred_element_type=jnp.float32)
    y = acc * scale_ref[...] + shift_ref[...]
    y = jnp.where(y >= 0, y, NEG_SLOPE * y)
    o_ref[...] = y.astype(o_ref.dtype)


def _maxpool_kernel(x_ref, o_ref):
    """2x2 max-pool, lane-dense layout.

    x_ref: (bm, 2, OW, 2*C)  -- (pooled-row, height-tap, pooled-col, width-tap*C)
    o_ref: (bm, OW, C)
    """
    xv = x_ref[...]
    a = jnp.maximum(xv[:, 0], xv[:, 1])          # height tap -> (bm, OW, 2C)
    c = o_ref.shape[-1]
    o_ref[...] = jnp.maximum(a[..., :c], a[..., c:])   # width tap -> (bm, OW, C)


def _fc_chain_kernel(x_ref, w1_ref, b1_ref, w2_ref, b2_ref, w3_ref, b3_ref, o_ref):
    """fc1 -> lrelu -> fc2 -> lrelu -> fc3, fully in VMEM (bf16 matmuls, f32 epilogue)."""
    h = jnp.dot(x_ref[...], w1_ref[...], preferred_element_type=jnp.float32)
    h = h + b1_ref[...]
    h = jnp.where(h >= 0, h, NEG_SLOPE * h)
    h = jnp.dot(h.astype(jnp.bfloat16), w2_ref[...], preferred_element_type=jnp.float32)
    h = h + b2_ref[...]
    h = jnp.where(h >= 0, h, NEG_SLOPE * h)
    h = jnp.dot(h.astype(jnp.bfloat16), w3_ref[...], preferred_element_type=jnp.float32)
    o_ref[...] = h + b3_ref[...]


# ----------------------------------------------------------------------------
# Pallas wrappers
# ----------------------------------------------------------------------------
def conv_bn_act(patches, w_mat, scale, shift):
    """out = leaky_relu((patches @ w_mat) * scale + shift), bf16 output.

    patches: (M, K) bf16 im2col rows, w_mat: (K, N) bf16, scale/shift: (1, N) f32.
    Grid is 1-D over M only; K and N are whole-array blocks resident in VMEM.
    """
    M, K = patches.shape
    K2, N = w_mat.shape
    assert K == K2
    Mp = _round_up(M, 8)
    tm = _pick_tm(Mp)

    # VMEM budget for double-buffered x/w/out blocks + scale/shift (bf16/bf16/f32).
    blk_bytes = 2 * 2 * (tm * K + K * N + tm * N) + 2 * 2 * N * 4
    # TODO(synk): add a K-gridded accumulate fallback if this ever trips.
    assert blk_bytes < VMEM_LIMIT, "conv tile does not fit VMEM budget"

    xp = patches if Mp == M else jnp.pad(patches, ((0, Mp - M), (0, 0)))

    out = pl.pallas_call(
        _conv_bn_act_kernel,
        out_shape=jax.ShapeDtypeStruct((Mp, N), jnp.bfloat16),
        grid_spec=pltpu.PrefetchScalarGridSpec(
            num_scalar_prefetch=0,
            grid=(Mp // tm,),
            in_specs=[
                pl.BlockSpec((tm, K), lambda i: (i, 0)),   # full-K block (K may be 25)
                pl.BlockSpec((K, N), lambda i: (0, 0)),    # whole weight resident
                pl.BlockSpec((1, N), lambda i: (0, 0)),
                pl.BlockSpec((1, N), lambda i: (0, 0)),
            ],
            out_specs=pl.BlockSpec((tm, N), lambda i: (i, 0)),
        ),
        compiler_params=pltpu.CompilerParams(
            dimension_semantics=("parallel",),
            vmem_limit_bytes=VMEM_LIMIT,
        ),
        cost_estimate=pl.CostEstimate(
            flops=2 * Mp * N * K,
            transcendentals=0,
            bytes_accessed=Mp * K * 2 + K * N * 2 + Mp * N * 2,
        ),
    )(xp, w_mat, scale, shift)
    return out if Mp == M else out[:M]


def maxpool2x2(x):
    """MaxPool2d(2,2) on NHWC input (even H, W — true for this model)."""
    N, H, W, C = x.shape
    assert H % 2 == 0 and W % 2 == 0, "maxpool2x2 requires even spatial dims"
    OH, OW = H // 2, W // 2
    # contiguous (metadata-only) reshape: height tap -> size-2 leading axis,
    # width tap folded into the lane dim (2*C lanes).
    xr = x.reshape(N * OH, 2, OW, 2 * C)
    out = pl.pallas_call(
        _maxpool_kernel,
        out_shape=jax.ShapeDtypeStruct((N * OH, OW, C), x.dtype),
        grid=(N,),
        in_specs=[pl.BlockSpec((OH, 2, OW, 2 * C), lambda i: (i, 0, 0, 0))],
        out_specs=pl.BlockSpec((OH, OW, C), lambda i: (i, 0, 0)),
        compiler_params=pltpu.CompilerParams(
            dimension_semantics=("parallel",),
            vmem_limit_bytes=VMEM_LIMIT,
        ),
    )(xr)
    return out.reshape(N, OH, OW, C)


def fc_chain(x, fc):
    """fc1 -> lrelu -> fc2 -> lrelu -> fc3 as one Pallas call.  x: (M, fc_in) bf16."""
    M = x.shape[0]
    n3p = fc["w3"].shape[1]
    out = pl.pallas_call(
        _fc_chain_kernel,
        out_shape=jax.ShapeDtypeStruct((M, n3p), jnp.float32),
        in_specs=[pl.BlockSpec(memory_space=pltpu.MemorySpace.VMEM)] * 7,
        out_specs=pl.BlockSpec(memory_space=pltpu.MemorySpace.VMEM),
        compiler_params=pltpu.CompilerParams(vmem_limit_bytes=VMEM_LIMIT),
    )(x.astype(jnp.bfloat16),
      fc["w1"], fc["b1"], fc["w2"], fc["b2"], fc["w3"], fc["b3"])
    return out[:, :FC3_OUT]


# ----------------------------------------------------------------------------
# Glue (patch extraction / parameter prep)
# ----------------------------------------------------------------------------
def im2col(x, kh, kw):
    """NHWC bf16 -> (N*OH*OW, kh*kw*C) patches, kernel-position-major / channel-minor."""
    # TODO(synk): replace with in-kernel implicit-GEMM patch construction.
    N, H, W, C = x.shape
    OH, OW = H - kh + 1, W - kw + 1
    cols = [x[:, i:i + OH, j:j + OW, :] for i in range(kh) for j in range(kw)]
    p = jnp.concatenate(cols, axis=-1)           # (N, OH, OW, kh*kw*C)
    return p.reshape(N * OH * OW, kh * kw * C), (N, OH, OW)


def conv_bn_lrelu_pool(x, blk, k):
    """conv (valid, stride 1) -> BN(inference) -> leaky_relu -> maxpool 2x2."""
    patches, (N, OH, OW) = im2col(x, k, k)
    cout = blk["w_mat"].shape[1]
    y = conv_bn_act(patches, blk["w_mat"], blk["scale"], blk["shift"])
    y = y.reshape(N, OH, OW, cout)
    return maxpool2x2(y)


def prepare_params(params):
    """One-time weight prep: transpose, BN fold, bf16 casts, fc3 lane padding."""
    prep = {}
    for li in (1, 2, 3):
        blk = params[f"block{li}"]
        w = blk["w"]                                   # torch layout (Cout, Cin, KH, KW)
        cout, cin, kh, kw = w.shape
        # rows ordered ((i*kw + j)*Cin + c) to match im2col column order
        w_mat = jnp.transpose(w, (2, 3, 1, 0)).reshape(kh * kw * cin, cout)
        scale = blk["gamma"] / jnp.sqrt(blk["var"] + BN_EPS)
        shift = (blk["b"] - blk["mean"]) * scale + blk["beta"]
        prep[f"block{li}"] = dict(
            w_mat=w_mat.astype(jnp.bfloat16),
            scale=scale.reshape(1, cout).astype(jnp.float32),
            shift=shift.reshape(1, cout).astype(jnp.float32),
        )
    n3p = _round_up(FC3_OUT, 128)                      # lane-dense fc3 output
    prep["fc"] = dict(
        w1=params["fc1_w"].astype(jnp.bfloat16),
        b1=params["fc1_b"].reshape(1, -1).astype(jnp.float32),
        w2=params["fc2_w"].astype(jnp.bfloat16),
        b2=params["fc2_b"].reshape(1, -1).astype(jnp.float32),
        w3=jnp.pad(params["fc3_w"], ((0, 0), (0, n3p - FC3_OUT))).astype(jnp.bfloat16),
        b3=jnp.pad(params["fc3_b"], (0, n3p - FC3_OUT)).reshape(1, -1).astype(jnp.float32),
    )
    return prep


def init_params(key, input_hw=(32, 32)):
    keys = jax.random.split(key, 13)
    params = {}
    ki = 0
    for li, (cin, cout, k) in enumerate(zip(CHANNELS[:-1], CHANNELS[1:], KSIZES), 1):
        params[f"block{li}"] = dict(
            w=0.05 * jax.random.normal(keys[ki], (cout, cin, k, k), jnp.float32),
            b=0.05 * jax.random.normal(keys[ki + 1], (cout,), jnp.float32),
            gamma=jnp.ones((cout,), jnp.float32) + 0.01 * jax.random.normal(keys[ki + 2], (cout,)),
            beta=0.01 * jax.random.normal(keys[ki + 3], (cout,), jnp.float32),
            mean=jnp.zeros((cout,), jnp.float32),
            var=jnp.ones((cout,), jnp.float32),
        )
        ki += 4
    # spatial sizes through the three conv+pool stages
    h, w = input_hw
    for k in KSIZES:
        h, w = (h - k + 1) // 2, (w - k + 1) // 2
    fc_in = CHANNELS[-1] * h * w
    fkeys = jax.random.split(keys[-1], 6)
    params["fc1_w"] = 0.05 * jax.random.normal(fkeys[0], (fc_in, 1024), jnp.float32)
    params["fc1_b"] = 0.05 * jax.random.normal(fkeys[1], (1024,), jnp.float32)
    params["fc2_w"] = 0.05 * jax.random.normal(fkeys[2], (1024, 128), jnp.float32)
    params["fc2_b"] = 0.05 * jax.random.normal(fkeys[3], (128,), jnp.float32)
    params["fc3_w"] = 0.05 * jax.random.normal(fkeys[4], (128, FC3_OUT), jnp.float32)
    params["fc3_b"] = 0.05 * jax.random.normal(fkeys[5], (FC3_OUT,), jnp.float32)
    return params


def circle_detector_forward(x_nchw, prep):
    # NCHW (PyTorch) -> NHWC (kernel layout), bf16 activations throughout
    x = jnp.transpose(x_nchw, (0, 2, 3, 1)).astype(jnp.bfloat16)
    for li, k in zip((1, 2, 3), KSIZES):
        x = conv_bn_lrelu_pool(x, prep[f"block{li}"], k)
    # match torch x.view(N, -1) on an NCHW tensor: flatten in (C, H, W) order
    N = x.shape[0]
    x = jnp.transpose(x, (0, 3, 1, 2)).reshape(N, -1)
    return fc_chain(x, prep["fc"])


if __name__ == "__main__":
    key = jax.random.PRNGKey(0)
    pkey, xkey = jax.random.split(key)
    # small but structurally consistent input: batch=2, 1 channel, 32x32
    x = jax.random.normal(xkey, (2, 1, 32, 32), jnp.float32)
    params = init_params(pkey, input_hw=(32, 32))
    prep = prepare_params(params)            # one-time weight preprocessing
    fwd = jax.jit(circle_detector_forward)
    out = jax.block_until_ready(fwd(x, prep))
    assert out.shape == (2, FC3_OUT) and out.dtype == jnp.float32
    print("KERNEL_OK")
</pallas_src>

<mosaic_0001>
module attributes {stable_mosaic.version = 11 : i64} {
  func.func @_conv_bn_act_kernel(%arg0: i32, %arg1: memref<224x25xbf16, #tpu.memory_space<vmem>>, %arg2: memref<25x128xbf16, #tpu.memory_space<vmem>>, %arg3: memref<1x128xf32, #tpu.memory_space<vmem>>, %arg4: memref<1x128xf32, #tpu.memory_space<vmem>>, %arg5: memref<224x128xbf16, #tpu.memory_space<vmem>>) attributes {dimension_semantics = [#tpu.dimension_semantics<parallel>], iteration_bounds = array<i64: 7>, scalar_prefetch = 0 : i64, scratch_operands = 0 : i64, tpu.core_type = #tpu.core_type<tc>, window_params = [{transform_indices = @transform_0, window_bounds = array<i64: 224, 25>}, {pipeline_mode = #tpu.pipeline_mode<synchronous>, transform_indices = @transform_1, window_bounds = array<i64: 25, 128>}, {pipeline_mode = #tpu.pipeline_mode<synchronous>, transform_indices = @transform_2, window_bounds = array<i64: 1, 128>}, {pipeline_mode = #tpu.pipeline_mode<synchronous>, transform_indices = @transform_3, window_bounds = array<i64: 1, 128>}, {transform_indices = @transform_4, window_bounds = array<i64: 224, 128>}]} {
    %c0 = arith.constant 0 : index
    %c0_0 = arith.constant 0 : index
    %0 = vector.load %arg1[%c0, %c0_0] : memref<224x25xbf16, #tpu.memory_space<vmem>>, vector<224x25xbf16>
    %c0_1 = arith.constant 0 : index
    %c0_2 = arith.constant 0 : index
    %1 = vector.load %arg2[%c0_1, %c0_2] : memref<25x128xbf16, #tpu.memory_space<vmem>>, vector<25x128xbf16>
    %cst = arith.constant dense<0.000000e+00> : vector<224x128xf32>
    %2 = tpu.matmul %0, %1, %cst {dimension_numbers = #tpu.dot_dimension_numbers<[1], [0], [0], [1], [0, 0, 1, 1], [], []>} : vector<224x25xbf16>, vector<25x128xbf16>, vector<224x128xf32> -> vector<224x128xf32>
    %c0_3 = arith.constant 0 : index
    %c0_4 = arith.constant 0 : index
    %3 = vector.load %arg3[%c0_3, %c0_4] : memref<1x128xf32, #tpu.memory_space<vmem>>, vector<1x128xf32>
    %4 = vector.broadcast %3 : vector<1x128xf32> to vector<224x128xf32>
    %5 = arith.mulf %2, %4 : vector<224x128xf32>
    %c0_5 = arith.constant 0 : index
    %c0_6 = arith.constant 0 : index
    %6 = vector.load %arg4[%c0_5, %c0_6] : memref<1x128xf32, #tpu.memory_space<vmem>>, vector<1x128xf32>
    %7 = vector.broadcast %6 : vector<1x128xf32> to vector<224x128xf32>
    %8 = arith.addf %5, %7 : vector<224x128xf32>
    %cst_7 = arith.constant 0.000000e+00 : f32
    %9 = vector.broadcast %cst_7 : f32 to vector<224x128xf32>
    %10 = arith.cmpf oge, %8, %9 : vector<224x128xf32>
    %cst_8 = arith.constant 0.00999999977 : f32
    %11 = vector.broadcast %cst_8 : f32 to vector<224x128xf32>
    %12 = arith.mulf %11, %8 : vector<224x128xf32>
    %13 = arith.select %10, %8, %12 : vector<224x128xi1>, vector<224x128xf32>
    %14 = arith.truncf %13 : vector<224x128xf32> to vector<224x128xbf16>
    %c0_9 = arith.constant 0 : index
    %c0_10 = arith.constant 0 : index
    %15 = vector.load %arg5[%c0_9, %c0_10] : memref<224x128xbf16, #tpu.memory_space<vmem>>, vector<224x128xbf16>
    tpu.vector_store %arg5[%c0_9, %c0_10], %14 {strides = array<i32>} : memref<224x128xbf16, #tpu.memory_space<vmem>>, vector<224x128xbf16>,
    return
  }
  func.func @transform_0(%arg0: i32) -> (i32, i32) {
    %c0_i32 = arith.constant 0 : i32
    %c0_i32_0 = arith.constant 0 : i32
    return %arg0, %c0_i32 : i32, i32
  }
  func.func @transform_1(%arg0: i32) -> (i32, i32) {
    %c0_i32 = arith.constant 0 : i32
    %c0_i32_0 = arith.constant 0 : i32
    %c0_i32_1 = arith.constant 0 : i32
    return %c0_i32, %c0_i32_0 : i32, i32
  }
  func.func @transform_2(%arg0: i32) -> (i32, i32) {
    %c0_i32 = arith.constant 0 : i32
    %c0_i32_0 = arith.constant 0 : i32
    %c0_i32_1 = arith.constant 0 : i32
    return %c0_i32, %c0_i32_0 : i32, i32
  }
  func.func @transform_3(%arg0: i32) -> (i32, i32) {
    %c0_i32 = arith.constant 0 : i32
    %c0_i32_0 = arith.constant 0 : i32
    %c0_i32_1 = arith.constant 0 : i32
    return %c0_i32, %c0_i32_0 : i32, i32
  }
  func.func @transform_4(%arg0: i32) -> (i32, i32) {
    %c0_i32 = arith.constant 0 : i32
    %c0_i32_0 = arith.constant 0 : i32
    return %arg0, %c0_i32 : i32, i32
  }
}

module attributes {stable_mosaic.version = 11 : i64} {
  func.func @_maxpool_kernel(%arg0: i32, %arg1: memref<14x2x14x256xbf16, #tpu.memory_space<vmem>>, %arg2: memref<14x14x128xbf16, #tpu.memory_space<vmem>>) attributes {dimension_semantics = [#tpu.dimension_semantics<parallel>], iteration_bounds = array<i64: 2>, scalar_prefetch = 0 : i64, scratch_operands = 0 : i64, tpu.core_type = #tpu.core_type<tc>, window_params = [{transform_indices = @transform_0, window_bounds = array<i64: 14, 2, 14, 256>}, {transform_indices = @transform_1, window_bounds = array<i64: 14, 14, 128>}]} {
    %c0 = arith.constant 0 : index
    %c0_0 = arith.constant 0 : index
    %c0_1 = arith.constant 0 : index
    %c0_2 = arith.constant 0 : index
    %0 = vector.load %arg1[%c0, %c0_0, %c0_1, %c0_2] : memref<14x2x14x256xbf16, #tpu.memory_space<vmem>>, vector<14x2x14x256xbf16>
    %1 = vector.extract_strided_slice %0 {offsets = [0, 0, 0, 0], sizes = [14, 1, 14, 256], strides = [1, 1, 1, 1]} : vector<14x2x14x256xbf16> to vector<14x1x14x256xbf16>
    %2 = vector.shape_cast %1 : vector<14x1x14x256xbf16> to vector<14x14x256xbf16>
    %3 = vector.extract_strided_slice %0 {offsets = [0, 1, 0, 0], sizes = [14, 1, 14, 256], strides = [1, 1, 1, 1]} : vector<14x2x14x256xbf16> to vector<14x1x14x256xbf16>
    %4 = vector.shape_cast %3 : vector<14x1x14x256xbf16> to vector<14x14x256xbf16>
    %5 = arith.maximumf %2, %4 : vector<14x14x256xbf16>
    %6 = vector.extract_strided_slice %5 {offsets = [0, 0, 0], sizes = [14, 14, 128], strides = [1, 1, 1]} : vector<14x14x256xbf16> to vector<14x14x128xbf16>
    %7 = vector.extract_strided_slice %5 {offsets = [0, 0, 128], sizes = [14, 14, 128], strides = [1, 1, 1]} : vector<14x14x256xbf16> to vector<14x14x128xbf16>
    %8 = arith.maximumf %6, %7 : vector<14x14x128xbf16>
    %c0_3 = arith.constant 0 : index
    %c0_4 = arith.constant 0 : index
    %c0_5 = arith.constant 0 : index
    %9 = vector.load %arg2[%c0_3, %c0_4, %c0_5] : memref<14x14x128xbf16, #tpu.memory_space<vmem>>, vector<14x14x128xbf16>
    tpu.vector_store %arg2[%c0_3, %c0_4, %c0_5], %8 {strides = array<i32>} : memref<14x14x128xbf16, #tpu.memory_space<vmem>>, vector<14x14x128xbf16>,
    return
  }
  func.func @transform_0(%arg0: i32) -> (i32, i32, i32, i32) {
    %c0_i32 = arith.constant 0 : i32
    %c0_i32_0 = arith.constant 0 : i32
    %c0_i32_1 = arith.constant 0 : i32
    %c0_i32_2 = arith.constant 0 : i32
    return %arg0, %c0_i32, %c0_i32_0, %c0_i32_1 : i32, i32, i32, i32
  }
  func.func @transform_1(%arg0: i32) -> (i32, i32, i32) {
    %c0_i32 = arith.constant 0 : i32
    %c0_i32_0 = arith.constant 0 : i32
    %c0_i32_1 = arith.constant 0 : i32
    return %arg0, %c0_i32, %c0_i32_0 : i32, i32, i32
  }
}

module attributes {stable_mosaic.version = 11 : i64} {
  func.func @_conv_bn_act_kernel(%arg0: i32, %arg1: memref<144x1152xbf16, #tpu.memory_space<vmem>>, %arg2: memref<1152x512xbf16, #tpu.memory_space<vmem>>, %arg3: memref<1x512xf32, #tpu.memory_space<vmem>>, %arg4: memref<1x512xf32, #tpu.memory_space<vmem>>, %arg5: memref<144x512xbf16, #tpu.memory_space<vmem>>) attributes {dimension_semantics = [#tpu.dimension_semantics<parallel>], iteration_bounds = array<i64: 2>, scalar_prefetch = 0 : i64, scratch_operands = 0 : i64, tpu.core_type = #tpu.core_type<tc>, window_params = [{transform_indices = @transform_0, window_bounds = array<i64: 144, 1152>}, {pipeline_mode = #tpu.pipeline_mode<synchronous>, transform_indices = @transform_1, window_bounds = array<i64: 1152, 512>}, {pipeline_mode = #tpu.pipeline_mode<synchronous>, transform_indices = @transform_2, window_bounds = array<i64: 1, 512>}, {pipeline_mode = #tpu.pipeline_mode<synchronous>, transform_indices = @transform_3, window_bounds = array<i64: 1, 512>}, {transform_indices = @transform_4, window_bounds = array<i64: 144, 512>}]} {
    %c0 = arith.constant 0 : index
    %c0_0 = arith.constant 0 : index
    %0 = vector.load %arg1[%c0, %c0_0] : memref<144x1152xbf16, #tpu.memory_space<vmem>>, vector<144x1152xbf16>
    %c0_1 = arith.constant 0 : index
    %c0_2 = arith.constant 0 : index
    %1 = vector.load %arg2[%c0_1, %c0_2] : memref<1152x512xbf16, #tpu.memory_space<vmem>>, vector<1152x512xbf16>
    %cst = arith.constant dense<0.000000e+00> : vector<144x512xf32>
    %2 = tpu.matmul %0, %1, %cst {dimension_numbers = #tpu.dot_dimension_numbers<[1], [0], [0], [1], [0, 0, 1, 1], [], []>} : vector<144x1152xbf16>, vector<1152x512xbf16>, vector<144x512xf32> -> vector<144x512xf32>
    %c0_3 = arith.constant 0 : index
    %c0_4 = arith.constant 0 : index
    %3 = vector.load %arg3[%c0_3, %c0_4] : memref<1x512xf32, #tpu.memory_space<vmem>>, vector<1x512xf32>
    %4 = vector.broadcast %3 : vector<1x512xf32> to vector<144x512xf32>
    %5 = arith.mulf %2, %4 : vector<144x512xf32>
    %c0_5 = arith.constant 0 : index
    %c0_6 = arith.constant 0 : index
    %6 = vector.load %arg4[%c0_5, %c0_6] : memref<1x512xf32, #tpu.memory_space<vmem>>, vector<1x512xf32>
    %7 = vector.broadcast %6 : vector<1x512xf32> to vector<144x512xf32>
    %8 = arith.addf %5, %7 : vector<144x512xf32>
    %cst_7 = arith.constant 0.000000e+00 : f32
    %9 = vector.broadcast %cst_7 : f32 to vector<144x512xf32>
    %10 = arith.cmpf oge, %8, %9 : vector<144x512xf32>
    %cst_8 = arith.constant 0.00999999977 : f32
    %11 = vector.broadcast %cst_8 : f32 to vector<144x512xf32>
    %12 = arith.mulf %11, %8 : vector<144x512xf32>
    %13 = arith.select %10, %8, %12 : vector<144x512xi1>, vector<144x512xf32>
    %14 = arith.truncf %13 : vector<144x512xf32> to vector<144x512xbf16>
    %c0_9 = arith.constant 0 : index
    %c0_10 = arith.constant 0 : index
    %15 = vector.load %arg5[%c0_9, %c0_10] : memref<144x512xbf16, #tpu.memory_space<vmem>>, vector<144x512xbf16>
    tpu.vector_store %arg5[%c0_9, %c0_10], %14 {strides = array<i32>} : memref<144x512xbf16, #tpu.memory_space<vmem>>, vector<144x512xbf16>,
    return
  }
  func.func @transform_0(%arg0: i32) -> (i32, i32) {
    %c0_i32 = arith.constant 0 : i32
    %c0_i32_0 = arith.constant 0 : i32
    return %arg0, %c0_i32 : i32, i32
  }
  func.func @transform_1(%arg0: i32) -> (i32, i32) {
    %c0_i32 = arith.constant 0 : i32
    %c0_i32_0 = arith.constant 0 : i32
    %c0_i32_1 = arith.constant 0 : i32
    return %c0_i32, %c0_i32_0 : i32, i32
  }
  func.func @transform_2(%arg0: i32) -> (i32, i32) {
    %c0_i32 = arith.constant 0 : i32
    %c0_i32_0 = arith.constant 0 : i32
    %c0_i32_1 = arith.constant 0 : i32
    return %c0_i32, %c0_i32_0 : i32, i32
  }
  func.func @transform_3(%arg0: i32) -> (i32, i32) {
    %c0_i32 = arith.constant 0 : i32
    %c0_i32_0 = arith.constant 0 : i32
    %c0_i32_1 = arith.constant 0 : i32
    return %c0_i32, %c0_i32_0 : i32, i32
  }
  func.func @transform_4(%arg0: i32) -> (i32, i32) {
    %c0_i32 = arith.constant 0 : i32
    %c0_i32_0 = arith.constant 0 : i32
    return %arg0, %c0_i32 : i32, i32
  }
}

module attributes {stable_mosaic.version = 11 : i64} {
  func.func @_maxpool_kernel(%arg0: i32, %arg1: memref<6x2x6x1024xbf16, #tpu.memory_space<vmem>>, %arg2: memref<6x6x512xbf16, #tpu.memory_space<vmem>>) attributes {dimension_semantics = [#tpu.dimension_semantics<parallel>], iteration_bounds = array<i64: 2>, scalar_prefetch = 0 : i64, scratch_operands = 0 : i64, tpu.core_type = #tpu.core_type<tc>, window_params = [{transform_indices = @transform_0, window_bounds = array<i64: 6, 2, 6, 1024>}, {transform_indices = @transform_1, window_bounds = array<i64: 6, 6, 512>}]} {
    %c0 = arith.constant 0 : index
    %c0_0 = arith.constant 0 : index
    %c0_1 = arith.constant 0 : index
    %c0_2 = arith.constant 0 : index
    %0 = vector.load %arg1[%c0, %c0_0, %c0_1, %c0_2] : memref<6x2x6x1024xbf16, #tpu.memory_space<vmem>>, vector<6x2x6x1024xbf16>
    %1 = vector.extract_strided_slice %0 {offsets = [0, 0, 0, 0], sizes = [6, 1, 6, 1024], strides = [1, 1, 1, 1]} : vector<6x2x6x1024xbf16> to vector<6x1x6x1024xbf16>
    %2 = vector.shape_cast %1 : vector<6x1x6x1024xbf16> to vector<6x6x1024xbf16>
    %3 = vector.extract_strided_slice %0 {offsets = [0, 1, 0, 0], sizes = [6, 1, 6, 1024], strides = [1, 1, 1, 1]} : vector<6x2x6x1024xbf16> to vector<6x1x6x1024xbf16>
    %4 = vector.shape_cast %3 : vector<6x1x6x1024xbf16> to vector<6x6x1024xbf16>
    %5 = arith.maximumf %2, %4 : vector<6x6x1024xbf16>
    %6 = vector.extract_strided_slice %5 {offsets = [0, 0, 0], sizes = [6, 6, 512], strides = [1, 1, 1]} : vector<6x6x1024xbf16> to vector<6x6x512xbf16>
    %7 = vector.extract_strided_slice %5 {offsets = [0, 0, 512], sizes = [6, 6, 512], strides = [1, 1, 1]} : vector<6x6x1024xbf16> to vector<6x6x512xbf16>
    %8 = arith.maximumf %6, %7 : vector<6x6x512xbf16>
    %c0_3 = arith.constant 0 : index
    %c0_4 = arith.constant 0 : index
    %c0_5 = arith.constant 0 : index
    %9 = vector.load %arg2[%c0_3, %c0_4, %c0_5] : memref<6x6x512xbf16, #tpu.memory_space<vmem>>, vector<6x6x512xbf16>
    tpu.vector_store %arg2[%c0_3, %c0_4, %c0_5], %8 {strides = array<i32>} : memref<6x6x512xbf16, #tpu.memory_space<vmem>>, vector<6x6x512xbf16>,
    return
  }
  func.func @transform_0(%arg0: i32) -> (i32, i32, i32, i32) {
    %c0_i32 = arith.constant 0 : i32
    %c0_i32_0 = arith.constant 0 : i32
    %c0_i32_1 = arith.constant 0 : i32
    %c0_i32_2 = arith.constant 0 : i32
    return %arg0, %c0_i32, %c0_i32_0, %c0_i32_1 : i32, i32, i32, i32
  }
  func.func @transform_1(%arg0: i32) -> (i32, i32, i32) {
    %c0_i32 = arith.constant 0 : i32
    %c0_i32_0 = arith.constant 0 : i32
    %c0_i32_1 = arith.constant 0 : i32
    return %arg0, %c0_i32, %c0_i32_0 : i32, i32, i32
  }
}

module attributes {stable_mosaic.version = 11 : i64} {
  func.func @_conv_bn_act_kernel(%arg0: i32, %arg1: memref<32x4608xbf16, #tpu.memory_space<vmem>>, %arg2: memref<4608x64xbf16, #tpu.memory_space<vmem>>, %arg3: memref<1x64xf32, #tpu.memory_space<vmem>>, %arg4: memref<1x64xf32, #tpu.memory_space<vmem>>, %arg5: memref<32x64xbf16, #tpu.memory_space<vmem>>) attributes {dimension_semantics = [#tpu.dimension_semantics<parallel>], iteration_bounds = array<i64: 1>, scalar_prefetch = 0 : i64, scratch_operands = 0 : i64, tpu.core_type = #tpu.core_type<tc>, window_params = [{transform_indices = @transform_0, window_bounds = array<i64: 32, 4608>}, {pipeline_mode = #tpu.pipeline_mode<synchronous>, transform_indices = @transform_1, window_bounds = array<i64: 4608, 64>}, {pipeline_mode = #tpu.pipeline_mode<synchronous>, transform_indices = @transform_2, window_bounds = array<i64: 1, 64>}, {pipeline_mode = #tpu.pipeline_mode<synchronous>, transform_indices = @transform_3, window_bounds = array<i64: 1, 64>}, {transform_indices = @transform_4, window_bounds = array<i64: 32, 64>}]} {
    %c0 = arith.constant 0 : index
    %c0_0 = arith.constant 0 : index
    %0 = vector.load %arg1[%c0, %c0_0] : memref<32x4608xbf16, #tpu.memory_space<vmem>>, vector<32x4608xbf16>
    %c0_1 = arith.constant 0 : index
    %c0_2 = arith.constant 0 : index
    %1 = vector.load %arg2[%c0_1, %c0_2] : memref<4608x64xbf16, #tpu.memory_space<vmem>>, vector<4608x64xbf16>
    %cst = arith.constant dense<0.000000e+00> : vector<32x64xf32>
    %2 = tpu.matmul %0, %1, %cst {dimension_numbers = #tpu.dot_dimension_numbers<[1], [0], [0], [1], [0, 0, 1, 1], [], []>} : vector<32x4608xbf16>, vector<4608x64xbf16>, vector<32x64xf32> -> vector<32x64xf32>
    %c0_3 = arith.constant 0 : index
    %c0_4 = arith.constant 0 : index
    %3 = vector.load %arg3[%c0_3, %c0_4] : memref<1x64xf32, #tpu.memory_space<vmem>>, vector<1x64xf32>
    %4 = vector.broadcast %3 : vector<1x64xf32> to vector<32x64xf32>
    %5 = arith.mulf %2, %4 : vector<32x64xf32>
    %c0_5 = arith.constant 0 : index
    %c0_6 = arith.constant 0 : index
    %6 = vector.load %arg4[%c0_5, %c0_6] : memref<1x64xf32, #tpu.memory_space<vmem>>, vector<1x64xf32>
    %7 = vector.broadcast %6 : vector<1x64xf32> to vector<32x64xf32>
    %8 = arith.addf %5, %7 : vector<32x64xf32>
    %cst_7 = arith.constant 0.000000e+00 : f32
    %9 = vector.broadcast %cst_7 : f32 to vector<32x64xf32>
    %10 = arith.cmpf oge, %8, %9 : vector<32x64xf32>
    %cst_8 = arith.constant 0.00999999977 : f32
    %11 = vector.broadcast %cst_8 : f32 to vector<32x64xf32>
    %12 = arith.mulf %11, %8 : vector<32x64xf32>
    %13 = arith.select %10, %8, %12 : vector<32x64xi1>, vector<32x64xf32>
    %14 = arith.truncf %13 : vector<32x64xf32> to vector<32x64xbf16>
    %c0_9 = arith.constant 0 : index
    %c0_10 = arith.constant 0 : index
    %15 = vector.load %arg5[%c0_9, %c0_10] : memref<32x64xbf16, #tpu.memory_space<vmem>>, vector<32x64xbf16>
    tpu.vector_store %arg5[%c0_9, %c0_10], %14 {strides = array<i32>} : memref<32x64xbf16, #tpu.memory_space<vmem>>, vector<32x64xbf16>,
    return
  }
  func.func @transform_0(%arg0: i32) -> (i32, i32) {
    %c0_i32 = arith.constant 0 : i32
    %c0_i32_0 = arith.constant 0 : i32
    return %arg0, %c0_i32 : i32, i32
  }
  func.func @transform_1(%arg0: i32) -> (i32, i32) {
    %c0_i32 = arith.constant 0 : i32
    %c0_i32_0 = arith.constant 0 : i32
    %c0_i32_1 = arith.constant 0 : i32
    return %c0_i32, %c0_i32_0 : i32, i32
  }
  func.func @transform_2(%arg0: i32) -> (i32, i32) {
    %c0_i32 = arith.constant 0 : i32
    %c0_i32_0 = arith.constant 0 : i32
    %c0_i32_1 = arith.constant 0 : i32
    return %c0_i32, %c0_i32_0 : i32, i32
  }
  func.func @transform_3(%arg0: i32) -> (i32, i32) {
    %c0_i32 = arith.constant 0 : i32
    %c0_i32_0 = arith.constant 0 : i32
    %c0_i32_1 = arith.constant 0 : i32
    return %c0_i32, %c0_i32_0 : i32, i32
  }
  func.func @transform_4(%arg0: i32) -> (i32, i32) {
    %c0_i32 = arith.constant 0 : i32
    %c0_i32_0 = arith.constant 0 : i32
    return %arg0, %c0_i32 : i32, i32
  }
}

module attributes {stable_mosaic.version = 11 : i64} {
  func.func @_maxpool_kernel(%arg0: i32, %arg1: memref<2x2x2x128xbf16, #tpu.memory_space<vmem>>, %arg2: memref<2x2x64xbf16, #tpu.memory_space<vmem>>) attributes {dimension_semantics = [#tpu.dimension_semantics<parallel>], iteration_bounds = array<i64: 2>, scalar_prefetch = 0 : i64, scratch_operands = 0 : i64, tpu.core_type = #tpu.core_type<tc>, window_params = [{transform_indices = @transform_0, window_bounds = array<i64: 2, 2, 2, 128>}, {transform_indices = @transform_1, window_bounds = array<i64: 2, 2, 64>}]} {
    %c0 = arith.constant 0 : index
    %c0_0 = arith.constant 0 : index
    %c0_1 = arith.constant 0 : index
    %c0_2 = arith.constant 0 : index
    %0 = vector.load %arg1[%c0, %c0_0, %c0_1, %c0_2] : memref<2x2x2x128xbf16, #tpu.memory_space<vmem>>, vector<2x2x2x128xbf16>
    %1 = vector.extract_strided_slice %0 {offsets = [0, 0, 0, 0], sizes = [2, 1, 2, 128], strides = [1, 1, 1, 1]} : vector<2x2x2x128xbf16> to vector<2x1x2x128xbf16>
    %2 = vector.shape_cast %1 : vector<2x1x2x128xbf16> to vector<2x2x128xbf16>
    %3 = vector.extract_strided_slice %0 {offsets = [0, 1, 0, 0], sizes = [2, 1, 2, 128], strides = [1, 1, 1, 1]} : vector<2x2x2x128xbf16> to vector<2x1x2x128xbf16>
    %4 = vector.shape_cast %3 : vector<2x1x2x128xbf16> to vector<2x2x128xbf16>
    %5 = arith.maximumf %2, %4 : vector<2x2x128xbf16>
    %6 = vector.extract_strided_slice %5 {offsets = [0, 0, 0], sizes = [2, 2, 64], strides = [1, 1, 1]} : vector<2x2x128xbf16> to vector<2x2x64xbf16>
    %7 = vector.extract_strided_slice %5 {offsets = [0, 0, 64], sizes = [2, 2, 64], strides = [1, 1, 1]} : vector<2x2x128xbf16> to vector<2x2x64xbf16>
    %8 = arith.maximumf %6, %7 : vector<2x2x64xbf16>
    %c0_3 = arith.constant 0 : index
    %c0_4 = arith.constant 0 : index
    %c0_5 = arith.constant 0 : index
    %9 = vector.load %arg2[%c0_3, %c0_4, %c0_5] : memref<2x2x64xbf16, #tpu.memory_space<vmem>>, vector<2x2x64xbf16>
    tpu.vector_store %arg2[%c0_3, %c0_4, %c0_5], %8 {strides = array<i32>} : memref<2x2x64xbf16, #tpu.memory_space<vmem>>, vector<2x2x64xbf16>,
    return
  }
  func.func @transform_0(%arg0: i32) -> (i32, i32, i32, i32) {
    %c0_i32 = arith.constant 0 : i32
    %c0_i32_0 = arith.constant 0 : i32
    %c0_i32_1 = arith.constant 0 : i32
    %c0_i32_2 = arith.constant 0 : i32
    return %arg0, %c0_i32, %c0_i32_0, %c0_i32_1 : i32, i32, i32, i32
  }
  func.func @transform_1(%arg0: i32) -> (i32, i32, i32) {
    %c0_i32 = arith.constant 0 : i32
    %c0_i32_0 = arith.constant 0 : i32
    %c0_i32_1 = arith.constant 0 : i32
    return %arg0, %c0_i32, %c0_i32_0 : i32, i32, i32
  }
}

module attributes {stable_mosaic.version = 11 : i64} {
  func.func @_fc_chain_kernel(%arg0: memref<2x256xbf16, #tpu.memory_space<vmem>>, %arg1: memref<256x1024xbf16, #tpu.memory_space<vmem>>, %arg2: memref<1x1024xf32, #tpu.memory_space<vmem>>, %arg3: memref<1024x128xbf16, #tpu.memory_space<vmem>>, %arg4: memref<1x128xf32, #tpu.memory_space<vmem>>, %arg5: memref<128x128xbf16, #tpu.memory_space<vmem>>, %arg6: memref<1x128xf32, #tpu.memory_space<vmem>>, %arg7: memref<2x128xf32, #tpu.memory_space<vmem>>) attributes {dimension_semantics = [], scalar_prefetch = 0 : i64, scratch_operands = 0 : i64, tpu.core_type = #tpu.core_type<tc>} {
    %c0 = arith.constant 0 : index
    %c0_0 = arith.constant 0 : index
    %0 = vector.load %arg0[%c0, %c0_0] : memref<2x256xbf16, #tpu.memory_space<vmem>>, vector<2x256xbf16>
    %c0_1 = arith.constant 0 : index
    %c0_2 = arith.constant 0 : index
    %1 = vector.load %arg1[%c0_1, %c0_2] : memref<256x1024xbf16, #tpu.memory_space<vmem>>, vector<256x1024xbf16>
    %cst = arith.constant dense<0.000000e+00> : vector<2x1024xf32>
    %2 = tpu.matmul %0, %1, %cst {dimension_numbers = #tpu.dot_dimension_numbers<[1], [0], [0], [1], [0, 0, 1, 1], [], []>} : vector<2x256xbf16>, vector<256x1024xbf16>, vector<2x1024xf32> -> vector<2x1024xf32>
    %c0_3 = arith.constant 0 : index
    %c0_4 = arith.constant 0 : index
    %3 = vector.load %arg2[%c0_3, %c0_4] : memref<1x1024xf32, #tpu.memory_space<vmem>>, vector<1x1024xf32>
    %4 = vector.broadcast %3 : vector<1x1024xf32> to vector<2x1024xf32>
    %5 = arith.addf %2, %4 : vector<2x1024xf32>
    %cst_5 = arith.constant 0.000000e+00 : f32
    %6 = vector.broadcast %cst_5 : f32 to vector<2x1024xf32>
    %7 = arith.cmpf oge, %5, %6 : vector<2x1024xf32>
    %cst_6 = arith.constant 0.00999999977 : f32
    %8 = vector.broadcast %cst_6 : f32 to vector<2x1024xf32>
    %9 = arith.mulf %8, %5 : vector<2x1024xf32>
    %10 = arith.select %7, %5, %9 : vector<2x1024xi1>, vector<2x1024xf32>
    %11 = arith.truncf %10 : vector<2x1024xf32> to vector<2x1024xbf16>
    %c0_7 = arith.constant 0 : index
    %c0_8 = arith.constant 0 : index
    %12 = vector.load %arg3[%c0_7, %c0_8] : memref<1024x128xbf16, #tpu.memory_space<vmem>>, vector<1024x128xbf16>
    %cst_9 = arith.constant dense<0.000000e+00> : vector<2x128xf32>
    %13 = tpu.matmul %11, %12, %cst_9 {dimension_numbers = #tpu.dot_dimension_numbers<[1], [0], [0], [1], [0, 0, 1, 1], [], []>} : vector<2x1024xbf16>, vector<1024x128xbf16>, vector<2x128xf32> -> vector<2x128xf32>
    %c0_10 = arith.constant 0 : index
    %c0_11 = arith.constant 0 : index
    %14 = vector.load %arg4[%c0_10, %c0_11] : memref<1x128xf32, #tpu.memory_space<vmem>>, vector<1x128xf32>
    %15 = vector.broadcast %14 : vector<1x128xf32> to vector<2x128xf32>
    %16 = arith.addf %13, %15 : vector<2x128xf32>
    %cst_12 = arith.constant 0.000000e+00 : f32
    %17 = vector.broadcast %cst_12 : f32 to vector<2x128xf32>
    %18 = arith.cmpf oge, %16, %17 : vector<2x128xf32>
    %cst_13 = arith.constant 0.00999999977 : f32
    %19 = vector.broadcast %cst_13 : f32 to vector<2x128xf32>
    %20 = arith.mulf %19, %16 : vector<2x128xf32>
    %21 = arith.select %18, %16, %20 : vector<2x128xi1>, vector<2x128xf32>
    %22 = arith.truncf %21 : vector<2x128xf32> to vector<2x128xbf16>
    %c0_14 = arith.constant 0 : index
    %c0_15 = arith.constant 0 : index
    %23 = vector.load %arg5[%c0_14, %c0_15] : memref<128x128xbf16, #tpu.memory_space<vmem>>, vector<128x128xbf16>
    %cst_16 = arith.constant dense<0.000000e+00> : vector<2x128xf32>
    %24 = tpu.matmul %22, %23, %cst_16 {dimension_numbers = #tpu.dot_dimension_numbers<[1], [0], [0], [1], [0, 0, 1, 1], [], []>} : vector<2x128xbf16>, vector<128x128xbf16>, vector<2x128xf32> -> vector<2x128xf32>
    %c0_17 = arith.constant 0 : index
    %c0_18 = arith.constant 0 : index
    %25 = vector.load %arg6[%c0_17, %c0_18] : memref<1x128xf32, #tpu.memory_space<vmem>>, vector<1x128xf32>
    %26 = vector.broadcast %25 : vector<1x128xf32> to vector<2x128xf32>
    %27 = arith.addf %24, %26 : vector<2x128xf32>
    %c0_19 = arith.constant 0 : index
    %c0_20 = arith.constant 0 : index
    %28 = vector.load %arg7[%c0_19, %c0_20] : memref<2x128xf32, #tpu.memory_space<vmem>>, vector<2x128xf32>
    tpu.vector_store %arg7[%c0_19, %c0_20], %27 {strides = array<i32>} : memref<2x128xf32, #tpu.memory_space<vmem>>, vector<2x128xf32>,
    return
  }
}

</mosaic_0001>

<bundles_post_ra>
// kernel: circle_detector_forward.7
= control target key start
LH: loop header
LB: loop body
LE: loop exit
PB: predicated region body
PF: predicated region fallthrough
CT: control target
= control target key end

     0   :  { %s941_s15 = smov 0   ;;  %s1072_s0 = inlined_call_operand.vmem [shape: bf16[1568,25], index: 0, kind: input, shape index: {}]   ;;  %s1073_s1 = inlined_call_operand.vmem [shape: bf16[25,128], index: 1, kind: input, shape index: {}]   ;;  %s1074_s2 = inlined_call_operand.vmem [shape: f32[1,128], index: 2, kind: input, shape index: {}]   ;;  %s1075_s3 = inlined_call_operand.vmem [shape: f32[1,128], index: 3, kind: input, shape index: {}]   ;;  %s1076_s4 = inlined_call_operand.vmem [shape: bf16[1568,128], index: 4, kind: output, shape index: {}]  }
   0x1 LB: > { %s704_s16 = sadd.s32 4294967295, %s913_s15   ;;  %p708_p0 = scmp.ge.s32.totalorder %s913_s15, 1  ;;  %s913_s15 = sphi %s941_s15, %s14_s15  }
   0x2   : > { %p163_p1 = scmp.lt.s32.totalorder %s913_s15, 8 }
   0x4   : > { %p164_p2 = pnand %p708_p0, %p163_p1 }
   0x5   : > { %s189_s21 = smul.u32 (!%p164_p2), 28, %s704_s16 }
   0x6   : > { %167 = sbr.rel (%p164_p2) target bundleno = 223 (0xdf), region = 36 }
   0x7   : > { %p190_p3 = scmp.lt.s32.totalorder (!%p164_p2), %s189_s21, 195 }
   0xb   : > { %v773_v0 = vld [vmem:[%s1073_s1 + $0x8] sm:$0xf]  ;;  %v806_v1 = vld [vmem:[%s1073_s1 + $0x8] sm:$0x10]  ;;  %vm358_vm0 = vcmask 1043456   ;;  %vm359_vm1 = vcmask 1044480  }
   0xc   : > { %v774_v2 = vor.u32 %v806_v1, %v773_v0  ;;  %v915_v3 = vmov 65535   ;;  %s1078_s21 = smov (!%p190_p3, %s189_s21), 195  ;;  %v805_v7 = vld [vmem:[%s1073_s1] sm:$0xff]  ;;  %vm315_vm2 = vcmask 203776  }
   0xd   : > { %v360_v4 = vsel %vm358_vm0, 4294967295, %v915_v3  ;;  %s709_s24 = sshll.u32 %s1078_s21, 2  ;;  %v983_v22 = vld [vmem:[%s1074_s2] ss:$0 sm:$0xff] }
   0xe   : > { %v361_v5 = vsel %vm359_vm1, %v360_v4, 0  ;;  %s193_s27 = scalar_lea.vmem %s1072_s0, %s709_s24  ;;  %v989_v26 = vld [vmem:[%s1075_s3] ss:$0 sm:$0xff]  ;;  %s1007_s8 = scalar_lea.vmem %s1076_s4, %s709_s24 }
   0xf   : > { %v363_v6 = vand.u32 %v774_v2, %v361_v5  ;;  %v791_v8 = vld [vmem:[%s193_s27] sm:$0xff]  ;;  %v792_v12 = vld [vmem:[%s193_s27 + $0x8] sm:$0xff]  ;;  %v793_v16 = vld [vmem:[%s193_s27 + $0x10] sm:$0xff] }
  0x10   : > { %v795_v9 = vld [vmem:[%s193_s27 + $0x20] sm:$0xff]  ;;  %v796_v13 = vld [vmem:[%s193_s27 + $0x28] sm:$0xff]  ;;  %v797_v17 = vld [vmem:[%s193_s27 + $0x30] sm:$0xff] }
  0x11   : > { %371 = vmatpush.bf16.msra.mxu0 %v363_v6  ;;  %890 = vmatpush.bf16.msra.mxu1 %v363_v6  ;;  %v799_v10 = vld [vmem:[%s193_s27 + $0x40] sm:$0xff]  ;;  %v800_v14 = vld [vmem:[%s193_s27 + $0x48] sm:$0xff]  ;;  %v801_v18 = vld [vmem:[%s193_s27 + $0x50] sm:$0xff] }
  0x12   : > { %891 = vmatpush.bf16.msra.mxu2 %v363_v6  ;;  %892 = vmatpush.bf16.msra.mxu3 %v363_v6  ;;  %v803_v11 = vld [vmem:[%s193_s27 + $0x60] sm:$0xff]  ;;  %v804_v15 = vld [vmem:[%s193_s27 + $0x68] sm:$0xff]  ;;  %v794_v19 = vld [vmem:[%s193_s27 + $0x18] sm:$0xff] }
  0x13   : > { %v798_v20 = vld [vmem:[%s193_s27 + $0x38] sm:$0xff] }
  0x14   : > { %v802_v21 = vld [vmem:[%s193_s27 + $0x58] sm:$0xff] }
  0x15   : > { %372 = vmatpush.bf16.msra.mxu0 %v805_v7  ;;  %893 = vmatpush.bf16.msra.mxu1 %v805_v7 }
  0x16   : > { %894 = vmatpush.bf16.msra.mxu2 %v805_v7  ;;  %895 = vmatpush.bf16.msra.mxu3 %v805_v7 }
  0x18   : > { %775 = vmatmul.msk.bf16.vlgmr.msra.gmra.mxu0 %vm315_vm2, %v791_v8  ;;  %779 = vmatmul.msk.bf16.vlgmr.msra.gmra.mxu1 %vm315_vm2, %v795_v9 }
  0x19   : > { %783 = vmatmul.msk.bf16.vlgmr.msra.gmra.mxu2 %vm315_vm2, %v799_v10  ;;  %787 = vmatmul.msk.bf16.vlgmr.msra.gmra.mxu3 %vm315_vm2, %v803_v11 }
  0x28   : > { %776 = vmatmul.msk.bf16.gmra.mxu0 %vm315_vm2, %v792_v12  ;;  %780 = vmatmul.msk.bf16.gmra.mxu1 %vm315_vm2, %v796_v13 }
  0x29   : > { %784 = vmatmul.msk.bf16.gmra.mxu2 %vm315_vm2, %v800_v14  ;;  %788 = vmatmul.msk.bf16.gmra.mxu3 %vm315_vm2, %v804_v15 }
  0x38   : > { %777 = vmatmul.msk.bf16.gmra.mxu0 %vm315_vm2, %v793_v16  ;;  %781 = vmatmul.msk.bf16.gmra.mxu1 %vm315_vm2, %v797_v17 }
  0x39   : > { %785 = vmatmul.msk.bf16.gmra.mxu2 %vm315_vm2, %v801_v18 }
  0x48   : > { %778 = vmatmul.msk.bf16.gmra.mxu0 %vm315_vm2, %v794_v19  ;;  %782 = vmatmul.msk.bf16.gmra.mxu1 %vm315_vm2, %v798_v20 }
  0x49   : > { %786 = vmatmul.msk.bf16.gmra.mxu2 %vm315_vm2, %v802_v21 }
  0x95   : > { %v374_v23 = vpop.f32.mrf.mxu0  ;;  %v394_v24 = vpop.f32.mrf.mxu1 }
  0x96   : > { %v448_v25 = vmul.f32 %v983_v22, %v374_v23  ;;  %v456_v27 = vmul.f32 %v983_v22, %v394_v24 }
  0x98   : > { %v480_v28 = vadd.f32 %v989_v26, %v448_v25  ;;  %v488_v29 = vadd.f32 %v989_v26, %v456_v27 }
  0x9a   : > { %vm508_vm3 = vcmp.ge.f32.partialorder %v480_v28, 0.0  ;;  %v536_v38 = vmul.f32 0.01, %v480_v28  ;;  %v544_v39 = vmul.f32 0.01, %v488_v29  ;;  %vm516_vm4 = vcmp.ge.f32.partialorder %v488_v29, 0.0 }
  0x9c   : > { %v414_v30 = vpop.f32.mrf.mxu2  ;;  %v434_v31 = vpop.f32.mrf.mxu3  ;;  %v564_v46 = vsel %vm508_vm3, %v480_v28, %v536_v38  ;;  %v572_v47 = vsel %vm516_vm4, %v488_v29, %v544_v39 }
  0x9d   : > { %v464_v32 = vmul.f32 %v983_v22, %v414_v30  ;;  %v376_v33 = vpop.f32.mrf.mxu0  ;;  %v396_v34 = vpop.f32.mrf.mxu1  ;;  %v472_v35 = vmul.f32 %v983_v22, %v434_v31 }
  0x9e   : > { %v449_v36 = vmul.f32 %v983_v22, %v376_v33  ;;  %v457_v37 = vmul.f32 %v983_v22, %v396_v34 }
  0x9f   : > { %v504_v42 = vadd.f32 %v989_v26, %v472_v35  ;;  %v496_v43 = vadd.f32 %v989_v26, %v464_v32 }
  0xa0   : > { %v481_v40 = vadd.f32 %v989_v26, %v449_v36  ;;  %v489_v41 = vadd.f32 %v989_v26, %v457_v37 }
  0xa1   : > { %vm532_vm7 = vcmp.ge.f32.partialorder %v504_v42, 0.0  ;;  %v560_v51 = vmul.f32 0.01, %v504_v42  ;;  %vm524_vm8 = vcmp.ge.f32.partialorder %v496_v43, 0.0  ;;  %v552_v59 = vmul.f32 0.01, %v496_v43 }
  0xa2   : > { %vm509_vm5 = vcmp.ge.f32.partialorder %v481_v40, 0.0  ;;  %v537_v44 = vmul.f32 0.01, %v481_v40  ;;  %vm517_vm6 = vcmp.ge.f32.partialorder %v489_v41, 0.0  ;;  %v545_v45 = vmul.f32 0.01, %v489_v41 }
  0xa3   : > { %v588_v0 = vsel %vm532_vm7, %v504_v42, %v560_v51  ;;  %v580_v3 = vsel %vm524_vm8, %v496_v43, %v552_v59 }
  0xa4   : > { %v565_v48 = vsel %vm509_vm5, %v481_v40, %v537_v44  ;;  %v573_v49 = vsel %vm517_vm6, %v489_v41, %v545_v45  ;;  %v416_v50 = vpop.f32.mrf.mxu2  ;;  %v436_v52 = vpop.f32.mrf.mxu3 }
  0xa5   : > { %v810_v53 = vpack.c.bf16 %v565_v48, %v564_v46  ;;  %v830_v54 = vpack.c.bf16 %v573_v49, %v572_v47  ;;  %v465_v55 = vmul.f32 %v983_v22, %v416_v50  ;;  %v379_v56 = vpop.f32.mrf.mxu0  ;;  %v399_v57 = vpop.f32.mrf.mxu1  ;;  %v473_v58 = vmul.f32 %v983_v22, %v436_v52 }
  0xa6   : > { %v450_v61 = vmul.f32 %v983_v22, %v379_v56  ;;  %v458_v62 = vmul.f32 %v983_v22, %v399_v57 }
  0xa7   : > { %811 = vst [vmem:[%s1007_s8] sm:$0xff] %v810_v53   ;;  %v497_v60 = vadd.f32 %v989_v26, %v465_v55  ;;  %v505_v63 = vadd.f32 %v989_v26, %v473_v58 }
  0xa8   : > { %880 = vst [vmem:[%s1007_s8 + $0x20] sm:$0xff] %v830_v54   ;;  %v482_v5 = vadd.f32 %v989_v26, %v450_v61  ;;  %v490_v6 = vadd.f32 %v989_v26, %v458_v62 }
  0xa9   : > { %vm525_vm9 = vcmp.ge.f32.partialorder %v497_v60, 0.0  ;;  %v553_v1 = vmul.f32 0.01, %v497_v60  ;;  %vm533_vm10 = vcmp.ge.f32.partialorder %v505_v63, 0.0  ;;  %v561_v2 = vmul.f32 0.01, %v505_v63 }
  0xaa   : > { %vm510_vm11 = vcmp.ge.f32.partialorder %v482_v5, 0.0  ;;  %v538_v17 = vmul.f32 0.01, %v482_v5  ;;  %v546_v18 = vmul.f32 0.01, %v490_v6  ;;  %vm518_vm12 = vcmp.ge.f32.partialorder %v490_v6, 0.0 }
  0xab   : > { %v581_v4 = vsel %vm525_vm9, %v497_v60, %v553_v1  ;;  %v589_v7 = vsel %vm533_vm10, %v505_v63, %v561_v2 }
  0xac   : > { %v850_v8 = vpack.c.bf16 %v581_v4, %v580_v3  ;;  %v419_v9 = vpop.f32.mrf.mxu2  ;;  %v870_v10 = vpack.c.bf16 %v589_v7, %v588_v0  ;;  %v439_v11 = vpop.f32.mrf.mxu3  ;;  %v566_v27 = vsel %vm510_vm11, %v482_v5, %v538_v17  ;;  %v574_v28 = vsel %vm518_vm12, %v490_v6, %v546_v18 }
  0xad   : > { %v381_v12 = vpop.f32.mrf.mxu0  ;;  %v401_v13 = vpop.f32.mrf.mxu1  ;;  %v474_v14 = vmul.f32 %v983_v22, %v439_v11  ;;  %v466_v19 = vmul.f32 %v983_v22, %v419_v9 }
  0xae   : > { %884 = vst [vmem:[%s1007_s8 + $0x40] sm:$0xff] %v850_v8   ;;  %v451_v15 = vmul.f32 %v983_v22, %v381_v12  ;;  %v459_v16 = vmul.f32 %v983_v22, %v401_v13 }
  0xaf   : > { %888 = vst [vmem:[%s1007_s8 + $0x60] sm:$0xff] %v870_v10   ;;  %v506_v23 = vadd.f32 %v989_v26, %v474_v14  ;;  %v498_v29 = vadd.f32 %v989_v26, %v466_v19 }
  0xb0   : > { %v483_v20 = vadd.f32 %v989_v26, %v451_v15  ;;  %v491_v21 = vadd.f32 %v989_v26, %v459_v16 }
  0xb1   : > { %vm534_vm15 = vcmp.ge.f32.partialorder %v506_v23, 0.0  ;;  %v562_v33 = vmul.f32 0.01, %v506_v23  ;;  %v554_v41 = vmul.f32 0.01, %v498_v29  ;;  %vm526_vm0 = vcmp.ge.f32.partialorder %v498_v29, 0.0 }
  0xb2   : > { %vm511_vm13 = vcmp.ge.f32.partialorder %v483_v20, 0.0  ;;  %v539_v24 = vmul.f32 0.01, %v483_v20  ;;  %vm519_vm14 = vcmp.ge.f32.partialorder %v491_v21, 0.0  ;;  %v547_v25 = vmul.f32 0.01, %v491_v21 }
  0xb3   : > { %v590_v46 = vsel %vm534_vm15, %v506_v23, %v562_v33  ;;  %v582_v49 = vsel %vm526_vm0, %v498_v29, %v554_v41 }
  0xb4   : > { %v567_v30 = vsel %vm511_vm13, %v483_v20, %v539_v24  ;;  %v575_v31 = vsel %vm519_vm14, %v491_v21, %v547_v25  ;;  %v421_v32 = vpop.f32.mrf.mxu2  ;;  %v441_v34 = vpop.f32.mrf.mxu3 }
  0xb5   : > { %v815_v35 = vpack.c.bf16 %v567_v30, %v566_v27  ;;  %v835_v36 = vpack.c.bf16 %v575_v31, %v574_v28  ;;  %v467_v37 = vmul.f32 %v983_v22, %v421_v32  ;;  %v384_v38 = vpop.f32.mrf.mxu0  ;;  %v404_v39 = vpop.f32.mrf.mxu1  ;;  %v475_v40 = vmul.f32 %v983_v22, %v441_v34 }
  0xb6   : > { %v452_v44 = vmul.f32 %v983_v22, %v384_v38  ;;  %v460_v45 = vmul.f32 %v983_v22, %v404_v39 }
  0xb7   : > { %877 = vst [vmem:[%s1007_s8 + $0x8] sm:$0xff] %v815_v35   ;;  %v499_v42 = vadd.f32 %v989_v26, %v467_v37  ;;  %v507_v43 = vadd.f32 %v989_v26, %v475_v40 }
  0xb8   : > { %881 = vst [vmem:[%s1007_s8 + $0x28] sm:$0xff] %v835_v36   ;;  %v484_v53 = vadd.f32 %v989_v26, %v452_v44  ;;  %v492_v54 = vadd.f32 %v989_v26, %v460_v45 }
  0xb9   : > { %vm527_vm1 = vcmp.ge.f32.partialorder %v499_v42, 0.0  ;;  %v555_v47 = vmul.f32 0.01, %v499_v42  ;;  %vm535_vm2 = vcmp.ge.f32.partialorder %v507_v43, 0.0  ;;  %v563_v48 = vmul.f32 0.01, %v507_v43 }
  0xba   : > { %v540_v62 = vmul.f32 0.01, %v484_v53  ;;  %v548_v63 = vmul.f32 0.01, %v492_v54  ;;  %vm512_vm3 = vcmp.ge.f32.partialorder %v484_v53, 0.0  ;;  %vm520_vm4 = vcmp.ge.f32.partialorder %v492_v54, 0.0 }
  0xbb   : > { %v583_v50 = vsel %vm527_vm1, %v499_v42, %v555_v47  ;;  %v591_v51 = vsel %vm535_vm2, %v507_v43, %v563_v48 }
  0xbc   : > { %v855_v52 = vpack.c.bf16 %v583_v50, %v582_v49  ;;  %v424_v55 = vpop.f32.mrf.mxu2  ;;  %v875_v56 = vpack.c.bf16 %v591_v51, %v590_v46  ;;  %v568_v5 = vsel %vm512_vm3, %v484_v53, %v540_v62  ;;  %v576_v6 = vsel %vm520_vm4, %v492_v54, %v548_v63 }
  0xbd   : > { %v386_v57 = vpop.f32.mrf.mxu0  ;;  %v406_v58 = vpop.f32.mrf.mxu1  ;;  %v468_v61 = vmul.f32 %v983_v22, %v424_v55 }
  0xbe   : > { %885 = vst [vmem:[%s1007_s8 + $0x48] sm:$0xff] %v855_v52   ;;  %v453_v59 = vmul.f32 %v983_v22, %v386_v57  ;;  %v461_v60 = vmul.f32 %v983_v22, %v406_v58 }
  0xbf   : > { %889 = vst [vmem:[%s1007_s8 + $0x68] sm:$0xff] %v875_v56   ;;  %v500_v4 = vadd.f32 %v989_v26, %v468_v61 }
  0xc0   : > { %v485_v0 = vadd.f32 %v989_v26, %v453_v59  ;;  %v493_v1 = vadd.f32 %v989_v26, %v461_v60 }
  0xc1   : > { %v556_v15 = vmul.f32 0.01, %v500_v4  ;;  %vm528_vm7 = vcmp.ge.f32.partialorder %v500_v4, 0.0 }
  0xc2   : > { %vm513_vm5 = vcmp.ge.f32.partialorder %v485_v0, 0.0  ;;  %v541_v2 = vmul.f32 0.01, %v485_v0  ;;  %vm521_vm6 = vcmp.ge.f32.partialorder %v493_v1, 0.0  ;;  %v549_v3 = vmul.f32 0.01, %v493_v1 }
  0xc3   : > { %v584_v20 = vsel %vm528_vm7, %v500_v4, %v556_v15 }
  0xc4   : > { %v569_v7 = vsel %vm513_vm5, %v485_v0, %v541_v2  ;;  %v577_v8 = vsel %vm521_vm6, %v493_v1, %v549_v3  ;;  %v426_v9 = vpop.f32.mrf.mxu2 }
  0xc5   : > { %v820_v10 = vpack.c.bf16 %v569_v7, %v568_v5  ;;  %v840_v11 = vpack.c.bf16 %v577_v8, %v576_v6  ;;  %v469_v12 = vmul.f32 %v983_v22, %v426_v9  ;;  %v389_v13 = vpop.f32.mrf.mxu0  ;;  %v409_v14 = vpop.f32.mrf.mxu1 }
  0xc6   : > { %v454_v17 = vmul.f32 %v983_v22, %v389_v13  ;;  %v462_v18 = vmul.f32 %v983_v22, %v409_v14 }
  0xc7   : > { %878 = vst [vmem:[%s1007_s8 + $0x10] sm:$0xff] %v820_v10   ;;  %v501_v16 = vadd.f32 %v989_v26, %v469_v12 }
  0xc8   : > { %882 = vst [vmem:[%s1007_s8 + $0x30] sm:$0xff] %v840_v11   ;;  %v486_v24 = vadd.f32 %v989_v26, %v454_v17  ;;  %v494_v25 = vadd.f32 %v989_v26, %v462_v18 }
  0xc9   : > { %vm529_vm8 = vcmp.ge.f32.partialorder %v501_v16, 0.0  ;;  %v557_v19 = vmul.f32 0.01, %v501_v16 }
  0xca   : > { %v542_v33 = vmul.f32 0.01, %v486_v24  ;;  %v550_v34 = vmul.f32 0.01, %v494_v25  ;;  %vm514_vm9 = vcmp.ge.f32.partialorder %v486_v24, 0.0  ;;  %vm522_vm10 = vcmp.ge.f32.partialorder %v494_v25, 0.0 }
  0xcb   : > { %v585_v21 = vsel %vm529_vm8, %v501_v16, %v557_v19 }
  0xcc   : > { %v860_v23 = vpack.c.bf16 %v585_v21, %v584_v20  ;;  %v429_v27 = vpop.f32.mrf.mxu2  ;;  %v570_v40 = vsel %vm514_vm9, %v486_v24, %v542_v33  ;;  %v578_v41 = vsel %vm522_vm10, %v494_v25, %v550_v34 }
  0xcd   : > { %v391_v28 = vpop.f32.mrf.mxu0  ;;  %v411_v29 = vpop.f32.mrf.mxu1  ;;  %v470_v32 = vmul.f32 %v983_v22, %v429_v27 }
  0xce   : > { %886 = vst [vmem:[%s1007_s8 + $0x50] sm:$0xff] %v860_v23   ;;  %v455_v30 = vmul.f32 %v983_v22, %v391_v28  ;;  %v463_v31 = vmul.f32 %v983_v22, %v411_v29 }
  0xcf   : > { %v502_v39 = vadd.f32 %v989_v26, %v470_v32 }
  0xd0   : > { %v487_v35 = vadd.f32 %v989_v26, %v455_v30  ;;  %v495_v36 = vadd.f32 %v989_v26, %v463_v31 }
  0xd1   : > { %v558_v48 = vmul.f32 0.01, %v502_v39  ;;  %vm530_vm13 = vcmp.ge.f32.partialorder %v502_v39, 0.0 }
  0xd2   : > { %vm515_vm11 = vcmp.ge.f32.partialorder %v487_v35, 0.0  ;;  %v543_v37 = vmul.f32 0.01, %v487_v35  ;;  %vm523_vm12 = vcmp.ge.f32.partialorder %v495_v36, 0.0  ;;  %v551_v38 = vmul.f32 0.01, %v495_v36 }
  0xd3   : > { %v586_v51 = vsel %vm530_vm13, %v502_v39, %v558_v48 }
  0xd4   : > { %v571_v42 = vsel %vm515_vm11, %v487_v35, %v543_v37  ;;  %v579_v43 = vsel %vm523_vm12, %v495_v36, %v551_v38  ;;  %v431_v44 = vpop.f32.mrf.mxu2 }
  0xd5   : > { %v825_v45 = vpack.c.bf16 %v571_v42, %v570_v40  ;;  %v845_v46 = vpack.c.bf16 %v579_v43, %v578_v41  ;;  %v471_v47 = vmul.f32 %v983_v22, %v431_v44 }
  0xd7   : > { %879 = vst [vmem:[%s1007_s8 + $0x18] sm:$0xff] %v825_v45   ;;  %v503_v49 = vadd.f32 %v989_v26, %v471_v47 }
  0xd8   : > { %883 = vst [vmem:[%s1007_s8 + $0x38] sm:$0xff] %v845_v46  }
  0xd9   : > { %vm531_vm14 = vcmp.ge.f32.partialorder %v503_v49, 0.0  ;;  %v559_v50 = vmul.f32 0.01, %v503_v49 }
  0xdb   : > { %v587_v52 = vsel %vm531_vm14, %v503_v49, %v559_v50 }
  0xdc   : > { %v865_v53 = vpack.c.bf16 %v587_v52, %v586_v51 }
  0xde   : > { %887 = vst [vmem:[%s1007_s8 + $0x58] sm:$0xff] %v865_v53  }
  0xdf PF: > { %s14_s15 = sadd.s32 1, %s913_s15  }
  0xe0   : > { %p11_p4 = scmp.ge.s32.totalorder %s14_s15, 9  }
  0xe2   :  { %13 = sbr.rel (!%p11_p4) target bundleno = 1 (0x1), region = 66 }

// kernel: circle_detector_forward.8
= control target key start
LH: loop header
LB: loop body
LE: loop exit
PB: predicated region body
PF: predicated region fallthrough
CT: control target
= control target key end

     0   :  { %s698_s6 = smov 0   ;;  %s807_s0 = inlined_call_operand.vmem [shape: bf16[28,2,14,256], index: 0, kind: input, shape index: {}]   ;;  %s808_s1 = inlined_call_operand.vmem [shape: bf16[28,14,128], index: 1, kind: output, shape index: {}]  }
   0x1 LB: > { %s659_s7 = sadd.s32 4294967295, %s686_s6   ;;  %p663_p0 = scmp.ge.s32.totalorder %s686_s6, 1  ;;  %s686_s6 = sphi %s698_s6, %s11_s6  }
   0x2   : > { %p89_p1 = scmp.lt.s32.totalorder %s686_s6, 3 }
   0x4   : > { %p90_p2 = pnand %p663_p0, %p89_p1 }
   0x5   : > { %s111_s8 = smul.u32 (!%p90_p2), 14, %s659_s7 }
   0x6   : > { %93 = sbr.rel (%p90_p2) target bundleno = 102 (0x66), region = 24 }
   0x7   : > { %p112_p3 = scmp.lt.s32.totalorder (!%p90_p2), %s111_s8, 27 }
   0xb   : > { %s810_s8 = smov (!%p112_p3, %s111_s8), 27 }
   0xc   : > { %s670_s9 = sshll.u32 %s810_s8, 5  ;;  %s671_s13 = sshll.u32 %s810_s8, 3 }
   0xd   : > { %s712_s12 = scalar_lea.vmem %s807_s0, %s670_s9  ;;  %s731_s16 = scalar_lea.vmem %s808_s1, %s671_s13 }
   0xe   : > { %v125_v0 = vld [vmem:[%s712_s12] sm:$0xff]  ;;  %v127_v1 = vld [vmem:[%s712_s12 + $0x10] sm:$0xff]  ;;  %v126_v2 = vld [vmem:[%s712_s12 + $0x8] sm:$0x77] }
   0xf   : > { %v181_v3 = vunpack.c.l.bf16 %v125_v0  ;;  %v182_v4 = vunpack.c.h.bf16 %v125_v0  ;;  %v237_v5 = vunpack.c.l.bf16 %v127_v1  ;;  %v238_v6 = vunpack.c.h.bf16 %v127_v1  ;;  %v128_v7 = vld [vmem:[%s712_s12 + $0x18] sm:$0x77]  ;;  %v129_v8 = vld [vmem:[%s712_s12 + $0x20] sm:$0xff]  ;;  %v131_v9 = vld [vmem:[%s712_s12 + $0x30] sm:$0xff] }
  0x10   : > { %v183_v10 = vunpack.c.l.bf16 %v126_v2  ;;  %v184_v11 = vunpack.c.h.bf16 %v126_v2  ;;  %v239_v12 = vunpack.c.l.bf16 %v128_v7  ;;  %v240_v13 = vunpack.c.h.bf16 %v128_v7  ;;  %v130_v14 = vld [vmem:[%s712_s12 + $0x28] sm:$0x77]  ;;  %v132_v15 = vld [vmem:[%s712_s12 + $0x38] sm:$0x77]  ;;  %v133_v24 = vld [vmem:[%s712_s12 + $0x40] sm:$0xff] }
  0x11   : > { %v293_v16 = vmax.f32 %v181_v3, %v237_v5  ;;  %v294_v17 = vmax.f32 %v182_v4, %v238_v6  ;;  %v185_v18 = vunpack.c.l.bf16 %v129_v8  ;;  %v186_v19 = vunpack.c.h.bf16 %v129_v8  ;;  %v135_v29 = vld [vmem:[%s712_s12 + $0x50] sm:$0xff]  ;;  %v134_v34 = vld [vmem:[%s712_s12 + $0x48] sm:$0x77]  ;;  %v136_v43 = vld [vmem:[%s712_s12 + $0x58] sm:$0x77] }
  0x12   : > { %v295_v20 = vmax.f32 %v183_v10, %v239_v12  ;;  %v296_v21 = vmax.f32 %v184_v11, %v240_v13  ;;  %v241_v22 = vunpack.c.l.bf16 %v131_v9  ;;  %v242_v23 = vunpack.c.h.bf16 %v131_v9  ;;  %v137_v48 = vld [vmem:[%s712_s12 + $0x60] sm:$0xff]  ;;  %v139_v60 = vld [vmem:[%s712_s12 + $0x70] sm:$0xff]  ;;  %v138_v2 = vld [vmem:[%s712_s12 + $0x68] sm:$0x77] }
  0x13   : > { %v349_v25 = vpack.c.bf16 %v294_v17, %v293_v16  ;;  %v187_v26 = vunpack.c.l.bf16 %v130_v14  ;;  %v188_v27 = vunpack.c.h.bf16 %v130_v14  ;;  %v243_v28 = vunpack.c.l.bf16 %v132_v15  ;;  %v140_v11 = vld [vmem:[%s712_s12 + $0x78] sm:$0x77]  ;;  %v141_v12 = vld [vmem:[%s712_s12 + $0x80] sm:$0xff] }
  0x14   : > { %v350_v30 = vpack.c.bf16 %v296_v21, %v295_v20  ;;  %v297_v31 = vmax.f32 %v185_v18, %v241_v22  ;;  %v298_v32 = vmax.f32 %v186_v19, %v242_v23  ;;  %v244_v33 = vunpack.c.h.bf16 %v132_v15  ;;  %v143_v21 = vld [vmem:[%s712_s12 + $0x90] sm:$0xff] }
  0x15   : > { %v433_v35 = vrot.slane %v349_v25, 4  ;;  %v299_v36 = vmax.f32 %v187_v26, %v243_v28  ;;  %v189_v37 = vunpack.c.l.bf16 %v133_v24  ;;  %v190_v38 = vunpack.c.h.bf16 %v133_v24  ;;  %v142_v26 = vld [vmem:[%s712_s12 + $0x88] sm:$0x77] }
  0x16   : > { %v434_v39 = vrot.slane %v350_v30, 4  ;;  %v351_v40 = vpack.c.bf16 %v298_v32, %v297_v31  ;;  %v300_v41 = vmax.f32 %v188_v27, %v244_v33  ;;  %v245_v42 = vunpack.c.l.bf16 %v135_v29 }
  0x17   : > { %v489_v44 = vunpack.c.l.bf16 %v433_v35  ;;  %v246_v45 = vunpack.c.h.bf16 %v135_v29  ;;  %v191_v46 = vunpack.c.l.bf16 %v134_v34  ;;  %v192_v47 = vunpack.c.h.bf16 %v134_v34  ;;  %v144_v35 = vld [vmem:[%s712_s12 + $0x98] sm:$0x77] }
  0x18   : > { %v490_v49 = vunpack.c.l.bf16 %v434_v39  ;;  %v435_v50 = vrot.slane %v351_v40, 4  ;;  %v352_v51 = vpack.c.bf16 %v300_v41, %v299_v36  ;;  %v301_v52 = vmax.f32 %v189_v37, %v245_v42  ;;  %v145_v40 = vld [vmem:[%s712_s12 + $0xa0] sm:$0xff] }
  0x19   : > { %v517_v53 = vmax.f32 %v293_v16, %v489_v44  ;;  %v302_v54 = vmax.f32 %v190_v38, %v246_v45  ;;  %v247_v55 = vunpack.c.l.bf16 %v136_v43  ;;  %v248_v56 = vunpack.c.h.bf16 %v136_v43  ;;  %v147_v45 = vld [vmem:[%s712_s12 + $0xb0] sm:$0xff] }
  0x1a   : > { %v518_v57 = vmax.f32 %v295_v20, %v490_v49  ;;  %v491_v58 = vunpack.c.l.bf16 %v435_v50  ;;  %v436_v59 = vrot.slane %v352_v51, 4  ;;  %v193_v61 = vunpack.c.l.bf16 %v137_v48  ;;  %v146_v50 = vld [vmem:[%s712_s12 + $0xa8] sm:$0x77] }
  0x1b   : > { %v545_v62 = vpack.c.bf16 %v517_v53, %v517_v53  ;;  %v353_v63 = vpack.c.bf16 %v302_v54, %v301_v52  ;;  %v303_v0 = vmax.f32 %v191_v46, %v247_v55  ;;  %v304_v1 = vmax.f32 %v192_v47, %v248_v56 }
  0x1c   : > { %v546_v3 = vpack.c.bf16 %v518_v57, %v518_v57  ;;  %v519_v4 = vmax.f32 %v297_v31, %v491_v58  ;;  %v492_v5 = vunpack.c.l.bf16 %v436_v59  ;;  %v194_v6 = vunpack.c.h.bf16 %v137_v48  ;;  %v148_v59 = vld [vmem:[%s712_s12 + $0xb8] sm:$0x77] }
  0x1d   : > { %573 = vst [vmem:[%s731_s16] sm:$0xf] %v545_v62  ;;  %v437_v7 = vrot.slane %v353_v63, 4  ;;  %v354_v8 = vpack.c.bf16 %v304_v1, %v303_v0  ;;  %v249_v9 = vunpack.c.l.bf16 %v139_v60  ;;  %v250_v10 = vunpack.c.h.bf16 %v139_v60 }
  0x1e   : > { %574 = vst [vmem:[%s731_s16 + $0x4] sm:$0x7] %v546_v3  ;;  %v547_v13 = vpack.c.bf16 %v519_v4, %v519_v4  ;;  %v520_v14 = vmax.f32 %v299_v36, %v492_v5  ;;  %v195_v15 = vunpack.c.l.bf16 %v138_v2  ;;  %v196_v16 = vunpack.c.h.bf16 %v138_v2 }
  0x1f   : > { %v493_v17 = vunpack.c.l.bf16 %v437_v7  ;;  %v438_v18 = vrot.slane %v354_v8, 4  ;;  %v305_v19 = vmax.f32 %v193_v61, %v249_v9  ;;  %v306_v20 = vmax.f32 %v194_v6, %v250_v10  ;;  %v151_v9 = vld [vmem:[%s712_s12 + $0xd0] sm:$0xff] }
  0x20   : > { %575 = vst [vmem:[%s731_s16 + $0x8] sm:$0xf] %v547_v13  ;;  %v548_v22 = vpack.c.bf16 %v520_v14, %v520_v14  ;;  %v251_v23 = vunpack.c.l.bf16 %v140_v11  ;;  %v252_v24 = vunpack.c.h.bf16 %v140_v11  ;;  %v197_v25 = vunpack.c.l.bf16 %v141_v12  ;;  %v150_v14 = vld [vmem:[%s712_s12 + $0xc8] sm:$0x77] }
  0x21   : > { %v521_v27 = vmax.f32 %v301_v52, %v493_v17  ;;  %v494_v28 = vunpack.c.l.bf16 %v438_v18  ;;  %v355_v29 = vpack.c.bf16 %v306_v20, %v305_v19  ;;  %v198_v30 = vunpack.c.h.bf16 %v141_v12 }
  0x22   : > { %576 = vst [vmem:[%s731_s16 + $0xc] sm:$0x7] %v548_v22  ;;  %v307_v31 = vmax.f32 %v195_v15, %v251_v23  ;;  %v308_v32 = vmax.f32 %v196_v16, %v252_v24  ;;  %v253_v33 = vunpack.c.l.bf16 %v143_v21  ;;  %v254_v34 = vunpack.c.h.bf16 %v143_v21  ;;  %v152_v23 = vld [vmem:[%s712_s12 + $0xd8] sm:$0x77]  ;;  %v153_v24 = vld [vmem:[%s712_s12 + $0xe0] sm:$0xff] }
  0x23   : > { %v549_v36 = vpack.c.bf16 %v521_v27, %v521_v27  ;;  %v522_v37 = vmax.f32 %v303_v0, %v494_v28  ;;  %v439_v38 = vrot.slane %v355_v29, 4  ;;  %v199_v39 = vunpack.c.l.bf16 %v142_v26  ;;  %v149_v0 = vld [vmem:[%s712_s12 + $0xc0] sm:$0xff] }
  0x24   : > { %v356_v41 = vpack.c.bf16 %v308_v32, %v307_v31  ;;  %v309_v42 = vmax.f32 %v197_v25, %v253_v33  ;;  %v310_v43 = vmax.f32 %v198_v30, %v254_v34  ;;  %v200_v44 = vunpack.c.h.bf16 %v142_v26  ;;  %v155_v33 = vld [vmem:[%s712_s12 + $0xf0] sm:$0xff] }
  0x25   : > { %577 = vst [vmem:[%s731_s16 + $0x10] sm:$0xf] %v549_v36  ;;  %v550_v46 = vpack.c.bf16 %v522_v37, %v522_v37  ;;  %v495_v47 = vunpack.c.l.bf16 %v439_v38  ;;  %v255_v48 = vunpack.c.l.bf16 %v144_v35  ;;  %v256_v49 = vunpack.c.h.bf16 %v144_v35  ;;  %v154_v38 = vld [vmem:[%s712_s12 + $0xe8] sm:$0x77] }
  0x26   : > { %v440_v51 = vrot.slane %v356_v41, 4  ;;  %v357_v52 = vpack.c.bf16 %v310_v43, %v309_v42  ;;  %v201_v53 = vunpack.c.l.bf16 %v145_v40  ;;  %v202_v54 = vunpack.c.h.bf16 %v145_v40 }
  0x27   : > { %578 = vst [vmem:[%s731_s16 + $0x14] sm:$0x7] %v550_v46  ;;  %v523_v55 = vmax.f32 %v305_v19, %v495_v47  ;;  %v311_v56 = vmax.f32 %v199_v39, %v255_v48  ;;  %v312_v57 = vmax.f32 %v200_v44, %v256_v49  ;;  %v257_v58 = vunpack.c.l.bf16 %v147_v45  ;;  %v156_v47 = vld [vmem:[%s712_s12 + $0xf8] sm:$0x77] }
  0x28   : > { %v496_v60 = vunpack.c.l.bf16 %v440_v51  ;;  %v441_v61 = vrot.slane %v357_v52, 4  ;;  %v258_v62 = vunpack.c.h.bf16 %v147_v45  ;;  %v203_v63 = vunpack.c.l.bf16 %v146_v50  ;;  %v157_v52 = vld [vmem:[%s712_s12 + $0x100] sm:$0xff] }
  0x29   : > { %v551_v1 = vpack.c.bf16 %v523_v55, %v523_v55  ;;  %v358_v2 = vpack.c.bf16 %v312_v57, %v311_v56  ;;  %v313_v3 = vmax.f32 %v201_v53, %v257_v58  ;;  %v204_v4 = vunpack.c.h.bf16 %v146_v50 }
  0x2a   : > { %v524_v5 = vmax.f32 %v307_v31, %v496_v60  ;;  %v497_v6 = vunpack.c.l.bf16 %v441_v61  ;;  %v314_v7 = vmax.f32 %v202_v54, %v258_v62  ;;  %v259_v8 = vunpack.c.l.bf16 %v148_v59  ;;  %v159_v61 = vld [vmem:[%s712_s12 + $0x110] sm:$0xff] }
  0x2b   : > { %579 = vst [vmem:[%s731_s16 + $0x18] sm:$0xf] %v551_v1  ;;  %v442_v10 = vrot.slane %v358_v2, 4  ;;  %v260_v11 = vunpack.c.h.bf16 %v148_v59  ;;  %v205_v12 = vunpack.c.l.bf16 %v149_v0  ;;  %v206_v13 = vunpack.c.h.bf16 %v149_v0  ;;  %v158_v2 = vld [vmem:[%s712_s12 + $0x108] sm:$0x77] }
  0x2c   : > { %v552_v15 = vpack.c.bf16 %v524_v5, %v524_v5  ;;  %v525_v16 = vmax.f32 %v309_v42, %v497_v6  ;;  %v359_v17 = vpack.c.bf16 %v314_v7, %v313_v3  ;;  %v315_v18 = vmax.f32 %v203_v63, %v259_v8 }
  0x2d   : > { %v498_v19 = vunpack.c.l.bf16 %v442_v10  ;;  %v316_v20 = vmax.f32 %v204_v4, %v260_v11  ;;  %v261_v21 = vunpack.c.l.bf16 %v151_v9  ;;  %v262_v22 = vunpack.c.h.bf16 %v151_v9  ;;  %v160_v11 = vld [vmem:[%s712_s12 + $0x118] sm:$0x77] }
  0x2e   : > { %580 = vst [vmem:[%s731_s16 + $0x1c] sm:$0x7] %v552_v15  ;;  %v553_v25 = vpack.c.bf16 %v525_v16, %v525_v16  ;;  %v443_v26 = vrot.slane %v359_v17, 4  ;;  %v207_v27 = vunpack.c.l.bf16 %v150_v14  ;;  %v208_v28 = vunpack.c.h.bf16 %v150_v14 }
  0x2f   : > { %v526_v29 = vmax.f32 %v311_v56, %v498_v19  ;;  %v360_v30 = vpack.c.bf16 %v316_v20, %v315_v18  ;;  %v317_v31 = vmax.f32 %v205_v12, %v261_v21  ;;  %v318_v32 = vmax.f32 %v206_v13, %v262_v22  ;;  %v161_v12 = vld [vmem:[%s712_s12 + $0x120] sm:$0xff]  ;;  %v163_v21 = vld [vmem:[%s712_s12 + $0x130] sm:$0xff] }
  0x30   : > { %581 = vst [vmem:[%s731_s16 + $0x20] sm:$0xf] %v553_v25  ;;  %v499_v34 = vunpack.c.l.bf16 %v443_v26  ;;  %v263_v35 = vunpack.c.l.bf16 %v152_v23  ;;  %v264_v36 = vunpack.c.h.bf16 %v152_v23  ;;  %v209_v37 = vunpack.c.l.bf16 %v153_v24  ;;  %v162_v26 = vld [vmem:[%s712_s12 + $0x128] sm:$0x77] }
  0x31   : > { %v554_v39 = vpack.c.bf16 %v526_v29, %v526_v29  ;;  %v444_v40 = vrot.slane %v360_v30, 4  ;;  %v361_v41 = vpack.c.bf16 %v318_v32, %v317_v31  ;;  %v210_v42 = vunpack.c.h.bf16 %v153_v24 }
  0x32   : > { %v527_v43 = vmax.f32 %v313_v3, %v499_v34  ;;  %v319_v44 = vmax.f32 %v207_v27, %v263_v35  ;;  %v320_v45 = vmax.f32 %v208_v28, %v264_v36  ;;  %v265_v46 = vunpack.c.l.bf16 %v155_v33  ;;  %v164_v35 = vld [vmem:[%s712_s12 + $0x138] sm:$0x77] }
  0x33   : > { %582 = vst [vmem:[%s731_s16 + $0x24] sm:$0x7] %v554_v39  ;;  %v500_v48 = vunpack.c.l.bf16 %v444_v40  ;;  %v445_v49 = vrot.slane %v361_v41, 4  ;;  %v266_v50 = vunpack.c.h.bf16 %v155_v33  ;;  %v211_v51 = vunpack.c.l.bf16 %v154_v38  ;;  %v165_v40 = vld [vmem:[%s712_s12 + $0x140] sm:$0xff] }
  0x34   : > { %v555_v53 = vpack.c.bf16 %v527_v43, %v527_v43  ;;  %v362_v54 = vpack.c.bf16 %v320_v45, %v319_v44  ;;  %v321_v55 = vmax.f32 %v209_v37, %v265_v46  ;;  %v212_v56 = vunpack.c.h.bf16 %v154_v38 }
  0x35   : > { %v528_v57 = vmax.f32 %v315_v18, %v500_v48  ;;  %v501_v58 = vunpack.c.l.bf16 %v445_v49  ;;  %v322_v59 = vmax.f32 %v210_v42, %v266_v50  ;;  %v267_v60 = vunpack.c.l.bf16 %v156_v47  ;;  %v167_v49 = vld [vmem:[%s712_s12 + $0x150] sm:$0xff] }
  0x36   : > { %583 = vst [vmem:[%s731_s16 + $0x28] sm:$0xf] %v555_v53  ;;  %v446_v62 = vrot.slane %v362_v54, 4  ;;  %v268_v63 = vunpack.c.h.bf16 %v156_v47  ;;  %v213_v0 = vunpack.c.l.bf16 %v157_v52  ;;  %v214_v1 = vunpack.c.h.bf16 %v157_v52  ;;  %v166_v54 = vld [vmem:[%s712_s12 + $0x148] sm:$0x77] }
  0x37   : > { %v556_v3 = vpack.c.bf16 %v528_v57, %v528_v57  ;;  %v529_v4 = vmax.f32 %v317_v31, %v501_v58  ;;  %v363_v5 = vpack.c.bf16 %v322_v59, %v321_v55  ;;  %v323_v6 = vmax.f32 %v211_v51, %v267_v60 }
  0x38   : > { %v502_v7 = vunpack.c.l.bf16 %v446_v62  ;;  %v324_v8 = vmax.f32 %v212_v56, %v268_v63  ;;  %v269_v9 = vunpack.c.l.bf16 %v159_v61  ;;  %v270_v10 = vunpack.c.h.bf16 %v159_v61  ;;  %v168_v63 = vld [vmem:[%s712_s12 + $0x158] sm:$0x77] }
  0x39   : > { %584 = vst [vmem:[%s731_s16 + $0x2c] sm:$0x7] %v556_v3  ;;  %v557_v13 = vpack.c.bf16 %v529_v4, %v529_v4  ;;  %v447_v14 = vrot.slane %v363_v5, 4  ;;  %v215_v15 = vunpack.c.l.bf16 %v158_v2  ;;  %v216_v16 = vunpack.c.h.bf16 %v158_v2 }
  0x3a   : > { %v530_v17 = vmax.f32 %v319_v44, %v502_v7  ;;  %v364_v18 = vpack.c.bf16 %v324_v8, %v323_v6  ;;  %v325_v19 = vmax.f32 %v213_v0, %v269_v9  ;;  %v326_v20 = vmax.f32 %v214_v1, %v270_v10  ;;  %v169_v0 = vld [vmem:[%s712_s12 + $0x160] sm:$0xff]  ;;  %v171_v9 = vld [vmem:[%s712_s12 + $0x170] sm:$0xff] }
  0x3b   : > { %585 = vst [vmem:[%s731_s16 + $0x30] sm:$0xf] %v557_v13  ;;  %v503_v22 = vunpack.c.l.bf16 %v447_v14  ;;  %v271_v23 = vunpack.c.l.bf16 %v160_v11  ;;  %v272_v24 = vunpack.c.h.bf16 %v160_v11  ;;  %v217_v25 = vunpack.c.l.bf16 %v161_v12  ;;  %v170_v14 = vld [vmem:[%s712_s12 + $0x168] sm:$0x77] }
  0x3c   : > { %v558_v27 = vpack.c.bf16 %v530_v17, %v530_v17  ;;  %v448_v28 = vrot.slane %v364_v18, 4  ;;  %v365_v29 = vpack.c.bf16 %v326_v20, %v325_v19  ;;  %v218_v30 = vunpack.c.h.bf16 %v161_v12 }
  0x3d   : > { %v531_v31 = vmax.f32 %v321_v55, %v503_v22  ;;  %v327_v32 = vmax.f32 %v215_v15, %v271_v23  ;;  %v328_v33 = vmax.f32 %v216_v16, %v272_v24  ;;  %v273_v34 = vunpack.c.l.bf16 %v163_v21  ;;  %v172_v23 = vld [vmem:[%s712_s12 + $0x178] sm:$0x77] }
  0x3e   : > { %586 = vst [vmem:[%s731_s16 + $0x34] sm:$0x7] %v558_v27  ;;  %v504_v36 = vunpack.c.l.bf16 %v448_v28  ;;  %v449_v37 = vrot.slane %v365_v29, 4  ;;  %v274_v38 = vunpack.c.h.bf16 %v163_v21  ;;  %v219_v39 = vunpack.c.l.bf16 %v162_v26  ;;  %v173_v28 = vld [vmem:[%s712_s12 + $0x180] sm:$0xff] }
  0x3f   : > { %v559_v41 = vpack.c.bf16 %v531_v31, %v531_v31  ;;  %v366_v42 = vpack.c.bf16 %v328_v33, %v327_v32  ;;  %v329_v43 = vmax.f32 %v217_v25, %v273_v34  ;;  %v220_v44 = vunpack.c.h.bf16 %v162_v26 }
  0x40   : > { %v532_v45 = vmax.f32 %v323_v6, %v504_v36  ;;  %v505_v46 = vunpack.c.l.bf16 %v449_v37  ;;  %v330_v47 = vmax.f32 %v218_v30, %v274_v38  ;;  %v275_v48 = vunpack.c.l.bf16 %v164_v35  ;;  %v175_v37 = vld [vmem:[%s712_s12 + $0x190] sm:$0xff] }
  0x41   : > { %587 = vst [vmem:[%s731_s16 + $0x38] sm:$0xf] %v559_v41  ;;  %v450_v50 = vrot.slane %v366_v42, 4  ;;  %v276_v51 = vunpack.c.h.bf16 %v164_v35  ;;  %v221_v52 = vunpack.c.l.bf16 %v165_v40  ;;  %v222_v53 = vunpack.c.h.bf16 %v165_v40  ;;  %v174_v42 = vld [vmem:[%s712_s12 + $0x188] sm:$0x77] }
  0x42   : > { %v560_v55 = vpack.c.bf16 %v532_v45, %v532_v45  ;;  %v533_v56 = vmax.f32 %v325_v19, %v505_v46  ;;  %v367_v57 = vpack.c.bf16 %v330_v47, %v329_v43  ;;  %v331_v58 = vmax.f32 %v219_v39, %v275_v48 }
  0x43   : > { %v506_v59 = vunpack.c.l.bf16 %v450_v50  ;;  %v332_v60 = vmax.f32 %v220_v44, %v276_v51  ;;  %v277_v61 = vunpack.c.l.bf16 %v167_v49  ;;  %v278_v62 = vunpack.c.h.bf16 %v167_v49  ;;  %v176_v51 = vld [vmem:[%s712_s12 + $0x198] sm:$0x77] }
  0x44   : > { %588 = vst [vmem:[%s731_s16 + $0x3c] sm:$0x7] %v560_v55  ;;  %v561_v1 = vpack.c.bf16 %v533_v56, %v533_v56  ;;  %v451_v2 = vrot.slane %v367_v57, 4  ;;  %v223_v3 = vunpack.c.l.bf16 %v166_v54  ;;  %v224_v4 = vunpack.c.h.bf16 %v166_v54 }
  0x45   : > { %v534_v5 = vmax.f32 %v327_v32, %v506_v59  ;;  %v368_v6 = vpack.c.bf16 %v332_v60, %v331_v58  ;;  %v333_v7 = vmax.f32 %v221_v52, %v277_v61  ;;  %v334_v8 = vmax.f32 %v222_v53, %v278_v62  ;;  %v177_v52 = vld [vmem:[%s712_s12 + $0x1a0] sm:$0xff]  ;;  %v179_v61 = vld [vmem:[%s712_s12 + $0x1b0] sm:$0xff] }
  0x46   : > { %589 = vst [vmem:[%s731_s16 + $0x40] sm:$0xf] %v561_v1  ;;  %v507_v10 = vunpack.c.l.bf16 %v451_v2  ;;  %v279_v11 = vunpack.c.l.bf16 %v168_v63  ;;  %v280_v12 = vunpack.c.h.bf16 %v168_v63  ;;  %v225_v13 = vunpack.c.l.bf16 %v169_v0  ;;  %v178_v2 = vld [vmem:[%s712_s12 + $0x1a8] sm:$0x77] }
  0x47   : > { %v562_v15 = vpack.c.bf16 %v534_v5, %v534_v5  ;;  %v452_v16 = vrot.slane %v368_v6, 4  ;;  %v369_v17 = vpack.c.bf16 %v334_v8, %v333_v7  ;;  %v226_v18 = vunpack.c.h.bf16 %v169_v0 }
  0x48   : > { %v535_v19 = vmax.f32 %v329_v43, %v507_v10  ;;  %v335_v20 = vmax.f32 %v223_v3, %v279_v11  ;;  %v336_v21 = vmax.f32 %v224_v4, %v280_v12  ;;  %v281_v22 = vunpack.c.l.bf16 %v171_v9  ;;  %v180_v11 = vld [vmem:[%s712_s12 + $0x1b8] sm:$0x77] }
  0x49   : > { %590 = vst [vmem:[%s731_s16 + $0x44] sm:$0x7] %v562_v15  ;;  %v508_v24 = vunpack.c.l.bf16 %v452_v16  ;;  %v453_v25 = vrot.slane %v369_v17, 4  ;;  %v282_v26 = vunpack.c.h.bf16 %v171_v9  ;;  %v227_v27 = vunpack.c.l.bf16 %v170_v14 }
  0x4a   : > { %v563_v29 = vpack.c.bf16 %v535_v19, %v535_v19  ;;  %v370_v30 = vpack.c.bf16 %v336_v21, %v335_v20  ;;  %v337_v31 = vmax.f32 %v225_v13, %v281_v22  ;;  %v228_v32 = vunpack.c.h.bf16 %v170_v14 }
  0x4b   : > { %v536_v33 = vmax.f32 %v331_v58, %v508_v24  ;;  %v509_v34 = vunpack.c.l.bf16 %v453_v25  ;;  %v338_v35 = vmax.f32 %v226_v18, %v282_v26  ;;  %v283_v36 = vunpack.c.l.bf16 %v172_v23 }
  0x4c   : > { %591 = vst [vmem:[%s731_s16 + $0x48] sm:$0xf] %v563_v29  ;;  %v454_v38 = vrot.slane %v370_v30, 4  ;;  %v284_v39 = vunpack.c.h.bf16 %v172_v23  ;;  %v229_v40 = vunpack.c.l.bf16 %v173_v28  ;;  %v230_v41 = vunpack.c.h.bf16 %v173_v28 }
  0x4d   : > { %v564_v43 = vpack.c.bf16 %v536_v33, %v536_v33  ;;  %v537_v44 = vmax.f32 %v333_v7, %v509_v34  ;;  %v371_v45 = vpack.c.bf16 %v338_v35, %v337_v31  ;;  %v339_v46 = vmax.f32 %v227_v27, %v283_v36 }
  0x4e   : > { %v510_v47 = vunpack.c.l.bf16 %v454_v38  ;;  %v340_v48 = vmax.f32 %v228_v32, %v284_v39  ;;  %v285_v49 = vunpack.c.l.bf16 %v175_v37  ;;  %v286_v50 = vunpack.c.h.bf16 %v175_v37 }
  0x4f   : > { %592 = vst [vmem:[%s731_s16 + $0x4c] sm:$0x7] %v564_v43  ;;  %v565_v53 = vpack.c.bf16 %v537_v44, %v537_v44  ;;  %v455_v54 = vrot.slane %v371_v45, 4  ;;  %v231_v55 = vunpack.c.l.bf16 %v174_v42  ;;  %v232_v56 = vunpack.c.h.bf16 %v174_v42 }
  0x50   : > { %v538_v57 = vmax.f32 %v335_v20, %v510_v47  ;;  %v372_v58 = vpack.c.bf16 %v340_v48, %v339_v46  ;;  %v341_v59 = vmax.f32 %v229_v40, %v285_v49  ;;  %v342_v60 = vmax.f32 %v230_v41, %v286_v50 }
  0x51   : > { %593 = vst [vmem:[%s731_s16 + $0x50] sm:$0xf] %v565_v53  ;;  %v511_v62 = vunpack.c.l.bf16 %v455_v54  ;;  %v287_v63 = vunpack.c.l.bf16 %v176_v51  ;;  %v288_v0 = vunpack.c.h.bf16 %v176_v51  ;;  %v233_v1 = vunpack.c.l.bf16 %v177_v52 }
  0x52   : > { %v566_v3 = vpack.c.bf16 %v538_v57, %v538_v57  ;;  %v456_v4 = vrot.slane %v372_v58, 4  ;;  %v373_v5 = vpack.c.bf16 %v342_v60, %v341_v59  ;;  %v234_v6 = vunpack.c.h.bf16 %v177_v52 }
  0x53   : > { %v539_v7 = vmax.f32 %v337_v31, %v511_v62  ;;  %v343_v8 = vmax.f32 %v231_v55, %v287_v63  ;;  %v344_v9 = vmax.f32 %v232_v56, %v288_v0  ;;  %v289_v10 = vunpack.c.l.bf16 %v179_v61 }
  0x54   : > { %594 = vst [vmem:[%s731_s16 + $0x54] sm:$0x7] %v566_v3  ;;  %v512_v12 = vunpack.c.l.bf16 %v456_v4  ;;  %v457_v13 = vrot.slane %v373_v5, 4  ;;  %v290_v14 = vunpack.c.h.bf16 %v179_v61  ;;  %v235_v15 = vunpack.c.l.bf16 %v178_v2 }
  0x55   : > { %v567_v16 = vpack.c.bf16 %v539_v7, %v539_v7  ;;  %v374_v17 = vpack.c.bf16 %v344_v9, %v343_v8  ;;  %v345_v18 = vmax.f32 %v233_v1, %v289_v10  ;;  %v236_v19 = vunpack.c.h.bf16 %v178_v2 }
  0x56   : > { %v540_v20 = vmax.f32 %v339_v46, %v512_v12  ;;  %v513_v21 = vunpack.c.l.bf16 %v457_v13  ;;  %v346_v22 = vmax.f32 %v234_v6, %v290_v14  ;;  %v291_v23 = vunpack.c.l.bf16 %v180_v11 }
  0x57   : > { %595 = vst [vmem:[%s731_s16 + $0x58] sm:$0xf] %v567_v16  ;;  %v458_v24 = vrot.slane %v374_v17, 4  ;;  %v292_v25 = vunpack.c.h.bf16 %v180_v11 }
  0x58   : > { %v568_v26 = vpack.c.bf16 %v540_v20, %v540_v20  ;;  %v541_v27 = vmax.f32 %v341_v59, %v513_v21  ;;  %v375_v28 = vpack.c.bf16 %v346_v22, %v345_v18  ;;  %v347_v29 = vmax.f32 %v235_v15, %v291_v23 }
  0x59   : > { %v514_v30 = vunpack.c.l.bf16 %v458_v24  ;;  %v348_v31 = vmax.f32 %v236_v19, %v292_v25 }
  0x5a   : > { %596 = vst [vmem:[%s731_s16 + $0x5c] sm:$0x7] %v568_v26  ;;  %v569_v32 = vpack.c.bf16 %v541_v27, %v541_v27  ;;  %v459_v33 = vrot.slane %v375_v28, 4 }
  0x5b   : > { %v542_v34 = vmax.f32 %v343_v8, %v514_v30  ;;  %v376_v35 = vpack.c.bf16 %v348_v31, %v347_v29 }
  0x5c   : > { %597 = vst [vmem:[%s731_s16 + $0x60] sm:$0xf] %v569_v32  ;;  %v515_v36 = vunpack.c.l.bf16 %v459_v33 }
  0x5d   : > { %v570_v37 = vpack.c.bf16 %v542_v34, %v542_v34  ;;  %v460_v38 = vrot.slane %v376_v35, 4 }
  0x5e   : > { %v543_v39 = vmax.f32 %v345_v18, %v515_v36 }
  0x5f   : > { %598 = vst [vmem:[%s731_s16 + $0x64] sm:$0x7] %v570_v37  ;;  %v516_v40 = vunpack.c.l.bf16 %v460_v38 }
  0x60   : > { %v571_v41 = vpack.c.bf16 %v543_v39, %v543_v39 }
  0x61   : > { %v544_v42 = vmax.f32 %v347_v29, %v516_v40 }
  0x62   : > { %599 = vst [vmem:[%s731_s16 + $0x68] sm:$0xf] %v571_v41 }
  0x63   : > { %v572_v43 = vpack.c.bf16 %v544_v42, %v544_v42 }
  0x65   : > { %600 = vst [vmem:[%s731_s16 + $0x6c] sm:$0x7] %v572_v43 }
  0x66 PF: > { %s11_s6 = sadd.s32 1, %s686_s6  }
  0x67   : > { %p8_p4 = scmp.ge.s32.totalorder %s11_s6, 4  }
  0x69   :  { %10 = sbr.rel (!%p8_p4) target bundleno = 1 (0x1), region = 54 }

// kernel: circle_detector_forward.10
= control target key start
LH: loop header
LB: loop body
LE: loop exit
PB: predicated region body
PF: predicated region fallthrough
CT: control target
= control target key end

     0   :  { %s534_s6 = smov 0   ;;  %s619_s0 = inlined_call_operand.vmem [shape: bf16[12,2,6,1024], index: 0, kind: input, shape index: {}]   ;;  %s620_s1 = inlined_call_operand.vmem [shape: bf16[12,6,512], index: 1, kind: output, shape index: {}]  }
   0x1 LB: > { %s495_s7 = sadd.s32 4294967295, %s522_s6   ;;  %p499_p0 = scmp.ge.s32.totalorder %s522_s6, 1  ;;  %s522_s6 = sphi %s534_s6, %s11_s6  }
   0x2   : > { %p89_p1 = scmp.lt.s32.totalorder %s522_s6, 3 }
   0x4   : > { %p90_p2 = pnand %p499_p0, %p89_p1 }
   0x5   : > { %s111_s8 = smul.u32 (!%p90_p2), 6, %s495_s7 }
   0x6   : > { %93 = sbr.rel (%p90_p2) target bundleno = 66 (0x42), region = 24 }
   0x7   : > { %p112_p3 = scmp.lt.s32.totalorder (!%p90_p2), %s111_s8, 11 }
   0xb   : > { %s622_s8 = smov (!%p112_p3, %s111_s8), 11 }
   0xc   : > { %s506_s9 = sshll.u32 %s622_s8, 6  ;;  %s507_s13 = sshll.u32 %s622_s8, 4 }
   0xd   : > { %s548_s12 = scalar_lea.vmem %s619_s0, %s506_s9  ;;  %s566_s16 = scalar_lea.vmem %s620_s1, %s507_s13 }
   0xe   : > { %v125_v0 = vld [vmem:[%s548_s12] sm:$0x77]  ;;  %v127_v1 = vld [vmem:[%s548_s12 + $0x10] sm:$0x77]  ;;  %v126_v8 = vld [vmem:[%s548_s12 + $0x8] sm:$0x77] }
   0xf   : > { %v129_v2 = vld [vmem:[%s548_s12 + $0x20] sm:$0x77]  ;;  %v131_v3 = vld [vmem:[%s548_s12 + $0x30] sm:$0x77]  ;;  %v173_v4 = vunpack.c.l.bf16 %v125_v0  ;;  %v174_v5 = vunpack.c.h.bf16 %v125_v0  ;;  %v177_v6 = vunpack.c.l.bf16 %v127_v1  ;;  %v178_v7 = vunpack.c.h.bf16 %v127_v1  ;;  %v128_v9 = vld [vmem:[%s548_s12 + $0x18] sm:$0x77] }
  0x10   : > { %v221_v10 = vunpack.c.l.bf16 %v129_v2  ;;  %v222_v11 = vunpack.c.h.bf16 %v129_v2  ;;  %v225_v12 = vunpack.c.l.bf16 %v131_v3  ;;  %v226_v13 = vunpack.c.h.bf16 %v131_v3  ;;  %v130_v14 = vld [vmem:[%s548_s12 + $0x28] sm:$0x77]  ;;  %v132_v15 = vld [vmem:[%s548_s12 + $0x38] sm:$0x77]  ;;  %v133_v20 = vld [vmem:[%s548_s12 + $0x40] sm:$0x77] }
  0x11   : > { %v175_v16 = vunpack.c.l.bf16 %v126_v8  ;;  %v176_v17 = vunpack.c.h.bf16 %v126_v8  ;;  %v179_v18 = vunpack.c.l.bf16 %v128_v9  ;;  %v180_v19 = vunpack.c.h.bf16 %v128_v9  ;;  %v135_v29 = vld [vmem:[%s548_s12 + $0x50] sm:$0x77]  ;;  %v137_v30 = vld [vmem:[%s548_s12 + $0x60] sm:$0x77]  ;;  %v134_v40 = vld [vmem:[%s548_s12 + $0x48] sm:$0x77] }
  0x12   : > { %v269_v21 = vmax.f32 %v173_v4, %v221_v10  ;;  %v270_v22 = vmax.f32 %v174_v5, %v222_v11  ;;  %v273_v23 = vmax.f32 %v177_v6, %v225_v12  ;;  %v274_v24 = vmax.f32 %v178_v7, %v226_v13  ;;  %v139_v33 = vld [vmem:[%s548_s12 + $0x70] sm:$0x77]  ;;  %v136_v45 = vld [vmem:[%s548_s12 + $0x58] sm:$0x77]  ;;  %v138_v50 = vld [vmem:[%s548_s12 + $0x68] sm:$0x77] }
  0x13   : > { %v223_v25 = vunpack.c.l.bf16 %v130_v14  ;;  %v224_v26 = vunpack.c.h.bf16 %v130_v14  ;;  %v227_v27 = vunpack.c.l.bf16 %v132_v15  ;;  %v228_v28 = vunpack.c.h.bf16 %v132_v15  ;;  %v140_v53 = vld [vmem:[%s548_s12 + $0x78] sm:$0x77]  ;;  %v141_v56 = vld [vmem:[%s548_s12 + $0x80] sm:$0x77]  ;;  %v143_v1 = vld [vmem:[%s548_s12 + $0x90] sm:$0x77] }
  0x14   : > { %v389_v31 = vmax.f32 %v269_v21, %v273_v23  ;;  %v390_v32 = vmax.f32 %v270_v22, %v274_v24  ;;  %v181_v34 = vunpack.c.l.bf16 %v133_v20  ;;  %v182_v35 = vunpack.c.h.bf16 %v133_v20  ;;  %v145_v5 = vld [vmem:[%s548_s12 + $0xa0] sm:$0x77]  ;;  %v147_v6 = vld [vmem:[%s548_s12 + $0xb0] sm:$0x77]  ;;  %v142_v12 = vld [vmem:[%s548_s12 + $0x88] sm:$0x77] }
  0x15   : > { %v271_v36 = vmax.f32 %v175_v16, %v223_v25  ;;  %v272_v37 = vmax.f32 %v176_v17, %v224_v26  ;;  %v275_v38 = vmax.f32 %v179_v18, %v227_v27  ;;  %v276_v39 = vmax.f32 %v180_v19, %v228_v28  ;;  %v144_v21 = vld [vmem:[%s548_s12 + $0x98] sm:$0x77]  ;;  %v146_v25 = vld [vmem:[%s548_s12 + $0xa8] sm:$0x77] }
  0x16   : > { %v413_v41 = vpack.c.bf16 %v390_v32, %v389_v31  ;;  %v185_v42 = vunpack.c.l.bf16 %v135_v29  ;;  %v186_v43 = vunpack.c.h.bf16 %v135_v29  ;;  %v229_v44 = vunpack.c.l.bf16 %v137_v30  ;;  %v148_v26 = vld [vmem:[%s548_s12 + $0xb8] sm:$0x77]  ;;  %v149_v32 = vld [vmem:[%s548_s12 + $0xc0] sm:$0x77] }
  0x17   : > { %v391_v46 = vmax.f32 %v271_v36, %v275_v38  ;;  %v392_v47 = vmax.f32 %v272_v37, %v276_v39  ;;  %v230_v48 = vunpack.c.h.bf16 %v137_v30  ;;  %v233_v49 = vunpack.c.l.bf16 %v139_v33  ;;  %v151_v37 = vld [vmem:[%s548_s12 + $0xd0] sm:$0x77] }
  0x18   : > { %425 = vst [vmem:[%s566_s16] sm:$0x77] %v413_v41  ;;  %v234_v51 = vunpack.c.h.bf16 %v139_v33  ;;  %v277_v52 = vmax.f32 %v181_v34, %v229_v44  ;;  %v183_v54 = vunpack.c.l.bf16 %v134_v40  ;;  %v184_v55 = vunpack.c.h.bf16 %v134_v40 }
  0x19   : > { %v414_v57 = vpack.c.bf16 %v392_v47, %v391_v46  ;;  %v278_v58 = vmax.f32 %v182_v35, %v230_v48  ;;  %v281_v59 = vmax.f32 %v185_v42, %v233_v49  ;;  %v187_v60 = vunpack.c.l.bf16 %v136_v45  ;;  %v153_v42 = vld [vmem:[%s548_s12 + $0xe0] sm:$0x77] }
  0x1a   : > { %v282_v61 = vmax.f32 %v186_v43, %v234_v51  ;;  %v188_v62 = vunpack.c.h.bf16 %v136_v45  ;;  %v231_v63 = vunpack.c.l.bf16 %v138_v50  ;;  %v232_v0 = vunpack.c.h.bf16 %v138_v50  ;;  %v155_v45 = vld [vmem:[%s548_s12 + $0xf0] sm:$0x77] }
  0x1b   : > { %426 = vst [vmem:[%s566_s16 + $0x8] sm:$0x77] %v414_v57  ;;  %v393_v2 = vmax.f32 %v277_v52, %v281_v59  ;;  %v235_v3 = vunpack.c.l.bf16 %v140_v53  ;;  %v236_v4 = vunpack.c.h.bf16 %v140_v53  ;;  %v189_v7 = vunpack.c.l.bf16 %v141_v56  ;;  %v150_v52 = vld [vmem:[%s548_s12 + $0xc8] sm:$0x77]  ;;  %v152_v57 = vld [vmem:[%s548_s12 + $0xd8] sm:$0x77] }
  0x1c   : > { %v394_v8 = vmax.f32 %v278_v58, %v282_v61  ;;  %v279_v9 = vmax.f32 %v183_v54, %v231_v63  ;;  %v280_v10 = vmax.f32 %v184_v55, %v232_v0  ;;  %v190_v11 = vunpack.c.h.bf16 %v141_v56 }
  0x1d   : > { %v283_v13 = vmax.f32 %v187_v60, %v235_v3  ;;  %v284_v14 = vmax.f32 %v188_v62, %v236_v4  ;;  %v193_v15 = vunpack.c.l.bf16 %v143_v1  ;;  %v194_v16 = vunpack.c.h.bf16 %v143_v1  ;;  %v154_v62 = vld [vmem:[%s548_s12 + $0xe8] sm:$0x77]  ;;  %v156_v1 = vld [vmem:[%s548_s12 + $0xf8] sm:$0x77] }
  0x1e   : > { %v415_v17 = vpack.c.bf16 %v394_v8, %v393_v2  ;;  %v237_v18 = vunpack.c.l.bf16 %v145_v5  ;;  %v238_v19 = vunpack.c.h.bf16 %v145_v5  ;;  %v241_v20 = vunpack.c.l.bf16 %v147_v6  ;;  %v157_v8 = vld [vmem:[%s548_s12 + $0x100] sm:$0x77] }
  0x1f   : > { %v395_v22 = vmax.f32 %v279_v9, %v283_v13  ;;  %v396_v23 = vmax.f32 %v280_v10, %v284_v14  ;;  %v242_v24 = vunpack.c.h.bf16 %v147_v6  ;;  %v191_v27 = vunpack.c.l.bf16 %v142_v12  ;;  %v159_v13 = vld [vmem:[%s548_s12 + $0x110] sm:$0x77] }
  0x20   : > { %427 = vst [vmem:[%s566_s16 + $0x10] sm:$0x77] %v415_v17  ;;  %v285_v28 = vmax.f32 %v189_v7, %v237_v18  ;;  %v286_v29 = vmax.f32 %v190_v11, %v238_v19  ;;  %v289_v30 = vmax.f32 %v193_v15, %v241_v20  ;;  %v192_v31 = vunpack.c.h.bf16 %v142_v12  ;;  %v161_v18 = vld [vmem:[%s548_s12 + $0x120] sm:$0x77]  ;;  %v163_v19 = vld [vmem:[%s548_s12 + $0x130] sm:$0x77] }
  0x21   : > { %v416_v33 = vpack.c.bf16 %v396_v23, %v395_v22  ;;  %v290_v34 = vmax.f32 %v194_v16, %v242_v24  ;;  %v195_v35 = vunpack.c.l.bf16 %v144_v21  ;;  %v196_v36 = vunpack.c.h.bf16 %v144_v21  ;;  %v158_v24 = vld [vmem:[%s548_s12 + $0x108] sm:$0x77] }
  0x22   : > { %v397_v38 = vmax.f32 %v285_v28, %v289_v30  ;;  %v239_v39 = vunpack.c.l.bf16 %v146_v25  ;;  %v240_v40 = vunpack.c.h.bf16 %v146_v25  ;;  %v243_v41 = vunpack.c.l.bf16 %v148_v26 }
  0x23   : > { %428 = vst [vmem:[%s566_s16 + $0x18] sm:$0x77] %v416_v33  ;;  %v398_v43 = vmax.f32 %v286_v29, %v290_v34  ;;  %v244_v44 = vunpack.c.h.bf16 %v148_v26  ;;  %v197_v46 = vunpack.c.l.bf16 %v149_v32  ;;  %v198_v47 = vunpack.c.h.bf16 %v149_v32  ;;  %v160_v33 = vld [vmem:[%s548_s12 + $0x118] sm:$0x77] }
  0x24   : > { %v287_v48 = vmax.f32 %v191_v27, %v239_v39  ;;  %v288_v49 = vmax.f32 %v192_v31, %v240_v40  ;;  %v291_v50 = vmax.f32 %v195_v35, %v243_v41  ;;  %v201_v51 = vunpack.c.l.bf16 %v151_v37 }
  0x25   : > { %v417_v53 = vpack.c.bf16 %v398_v43, %v397_v38  ;;  %v292_v54 = vmax.f32 %v196_v36, %v244_v44  ;;  %v202_v55 = vunpack.c.h.bf16 %v151_v37  ;;  %v245_v56 = vunpack.c.l.bf16 %v153_v42  ;;  %v162_v37 = vld [vmem:[%s548_s12 + $0x128] sm:$0x77]  ;;  %v164_v38 = vld [vmem:[%s548_s12 + $0x138] sm:$0x77]  ;;  %v165_v44 = vld [vmem:[%s548_s12 + $0x140] sm:$0x77] }
  0x26   : > { %v399_v58 = vmax.f32 %v287_v48, %v291_v50  ;;  %v246_v59 = vunpack.c.h.bf16 %v153_v42  ;;  %v249_v60 = vunpack.c.l.bf16 %v155_v45  ;;  %v250_v61 = vunpack.c.h.bf16 %v155_v45 }
  0x27   : > { %429 = vst [vmem:[%s566_s16 + $0x20] sm:$0x77] %v417_v53  ;;  %v400_v63 = vmax.f32 %v288_v49, %v292_v54  ;;  %v293_v0 = vmax.f32 %v197_v46, %v245_v56  ;;  %v199_v2 = vunpack.c.l.bf16 %v150_v52  ;;  %v200_v3 = vunpack.c.h.bf16 %v150_v52  ;;  %v167_v49 = vld [vmem:[%s548_s12 + $0x150] sm:$0x77]  ;;  %v169_v54 = vld [vmem:[%s548_s12 + $0x160] sm:$0x77] }
  0x28   : > { %v294_v4 = vmax.f32 %v198_v47, %v246_v59  ;;  %v297_v5 = vmax.f32 %v201_v51, %v249_v60  ;;  %v298_v6 = vmax.f32 %v202_v55, %v250_v61  ;;  %v203_v7 = vunpack.c.l.bf16 %v152_v57 }
  0x29   : > { %v418_v9 = vpack.c.bf16 %v400_v63, %v399_v58  ;;  %v204_v10 = vunpack.c.h.bf16 %v152_v57  ;;  %v247_v11 = vunpack.c.l.bf16 %v154_v62  ;;  %v248_v12 = vunpack.c.h.bf16 %v154_v62  ;;  %v171_v57 = vld [vmem:[%s548_s12 + $0x170] sm:$0x77] }
  0x2a   : > { %v401_v14 = vmax.f32 %v293_v0, %v297_v5  ;;  %v402_v15 = vmax.f32 %v294_v4, %v298_v6  ;;  %v251_v16 = vunpack.c.l.bf16 %v156_v1  ;;  %v252_v17 = vunpack.c.h.bf16 %v156_v1  ;;  %v166_v0 = vld [vmem:[%s548_s12 + $0x148] sm:$0x77]  ;;  %v168_v5 = vld [vmem:[%s548_s12 + $0x158] sm:$0x77] }
  0x2b   : > { %430 = vst [vmem:[%s566_s16 + $0x28] sm:$0x77] %v418_v9  ;;  %v295_v20 = vmax.f32 %v199_v2, %v247_v11  ;;  %v296_v21 = vmax.f32 %v200_v3, %v248_v12  ;;  %v205_v22 = vunpack.c.l.bf16 %v157_v8  ;;  %v206_v23 = vunpack.c.h.bf16 %v157_v8 }
  0x2c   : > { %v419_v25 = vpack.c.bf16 %v402_v15, %v401_v14  ;;  %v299_v26 = vmax.f32 %v203_v7, %v251_v16  ;;  %v300_v27 = vmax.f32 %v204_v10, %v252_v17  ;;  %v209_v28 = vunpack.c.l.bf16 %v159_v13  ;;  %v170_v10 = vld [vmem:[%s548_s12 + $0x168] sm:$0x77] }
  0x2d   : > { %v210_v29 = vunpack.c.h.bf16 %v159_v13  ;;  %v253_v30 = vunpack.c.l.bf16 %v161_v18  ;;  %v254_v31 = vunpack.c.h.bf16 %v161_v18  ;;  %v257_v32 = vunpack.c.l.bf16 %v163_v19  ;;  %v172_v13 = vld [vmem:[%s548_s12 + $0x178] sm:$0x77] }
  0x2e   : > { %431 = vst [vmem:[%s566_s16 + $0x30] sm:$0x77] %v419_v25  ;;  %v403_v34 = vmax.f32 %v295_v20, %v299_v26  ;;  %v404_v35 = vmax.f32 %v296_v21, %v300_v27  ;;  %v258_v36 = vunpack.c.h.bf16 %v163_v19  ;;  %v207_v39 = vunpack.c.l.bf16 %v158_v24 }
  0x2f   : > { %v301_v40 = vmax.f32 %v205_v22, %v253_v30  ;;  %v302_v41 = vmax.f32 %v206_v23, %v254_v31  ;;  %v305_v42 = vmax.f32 %v209_v28, %v257_v32  ;;  %v208_v43 = vunpack.c.h.bf16 %v158_v24 }
  0x30   : > { %v420_v45 = vpack.c.bf16 %v404_v35, %v403_v34  ;;  %v306_v46 = vmax.f32 %v210_v29, %v258_v36  ;;  %v211_v47 = vunpack.c.l.bf16 %v160_v33  ;;  %v212_v48 = vunpack.c.h.bf16 %v160_v33 }
  0x31   : > { %v405_v50 = vmax.f32 %v301_v40, %v305_v42  ;;  %v255_v51 = vunpack.c.l.bf16 %v162_v37  ;;  %v256_v52 = vunpack.c.h.bf16 %v162_v37  ;;  %v259_v53 = vunpack.c.l.bf16 %v164_v38 }
  0x32   : > { %432 = vst [vmem:[%s566_s16 + $0x38] sm:$0x77] %v420_v45  ;;  %v406_v55 = vmax.f32 %v302_v41, %v306_v46  ;;  %v260_v56 = vunpack.c.h.bf16 %v164_v38  ;;  %v213_v58 = vunpack.c.l.bf16 %v165_v44  ;;  %v214_v59 = vunpack.c.h.bf16 %v165_v44 }
  0x33   : > { %v303_v60 = vmax.f32 %v207_v39, %v255_v51  ;;  %v304_v61 = vmax.f32 %v208_v43, %v256_v52  ;;  %v307_v62 = vmax.f32 %v211_v47, %v259_v53  ;;  %v217_v63 = vunpack.c.l.bf16 %v167_v49 }
  0x34   : > { %v421_v1 = vpack.c.bf16 %v406_v55, %v405_v50  ;;  %v308_v2 = vmax.f32 %v212_v48, %v260_v56  ;;  %v218_v3 = vunpack.c.h.bf16 %v167_v49  ;;  %v261_v4 = vunpack.c.l.bf16 %v169_v54 }
  0x35   : > { %v407_v6 = vmax.f32 %v303_v60, %v307_v62  ;;  %v262_v7 = vunpack.c.h.bf16 %v169_v54  ;;  %v265_v8 = vunpack.c.l.bf16 %v171_v57  ;;  %v266_v9 = vunpack.c.h.bf16 %v171_v57 }
  0x36   : > { %433 = vst [vmem:[%s566_s16 + $0x40] sm:$0x77] %v421_v1  ;;  %v408_v11 = vmax.f32 %v304_v61, %v308_v2  ;;  %v309_v12 = vmax.f32 %v213_v58, %v261_v4  ;;  %v215_v14 = vunpack.c.l.bf16 %v166_v0  ;;  %v216_v15 = vunpack.c.h.bf16 %v166_v0 }
  0x37   : > { %v310_v16 = vmax.f32 %v214_v59, %v262_v7  ;;  %v313_v17 = vmax.f32 %v217_v63, %v265_v8  ;;  %v314_v18 = vmax.f32 %v218_v3, %v266_v9  ;;  %v219_v19 = vunpack.c.l.bf16 %v168_v5 }
  0x38   : > { %v422_v20 = vpack.c.bf16 %v408_v11, %v407_v6  ;;  %v220_v21 = vunpack.c.h.bf16 %v168_v5  ;;  %v263_v22 = vunpack.c.l.bf16 %v170_v10  ;;  %v264_v23 = vunpack.c.h.bf16 %v170_v10 }
  0x39   : > { %v409_v24 = vmax.f32 %v309_v12, %v313_v17  ;;  %v410_v25 = vmax.f32 %v310_v16, %v314_v18  ;;  %v267_v26 = vunpack.c.l.bf16 %v172_v13  ;;  %v268_v27 = vunpack.c.h.bf16 %v172_v13 }
  0x3a   : > { %434 = vst [vmem:[%s566_s16 + $0x48] sm:$0x77] %v422_v20  ;;  %v311_v28 = vmax.f32 %v215_v14, %v263_v22  ;;  %v312_v29 = vmax.f32 %v216_v15, %v264_v23 }
  0x3b   : > { %v423_v30 = vpack.c.bf16 %v410_v25, %v409_v24  ;;  %v315_v31 = vmax.f32 %v219_v19, %v267_v26  ;;  %v316_v32 = vmax.f32 %v220_v21, %v268_v27 }
  0x3d   : > { %435 = vst [vmem:[%s566_s16 + $0x50] sm:$0x77] %v423_v30  ;;  %v411_v33 = vmax.f32 %v311_v28, %v315_v31  ;;  %v412_v34 = vmax.f32 %v312_v29, %v316_v32 }
  0x3f   : > { %v424_v35 = vpack.c.bf16 %v412_v34, %v411_v33 }
  0x41   : > { %436 = vst [vmem:[%s566_s16 + $0x58] sm:$0x77] %v424_v35 }
  0x42 PF: > { %s11_s6 = sadd.s32 1, %s522_s6  }
  0x43   : > { %p8_p4 = scmp.ge.s32.totalorder %s11_s6, 4  }
  0x45   :  { %10 = sbr.rel (!%p8_p4) target bundleno = 1 (0x1), region = 54 }

// kernel: circle_detector_forward.9
= control target key start
LH: loop header
LB: loop body
LE: loop exit
PB: predicated region body
PF: predicated region fallthrough
CT: control target
= control target key end

     0   :  { %s6792_s15 = smov 0   ;;  %s9947_s0 = inlined_call_operand.vmem [shape: bf16[288,1152], index: 0, kind: input, shape index: {}]   ;;  %s9948_s1 = inlined_call_operand.vmem [shape: bf16[1152,512], index: 1, kind: input, shape index: {}]   ;;  %s9949_s2 = inlined_call_operand.vmem [shape: f32[1,512], index: 2, kind: input, shape index: {}]   ;;  %s9950_s3 = inlined_call_operand.vmem [shape: f32[1,512], index: 3, kind: input, shape index: {}]   ;;  %s9951_s4 = inlined_call_operand.vmem [shape: bf16[288,512], index: 4, kind: output, shape index: {}]  }
   0x1 LB: > { %s4892_s16 = sadd.s32 4294967295, %s6765_s15   ;;  %p4896_p0 = scmp.ge.s32.totalorder %s6765_s15, 1  ;;  %s6765_s15 = sphi %s6792_s15, %s14_s15  }
   0x2   : > { %p164_p1 = scmp.lt.s32.totalorder %s6765_s15, 3 }
   0x4   : > { %p165_p2 = pnand %p4896_p0, %p164_p1 }
   0x6   : > { %168 = sbr.rel (%p165_p2) target bundleno = 1486 (0x5ce), region = 36 }
   0xb   : > { %v5338_v0 = vld [vmem:[%s9948_s1 + $0xe0] sm:$0xf]  ;;  %v6490_v1 = vld [vmem:[%s9948_s1 + $0xec] sm:$0xf0]  ;;  %s192_s29 = smul.u32 18, %s4892_s16 }
   0xc   : > { %v5466_v2 = vld [vmem:[%s9948_s1 + $0x1e0] sm:$0xf]  ;;  %v5339_v3 = vor.u32 %v6490_v1, %v5338_v0  ;;  %v6522_v4 = vld [vmem:[%s9948_s1 + $0x1ec] sm:$0xf0] }
   0xd   : > { %v5594_v5 = vld [vmem:[%s9948_s1 + $0x2e0] sm:$0xf]  ;;  %v6554_v6 = vld [vmem:[%s9948_s1 + $0x2ec] sm:$0xf0]  ;;  %v5467_v7 = vor.u32 %v6522_v4, %v5466_v2  ;;  %p193_p3 = scmp.lt.s32.totalorder %s192_s29, 35 }
   0xe   : > { %v5595_v8 = vor.u32 %v6554_v6, %v5594_v5  ;;  %v5722_v9 = vld [vmem:[%s9948_s1 + $0x3e0] sm:$0xf]  ;;  %v6586_v10 = vld [vmem:[%s9948_s1 + $0x3ec] sm:$0xf0]  ;;  %2438 = vmatpush.bf16.msra.mxu0 %v5339_v3 }
   0xf   : > { %v5322_v11 = vld [vmem:[%s9948_s1 + $0xc0] sm:$0xf]  ;;  %v5723_v12 = vor.u32 %v6586_v10, %v5722_v9  ;;  %v6486_v13 = vld [vmem:[%s9948_s1 + $0xcc] sm:$0xf0]  ;;  %2492 = vmatpush.bf16.msra.mxu1 %v5467_v7  ;;  %s10365_s29 = smov (!%p193_p3, %s192_s29), 35 }
  0x10   : > { %v5450_v14 = vld [vmem:[%s9948_s1 + $0x1c0] sm:$0xf]  ;;  %v6518_v15 = vld [vmem:[%s9948_s1 + $0x1cc] sm:$0xf0]  ;;  %2546 = vmatpush.bf16.msra.mxu2 %v5595_v8  ;;  %v5323_v16 = vor.u32 %v6486_v13, %v5322_v11  ;;  %s6748_s30 = smul.u32 36, %s10365_s29  ;;  %s6378_s8 = sshll.u32 %s10365_s29, 4 }
  0x11   : > { %v5451_v17 = vor.u32 %v6518_v15, %v5450_v14  ;;  %v5578_v18 = vld [vmem:[%s9948_s1 + $0x2c0] sm:$0xf]  ;;  %v6550_v19 = vld [vmem:[%s9948_s1 + $0x2cc] sm:$0xf0]  ;;  %2600 = vmatpush.bf16.msra.mxu3 %v5723_v12  ;;  %s8754_s11 = scalar_lea.vmem %s9951_s4, %s6378_s8 }
  0x12   : > { %v5706_v20 = vld [vmem:[%s9948_s1 + $0x3c0] sm:$0xf]  ;;  %v5579_v21 = vor.u32 %v6550_v19, %v5578_v18  ;;  %v6582_v22 = vld [vmem:[%s9948_s1 + $0x3cc] sm:$0xf0]  ;;  %2439 = vmatpush.bf16.msra.mxu0 %v5323_v16  ;;  %s7027_s22 = scalar_lea.vmem %s9947_s0, %s6748_s30 }
  0x13   : > { %v5306_v23 = vld [vmem:[%s9948_s1 + $0xa0] sm:$0xf]  ;;  %v6482_v24 = vld [vmem:[%s9948_s1 + $0xac] sm:$0xf0]  ;;  %v5707_v25 = vor.u32 %v6582_v22, %v5706_v20  ;;  %2493 = vmatpush.bf16.msra.mxu1 %v5451_v17 }
  0x14   : > { %v5434_v26 = vld [vmem:[%s9948_s1 + $0x1a0] sm:$0xf]  ;;  %v6514_v27 = vld [vmem:[%s9948_s1 + $0x1ac] sm:$0xf0]  ;;  %v5307_v29 = vor.u32 %v6482_v24, %v5306_v23  ;;  %2547 = vmatpush.bf16.msra.mxu2 %v5579_v21 }
  0x15   : > { %v5562_v28 = vld [vmem:[%s9948_s1 + $0x2a0] sm:$0xf]  ;;  %v6546_v30 = vld [vmem:[%s9948_s1 + $0x2ac] sm:$0xf0]  ;;  %v5435_v33 = vor.u32 %v6514_v27, %v5434_v26  ;;  %2601 = vmatpush.bf16.msra.mxu3 %v5707_v25 }
  0x16   : > { %v5690_v31 = vld [vmem:[%s9948_s1 + $0x3a0] sm:$0xf]  ;;  %v6578_v32 = vld [vmem:[%s9948_s1 + $0x3ac] sm:$0xf0]  ;;  %v5563_v34 = vor.u32 %v6546_v30, %v5562_v28  ;;  %2440 = vmatpush.bf16.msra.mxu0 %v5307_v29 }
  0x17   : > { %v5290_v35 = vld [vmem:[%s9948_s1 + $0x80] sm:$0xf]  ;;  %v6478_v36 = vld [vmem:[%s9948_s1 + $0x8c] sm:$0xf0]  ;;  %v5691_v38 = vor.u32 %v6578_v32, %v5690_v31  ;;  %2494 = vmatpush.bf16.msra.mxu1 %v5435_v33 }
  0x18   : > { %v5418_v37 = vld [vmem:[%s9948_s1 + $0x180] sm:$0xf]  ;;  %v6510_v39 = vld [vmem:[%s9948_s1 + $0x18c] sm:$0xf0]  ;;  %v5291_v44 = vor.u32 %v6478_v36, %v5290_v35  ;;  %2548 = vmatpush.bf16.msra.mxu2 %v5563_v34 }
  0x19   : > { %v5546_v40 = vld [vmem:[%s9948_s1 + $0x280] sm:$0xf]  ;;  %v6542_v41 = vld [vmem:[%s9948_s1 + $0x28c] sm:$0xf0]  ;;  %v5419_v45 = vor.u32 %v6510_v39, %v5418_v37  ;;  %2602 = vmatpush.bf16.msra.mxu3 %v5691_v38 }
  0x1a   : > { %v5674_v42 = vld [vmem:[%s9948_s1 + $0x380] sm:$0xf]  ;;  %v6574_v43 = vld [vmem:[%s9948_s1 + $0x38c] sm:$0xf0]  ;;  %v5547_v46 = vor.u32 %v6542_v41, %v5546_v40  ;;  %2441 = vmatpush.bf16.msra.mxu0 %v5291_v44 }
  0x1b   : > { %v5274_v47 = vld [vmem:[%s9948_s1 + $0x60] sm:$0xf]  ;;  %v6474_v48 = vld [vmem:[%s9948_s1 + $0x6c] sm:$0xf0]  ;;  %v5675_v50 = vor.u32 %v6574_v43, %v5674_v42  ;;  %2495 = vmatpush.bf16.msra.mxu1 %v5419_v45 }
  0x1c   : > { %v5402_v49 = vld [vmem:[%s9948_s1 + $0x160] sm:$0xf]  ;;  %v6506_v51 = vld [vmem:[%s9948_s1 + $0x16c] sm:$0xf0]  ;;  %v5275_v56 = vor.u32 %v6474_v48, %v5274_v47  ;;  %2549 = vmatpush.bf16.msra.mxu2 %v5547_v46  ;;  %v6383_v46 = vld [vmem:[%s7027_s22 + $0x20] sm:$0xf0] }
  0x1d   : > { %v5530_v52 = vld [vmem:[%s9948_s1 + $0x260] sm:$0xf]  ;;  %v6538_v53 = vld [vmem:[%s9948_s1 + $0x26c] sm:$0xf0]  ;;  %v5403_v57 = vor.u32 %v6506_v51, %v5402_v49  ;;  %2603 = vmatpush.bf16.msra.mxu3 %v5675_v50  ;;  %v6379_v47 = vld [vmem:[%s7027_s22 + $0x4] sm:$0xf] }
  0x1e   : > { %v5658_v54 = vld [vmem:[%s9948_s1 + $0x360] sm:$0xf]  ;;  %v6570_v55 = vld [vmem:[%s9948_s1 + $0x36c] sm:$0xf0]  ;;  %v5531_v58 = vor.u32 %v6538_v53, %v5530_v52  ;;  %2442 = vmatpush.bf16.msra.mxu0 %v5275_v56  ;;  %v4904_v50 = vld [vmem:[%s7027_s22 + $0x24] sm:$0xf0] }
  0x1f   : > { %v5258_v59 = vld [vmem:[%s9948_s1 + $0x40] sm:$0xf]  ;;  %v6470_v60 = vld [vmem:[%s9948_s1 + $0x4c] sm:$0xf0]  ;;  %v5659_v62 = vor.u32 %v6570_v55, %v5658_v54  ;;  %2496 = vmatpush.bf16.msra.mxu1 %v5403_v57  ;;  %v4910_v51 = vld [vmem:[%s7027_s22 + $0x8] sm:$0xf]  ;;  %v7046_v53 = vor.u32 %v6379_v47, %v4904_v50 }
  0x20   : > { %v5386_v61 = vld [vmem:[%s9948_s1 + $0x140] sm:$0xf]  ;;  %v6502_v63 = vld [vmem:[%s9948_s1 + $0x14c] sm:$0xf0]  ;;  %v5259_v4 = vor.u32 %v6470_v60, %v5258_v59  ;;  %2550 = vmatpush.bf16.msra.mxu2 %v5531_v58  ;;  %v6384_v52 = vld [vmem:[%s7027_s22 + $0x28] sm:$0xf0] }
  0x21   : > { %v5514_v0 = vld [vmem:[%s9948_s1 + $0x240] sm:$0xf]  ;;  %v6534_v1 = vld [vmem:[%s9948_s1 + $0x24c] sm:$0xf0]  ;;  %v5387_v6 = vor.u32 %v6502_v63, %v5386_v61  ;;  %2604 = vmatpush.bf16.msra.mxu3 %v5659_v62  ;;  %10091 = vst [vmem:[#allocation3_spill] sm:$0xff] %v7046_v53  ;;  %v7048_v54 = vor.u32 %v6384_v52, %v4910_v51 }
  0x22   : > { %v5642_v2 = vld [vmem:[%s9948_s1 + $0x340] sm:$0xf]  ;;  %v6566_v3 = vld [vmem:[%s9948_s1 + $0x34c] sm:$0xf0]  ;;  %v5515_v7 = vor.u32 %v6534_v1, %v5514_v0  ;;  %2443 = vmatpush.bf16.msra.mxu0 %v5259_v4  ;;  %v6380_v55 = vld [vmem:[%s7027_s22 + $0xc] sm:$0xf] }
  0x23   : > { %v5242_v5 = vld [vmem:[%s9948_s1 + $0x20] sm:$0xf]  ;;  %v6466_v8 = vld [vmem:[%s9948_s1 + $0x2c] sm:$0xf0]  ;;  %v5643_v11 = vor.u32 %v6566_v3, %v5642_v2  ;;  %2497 = vmatpush.bf16.msra.mxu1 %v5387_v6  ;;  %10092 = vst [vmem:[#allocation4_spill] sm:$0xff] %v7048_v54 }
  0x24   : > { %v5370_v9 = vld [vmem:[%s9948_s1 + $0x120] sm:$0xf]  ;;  %v6498_v10 = vld [vmem:[%s9948_s1 + $0x12c] sm:$0xf0]  ;;  %v5243_v16 = vor.u32 %v6466_v8, %v5242_v5  ;;  %2551 = vmatpush.bf16.msra.mxu2 %v5515_v7 }
  0x25   : > { %v5498_v12 = vld [vmem:[%s9948_s1 + $0x220] sm:$0xf]  ;;  %v6530_v13 = vld [vmem:[%s9948_s1 + $0x22c] sm:$0xf0]  ;;  %v5371_v19 = vor.u32 %v6498_v10, %v5370_v9  ;;  %2605 = vmatpush.bf16.msra.mxu3 %v5643_v11 }
  0x26   : > { %v5626_v14 = vld [vmem:[%s9948_s1 + $0x320] sm:$0xf]  ;;  %v6562_v15 = vld [vmem:[%s9948_s1 + $0x32c] sm:$0xf0]  ;;  %v5499_v20 = vor.u32 %v6530_v13, %v5498_v12  ;;  %2444 = vmatpush.bf16.msra.mxu0 %v5243_v16  ;;  %v4938_v16 = vld [vmem:[%s7027_s22 + $0x48] sm:$0xf] }
  0x27   : > { %v5226_v17 = vld [vmem:[%s9948_s1] sm:$0xf]  ;;  %v6462_v18 = vld [vmem:[%s9948_s1 + $0xc] sm:$0xf0]  ;;  %v5627_v24 = vor.u32 %v6562_v15, %v5626_v14  ;;  %2498 = vmatpush.bf16.msra.mxu1 %v5371_v19 }
  0x28   : > { %v5354_v21 = vld [vmem:[%s9948_s1 + $0x100] sm:$0xf]  ;;  %v6494_v22 = vld [vmem:[%s9948_s1 + $0x10c] sm:$0xf0]  ;;  %v5227_v30 = vor.u32 %v6462_v18, %v5226_v17  ;;  %2552 = vmatpush.bf16.msra.mxu2 %v5499_v20  ;;  %v6392_v17 = vld [vmem:[%s7027_s22 + $0x68] sm:$0xf0] }
  0x29   : > { %v5482_v23 = vld [vmem:[%s9948_s1 + $0x200] sm:$0xf]  ;;  %v6526_v25 = vld [vmem:[%s9948_s1 + $0x20c] sm:$0xf0]  ;;  %v5355_v35 = vor.u32 %v6494_v22, %v5354_v21  ;;  %2606 = vmatpush.bf16.msra.mxu3 %v5627_v24  ;;  %v6388_v18 = vld [vmem:[%s7027_s22 + $0x4c] sm:$0xf]  ;;  %v7102_v24 = vor.u32 %v6392_v17, %v4938_v16 }
  0x2a   : > { %v5610_v26 = vld [vmem:[%s9948_s1 + $0x300] sm:$0xf]  ;;  %v6558_v27 = vld [vmem:[%s9948_s1 + $0x30c] sm:$0xf0]  ;;  %v5483_v36 = vor.u32 %v6526_v25, %v5482_v23  ;;  %2445 = vmatpush.bf16.msra.mxu0 %v5227_v30  ;;  %v6393_v21 = vld [vmem:[%s7027_s22 + $0x70] sm:$0xf0] }
  0x2b   : > { %v6106_v28 = vld [vmem:[%s9948_s1 + $0x6e0] sm:$0xf]  ;;  %v6682_v29 = vld [vmem:[%s9948_s1 + $0x6ec] sm:$0xf0]  ;;  %v5611_v40 = vor.u32 %v6558_v27, %v5610_v26  ;;  %2499 = vmatpush.bf16.msra.mxu1 %v5355_v35  ;;  %v6389_v22 = vld [vmem:[%s7027_s22 + $0x54] sm:$0xf] }
  0x2c   : > { %v5850_v31 = vld [vmem:[%s9948_s1 + $0x4e0] sm:$0xf]  ;;  %v6618_v32 = vld [vmem:[%s9948_s1 + $0x4ec] sm:$0xf0]  ;;  %v6107_v41 = vor.u32 %v6682_v29, %v6106_v28  ;;  %2553 = vmatpush.bf16.msra.mxu2 %v5483_v36  ;;  %v4948_v23 = vld [vmem:[%s7027_s22 + $0x74] sm:$0xf0] }
  0x2d   : > { %v6234_v33 = vld [vmem:[%s9948_s1 + $0x7e0] sm:$0xf]  ;;  %v6714_v34 = vld [vmem:[%s9948_s1 + $0x7ec] sm:$0xf0]  ;;  %v5851_v57 = vor.u32 %v6618_v32, %v5850_v31  ;;  %2607 = vmatpush.bf16.msra.mxu3 %v5611_v40  ;;  %v7108_v27 = vor.u32 %v6389_v22, %v4948_v23 }
  0x2e   : > { %v5978_v37 = vld [vmem:[%s9948_s1 + $0x5e0] sm:$0xf]  ;;  %v6650_v38 = vld [vmem:[%s9948_s1 + $0x5ec] sm:$0xf0]  ;;  %v6235_v48 = vor.u32 %v6714_v34, %v6234_v33  ;;  %2500 = vmatmul.bf16.vlgmr.msra.gmra.mxu1 %v7046_v53 }
  0x2f   : > { %v6090_v39 = vld [vmem:[%s9948_s1 + $0x6c0] sm:$0xf]  ;;  %v6678_v42 = vld [vmem:[%s9948_s1 + $0x6cc] sm:$0xf0]  ;;  %v5979_v59 = vor.u32 %v6650_v38, %v5978_v37  ;;  %2554 = vmatmul.bf16.vlgmr.msra.gmra.mxu2 %v7048_v54  ;;  %2654 = vmatpush.bf16.msrb.mxu0 %v5851_v57  ;;  %10096 = vst [vmem:[#allocation8_spill] sm:$0xff] %v7108_v27 }
  0x30   : > { %v6218_v43 = vld [vmem:[%s9948_s1 + $0x7c0] sm:$0xf]  ;;  %v6710_v44 = vld [vmem:[%s9948_s1 + $0x7cc] sm:$0xf0]  ;;  %2762 = vmatpush.bf16.msrb.mxu2 %v6107_v41  ;;  %v6091_v60 = vor.u32 %v6678_v42, %v6090_v39  ;;  %v6401_v41 = vld [vmem:[%s7027_s22 + $0xb0] sm:$0xf0] }
  0x31   : > { %v4902_v45 = vld [vmem:[%s7027_s22] sm:$0xf]  ;;  %v4912_v56 = vld [vmem:[%s7027_s22 + $0x2c] sm:$0xf0]  ;;  %2816 = vmatpush.bf16.msrb.mxu3 %v6235_v48  ;;  %v6219_v63 = vor.u32 %v6710_v44, %v6218_v43  ;;  %2708 = vmatpush.bf16.msrb.mxu1 %v5979_v59  ;;  %v6397_v42 = vld [vmem:[%s7027_s22 + $0x94] sm:$0xf] }
  0x32   : > { %v7041_v49 = vor.u32 %v6383_v46, %v4902_v45  ;;  %v7052_v58 = vor.u32 %v6380_v55, %v4912_v56  ;;  %v5834_v61 = vld [vmem:[%s9948_s1 + $0x4c0] sm:$0xf]  ;;  %v6614_v62 = vld [vmem:[%s9948_s1 + $0x4cc] sm:$0xf0]  ;;  %v4976_v43 = vld [vmem:[%s7027_s22 + $0xb4] sm:$0xf0] }
  0x33   : > { %v5962_v0 = vld [vmem:[%s9948_s1 + $0x5c0] sm:$0xf]  ;;  %v6646_v1 = vld [vmem:[%s9948_s1 + $0x5cc] sm:$0xf0]  ;;  %v5835_v2 = vor.u32 %v6614_v62, %v5834_v61  ;;  %v4982_v44 = vld [vmem:[%s7027_s22 + $0x98] sm:$0xf]  ;;  %v7148_v50 = vor.u32 %v6397_v42, %v4976_v43 }
  0x34   : > { %10090 = vst [vmem:[#allocation2_spill] sm:$0xff] %v7041_v49  ;;  %2446 = vmatmul.bf16.vlgmr.msra.gmra.mxu0 %v7041_v49  ;;  %2608 = vmatmul.bf16.vlgmr.msra.gmra.mxu3 %v7052_v58  ;;  %v5963_v3 = vor.u32 %v6646_v1, %v5962_v0  ;;  %v6074_v4 = vld [vmem:[%s9948_s1 + $0x6a0] sm:$0xf]  ;;  %v6674_v5 = vld [vmem:[%s9948_s1 + $0x6ac] sm:$0xf0] }
  0x35   : > { %10093 = vst [vmem:[#allocation5_spill] sm:$0xff] %v7052_v58  ;;  %2763 = vmatpush.bf16.msrb.mxu2 %v6091_v60  ;;  %2817 = vmatpush.bf16.msrb.mxu3 %v6219_v63  ;;  %v5818_v6 = vld [vmem:[%s9948_s1 + $0x4a0] sm:$0xf]  ;;  %v6075_v7 = vor.u32 %v6674_v5, %v6074_v4  ;;  %v6610_v8 = vld [vmem:[%s9948_s1 + $0x4ac] sm:$0xf0] }
  0x36   : > { %v6202_v9 = vld [vmem:[%s9948_s1 + $0x7a0] sm:$0xf]  ;;  %v6706_v10 = vld [vmem:[%s9948_s1 + $0x7ac] sm:$0xf0]  ;;  %2655 = vmatpush.bf16.msrb.mxu0 %v5835_v2  ;;  %v5819_v11 = vor.u32 %v6610_v8, %v5818_v6  ;;  %2709 = vmatpush.bf16.msrb.mxu1 %v5963_v3  ;;  %v6402_v45 = vld [vmem:[%s7027_s22 + $0xb8] sm:$0xf0] }
  0x37   : > { %v6203_v12 = vor.u32 %v6706_v10, %v6202_v9  ;;  %v5946_v13 = vld [vmem:[%s9948_s1 + $0x5a0] sm:$0xf]  ;;  %v6642_v14 = vld [vmem:[%s9948_s1 + $0x5ac] sm:$0xf0]  ;;  %v6398_v46 = vld [vmem:[%s7027_s22 + $0x9c] sm:$0xf]  ;;  %v7150_v51 = vor.u32 %v6402_v45, %v4982_v44 }
  0x38   : > { %v5947_v15 = vor.u32 %v6642_v14, %v5946_v13  ;;  %v4940_v19 = vld [vmem:[%s7027_s22 + $0x6c] sm:$0xf0]  ;;  %v6058_v28 = vld [vmem:[%s9948_s1 + $0x680] sm:$0xf]  ;;  %10097 = vst [vmem:[#allocation9_spill] sm:$0xff] %v7148_v50 }
  0x39   : > { %2764 = vmatpush.bf16.msrb.mxu2 %v6075_v7  ;;  %2818 = vmatpush.bf16.msrb.mxu3 %v6203_v12  ;;  %v4946_v20 = vld [vmem:[%s7027_s22 + $0x50] sm:$0xf]  ;;  %v7104_v25 = vor.u32 %v6388_v18, %v4940_v19  ;;  %v5802_v30 = vld [vmem:[%s9948_s1 + $0x480] sm:$0xf]  ;;  %10098 = vst [vmem:[#allocation10_spill] sm:$0xff] %v7150_v51 }
  0x3a   : > { %2656 = vmatpush.bf16.msrb.mxu0 %v5819_v11  ;;  %2710 = vmatpush.bf16.msrb.mxu1 %v5947_v15  ;;  %v7106_v26 = vor.u32 %v6393_v21, %v4946_v20  ;;  %v6670_v29 = vld [vmem:[%s9948_s1 + $0x68c] sm:$0xf0]  ;;  %v6186_v33 = vld [vmem:[%s9948_s1 + $0x780] sm:$0xf]  ;;  %v5010_v4 = vld [vmem:[%s7027_s22 + $0xd8] sm:$0xf] }
  0x3b   : > { %10094 = vst [vmem:[#allocation6_spill] sm:$0xff] %v7104_v25  ;;  %v6059_v31 = vor.u32 %v6670_v29, %v6058_v28  ;;  %v6606_v32 = vld [vmem:[%s9948_s1 + $0x48c] sm:$0xf0]  ;;  %v5930_v37 = vld [vmem:[%s9948_s1 + $0x580] sm:$0xf] }
  0x3c   : > { %10095 = vst [vmem:[#allocation7_spill] sm:$0xff] %v7106_v26  ;;  %v6702_v34 = vld [vmem:[%s9948_s1 + $0x78c] sm:$0xf0]  ;;  %v5803_v35 = vor.u32 %v6606_v32, %v5802_v30  ;;  %v4984_v47 = vld [vmem:[%s7027_s22 + $0xbc] sm:$0xf0] }
  0x3d   : > { %v6187_v36 = vor.u32 %v6702_v34, %v6186_v33  ;;  %v6638_v38 = vld [vmem:[%s9948_s1 + $0x58c] sm:$0xf0]  ;;  %2765 = vmatpush.bf16.msrb.mxu2 %v6059_v31  ;;  %v7152_v52 = vor.u32 %v6398_v46, %v4984_v47  ;;  %v6042_v55 = vld [vmem:[%s9948_s1 + $0x660] sm:$0xf]  ;;  %v6410_v5 = vld [vmem:[%s7027_s22 + $0xf8] sm:$0xf0] }
  0x3e   : > { %2505 = vmatmul.bf16.gmra.mxu1 %v7104_v25  ;;  %v5931_v39 = vor.u32 %v6638_v38, %v5930_v37  ;;  %2657 = vmatpush.bf16.msrb.mxu0 %v5803_v35  ;;  %v4974_v40 = vld [vmem:[%s7027_s22 + $0x90] sm:$0xf]  ;;  %v5786_v57 = vld [vmem:[%s9948_s1 + $0x460] sm:$0xf]  ;;  %v6406_v6 = vld [vmem:[%s7027_s22 + $0xdc] sm:$0xf]  ;;  %v7190_v12 = vor.u32 %v6410_v5, %v5010_v4 }
  0x3f   : > { %2559 = vmatmul.bf16.gmra.mxu2 %v7106_v26  ;;  %2819 = vmatpush.bf16.msrb.mxu3 %v6187_v36  ;;  %v7146_v48 = vor.u32 %v6401_v41, %v4974_v40  ;;  %10099 = vst [vmem:[#allocation11_spill] sm:$0xff] %v7152_v52  ;;  %v6666_v56 = vld [vmem:[%s9948_s1 + $0x66c] sm:$0xf0]  ;;  %v6170_v61 = vld [vmem:[%s9948_s1 + $0x760] sm:$0xf] }
  0x40   : > { %2711 = vmatpush.bf16.msrb.mxu1 %v5931_v39  ;;  %v6043_v59 = vor.u32 %v6666_v56, %v6042_v55  ;;  %v6602_v60 = vld [vmem:[%s9948_s1 + $0x46c] sm:$0xf0]  ;;  %v5914_v1 = vld [vmem:[%s9948_s1 + $0x560] sm:$0xf]  ;;  %v6411_v9 = vld [vmem:[%s7027_s22 + $0x100] sm:$0xf0] }
  0x41   : > { %v6698_v62 = vld [vmem:[%s9948_s1 + $0x76c] sm:$0xf0]  ;;  %v5787_v63 = vor.u32 %v6602_v60, %v5786_v57  ;;  %v5012_v7 = vld [vmem:[%s7027_s22 + $0xfc] sm:$0xf0]  ;;  %v6407_v10 = vld [vmem:[%s7027_s22 + $0xe4] sm:$0xf] }
  0x42   : > { %v6171_v0 = vor.u32 %v6698_v62, %v6170_v61  ;;  %v6634_v2 = vld [vmem:[%s9948_s1 + $0x56c] sm:$0xf0]  ;;  %2766 = vmatpush.bf16.msrb.mxu2 %v6043_v59  ;;  %v5018_v8 = vld [vmem:[%s7027_s22 + $0xe0] sm:$0xf]  ;;  %v5020_v11 = vld [vmem:[%s7027_s22 + $0x104] sm:$0xf0]  ;;  %v7192_v13 = vor.u32 %v6406_v6, %v5012_v7 }
  0x43   : > { %v5915_v3 = vor.u32 %v6634_v2, %v5914_v1  ;;  %2658 = vmatpush.bf16.msrb.mxu0 %v5787_v63  ;;  %v7194_v14 = vor.u32 %v6411_v9, %v5018_v8  ;;  %v7196_v15 = vor.u32 %v6407_v10, %v5020_v11  ;;  %v6026_v16 = vld [vmem:[%s9948_s1 + $0x640] sm:$0xf]  ;;  %v6662_v17 = vld [vmem:[%s9948_s1 + $0x64c] sm:$0xf0]  ;;  %v6419_v33 = vld [vmem:[%s7027_s22 + $0x140] sm:$0xf0] }
  0x44   : > { %2451 = vmatmul.bf16.gmra.mxu0 %v7102_v24  ;;  %2613 = vmatmul.bf16.gmra.mxu3 %v7108_v27  ;;  %10100 = vst [vmem:[#allocation12_spill] sm:$0xff] %v7192_v13  ;;  %v5770_v18 = vld [vmem:[%s9948_s1 + $0x440] sm:$0xf]  ;;  %v6027_v19 = vor.u32 %v6662_v17, %v6026_v16  ;;  %v6598_v20 = vld [vmem:[%s9948_s1 + $0x44c] sm:$0xf0] }
  0x45   : > { %2820 = vmatpush.bf16.msrb.mxu3 %v6171_v0  ;;  %2712 = vmatpush.bf16.msrb.mxu1 %v5915_v3  ;;  %10101 = vst [vmem:[#allocation13_spill] sm:$0xff] %v7194_v14  ;;  %v6154_v21 = vld [vmem:[%s9948_s1 + $0x740] sm:$0xf]  ;;  %v6694_v22 = vld [vmem:[%s9948_s1 + $0x74c] sm:$0xf0]  ;;  %v5771_v23 = vor.u32 %v6598_v20, %v5770_v18 }
  0x46   : > { %10102 = vst [vmem:[#allocation14_spill] sm:$0xff] %v7196_v15  ;;  %v6155_v28 = vor.u32 %v6694_v22, %v6154_v21  ;;  %v5898_v29 = vld [vmem:[%s9948_s1 + $0x540] sm:$0xf]  ;;  %v6630_v30 = vld [vmem:[%s9948_s1 + $0x54c] sm:$0xf0]  ;;  %2767 = vmatpush.bf16.msrb.mxu2 %v6027_v19 }
  0x47   : > { %v5899_v31 = vor.u32 %v6630_v30, %v5898_v29  ;;  %2659 = vmatpush.bf16.msrb.mxu0 %v5771_v23  ;;  %v5046_v32 = vld [vmem:[%s7027_s22 + $0x120] sm:$0xf]  ;;  %v6415_v34 = vld [vmem:[%s7027_s22 + $0x124] sm:$0xf]  ;;  %v5048_v35 = vld [vmem:[%s7027_s22 + $0x144] sm:$0xf0] }
  0x48   : > { %v5054_v36 = vld [vmem:[%s7027_s22 + $0x128] sm:$0xf]  ;;  %v6420_v37 = vld [vmem:[%s7027_s22 + $0x148] sm:$0xf0]  ;;  %v5056_v39 = vld [vmem:[%s7027_s22 + $0x14c] sm:$0xf0]  ;;  %v7234_v40 = vor.u32 %v6419_v33, %v5046_v32  ;;  %v7236_v41 = vor.u32 %v6415_v34, %v5048_v35 }
  0x49   : > { %2821 = vmatpush.bf16.msrb.mxu3 %v6155_v28  ;;  %2713 = vmatpush.bf16.msrb.mxu1 %v5899_v31  ;;  %v6416_v38 = vld [vmem:[%s7027_s22 + $0x12c] sm:$0xf]  ;;  %v7238_v42 = vor.u32 %v6420_v37, %v5054_v36  ;;  %v6010_v44 = vld [vmem:[%s9948_s1 + $0x620] sm:$0xf]  ;;  %v6658_v45 = vld [vmem:[%s9948_s1 + $0x62c] sm:$0xf0] }
  0x4a   : > { %10103 = vst [vmem:[#allocation15_spill] sm:$0xff] %v7234_v40  ;;  %v7240_v43 = vor.u32 %v6416_v38, %v5056_v39  ;;  %v5754_v46 = vld [vmem:[%s9948_s1 + $0x420] sm:$0xf]  ;;  %v6011_v47 = vor.u32 %v6658_v45, %v6010_v44  ;;  %v6594_v55 = vld [vmem:[%s9948_s1 + $0x42c] sm:$0xf0] }
  0x4b   : > { %10104 = vst [vmem:[#allocation16_spill] sm:$0xff] %v7236_v41  ;;  %v6138_v56 = vld [vmem:[%s9948_s1 + $0x720] sm:$0xf]  ;;  %v6690_v57 = vld [vmem:[%s9948_s1 + $0x72c] sm:$0xf0]  ;;  %v5755_v59 = vor.u32 %v6594_v55, %v5754_v46 }
  0x4c   : > { %10105 = vst [vmem:[#allocation17_spill] sm:$0xff] %v7238_v42  ;;  %v6139_v60 = vor.u32 %v6690_v57, %v6138_v56  ;;  %2768 = vmatpush.bf16.msrb.mxu2 %v6011_v47  ;;  %v5082_v61 = vld [vmem:[%s7027_s22 + $0x168] sm:$0xf]  ;;  %v6428_v62 = vld [vmem:[%s7027_s22 + $0x188] sm:$0xf0] }
  0x4d   : > { %10106 = vst [vmem:[#allocation18_spill] sm:$0xff] %v7240_v43  ;;  %2660 = vmatpush.bf16.msrb.mxu0 %v5755_v59  ;;  %v6424_v63 = vld [vmem:[%s7027_s22 + $0x16c] sm:$0xf]  ;;  %v5084_v0 = vld [vmem:[%s7027_s22 + $0x18c] sm:$0xf0]  ;;  %v7272_v5 = vor.u32 %v6428_v62, %v5082_v61 }
  0x4e   : > { %2510 = vmatmul.bf16.gmra.mxu1 %v7148_v50  ;;  %2822 = vmatpush.bf16.msrb.mxu3 %v6139_v60  ;;  %v5090_v1 = vld [vmem:[%s7027_s22 + $0x170] sm:$0xf]  ;;  %v6429_v2 = vld [vmem:[%s7027_s22 + $0x190] sm:$0xf0]  ;;  %v5092_v4 = vld [vmem:[%s7027_s22 + $0x194] sm:$0xf0]  ;;  %v7274_v6 = vor.u32 %v6424_v63, %v5084_v0 }
  0x4f   : > { %2564 = vmatmul.bf16.gmra.mxu2 %v7150_v51  ;;  %v6425_v3 = vld [vmem:[%s7027_s22 + $0x174] sm:$0xf]  ;;  %10107 = vst [vmem:[#allocation19_spill] sm:$0xff] %v7272_v5  ;;  %v7276_v7 = vor.u32 %v6429_v2, %v5090_v1  ;;  %v5882_v9 = vld [vmem:[%s9948_s1 + $0x520] sm:$0xf] }
  0x50   : > { %10108 = vst [vmem:[#allocation20_spill] sm:$0xff] %v7274_v6  ;;  %v7278_v8 = vor.u32 %v6425_v3, %v5092_v4  ;;  %v6626_v10 = vld [vmem:[%s9948_s1 + $0x52c] sm:$0xf0]  ;;  %v6437_v17 = vld [vmem:[%s7027_s22 + $0x1d0] sm:$0xf0] }
  0x51   : > { %10109 = vst [vmem:[#allocation21_spill] sm:$0xff] %v7276_v7  ;;  %v5883_v11 = vor.u32 %v6626_v10, %v5882_v9  ;;  %v5118_v16 = vld [vmem:[%s7027_s22 + $0x1b0] sm:$0xf]  ;;  %v6433_v18 = vld [vmem:[%s7027_s22 + $0x1b4] sm:$0xf] }
  0x52   : > { %10110 = vst [vmem:[#allocation22_spill] sm:$0xff] %v7278_v8  ;;  %v5120_v19 = vld [vmem:[%s7027_s22 + $0x1d4] sm:$0xf0]  ;;  %v6438_v21 = vld [vmem:[%s7027_s22 + $0x1d8] sm:$0xf0]  ;;  %v7298_v28 = vor.u32 %v6437_v17, %v5118_v16 }
  0x53   : > { %2714 = vmatpush.bf16.msrb.mxu1 %v5883_v11  ;;  %v5126_v20 = vld [vmem:[%s7027_s22 + $0x1b8] sm:$0xf]  ;;  %v6434_v22 = vld [vmem:[%s7027_s22 + $0x1bc] sm:$0xf]  ;;  %v5128_v23 = vld [vmem:[%s7027_s22 + $0x1dc] sm:$0xf0]  ;;  %v7300_v29 = vor.u32 %v6433_v18, %v5120_v19 }
  0x54   : > { %2456 = vmatmul.bf16.gmra.mxu0 %v7146_v48  ;;  %2618 = vmatmul.bf16.gmra.mxu3 %v7152_v52  ;;  %10111 = vst [vmem:[#allocation23_spill] sm:$0xff] %v7298_v28  ;;  %v7302_v30 = vor.u32 %v6438_v21, %v5126_v20  ;;  %v7304_v31 = vor.u32 %v6434_v22, %v5128_v23  ;;  %v5994_v32 = vld [vmem:[%s9948_s1 + $0x600] sm:$0xf]  ;;  %v6654_v33 = vld [vmem:[%s9948_s1 + $0x60c] sm:$0xf0] }
  0x55   : > { %10112 = vst [vmem:[#allocation24_spill] sm:$0xff] %v7300_v29  ;;  %v5995_v34 = vor.u32 %v6654_v33, %v5994_v32  ;;  %v5738_v35 = vld [vmem:[%s9948_s1 + $0x400] sm:$0xf]  ;;  %v6590_v36 = vld [vmem:[%s9948_s1 + $0x40c] sm:$0xf0] }
  0x56   : > { %10113 = vst [vmem:[#allocation25_spill] sm:$0xff] %v7302_v30  ;;  %v5739_v37 = vor.u32 %v6590_v36, %v5738_v35  ;;  %v6122_v38 = vld [vmem:[%s9948_s1 + $0x700] sm:$0xf]  ;;  %v6686_v39 = vld [vmem:[%s9948_s1 + $0x70c] sm:$0xf0] }
  0x57   : > { %10114 = vst [vmem:[#allocation26_spill] sm:$0xff] %v7304_v31  ;;  %2769 = vmatpush.bf16.msrb.mxu2 %v5995_v34  ;;  %v5866_v44 = vld [vmem:[%s9948_s1 + $0x500] sm:$0xf]  ;;  %v6123_v45 = vor.u32 %v6686_v39, %v6122_v38  ;;  %v6622_v46 = vld [vmem:[%s9948_s1 + $0x50c] sm:$0xf0] }
  0x58   : > { %2661 = vmatpush.bf16.msrb.mxu0 %v5739_v37  ;;  %v5867_v47 = vor.u32 %v6622_v46, %v5866_v44  ;;  %v5154_v55 = vld [vmem:[%s7027_s22 + $0x1f8] sm:$0xf]  ;;  %v6446_v56 = vld [vmem:[%s7027_s22 + $0x218] sm:$0xf0]  ;;  %v5156_v59 = vld [vmem:[%s7027_s22 + $0x21c] sm:$0xf0] }
  0x59   : > { %2823 = vmatpush.bf16.msrb.mxu3 %v6123_v45  ;;  %v6442_v57 = vld [vmem:[%s7027_s22 + $0x1fc] sm:$0xf]  ;;  %v5162_v60 = vld [vmem:[%s7027_s22 + $0x200] sm:$0xf]  ;;  %v6447_v61 = vld [vmem:[%s7027_s22 + $0x220] sm:$0xf0]  ;;  %v7342_v0 = vor.u32 %v6446_v56, %v5154_v55 }
  0x5a   : > { %2715 = vmatpush.bf16.msrb.mxu1 %v5867_v47  ;;  %v6443_v62 = vld [vmem:[%s7027_s22 + $0x204] sm:$0xf]  ;;  %v5164_v63 = vld [vmem:[%s7027_s22 + $0x224] sm:$0xf0]  ;;  %v7344_v1 = vor.u32 %v6442_v57, %v5156_v59  ;;  %v7346_v2 = vor.u32 %v6447_v61, %v5162_v60  ;;  %v5468_v9 = vld [vmem:[%s9948_s1 + $0x1f0] sm:$0xf0] }
  0x5b   : > { %10115 = vst [vmem:[#allocation27_spill] sm:$0xff] %v7342_v0  ;;  %v7348_v3 = vor.u32 %v6443_v62, %v5164_v63  ;;  %v6520_v4 = vld [vmem:[%s9948_s1 + $0x1e4] sm:$0xf]  ;;  %v6362_v10 = vld [vmem:[%s9948_s1 + $0x8e0] sm:$0xf] }
  0x5c   : > { %10116 = vst [vmem:[#allocation28_spill] sm:$0xff] %v7344_v1  ;;  %v5471_v11 = vor.u32 %v6520_v4, %v5468_v9  ;;  %v6746_v16 = vld [vmem:[%s9948_s1 + $0x8ec] sm:$0xf0]  ;;  %v6552_v17 = vld [vmem:[%s9948_s1 + $0x2e4] sm:$0xf] }
  0x5d   : > { %10117 = vst [vmem:[#allocation29_spill] sm:$0xff] %v7346_v2  ;;  %v5596_v18 = vld [vmem:[%s9948_s1 + $0x2f0] sm:$0xf0]  ;;  %v6363_v19 = vor.u32 %v6746_v16, %v6362_v10  ;;  %v6488_v21 = vld [vmem:[%s9948_s1 + $0xe4] sm:$0xf] }
  0x5e   : > { %2515 = vmatmul.bf16.gmra.mxu1 %v7192_v13  ;;  %10118 = vst [vmem:[#allocation30_spill] sm:$0xff] %v7348_v3  ;;  %v5599_v20 = vor.u32 %v6552_v17, %v5596_v18  ;;  %2978 = vmatpush.bf16.msra.mxu2 %v5471_v11  ;;  %v5340_v22 = vld [vmem:[%s9948_s1 + $0xf0] sm:$0xf0]  ;;  %v5190_v32 = vld [vmem:[%s7027_s22 + $0x240] sm:$0xf] }
  0x5f   : > { %2569 = vmatmul.bf16.gmra.mxu2 %v7194_v14  ;;  %2870 = vmatpush.bf16.msra.mxu0 %v6363_v19  ;;  %v5343_v23 = vor.u32 %v6488_v21, %v5340_v22  ;;  %v6455_v33 = vld [vmem:[%s7027_s22 + $0x260] sm:$0xf0]  ;;  %v5192_v35 = vld [vmem:[%s7027_s22 + $0x264] sm:$0xf0]  ;;  %v6456_v37 = vld [vmem:[%s7027_s22 + $0x268] sm:$0xf0] }
  0x60   : > { %3032 = vmatpush.bf16.msra.mxu3 %v5599_v20  ;;  %v6451_v34 = vld [vmem:[%s7027_s22 + $0x244] sm:$0xf]  ;;  %v5198_v36 = vld [vmem:[%s7027_s22 + $0x248] sm:$0xf]  ;;  %v6452_v38 = vld [vmem:[%s7027_s22 + $0x24c] sm:$0xf]  ;;  %v7386_v44 = vor.u32 %v6455_v33, %v5190_v32 }
  0x61   : > { %2924 = vmatpush.bf16.msra.mxu1 %v5343_v23  ;;  %v5200_v39 = vld [vmem:[%s7027_s22 + $0x26c] sm:$0xf0]  ;;  %v7388_v46 = vor.u32 %v6451_v34, %v5192_v35  ;;  %v7390_v47 = vor.u32 %v6456_v37, %v5198_v36  ;;  %v6516_v59 = vld [vmem:[%s9948_s1 + $0x1c4] sm:$0xf]  ;;  %v5452_v60 = vld [vmem:[%s9948_s1 + $0x1d0] sm:$0xf0] }
  0x62   : > { %10119 = vst [vmem:[#allocation31_spill] sm:$0xff] %v7386_v44  ;;  %v7392_v56 = vor.u32 %v6452_v38, %v5200_v39  ;;  %v5455_v61 = vor.u32 %v6516_v59, %v5452_v60  ;;  %v6346_v17 = vld [vmem:[%s9948_s1 + $0x8c0] sm:$0xf]  ;;  %v6742_v18 = vld [vmem:[%s9948_s1 + $0x8cc] sm:$0xf0] }
  0x63   : > { %10120 = vst [vmem:[#allocation32_spill] sm:$0xff] %v7388_v46  ;;  %v6548_v19 = vld [vmem:[%s9948_s1 + $0x2c4] sm:$0xf]  ;;  %v6347_v20 = vor.u32 %v6742_v18, %v6346_v17  ;;  %v5580_v21 = vld [vmem:[%s9948_s1 + $0x2d0] sm:$0xf0] }
  0x64   : > { %2461 = vmatmul.bf16.gmra.mxu0 %v7190_v12  ;;  %2623 = vmatmul.bf16.gmra.mxu3 %v7196_v15  ;;  %10121 = vst [vmem:[#allocation33_spill] sm:$0xff] %v7390_v47  ;;  %v6484_v22 = vld [vmem:[%s9948_s1 + $0xc4] sm:$0xf]  ;;  %v5324_v23 = vld [vmem:[%s9948_s1 + $0xd0] sm:$0xf0]  ;;  %v5583_v35 = vor.u32 %v6548_v19, %v5580_v21 }
  0x65   : > { %10122 = vst [vmem:[#allocation34_spill] sm:$0xff] %v7392_v56  ;;  %2979 = vmatpush.bf16.msra.mxu2 %v5455_v61  ;;  %v4918_v32 = vld [vmem:[%s7027_s22 + $0x10] sm:$0xf]  ;;  %v6385_v33 = vld [vmem:[%s7027_s22 + $0x30] sm:$0xf0]  ;;  %v5327_v36 = vor.u32 %v6484_v22, %v5324_v23  ;;  %2871 = vmatpush.bf16.msra.mxu0 %v6347_v20 }
  0x66   : > { %v6381_v34 = vld [vmem:[%s7027_s22 + $0x14] sm:$0xf]  ;;  %v4920_v37 = vld [vmem:[%s7027_s22 + $0x34] sm:$0xf0]  ;;  %v6386_v39 = vld [vmem:[%s7027_s22 + $0x38] sm:$0xf0]  ;;  %3033 = vmatpush.bf16.msra.mxu3 %v5583_v35  ;;  %v7432_v59 = vor.u32 %v6385_v33, %v4918_v32 }
  0x67   : > { %v4926_v38 = vld [vmem:[%s7027_s22 + $0x18] sm:$0xf]  ;;  %2925 = vmatpush.bf16.msra.mxu1 %v5327_v36  ;;  %v6512_v35 = vld [vmem:[%s9948_s1 + $0x1a4] sm:$0xf]  ;;  %v5436_v36 = vld [vmem:[%s9948_s1 + $0x1b0] sm:$0xf0] }
  0x68   : > { %10123 = vst [vmem:[#allocation35_spill] sm:$0xff] %v7432_v59  ;;  %v4954_v33 = vld [vmem:[%s7027_s22 + $0x58] sm:$0xf] }
  0x6e   : > { %2520 = vmatmul.bf16.gmra.mxu1 %v7236_v41 }
  0x6f   : > { %2574 = vmatmul.bf16.gmra.mxu2 %v7238_v42 }
  0x74   : > { %2466 = vmatmul.bf16.gmra.mxu0 %v7234_v40  ;;  %2628 = vmatmul.bf16.gmra.mxu3 %v7240_v43 }
  0x7e   : > { %2525 = vmatmul.bf16.gmra.mxu1 %v7274_v6 }
  0x7f   : > { %2579 = vmatmul.bf16.gmra.mxu2 %v7276_v7 }
  0x84   : > { %2471 = vmatmul.bf16.gmra.mxu0 %v7272_v5  ;;  %2633 = vmatmul.bf16.gmra.mxu3 %v7278_v8 }
  0x8e   : > { %2530 = vmatmul.bf16.gmra.mxu1 %v7300_v29 }
  0x8f   : > { %2584 = vmatmul.bf16.gmra.mxu2 %v7302_v30 }
  0x94   : > { %2476 = vmatmul.bf16.gmra.mxu0 %v7298_v28  ;;  %2638 = vmatmul.bf16.gmra.mxu3 %v7304_v31 }
  0x9e   : > { %2535 = vmatmul.bf16.gmra.mxu1 %v7344_v1 }
  0x9f   : > { %2589 = vmatmul.bf16.gmra.mxu2 %v7346_v2 }
  0xa4   : > { %2481 = vmatmul.bf16.gmra.mxu0 %v7342_v0  ;;  %2643 = vmatmul.bf16.gmra.mxu3 %v7348_v3  ;;  %v5000_v3 = vld [vmem:[%s7027_s22 + $0xcc] sm:$0xf0] }
  0xab   : > { %v2501_v55 = vpop.f32.mrf.mxu1 }
  0xae   : > { %2540 = vmatmul.bf16.gmra.mxu1 %v7388_v46 }
  0xaf   : > { %2594 = vmatmul.bf16.gmra.mxu2 %v7390_v47 }
  0xb1   : > { %v2447_v45 = vpop.f32.mrf.mxu0 }
  0xb2   : > { %v2502_v57 = vadd.f32 %v2501_v55, %v2447_v45  ;;  %v2555_v62 = vpop.f32.mrf.mxu2  ;;  %v6382_v45 = vld [vmem:[%s7027_s22 + $0x1c] sm:$0xf]  ;;  %v4928_v55 = vld [vmem:[%s7027_s22 + $0x3c] sm:$0xf0] }
  0xb3   : > { %v2503_v10 = vpop.f32.mrf.mxu1 }
  0xb4   : > { %2486 = vmatmul.bf16.gmra.mxu0 %v7386_v44  ;;  %2648 = vmatmul.bf16.gmra.mxu3 %v7392_v56  ;;  %v2556_v63 = vadd.f32 %v2555_v62, %v2502_v57 }
  0xb7   : > { %v2609_v4 = vpop.f32.mrf.mxu3 }
  0xb8   : > { %v7404_v11 = vadd.f32 %v2609_v4, %v2556_v63  ;;  %v7434_v63 = vor.u32 %v6381_v34, %v4920_v37  ;;  %v7436_v4 = vor.u32 %v6386_v39, %v4926_v38  ;;  %v6394_v34 = vld [vmem:[%s7027_s22 + $0x78] sm:$0xf0]  ;;  %v6330_v37 = vld [vmem:[%s9948_s1 + $0x8a0] sm:$0xf]  ;;  %v5439_v38 = vor.u32 %v6512_v35, %v5436_v36  ;;  %v6738_v39 = vld [vmem:[%s9948_s1 + $0x8ac] sm:$0xf0] }
  0xb9   : > { %v2449_v9 = vpop.f32.mrf.mxu0  ;;  %v7480_v36 = vor.u32 %v6394_v34, %v4954_v33 }
  0xba   : > { %v2504_v16 = vadd.f32 %v2503_v10, %v2449_v9  ;;  %v2557_v57 = vpop.f32.mrf.mxu2  ;;  %10124 = vst [vmem:[#allocation36_spill] sm:$0xff] %v7434_v63  ;;  %v7438_v10 = vor.u32 %v6382_v45, %v4928_v55  ;;  %v6544_v45 = vld [vmem:[%s9948_s1 + $0x2a4] sm:$0xf]  ;;  %v5564_v55 = vld [vmem:[%s9948_s1 + $0x2b0] sm:$0xf0]  ;;  %2980 = vmatpush.bf16.msra.mxu2 %v5439_v38 }
  0xbb   : > { %10125 = vst [vmem:[#allocation37_spill] sm:$0xff] %v7436_v4  ;;  %v2506_v9 = vpop.f32.mrf.mxu1 }
  0xbc   : > { %v2558_v60 = vadd.f32 %v2557_v57, %v2504_v16  ;;  %10126 = vst [vmem:[#allocation38_spill] sm:$0xff] %v7438_v10  ;;  %v6390_v57 = vld [vmem:[%s7027_s22 + $0x5c] sm:$0xf] }
  0xbd   : > { %10127 = vst [vmem:[#allocation39_spill] sm:$0xff] %v7480_v36 }
  0xbe   : > { %2716 = vmatmul.bf16.vlgmr.msrb.gmra.mxu1 %v7434_v63 }
  0xbf   : > { %v2611_v61 = vpop.f32.mrf.mxu3  ;;  %2770 = vmatmul.bf16.vlgmr.msrb.gmra.mxu2 %v7436_v4 }
  0xc0   : > { %v7440_v17 = vadd.f32 %v2611_v61, %v2558_v60  ;;  %v6331_v60 = vor.u32 %v6738_v39, %v6330_v37  ;;  %v5567_v61 = vor.u32 %v6544_v45, %v5564_v55 }
  0xc1   : > { %v2452_v62 = vpop.f32.mrf.mxu0 }
  0xc2   : > { %v2507_v18 = vadd.f32 %v2506_v9, %v2452_v62  ;;  %v2560_v16 = vpop.f32.mrf.mxu2  ;;  %v6480_v62 = vld [vmem:[%s9948_s1 + $0xa4] sm:$0xf]  ;;  %v5308_v9 = vld [vmem:[%s9948_s1 + $0xb0] sm:$0xf0]  ;;  %2872 = vmatpush.bf16.msra.mxu0 %v6331_v60  ;;  %3034 = vmatpush.bf16.msra.mxu3 %v5567_v61 }
  0xc3   : > { %v2508_v22 = vpop.f32.mrf.mxu1 }
  0xc4   : > { %2662 = vmatmul.bf16.vlgmr.msrb.gmra.mxu0 %v7432_v59  ;;  %2824 = vmatmul.bf16.vlgmr.msrb.gmra.mxu3 %v7438_v10  ;;  %v2561_v19 = vadd.f32 %v2560_v16, %v2507_v18  ;;  %v4956_v18 = vld [vmem:[%s7027_s22 + $0x7c] sm:$0xf0] }
  0xc5   : > { %v4962_v16 = vld [vmem:[%s7027_s22 + $0x60] sm:$0xf]  ;;  %v7482_v55 = vor.u32 %v6390_v57, %v4956_v18 }
  0xc7   : > { %v2614_v20 = vpop.f32.mrf.mxu3  ;;  %10128 = vst [vmem:[#allocation40_spill] sm:$0xff] %v7482_v55 }
  0xc8   : > { %v7446_v23 = vadd.f32 %v2614_v20, %v2561_v19  ;;  %v6395_v19 = vld [vmem:[%s7027_s22 + $0x80] sm:$0xf0]  ;;  %v5311_v20 = vor.u32 %v6480_v62, %v5308_v9 }
  0xc9   : > { %v2454_v21 = vpop.f32.mrf.mxu0  ;;  %v7484_v10 = vor.u32 %v6395_v19, %v4962_v16  ;;  %v6403_v16 = vld [vmem:[%s7027_s22 + $0xc0] sm:$0xf0] }
  0xca   : > { %v2509_v32 = vadd.f32 %v2508_v22, %v2454_v21  ;;  %v6391_v21 = vld [vmem:[%s7027_s22 + $0x64] sm:$0xf]  ;;  %v4964_v22 = vld [vmem:[%s7027_s22 + $0x84] sm:$0xf0]  ;;  %v2562_v35 = vpop.f32.mrf.mxu2  ;;  %2926 = vmatpush.bf16.msra.mxu1 %v5311_v20  ;;  %v5420_v20 = vld [vmem:[%s9948_s1 + $0x190] sm:$0xf0] }
  0xcb   : > { %10129 = vst [vmem:[#allocation41_spill] sm:$0xff] %v7484_v10  ;;  %v2511_v56 = vpop.f32.mrf.mxu1  ;;  %v7486_v38 = vor.u32 %v6391_v21, %v4964_v22  ;;  %v6508_v19 = vld [vmem:[%s9948_s1 + $0x184] sm:$0xf]  ;;  %v6314_v21 = vld [vmem:[%s9948_s1 + $0x880] sm:$0xf] }
  0xcc   : > { %v2563_v37 = vadd.f32 %v2562_v35, %v2509_v32  ;;  %v5423_v22 = vor.u32 %v6508_v19, %v5420_v20  ;;  %v6734_v35 = vld [vmem:[%s9948_s1 + $0x88c] sm:$0xf0]  ;;  %v6404_v19 = vld [vmem:[%s7027_s22 + $0xc8] sm:$0xf0] }
  0xcd   : > { %10130 = vst [vmem:[#allocation42_spill] sm:$0xff] %v7486_v38 }
  0xce   : > { %2721 = vmatmul.bf16.gmra.mxu1 %v7482_v55  ;;  %2981 = vmatpush.bf16.msra.mxu2 %v5423_v22 }
  0xcf   : > { %v2616_v39 = vpop.f32.mrf.mxu3  ;;  %2775 = vmatmul.bf16.gmra.mxu2 %v7484_v10 }
  0xd0   : > { %v7488_v62 = vadd.f32 %v2616_v39, %v2563_v37  ;;  %v6540_v37 = vld [vmem:[%s9948_s1 + $0x284] sm:$0xf]  ;;  %v5548_v39 = vld [vmem:[%s9948_s1 + $0x290] sm:$0xf0] }
  0xd1   : > { %v2457_v45 = vpop.f32.mrf.mxu0 }
  0xd2   : > { %v2512_v60 = vadd.f32 %v2511_v56, %v2457_v45  ;;  %v2565_v32 = vpop.f32.mrf.mxu2  ;;  %v4990_v56 = vld [vmem:[%s7027_s22 + $0xa0] sm:$0xf]  ;;  %v6399_v45 = vld [vmem:[%s7027_s22 + $0xa4] sm:$0xf] }
  0xd3   : > { %v2513_v61 = vpop.f32.mrf.mxu1 }
  0xd4   : > { %2667 = vmatmul.bf16.gmra.mxu0 %v7480_v36  ;;  %2829 = vmatmul.bf16.gmra.mxu3 %v7486_v38  ;;  %v2566_v33 = vadd.f32 %v2565_v32, %v2512_v60  ;;  %v6315_v60 = vor.u32 %v6734_v35, %v6314_v21  ;;  %v5551_v32 = vor.u32 %v6540_v37, %v5548_v39  ;;  %v6400_v38 = vld [vmem:[%s7027_s22 + $0xac] sm:$0xf]  ;;  %v6496_v36 = vld [vmem:[%s9948_s1 + $0x124] sm:$0xf] }
  0xd5   : > { %v7528_v21 = vor.u32 %v6403_v16, %v4990_v56  ;;  %v7534_v52 = vor.u32 %v6400_v38, %v5000_v3 }
  0xd6   : > { %2873 = vmatpush.bf16.msra.mxu0 %v6315_v60  ;;  %3035 = vmatpush.bf16.msra.mxu3 %v5551_v32  ;;  %v5404_v60 = vld [vmem:[%s9948_s1 + $0x170] sm:$0xf0]  ;;  %v6298_v32 = vld [vmem:[%s9948_s1 + $0x860] sm:$0xf] }
  0xd7   : > { %v2619_v34 = vpop.f32.mrf.mxu3  ;;  %10131 = vst [vmem:[#allocation43_spill] sm:$0xff] %v7528_v21 }
  0xd8   : > { %v7494_v9 = vadd.f32 %v2619_v34, %v2566_v33  ;;  %v6476_v33 = vld [vmem:[%s9948_s1 + $0x84] sm:$0xf]  ;;  %v5292_v34 = vld [vmem:[%s9948_s1 + $0x90] sm:$0xf0]  ;;  %10134 = vst [vmem:[#allocation46_spill] sm:$0xff] %v7534_v52 }
  0xd9   : > { %v2459_v57 = vpop.f32.mrf.mxu0  ;;  %v5295_v20 = vor.u32 %v6476_v33, %v5292_v34 }
  0xda   : > { %v2514_v18 = vadd.f32 %v2513_v61, %v2459_v57  ;;  %v4992_v57 = vld [vmem:[%s7027_s22 + $0xc4] sm:$0xf0]  ;;  %v2567_v31 = vpop.f32.mrf.mxu2 }
  0xdb   : > { %v4998_v61 = vld [vmem:[%s7027_s22 + $0xa8] sm:$0xf]  ;;  %2927 = vmatpush.bf16.msra.mxu1 %v5295_v20  ;;  %v7530_v8 = vor.u32 %v6399_v45, %v4992_v57  ;;  %v2516_v15 = vpop.f32.mrf.mxu1  ;;  %v6504_v45 = vld [vmem:[%s9948_s1 + $0x164] sm:$0xf]  ;;  %v6730_v57 = vld [vmem:[%s9948_s1 + $0x86c] sm:$0xf0] }
  0xdc   : > { %v2568_v35 = vadd.f32 %v2567_v31, %v2514_v18  ;;  %v7532_v43 = vor.u32 %v6404_v19, %v4998_v61  ;;  %v5407_v34 = vor.u32 %v6504_v45, %v5404_v60  ;;  %v6536_v61 = vld [vmem:[%s9948_s1 + $0x264] sm:$0xf]  ;;  %v5532_v19 = vld [vmem:[%s9948_s1 + $0x270] sm:$0xf0]  ;;  %v5026_v20 = vld [vmem:[%s7027_s22 + $0xe8] sm:$0xf] }
  0xdd   : > { %10132 = vst [vmem:[#allocation44_spill] sm:$0xff] %v7530_v8 }
  0xde   : > { %10133 = vst [vmem:[#allocation45_spill] sm:$0xff] %v7532_v43  ;;  %2726 = vmatmul.bf16.gmra.mxu1 %v7530_v8  ;;  %2982 = vmatpush.bf16.msra.mxu2 %v5407_v34 }
  0xdf   : > { %v2621_v37 = vpop.f32.mrf.mxu3  ;;  %2780 = vmatmul.bf16.gmra.mxu2 %v7532_v43 }
  0xe0   : > { %v7536_v22 = vadd.f32 %v2621_v37, %v2568_v35  ;;  %v6412_v35 = vld [vmem:[%s7027_s22 + $0x108] sm:$0xf0] }
  0xe1   : > { %v2462_v39 = vpop.f32.mrf.mxu0  ;;  %v6408_v37 = vld [vmem:[%s7027_s22 + $0xec] sm:$0xf]  ;;  %v7570_v60 = vor.u32 %v6412_v35, %v5026_v20 }
  0xe2   : > { %v2517_v33 = vadd.f32 %v2516_v15, %v2462_v39  ;;  %v2570_v31 = vpop.f32.mrf.mxu2  ;;  %v6299_v39 = vor.u32 %v6730_v57, %v6298_v32 }
  0xe3   : > { %v2518_v3 = vpop.f32.mrf.mxu1  ;;  %10135 = vst [vmem:[#allocation47_spill] sm:$0xff] %v7570_v60 }
  0xe4   : > { %2672 = vmatmul.bf16.gmra.mxu0 %v7528_v21  ;;  %2834 = vmatmul.bf16.gmra.mxu3 %v7534_v52  ;;  %v2571_v18 = vadd.f32 %v2570_v31, %v2517_v33  ;;  %v5535_v33 = vor.u32 %v6536_v61, %v5532_v19  ;;  %v5028_v31 = vld [vmem:[%s7027_s22 + $0x10c] sm:$0xf0]  ;;  %v6472_v19 = vld [vmem:[%s9948_s1 + $0x64] sm:$0xf] }
  0xe5   : > { %2874 = vmatpush.bf16.msra.mxu0 %v6299_v39  ;;  %v7572_v21 = vor.u32 %v6408_v37, %v5028_v31  ;;  %v6500_v31 = vld [vmem:[%s9948_s1 + $0x144] sm:$0xf] }
  0xe6   : > { %3036 = vmatpush.bf16.msra.mxu3 %v5535_v33 }
  0xe7   : > { %v2624_v56 = vpop.f32.mrf.mxu3  ;;  %10136 = vst [vmem:[#allocation48_spill] sm:$0xff] %v7572_v21 }
  0xe8   : > { %v7542_v38 = vadd.f32 %v2624_v56, %v2571_v18  ;;  %v5034_v18 = vld [vmem:[%s7027_s22 + $0xf0] sm:$0xf]  ;;  %v6413_v56 = vld [vmem:[%s7027_s22 + $0x110] sm:$0xf0] }
  0xe9   : > { %v2464_v16 = vpop.f32.mrf.mxu0  ;;  %v7574_v10 = vor.u32 %v6413_v56, %v5034_v18  ;;  %v5388_v18 = vld [vmem:[%s9948_s1 + $0x150] sm:$0xf0] }
  0xea   : > { %v2519_v15 = vadd.f32 %v2518_v3, %v2464_v16  ;;  %v6409_v16 = vld [vmem:[%s7027_s22 + $0xf4] sm:$0xf]  ;;  %v5036_v3 = vld [vmem:[%s7027_s22 + $0x114] sm:$0xf0]  ;;  %v2572_v45 = vpop.f32.mrf.mxu2  ;;  %v5391_v56 = vor.u32 %v6500_v31, %v5388_v18 }
  0xeb   : > { %10137 = vst [vmem:[#allocation49_spill] sm:$0xff] %v7574_v10  ;;  %v2521_v32 = vpop.f32.mrf.mxu1  ;;  %v7576_v57 = vor.u32 %v6409_v16, %v5036_v3  ;;  %v5062_v16 = vld [vmem:[%s7027_s22 + $0x130] sm:$0xf]  ;;  %v6421_v3 = vld [vmem:[%s7027_s22 + $0x150] sm:$0xf0] }
  0xec   : > { %v2573_v52 = vadd.f32 %v2572_v45, %v2519_v15  ;;  %v5276_v15 = vld [vmem:[%s9948_s1 + $0x70] sm:$0xf0]  ;;  %2983 = vmatpush.bf16.msra.mxu2 %v5391_v56  ;;  %v6282_v56 = vld [vmem:[%s9948_s1 + $0x840] sm:$0xf] }
  0xed   : > { %10138 = vst [vmem:[#allocation50_spill] sm:$0xff] %v7576_v57  ;;  %v5279_v20 = vor.u32 %v6472_v19, %v5276_v15  ;;  %v6417_v45 = vld [vmem:[%s7027_s22 + $0x134] sm:$0xf]  ;;  %v6422_v19 = vld [vmem:[%s7027_s22 + $0x158] sm:$0xf0] }
  0xee   : > { %2731 = vmatmul.bf16.gmra.mxu1 %v7572_v21  ;;  %v6418_v15 = vld [vmem:[%s7027_s22 + $0x13c] sm:$0xf] }
  0xef   : > { %v2626_v43 = vpop.f32.mrf.mxu3  ;;  %2785 = vmatmul.bf16.gmra.mxu2 %v7574_v10  ;;  %2928 = vmatpush.bf16.msra.mxu1 %v5279_v20  ;;  %v5072_v20 = vld [vmem:[%s7027_s22 + $0x15c] sm:$0xf0] }
  0xf0   : > { %v7578_v61 = vadd.f32 %v2626_v43, %v2573_v52  ;;  %v7612_v18 = vor.u32 %v6418_v15, %v5072_v20 }
  0xf1   : > { %v2467_v8 = vpop.f32.mrf.mxu0 }
  0xf2   : > { %v2522_v34 = vadd.f32 %v2521_v32, %v2467_v8  ;;  %v2575_v52 = vpop.f32.mrf.mxu2  ;;  %v5064_v32 = vld [vmem:[%s7027_s22 + $0x154] sm:$0xf0]  ;;  %10142 = vst [vmem:[#allocation54_spill] sm:$0xff] %v7612_v18 }
  0xf3   : > { %v2523_v37 = vpop.f32.mrf.mxu1 }
  0xf4   : > { %2677 = vmatmul.bf16.gmra.mxu0 %v7570_v60  ;;  %2839 = vmatmul.bf16.gmra.mxu3 %v7576_v57  ;;  %v2576_v43 = vadd.f32 %v2575_v52, %v2522_v34  ;;  %v5070_v34 = vld [vmem:[%s7027_s22 + $0x138] sm:$0xf]  ;;  %v7608_v57 = vor.u32 %v6417_v45, %v5064_v32  ;;  %v5516_v45 = vld [vmem:[%s9948_s1 + $0x250] sm:$0xf0]  ;;  %v6468_v32 = vld [vmem:[%s9948_s1 + $0x44] sm:$0xf] }
  0xf5   : > { %v7610_v10 = vor.u32 %v6422_v19, %v5070_v34  ;;  %v5260_v34 = vld [vmem:[%s9948_s1 + $0x50] sm:$0xf0] }
  0xf6   : > { %10140 = vst [vmem:[#allocation52_spill] sm:$0xff] %v7608_v57  ;;  %v5263_v15 = vor.u32 %v6468_v32, %v5260_v34  ;;  %v5100_v32 = vld [vmem:[%s7027_s22 + $0x19c] sm:$0xf0] }
  0xf7   : > { %v2629_v8 = vpop.f32.mrf.mxu3  ;;  %10141 = vst [vmem:[#allocation53_spill] sm:$0xff] %v7610_v10  ;;  %v5106_v34 = vld [vmem:[%s7027_s22 + $0x180] sm:$0xf] }
  0xf8   : > { %v7590_v39 = vadd.f32 %v2629_v8, %v2576_v43  ;;  %v7606_v43 = vor.u32 %v6421_v3, %v5062_v16  ;;  %v6532_v16 = vld [vmem:[%s9948_s1 + $0x244] sm:$0xf]  ;;  %2929 = vmatpush.bf16.msra.mxu1 %v5263_v15 }
  0xf9   : > { %v2469_v35 = vpop.f32.mrf.mxu0  ;;  %v5519_v19 = vor.u32 %v6532_v16, %v5516_v45  ;;  %v6430_v16 = vld [vmem:[%s7027_s22 + $0x198] sm:$0xf0] }
  0xfa   : > { %v2524_v33 = vadd.f32 %v2523_v37, %v2469_v35  ;;  %v2577_v52 = vpop.f32.mrf.mxu2  ;;  %10139 = vst [vmem:[#allocation51_spill] sm:$0xff] %v7606_v43  ;;  %v6426_v45 = vld [vmem:[%s7027_s22 + $0x17c] sm:$0xf] }
  0xfb   : > { %v2526_v31 = vpop.f32.mrf.mxu1  ;;  %3037 = vmatpush.bf16.msra.mxu3 %v5519_v19 }
  0xfc   : > { %v2578_v8 = vadd.f32 %v2577_v52, %v2524_v33  ;;  %v6726_v33 = vld [vmem:[%s9948_s1 + $0x84c] sm:$0xf0] }
  0xfd   : > { %v6283_v3 = vor.u32 %v6726_v33, %v6282_v56  ;;  %v5098_v33 = vld [vmem:[%s7027_s22 + $0x178] sm:$0xf] }
  0xfe   : > { %2736 = vmatmul.bf16.gmra.mxu1 %v7608_v57  ;;  %v7648_v19 = vor.u32 %v6430_v16, %v5098_v33  ;;  %v5500_v33 = vld [vmem:[%s9948_s1 + $0x230] sm:$0xf0] }
  0xff   : > { %v2631_v35 = vpop.f32.mrf.mxu3  ;;  %2790 = vmatmul.bf16.gmra.mxu2 %v7610_v10  ;;  %2875 = vmatpush.bf16.msra.mxu0 %v6283_v3  ;;  %v6427_v10 = vld [vmem:[%s7027_s22 + $0x184] sm:$0xf]  ;;  %v5108_v3 = vld [vmem:[%s7027_s22 + $0x1a4] sm:$0xf0] }
 0x100   : > { %v7614_v21 = vadd.f32 %v2631_v35, %v2578_v8  ;;  %10143 = vst [vmem:[#allocation55_spill] sm:$0xff] %v7648_v19 }
 0x101   : > { %v2472_v37 = vpop.f32.mrf.mxu0 }
 0x102   : > { %v2527_v60 = vadd.f32 %v2526_v31, %v2472_v37  ;;  %v2580_v20 = vpop.f32.mrf.mxu2 }
 0x103   : > { %v2528_v37 = vpop.f32.mrf.mxu1 }
 0x104   : > { %2682 = vmatmul.bf16.gmra.mxu0 %v7606_v43  ;;  %2844 = vmatmul.bf16.gmra.mxu3 %v7612_v18  ;;  %v2581_v52 = vadd.f32 %v2580_v20, %v2527_v60  ;;  %v6431_v18 = vld [vmem:[%s7027_s22 + $0x1a0] sm:$0xf0]  ;;  %v7650_v20 = vor.u32 %v6426_v45, %v5100_v32 }
 0x105   : > { %v7652_v55 = vor.u32 %v6431_v18, %v5106_v34  ;;  %v5244_v34 = vld [vmem:[%s9948_s1 + $0x30] sm:$0xf0] }
 0x106   : > { %10144 = vst [vmem:[#allocation56_spill] sm:$0xff] %v7650_v20 }
 0x107   : > { %v2634_v8 = vpop.f32.mrf.mxu3  ;;  %10145 = vst [vmem:[#allocation57_spill] sm:$0xff] %v7652_v55 }
 0x108   : > { %v7638_v31 = vadd.f32 %v2634_v8, %v2581_v52  ;;  %v7654_v8 = vor.u32 %v6427_v10, %v5108_v3  ;;  %v6722_v10 = vld [vmem:[%s9948_s1 + $0x82c] sm:$0xf0] }
 0x109   : > { %v2474_v35 = vpop.f32.mrf.mxu0 }
 0x10a   : > { %v2529_v56 = vadd.f32 %v2528_v37, %v2474_v35  ;;  %v2582_v57 = vpop.f32.mrf.mxu2  ;;  %10146 = vst [vmem:[#allocation58_spill] sm:$0xff] %v7654_v8 }
 0x10b   : > { %v2531_v52 = vpop.f32.mrf.mxu1 }
 0x10c   : > { %v2583_v15 = vadd.f32 %v2582_v57, %v2529_v56  ;;  %v5372_v57 = vld [vmem:[%s9948_s1 + $0x130] sm:$0xf0]  ;;  %v6266_v56 = vld [vmem:[%s9948_s1 + $0x820] sm:$0xf] }
 0x10d   : > { %v5375_v18 = vor.u32 %v6496_v36, %v5372_v57  ;;  %v6267_v16 = vor.u32 %v6722_v10, %v6266_v56  ;;  %v6464_v36 = vld [vmem:[%s9948_s1 + $0x24] sm:$0xf]  ;;  %v5134_v10 = vld [vmem:[%s7027_s22 + $0x1c0] sm:$0xf] }
 0x10e   : > { %2741 = vmatmul.bf16.gmra.mxu1 %v7650_v20  ;;  %v5144_v20 = vld [vmem:[%s7027_s22 + $0x1ec] sm:$0xf0] }
 0x10f   : > { %v2636_v43 = vpop.f32.mrf.mxu3  ;;  %2795 = vmatmul.bf16.gmra.mxu2 %v7652_v55  ;;  %2876 = vmatpush.bf16.msra.mxu0 %v6267_v16  ;;  %v5136_v16 = vld [vmem:[%s7027_s22 + $0x1e4] sm:$0xf0]  ;;  %v6436_v55 = vld [vmem:[%s7027_s22 + $0x1cc] sm:$0xf] }
 0x110   : > { %v7656_v35 = vadd.f32 %v2636_v43, %v2583_v15  ;;  %v6528_v43 = vld [vmem:[%s9948_s1 + $0x224] sm:$0xf]  ;;  %2984 = vmatpush.bf16.msra.mxu2 %v5375_v18 }
 0x111   : > { %v2477_v60 = vpop.f32.mrf.mxu0  ;;  %v5503_v45 = vor.u32 %v6528_v43, %v5500_v33  ;;  %v6439_v43 = vld [vmem:[%s7027_s22 + $0x1e0] sm:$0xf0] }
 0x112   : > { %v2532_v37 = vadd.f32 %v2531_v52, %v2477_v60  ;;  %v2585_v32 = vpop.f32.mrf.mxu2  ;;  %v5247_v52 = vor.u32 %v6464_v36, %v5244_v34  ;;  %v6435_v33 = vld [vmem:[%s7027_s22 + $0x1c4] sm:$0xf]  ;;  %v7696_v27 = vor.u32 %v6439_v43, %v5134_v10  ;;  %v5484_v10 = vld [vmem:[%s9948_s1 + $0x210] sm:$0xf0] }
 0x113   : > { %3038 = vmatpush.bf16.msra.mxu3 %v5503_v45  ;;  %v2533_v57 = vpop.f32.mrf.mxu1  ;;  %v5142_v45 = vld [vmem:[%s7027_s22 + $0x1c8] sm:$0xf]  ;;  %v7698_v36 = vor.u32 %v6435_v33, %v5136_v16  ;;  %v6460_v43 = vld [vmem:[%s9948_s1 + $0x4] sm:$0xf] }
 0x114   : > { %2687 = vmatmul.bf16.gmra.mxu0 %v7648_v19  ;;  %2849 = vmatmul.bf16.gmra.mxu3 %v7654_v8  ;;  %v2586_v3 = vadd.f32 %v2585_v32, %v2532_v37  ;;  %v6440_v8 = vld [vmem:[%s7027_s22 + $0x1e8] sm:$0xf0]  ;;  %10147 = vst [vmem:[#allocation59_spill] sm:$0xff] %v7696_v27 }
 0x115   : > { %2930 = vmatpush.bf16.msra.mxu1 %v5247_v52  ;;  %10148 = vst [vmem:[#allocation60_spill] sm:$0xff] %v7698_v36  ;;  %v7700_v34 = vor.u32 %v6440_v8, %v5142_v45  ;;  %v5228_v45 = vld [vmem:[%s9948_s1 + $0x10] sm:$0xf0] }
 0x117   : > { %v2639_v15 = vpop.f32.mrf.mxu3  ;;  %10149 = vst [vmem:[#allocation61_spill] sm:$0xff] %v7700_v34 }
 0x118   : > { %v7686_v56 = vadd.f32 %v2639_v15, %v2586_v3  ;;  %v7702_v15 = vor.u32 %v6436_v55, %v5144_v20  ;;  %v6718_v55 = vld [vmem:[%s9948_s1 + $0x80c] sm:$0xf0] }
 0x119   : > { %v2479_v60 = vpop.f32.mrf.mxu0 }
 0x11a   : > { %v2534_v18 = vadd.f32 %v2533_v57, %v2479_v60  ;;  %v2587_v19 = vpop.f32.mrf.mxu2  ;;  %10150 = vst [vmem:[#allocation62_spill] sm:$0xff] %v7702_v15  ;;  %v6492_v57 = vld [vmem:[%s9948_s1 + $0x104] sm:$0xf] }
 0x11b   : > { %v2536_v3 = vpop.f32.mrf.mxu1 }
 0x11c   : > { %v2588_v37 = vadd.f32 %v2587_v19, %v2534_v18  ;;  %v5356_v19 = vld [vmem:[%s9948_s1 + $0x110] sm:$0xf0]  ;;  %v6524_v18 = vld [vmem:[%s9948_s1 + $0x204] sm:$0xf] }
 0x11d   : > { %v5359_v8 = vor.u32 %v6492_v57, %v5356_v19  ;;  %v5487_v16 = vor.u32 %v6524_v18, %v5484_v10  ;;  %v5231_v57 = vor.u32 %v6460_v43, %v5228_v45  ;;  %v6448_v18 = vld [vmem:[%s7027_s22 + $0x228] sm:$0xf0] }
 0x11e   : > { %2746 = vmatmul.bf16.gmra.mxu1 %v7698_v36  ;;  %v6444_v10 = vld [vmem:[%s7027_s22 + $0x20c] sm:$0xf]  ;;  %v6449_v36 = vld [vmem:[%s7027_s22 + $0x230] sm:$0xf0] }
 0x11f   : > { %v2641_v32 = vpop.f32.mrf.mxu3  ;;  %2800 = vmatmul.bf16.gmra.mxu2 %v7700_v34  ;;  %3039 = vmatpush.bf16.msra.mxu3 %v5487_v16  ;;  %v5178_v34 = vld [vmem:[%s7027_s22 + $0x210] sm:$0xf] }
 0x120   : > { %v7704_v60 = vadd.f32 %v2641_v32, %v2588_v37  ;;  %2985 = vmatpush.bf16.msra.mxu2 %v5359_v8  ;;  %2931 = vmatpush.bf16.msra.mxu1 %v5231_v57  ;;  %v7748_v16 = vor.u32 %v6449_v36, %v5178_v34  ;;  %v5724_v34 = vld [vmem:[%s9948_s1 + $0x3f0] sm:$0xf0] }
 0x121   : > { %v2482_v4 = vpop.f32.mrf.mxu0 }
 0x122   : > { %v2537_v52 = vadd.f32 %v2536_v3, %v2482_v4  ;;  %v6250_v4 = vld [vmem:[%s9948_s1 + $0x800] sm:$0xf]  ;;  %v2590_v33 = vpop.f32.mrf.mxu2  ;;  %10153 = vst [vmem:[#allocation65_spill] sm:$0xff] %v7748_v16 }
 0x123   : > { %v6251_v20 = vor.u32 %v6718_v55, %v6250_v4  ;;  %v2538_v19 = vpop.f32.mrf.mxu1  ;;  %v5170_v55 = vld [vmem:[%s7027_s22 + $0x208] sm:$0xf] }
 0x124   : > { %2692 = vmatmul.bf16.gmra.mxu0 %v7696_v27  ;;  %2854 = vmatmul.bf16.gmra.mxu3 %v7702_v15  ;;  %v2591_v37 = vadd.f32 %v2590_v33, %v2537_v52  ;;  %v5172_v15 = vld [vmem:[%s7027_s22 + $0x22c] sm:$0xf0]  ;;  %v6445_v27 = vld [vmem:[%s7027_s22 + $0x214] sm:$0xf]  ;;  %v5180_v52 = vld [vmem:[%s7027_s22 + $0x234] sm:$0xf0]  ;;  %v7744_v63 = vor.u32 %v6448_v18, %v5170_v55 }
 0x125   : > { %2877 = vmatpush.bf16.msra.mxu0 %v6251_v20  ;;  %v7746_v45 = vor.u32 %v6444_v10, %v5172_v15  ;;  %v6648_v15 = vld [vmem:[%s9948_s1 + $0x5e4] sm:$0xf] }
 0x126   : > { %10151 = vst [vmem:[#allocation63_spill] sm:$0xff] %v7744_v63 }
 0x127   : > { %v2644_v32 = vpop.f32.mrf.mxu3  ;;  %10152 = vst [vmem:[#allocation64_spill] sm:$0xff] %v7746_v45 }
 0x128   : > { %v7734_v8 = vadd.f32 %v2644_v32, %v2591_v37  ;;  %v7750_v32 = vor.u32 %v6445_v27, %v5180_v52  ;;  %v5980_v27 = vld [vmem:[%s9948_s1 + $0x5f0] sm:$0xf0] }
 0x129   : > { %v2484_v3 = vpop.f32.mrf.mxu0  ;;  %v5983_v36 = vor.u32 %v6648_v15, %v5980_v27  ;;  %v6616_v27 = vld [vmem:[%s9948_s1 + $0x4e4] sm:$0xf] }
 0x12a   : > { %v2539_v4 = vadd.f32 %v2538_v19, %v2484_v3  ;;  %v2592_v33 = vpop.f32.mrf.mxu2  ;;  %10154 = vst [vmem:[#allocation66_spill] sm:$0xff] %v7750_v32  ;;  %v6680_v19 = vld [vmem:[%s9948_s1 + $0x6e4] sm:$0xf] }
 0x12b   : > { %v2541_v37 = vpop.f32.mrf.mxu1  ;;  %3194 = vmatpush.bf16.msrb.mxu2 %v5983_v36  ;;  %v6453_v36 = vld [vmem:[%s7027_s22 + $0x254] sm:$0xf] }
 0x12c   : > { %v2593_v59 = vadd.f32 %v2592_v33, %v2539_v4  ;;  %v6108_v4 = vld [vmem:[%s9948_s1 + $0x6f0] sm:$0xf0] }
 0x12d   : > { %v6111_v10 = vor.u32 %v6680_v19, %v6108_v4  ;;  %v6457_v19 = vld [vmem:[%s7027_s22 + $0x270] sm:$0xf0]  ;;  %v5208_v4 = vld [vmem:[%s7027_s22 + $0x274] sm:$0xf0] }
 0x12e   : > { %2751 = vmatmul.bf16.gmra.mxu1 %v7746_v45  ;;  %v7794_v45 = vor.u32 %v6453_v36, %v5208_v4 }
 0x12f   : > { %v2646_v20 = vpop.f32.mrf.mxu3  ;;  %2805 = vmatmul.bf16.gmra.mxu2 %v7748_v16  ;;  %3248 = vmatpush.bf16.msrb.mxu3 %v6111_v10  ;;  %v5216_v10 = vld [vmem:[%s7027_s22 + $0x27c] sm:$0xf0] }
 0x130   : > { %v7752_v3 = vadd.f32 %v2646_v20, %v2593_v59  ;;  %v6584_v59 = vld [vmem:[%s9948_s1 + $0x3e4] sm:$0xf]  ;;  %10156 = vst [vmem:[#allocation68_spill] sm:$0xff] %v7794_v45 }
 0x131   : > { %v2487_v43 = vpop.f32.mrf.mxu0  ;;  %v5727_v18 = vor.u32 %v6584_v59, %v5724_v34  ;;  %v5206_v34 = vld [vmem:[%s7027_s22 + $0x250] sm:$0xf] }
 0x132   : > { %v2542_v57 = vadd.f32 %v2541_v37, %v2487_v43  ;;  %v2595_v55 = vpop.f32.mrf.mxu2 }
 0x133   : > { %v2543_v43 = vpop.f32.mrf.mxu1  ;;  %3086 = vmatpush.bf16.msrb.mxu0 %v5727_v18  ;;  %v6454_v18 = vld [vmem:[%s7027_s22 + $0x25c] sm:$0xf] }
 0x134   : > { %2697 = vmatmul.bf16.gmra.mxu0 %v7744_v63  ;;  %2859 = vmatmul.bf16.gmra.mxu3 %v7750_v32  ;;  %v2596_v52 = vadd.f32 %v2595_v55, %v2542_v57  ;;  %v5852_v57 = vld [vmem:[%s9948_s1 + $0x4f0] sm:$0xf0]  ;;  %v5214_v55 = vld [vmem:[%s7027_s22 + $0x258] sm:$0xf]  ;;  %v6458_v32 = vld [vmem:[%s7027_s22 + $0x278] sm:$0xf0]  ;;  %v7799_v58 = vor.u32 %v6454_v18, %v5216_v10 }
 0x135   : > { %v5855_v59 = vor.u32 %v6616_v27, %v5852_v57  ;;  %v7796_v63 = vor.u32 %v6458_v32, %v5214_v55  ;;  %v6644_v32 = vld [vmem:[%s9948_s1 + $0x5c4] sm:$0xf] }
 0x136   : > { %10158 = vst [vmem:[#allocation70_spill] sm:$0xff] %v7799_v58  ;;  %v6580_v10 = vld [vmem:[%s9948_s1 + $0x3c4] sm:$0xf] }
 0x137   : > { %v2649_v33 = vpop.f32.mrf.mxu3  ;;  %3140 = vmatpush.bf16.msrb.mxu1 %v5855_v59  ;;  %10157 = vst [vmem:[#allocation69_spill] sm:$0xff] %v7796_v63 }
 0x138   : > { %v7776_v37 = vadd.f32 %v2649_v33, %v2596_v52  ;;  %v7792_v33 = vor.u32 %v6457_v19, %v5206_v34 }
 0x139   : > { %v2489_v20 = vpop.f32.mrf.mxu0 }
 0x13a   : > { %v2544_v15 = vadd.f32 %v2543_v43, %v2489_v20  ;;  %v2597_v52 = vpop.f32.mrf.mxu2  ;;  %10155 = vst [vmem:[#allocation67_spill] sm:$0xff] %v7792_v33 }
 0x13b   : > { %v2717_v57 = vpop.f32.mrf.mxu1 }
 0x13c   : > { %v2598_v20 = vadd.f32 %v2597_v52, %v2544_v15  ;;  %v5708_v52 = vld [vmem:[%s9948_s1 + $0x3d0] sm:$0xf0] }
 0x13e   : > { %2756 = vmatmul.bf16.gmra.mxu1 %v7794_v45 }
 0x13f   : > { %v2651_v43 = vpop.f32.mrf.mxu3  ;;  %2810 = vmatmul.bf16.gmra.mxu2 %v7796_v63 }
 0x140   : > { %v7801_v47 = vadd.f32 %v2651_v43, %v2598_v20  ;;  %v6676_v20 = vld [vmem:[%s9948_s1 + $0x6c4] sm:$0xf] }
 0x141   : > { %v2663_v16 = vpop.f32.mrf.mxu0 }
 0x142   : > { %v2664_v27 = vadd.f32 %v2663_v16, %v7404_v11  ;;  %v5964_v11 = vld [vmem:[%s9948_s1 + $0x5d0] sm:$0xf0]  ;;  %v2771_v15 = vpop.f32.mrf.mxu2 }
 0x143   : > { %v5967_v16 = vor.u32 %v6644_v32, %v5964_v11  ;;  %v2719_v55 = vpop.f32.mrf.mxu1  ;;  %v4934_v32 = vld [vmem:[%s7027_s22 + $0x20] sm:$0xf]  ;;  %v6387_v11 = vld [vmem:[%s7027_s22 + $0x40] sm:$0xf0] }
 0x144   : > { %v2718_v59 = vadd.f32 %v2717_v57, %v2664_v27  ;;  %2702 = vmatmul.bf16.gmra.mxu0 %v7792_v33  ;;  %2864 = vmatmul.bf16.gmra.mxu3 %v7799_v58  ;;  %v5711_v27 = vor.u32 %v6580_v10, %v5708_v52  ;;  %v6612_v57 = vld [vmem:[%s9948_s1 + $0x4c4] sm:$0xf] }
 0x145   : > { %3195 = vmatpush.bf16.msrb.mxu2 %v5967_v16 }
 0x146   : > { %v2772_v34 = vadd.f32 %v2771_v15, %v2718_v59  ;;  %v5836_v59 = vld [vmem:[%s9948_s1 + $0x4d0] sm:$0xf0]  ;;  %3087 = vmatpush.bf16.msrb.mxu0 %v5711_v27 }
 0x147   : > { %v2825_v19 = vpop.f32.mrf.mxu3  ;;  %v5839_v15 = vor.u32 %v6612_v57, %v5836_v59 }
 0x148   : > { %v7814_v18 = vadd.f32 %v2825_v19, %v2772_v34  ;;  %v7836_v19 = vor.u32 %v6387_v11, %v4934_v32  ;;  %v4970_v32 = vld [vmem:[%s7027_s22 + $0x68] sm:$0xf]  ;;  %v6396_v11 = vld [vmem:[%s7027_s22 + $0x88] sm:$0xf0] }
 0x149   : > { %v2665_v36 = vpop.f32.mrf.mxu0  ;;  %3141 = vmatpush.bf16.msrb.mxu1 %v5839_v15  ;;  %v5948_v15 = vld [vmem:[%s9948_s1 + $0x5b0] sm:$0xf0] }
 0x14a   : > { %v2666_v4 = vadd.f32 %v2665_v36, %v7440_v17  ;;  %v6092_v17 = vld [vmem:[%s9948_s1 + $0x6d0] sm:$0xf0]  ;;  %v2773_v34 = vpop.f32.mrf.mxu2  ;;  %10159 = vst [vmem:[#allocation71_spill] sm:$0xff] %v7836_v19 }
 0x14b   : > { %v6095_v16 = vor.u32 %v6676_v20, %v6092_v17  ;;  %v2722_v52 = vpop.f32.mrf.mxu1 }
 0x14c   : > { %v2720_v43 = vadd.f32 %v2719_v55, %v2666_v4 }
 0x14d   : > { %3249 = vmatpush.bf16.msrb.mxu3 %v6095_v16  ;;  %v6640_v16 = vld [vmem:[%s9948_s1 + $0x5a4] sm:$0xf] }
 0x14e   : > { %v2774_v36 = vadd.f32 %v2773_v34, %v2720_v43  ;;  %2932 = vmatmul.bf16.vlgmr.msra.gmra.mxu1 %v7041_v49 }
 0x14f   : > { %v2827_v4 = vpop.f32.mrf.mxu3  ;;  %2986 = vmatmul.bf16.vlgmr.msra.gmra.mxu2 %v7046_v53 }
 0x150   : > { %v7839_v58 = vadd.f32 %v2827_v4, %v2774_v36  ;;  %v5951_v36 = vor.u32 %v6640_v16, %v5948_v15  ;;  %v6672_v4 = vld [vmem:[%s9948_s1 + $0x6a4] sm:$0xf] }
 0x151   : > { %v2668_v55 = vpop.f32.mrf.mxu0 }
 0x152   : > { %v2669_v10 = vadd.f32 %v2668_v55, %v7446_v23  ;;  %v2776_v20 = vpop.f32.mrf.mxu2  ;;  %3196 = vmatpush.bf16.msrb.mxu2 %v5951_v36 }
 0x153   : > { %v2724_v23 = vpop.f32.mrf.mxu1 }
 0x154   : > { %v2723_v63 = vadd.f32 %v2722_v52, %v2669_v10  ;;  %2878 = vmatmul.bf16.vlgmr.msra.gmra.mxu0 %v7836_v19  ;;  %3040 = vmatmul.bf16.vlgmr.msra.gmra.mxu3 %v7048_v54  ;;  %v6076_v10 = vld [vmem:[%s9948_s1 + $0x6b0] sm:$0xf0]  ;;  %v6608_v52 = vld [vmem:[%s9948_s1 + $0x4a4] sm:$0xf] }
 0x156   : > { %v2777_v43 = vadd.f32 %v2776_v20, %v2723_v63  ;;  %v6576_v63 = vld [vmem:[%s9948_s1 + $0x3a4] sm:$0xf]  ;;  %v5820_v20 = vld [vmem:[%s9948_s1 + $0x4b0] sm:$0xf0] }
 0x157   : > { %v2830_v27 = vpop.f32.mrf.mxu3 }
 0x158   : > { %v7846_v59 = vadd.f32 %v2830_v27, %v2777_v43  ;;  %v6079_v43 = vor.u32 %v6672_v4, %v6076_v10  ;;  %v5823_v27 = vor.u32 %v6608_v52, %v5820_v20  ;;  %v5006_v10 = vld [vmem:[%s7027_s22 + $0xb0] sm:$0xf]  ;;  %v6405_v52 = vld [vmem:[%s7027_s22 + $0xd0] sm:$0xf0] }
 0x159   : > { %v2670_v17 = vpop.f32.mrf.mxu0 }
 0x15a   : > { %v2671_v57 = vadd.f32 %v2670_v17, %v7488_v62  ;;  %v5692_v62 = vld [vmem:[%s9948_s1 + $0x3b0] sm:$0xf0]  ;;  %v2778_v17 = vpop.f32.mrf.mxu2  ;;  %3250 = vmatpush.bf16.msrb.mxu3 %v6079_v43  ;;  %3142 = vmatpush.bf16.msrb.mxu1 %v5823_v27  ;;  %v6636_v43 = vld [vmem:[%s9948_s1 + $0x584] sm:$0xf] }
 0x15b   : > { %v5695_v55 = vor.u32 %v6576_v63, %v5692_v62  ;;  %v2727_v62 = vpop.f32.mrf.mxu1  ;;  %v5932_v27 = vld [vmem:[%s9948_s1 + $0x590] sm:$0xf0] }
 0x15c   : > { %v2725_v34 = vadd.f32 %v2724_v23, %v2671_v57  ;;  %v7874_v57 = vor.u32 %v6396_v11, %v4970_v32 }
 0x15d   : > { %3088 = vmatpush.bf16.msrb.mxu0 %v5695_v55 }
 0x15e   : > { %v2779_v23 = vadd.f32 %v2778_v17, %v2725_v34  ;;  %2937 = vmatmul.bf16.gmra.mxu1 %v7102_v24  ;;  %v5935_v17 = vor.u32 %v6636_v43, %v5932_v27 }
 0x15f   : > { %v2832_v16 = vpop.f32.mrf.mxu3  ;;  %2991 = vmatmul.bf16.gmra.mxu2 %v7104_v25 }
 0x160   : > { %v7877_v54 = vadd.f32 %v2832_v16, %v2779_v23  ;;  %v6668_v23 = vld [vmem:[%s9948_s1 + $0x684] sm:$0xf]  ;;  %v6060_v16 = vld [vmem:[%s9948_s1 + $0x690] sm:$0xf0]  ;;  %3197 = vmatpush.bf16.msrb.mxu2 %v5935_v17 }
 0x161   : > { %v2673_v15 = vpop.f32.mrf.mxu0 }
 0x162   : > { %v2674_v63 = vadd.f32 %v2673_v15, %v7494_v9  ;;  %v2781_v32 = vpop.f32.mrf.mxu2 }
 0x163   : > { %v2729_v9 = vpop.f32.mrf.mxu1 }
 0x164   : > { %v2728_v53 = vadd.f32 %v2727_v62, %v2674_v63  ;;  %2883 = vmatmul.bf16.gmra.mxu0 %v7874_v57  ;;  %3045 = vmatmul.bf16.gmra.mxu3 %v7106_v26  ;;  %v6063_v63 = vor.u32 %v6668_v23, %v6060_v16  ;;  %v6604_v62 = vld [vmem:[%s9948_s1 + $0x484] sm:$0xf] }
 0x166   : > { %v2782_v11 = vadd.f32 %v2781_v32, %v2728_v53  ;;  %v6572_v53 = vld [vmem:[%s9948_s1 + $0x384] sm:$0xf]  ;;  %v5804_v32 = vld [vmem:[%s9948_s1 + $0x490] sm:$0xf0]  ;;  %3251 = vmatpush.bf16.msrb.mxu3 %v6063_v63  ;;  %v5042_v63 = vld [vmem:[%s7027_s22 + $0xf8] sm:$0xf] }
 0x167   : > { %v2835_v34 = vpop.f32.mrf.mxu3 }
 0x168   : > { %v7884_v55 = vadd.f32 %v2835_v34, %v2782_v11  ;;  %v5807_v11 = vor.u32 %v6604_v62, %v5804_v32  ;;  %v6414_v62 = vld [vmem:[%s7027_s22 + $0x118] sm:$0xf0] }
 0x169   : > { %v2675_v36 = vpop.f32.mrf.mxu0 }
 0x16a   : > { %v2676_v4 = vadd.f32 %v2675_v36, %v7536_v22  ;;  %v5676_v22 = vld [vmem:[%s9948_s1 + $0x390] sm:$0xf0]  ;;  %v2783_v34 = vpop.f32.mrf.mxu2  ;;  %v7912_v36 = vor.u32 %v6405_v52, %v5006_v10  ;;  %3143 = vmatpush.bf16.msrb.mxu1 %v5807_v11  ;;  %v6632_v11 = vld [vmem:[%s9948_s1 + $0x564] sm:$0xf] }
 0x16b   : > { %v5679_v15 = vor.u32 %v6572_v53, %v5676_v22  ;;  %v2732_v53 = vpop.f32.mrf.mxu1 }
 0x16c   : > { %v2730_v20 = vadd.f32 %v2729_v9, %v2676_v4 }
 0x16d   : > { %3089 = vmatpush.bf16.msrb.mxu0 %v5679_v15 }
 0x16e   : > { %v2784_v4 = vadd.f32 %v2783_v34, %v2730_v20  ;;  %2942 = vmatmul.bf16.gmra.mxu1 %v7146_v48  ;;  %v5916_v34 = vld [vmem:[%s9948_s1 + $0x570] sm:$0xf0] }
 0x16f   : > { %v2837_v9 = vpop.f32.mrf.mxu3  ;;  %2996 = vmatmul.bf16.gmra.mxu2 %v7148_v50 }
 0x170   : > { %v7915_v22 = vadd.f32 %v2837_v9, %v2784_v4  ;;  %v6568_v4 = vld [vmem:[%s9948_s1 + $0x364] sm:$0xf]  ;;  %v5919_v9 = vor.u32 %v6632_v11, %v5916_v34 }
 0x171   : > { %v2678_v43 = vpop.f32.mrf.mxu0 }
 0x172   : > { %v2679_v27 = vadd.f32 %v2678_v43, %v7542_v38  ;;  %v2786_v10 = vpop.f32.mrf.mxu2  ;;  %v6664_v43 = vld [vmem:[%s9948_s1 + $0x664] sm:$0xf]  ;;  %3198 = vmatpush.bf16.msrb.mxu2 %v5919_v9 }
 0x173   : > { %v2734_v38 = vpop.f32.mrf.mxu1 }
 0x174   : > { %v2733_v23 = vadd.f32 %v2732_v53, %v2679_v27  ;;  %2888 = vmatmul.bf16.gmra.mxu0 %v7912_v36  ;;  %3050 = vmatmul.bf16.gmra.mxu3 %v7150_v51  ;;  %v6044_v27 = vld [vmem:[%s9948_s1 + $0x670] sm:$0xf0]  ;;  %v6600_v51 = vld [vmem:[%s9948_s1 + $0x464] sm:$0xf] }
 0x176   : > { %v2787_v52 = vadd.f32 %v2786_v10, %v2733_v23  ;;  %v6047_v23 = vor.u32 %v6664_v43, %v6044_v27 }
 0x177   : > { %v2840_v20 = vpop.f32.mrf.mxu3 }
 0x178   : > { %v7922_v15 = vadd.f32 %v2840_v20, %v2787_v52  ;;  %v7944_v52 = vor.u32 %v6414_v62, %v5042_v63  ;;  %3252 = vmatpush.bf16.msrb.mxu3 %v6047_v23 }
 0x179   : > { %v2680_v17 = vpop.f32.mrf.mxu0 }
 0x17a   : > { %v2681_v16 = vadd.f32 %v2680_v17, %v7578_v61  ;;  %v5660_v61 = vld [vmem:[%s9948_s1 + $0x370] sm:$0xf0]  ;;  %v2788_v10 = vpop.f32.mrf.mxu2 }
 0x17b   : > { %v5663_v53 = vor.u32 %v6568_v4, %v5660_v61  ;;  %v2737_v11 = vpop.f32.mrf.mxu1  ;;  %v5788_v4 = vld [vmem:[%s9948_s1 + $0x470] sm:$0xf0] }
 0x17c   : > { %v2735_v32 = vadd.f32 %v2734_v38, %v2681_v16  ;;  %v5791_v62 = vor.u32 %v6600_v51, %v5788_v4  ;;  %v6628_v51 = vld [vmem:[%s9948_s1 + $0x544] sm:$0xf] }
 0x17d   : > { %3090 = vmatpush.bf16.msrb.mxu0 %v5663_v53 }
 0x17e   : > { %v2789_v20 = vadd.f32 %v2788_v10, %v2735_v32  ;;  %2947 = vmatmul.bf16.gmra.mxu1 %v7190_v12  ;;  %v5900_v10 = vld [vmem:[%s9948_s1 + $0x550] sm:$0xf0] }
 0x17f   : > { %v2842_v17 = vpop.f32.mrf.mxu3  ;;  %3001 = vmatmul.bf16.gmra.mxu2 %v7192_v13  ;;  %3144 = vmatpush.bf16.msrb.mxu1 %v5791_v62 }
 0x180   : > { %v7947_v34 = vadd.f32 %v2842_v17, %v2789_v20  ;;  %v5078_v20 = vld [vmem:[%s7027_s22 + $0x140] sm:$0xf]  ;;  %v6423_v17 = vld [vmem:[%s7027_s22 + $0x160] sm:$0xf0] }
 0x181   : > { %v2683_v16 = vpop.f32.mrf.mxu0 }
 0x182   : > { %v2684_v38 = vadd.f32 %v2683_v16, %v7590_v39  ;;  %v2791_v39 = vpop.f32.mrf.mxu2  ;;  %v5903_v16 = vor.u32 %v6628_v51, %v5900_v10  ;;  %v6596_v51 = vld [vmem:[%s9948_s1 + $0x444] sm:$0xf]  ;;  %v5772_v10 = vld [vmem:[%s9948_s1 + $0x450] sm:$0xf0] }
 0x183   : > { %v2739_v27 = vpop.f32.mrf.mxu1 }
 0x184   : > { %v2738_v63 = vadd.f32 %v2737_v11, %v2684_v38  ;;  %2893 = vmatmul.bf16.gmra.mxu0 %v7944_v52  ;;  %3055 = vmatmul.bf16.gmra.mxu3 %v7194_v14  ;;  %v7970_v11 = vor.u32 %v6423_v17, %v5078_v20  ;;  %v5775_v17 = vor.u32 %v6596_v51, %v5772_v10  ;;  %v6432_v14 = vld [vmem:[%s7027_s22 + $0x1a8] sm:$0xf0] }
 0x185   : > { %3199 = vmatpush.bf16.msrb.mxu2 %v5903_v16 }
 0x186   : > { %v2792_v32 = vadd.f32 %v2791_v39, %v2738_v63  ;;  %10160 = vst [vmem:[#allocation72_spill] sm:$0xff] %v7970_v11  ;;  %3145 = vmatpush.bf16.msrb.mxu1 %v5775_v17  ;;  %v5884_v17 = vld [vmem:[%s9948_s1 + $0x530] sm:$0xf0] }
 0x187   : > { %v2845_v9 = vpop.f32.mrf.mxu3 }
 0x188   : > { %v7960_v53 = vadd.f32 %v2845_v9, %v2792_v32  ;;  %v6564_v9 = vld [vmem:[%s9948_s1 + $0x344] sm:$0xf] }
 0x189   : > { %v2685_v61 = vpop.f32.mrf.mxu0 }
 0x18a   : > { %v2686_v43 = vadd.f32 %v2685_v61, %v7614_v21  ;;  %v2793_v38 = vpop.f32.mrf.mxu2  ;;  %v5644_v61 = vld [vmem:[%s9948_s1 + $0x350] sm:$0xf0] }
 0x18b   : > { %v2742_v39 = vpop.f32.mrf.mxu1 }
 0x18c   : > { %v2740_v23 = vadd.f32 %v2739_v27, %v2686_v43  ;;  %v6660_v43 = vld [vmem:[%s9948_s1 + $0x644] sm:$0xf] }
 0x18e   : > { %v2794_v21 = vadd.f32 %v2793_v38, %v2740_v23  ;;  %v5647_v23 = vor.u32 %v6564_v9, %v5644_v61  ;;  %2952 = vmatmul.bf16.gmra.mxu1 %v7234_v40  ;;  %v5114_v61 = vld [vmem:[%s7027_s22 + $0x188] sm:$0xf] }
 0x18f   : > { %v2847_v4 = vpop.f32.mrf.mxu3  ;;  %3006 = vmatmul.bf16.gmra.mxu2 %v7236_v41 }
 0x190   : > { %v7973_v32 = vadd.f32 %v2847_v4, %v2794_v21  ;;  %3091 = vmatpush.bf16.msrb.mxu0 %v5647_v23 }
 0x191   : > { %v2688_v63 = vpop.f32.mrf.mxu0 }
 0x192   : > { %v2689_v62 = vadd.f32 %v2688_v63, %v7638_v31  ;;  %v6028_v31 = vld [vmem:[%s9948_s1 + $0x650] sm:$0xf0]  ;;  %v2796_v16 = vpop.f32.mrf.mxu2 }
 0x193   : > { %v6031_v20 = vor.u32 %v6660_v43, %v6028_v31  ;;  %v8002_v43 = vor.u32 %v6432_v14, %v5114_v61 }
 0x194   : > { %v2743_v27 = vadd.f32 %v2742_v39, %v2689_v62  ;;  %2898 = vmatmul.bf16.gmra.mxu0 %v7970_v11  ;;  %3060 = vmatmul.bf16.gmra.mxu3 %v7238_v42  ;;  %v2744_v62 = vpop.f32.mrf.mxu1 }
 0x195   : > { %3253 = vmatpush.bf16.msrb.mxu3 %v6031_v20  ;;  %10161 = vst [vmem:[#allocation73_spill] sm:$0xff] %v8002_v43 }
 0x196   : > { %v2797_v38 = vadd.f32 %v2796_v16, %v2743_v27 }
 0x197   : > { %v2850_v21 = vpop.f32.mrf.mxu3 }
 0x198   : > { %v7998_v39 = vadd.f32 %v2850_v21, %v2797_v38  ;;  %v6656_v38 = vld [vmem:[%s9948_s1 + $0x624] sm:$0xf] }
 0x199   : > { %v2690_v4 = vpop.f32.mrf.mxu0 }
 0x19a   : > { %v2691_v63 = vadd.f32 %v2690_v4, %v7656_v35  ;;  %v2798_v26 = vpop.f32.mrf.mxu2  ;;  %v6624_v35 = vld [vmem:[%s9948_s1 + $0x524] sm:$0xf]  ;;  %v6012_v4 = vld [vmem:[%s9948_s1 + $0x630] sm:$0xf0] }
 0x19b   : > { %v5887_v14 = vor.u32 %v6624_v35, %v5884_v17 }
 0x19c   : > { %v2745_v9 = vadd.f32 %v2744_v62, %v2691_v63  ;;  %v2747_v20 = vpop.f32.mrf.mxu1  ;;  %v6015_v63 = vor.u32 %v6656_v38, %v6012_v4  ;;  %v6592_v62 = vld [vmem:[%s9948_s1 + $0x424] sm:$0xf] }
 0x19d   : > { %3200 = vmatpush.bf16.msrb.mxu2 %v5887_v14 }
 0x19e   : > { %v2799_v31 = vadd.f32 %v2798_v26, %v2745_v9  ;;  %v6560_v26 = vld [vmem:[%s9948_s1 + $0x324] sm:$0xf]  ;;  %2957 = vmatmul.bf16.gmra.mxu1 %v7272_v5  ;;  %v5756_v9 = vld [vmem:[%s9948_s1 + $0x430] sm:$0xf0]  ;;  %3254 = vmatpush.bf16.msrb.mxu3 %v6015_v63 }
 0x19f   : > { %v2852_v51 = vpop.f32.mrf.mxu3  ;;  %3011 = vmatmul.bf16.gmra.mxu2 %v7274_v6  ;;  %v5759_v61 = vor.u32 %v6592_v62, %v5756_v9 }
 0x1a0   : > { %v8005_v27 = vadd.f32 %v2852_v51, %v2799_v31 }
 0x1a1   : > { %v2693_v23 = vpop.f32.mrf.mxu0  ;;  %3146 = vmatpush.bf16.msrb.mxu1 %v5759_v61 }
 0x1a2   : > { %v2694_v10 = vadd.f32 %v2693_v23, %v7686_v56  ;;  %v5628_v56 = vld [vmem:[%s9948_s1 + $0x330] sm:$0xf0]  ;;  %v2801_v31 = vpop.f32.mrf.mxu2 }
 0x1a3   : > { %v5631_v21 = vor.u32 %v6560_v26, %v5628_v56  ;;  %v5150_v26 = vld [vmem:[%s7027_s22 + $0x1d0] sm:$0xf]  ;;  %v6441_v56 = vld [vmem:[%s7027_s22 + $0x1f0] sm:$0xf0] }
 0x1a4   : > { %v2748_v16 = vadd.f32 %v2747_v20, %v2694_v10  ;;  %2903 = vmatmul.bf16.gmra.mxu0 %v8002_v43  ;;  %3065 = vmatmul.bf16.gmra.mxu3 %v7276_v7  ;;  %v2749_v35 = vpop.f32.mrf.mxu1  ;;  %v8040_v4 = vor.u32 %v6441_v56, %v5150_v26  ;;  %v6652_v56 = vld [vmem:[%s9948_s1 + $0x604] sm:$0xf] }
 0x1a5   : > { %3092 = vmatpush.bf16.msrb.mxu0 %v5631_v21 }
 0x1a6   : > { %v2802_v51 = vadd.f32 %v2801_v31, %v2748_v16  ;;  %10162 = vst [vmem:[#allocation74_spill] sm:$0xff] %v8040_v4 }
 0x1a7   : > { %v2855_v23 = vpop.f32.mrf.mxu3 }
 0x1a8   : > { %v8036_v17 = vadd.f32 %v2855_v23, %v2802_v51 }
 0x1a9   : > { %v2695_v10 = vpop.f32.mrf.mxu0 }
 0x1aa   : > { %v2696_v20 = vadd.f32 %v2695_v10, %v7704_v60  ;;  %v2803_v38 = vpop.f32.mrf.mxu2 }
 0x1ac   : > { %v2750_v14 = vadd.f32 %v2749_v35, %v2696_v20  ;;  %v2752_v16 = vpop.f32.mrf.mxu1  ;;  %v5868_v20 = vld [vmem:[%s9948_s1 + $0x510] sm:$0xf0]  ;;  %v6556_v35 = vld [vmem:[%s9948_s1 + $0x304] sm:$0xf] }
 0x1ae   : > { %v2804_v7 = vadd.f32 %v2803_v38, %v2750_v14  ;;  %2962 = vmatmul.bf16.gmra.mxu1 %v7298_v28  ;;  %v5996_v38 = vld [vmem:[%s9948_s1 + $0x610] sm:$0xf0] }
 0x1af   : > { %v2857_v21 = vpop.f32.mrf.mxu3  ;;  %3016 = vmatmul.bf16.gmra.mxu2 %v7300_v29 }
 0x1b0   : > { %v8043_v9 = vadd.f32 %v2857_v21, %v2804_v7  ;;  %v6620_v7 = vld [vmem:[%s9948_s1 + $0x504] sm:$0xf] }
 0x1b1   : > { %v2698_v62 = vpop.f32.mrf.mxu0  ;;  %v5871_v26 = vor.u32 %v6620_v7, %v5868_v20 }
 0x1b2   : > { %v2699_v63 = vadd.f32 %v2698_v62, %v7734_v8  ;;  %v2806_v60 = vpop.f32.mrf.mxu2 }
 0x1b3   : > { %3201 = vmatpush.bf16.msrb.mxu2 %v5871_v26 }
 0x1b4   : > { %v2753_v61 = vadd.f32 %v2752_v16, %v2699_v63  ;;  %2908 = vmatmul.bf16.gmra.mxu0 %v8040_v4  ;;  %3070 = vmatmul.bf16.gmra.mxu3 %v7302_v30  ;;  %v2754_v8 = vpop.f32.mrf.mxu1  ;;  %v5999_v63 = vor.u32 %v6652_v56, %v5996_v38  ;;  %v6588_v16 = vld [vmem:[%s9948_s1 + $0x404] sm:$0xf] }
 0x1b6   : > { %v2807_v31 = vadd.f32 %v2806_v60, %v2753_v61  ;;  %v5740_v61 = vld [vmem:[%s9948_s1 + $0x410] sm:$0xf0]  ;;  %v5186_v60 = vld [vmem:[%s7027_s22 + $0x218] sm:$0xf]  ;;  %3255 = vmatpush.bf16.msrb.mxu3 %v5999_v63 }
 0x1b7   : > { %v2860_v51 = vpop.f32.mrf.mxu3 }
 0x1b8   : > { %v8059_v14 = vadd.f32 %v2860_v51, %v2807_v31  ;;  %v6450_v31 = vld [vmem:[%s7027_s22 + $0x238] sm:$0xf0]  ;;  %v5743_v51 = vor.u32 %v6588_v16, %v5740_v61  ;;  %v5346_v61 = vld [vmem:[%s9948_s1 + $0xe8] sm:$0xf] }
 0x1b9   : > { %v2700_v23 = vpop.f32.mrf.mxu0  ;;  %v8078_v7 = vor.u32 %v6450_v31, %v5186_v60  ;;  %v6491_v60 = vld [vmem:[%s9948_s1 + $0xf4] sm:$0xf0]  ;;  %v6712_v31 = vld [vmem:[%s9948_s1 + $0x7e4] sm:$0xf] }
 0x1ba   : > { %v2701_v10 = vadd.f32 %v2700_v23, %v7752_v3  ;;  %v5612_v3 = vld [vmem:[%s9948_s1 + $0x310] sm:$0xf0]  ;;  %3147 = vmatpush.bf16.msrb.mxu1 %v5743_v51  ;;  %v2808_v23 = vpop.f32.mrf.mxu2 }
 0x1bb   : > { %v5615_v62 = vor.u32 %v6556_v35, %v5612_v3  ;;  %10163 = vst [vmem:[#allocation75_spill] sm:$0xff] %v8078_v7 }
 0x1bc   : > { %v2755_v21 = vadd.f32 %v2754_v8, %v2701_v10  ;;  %v2757_v3 = vpop.f32.mrf.mxu1 }
 0x1bd   : > { %3093 = vmatpush.bf16.msrb.mxu0 %v5615_v62 }
 0x1be   : > { %v2809_v10 = vadd.f32 %v2808_v23, %v2755_v21  ;;  %2967 = vmatmul.bf16.gmra.mxu1 %v7342_v0  ;;  %v5347_v23 = vor.u32 %v6491_v60, %v5346_v61 }
 0x1bf   : > { %v2862_v8 = vpop.f32.mrf.mxu3  ;;  %3021 = vmatmul.bf16.gmra.mxu2 %v7344_v1 }
 0x1c0   : > { %v8081_v56 = vadd.f32 %v2862_v8, %v2809_v10  ;;  %v5474_v10 = vld [vmem:[%s9948_s1 + $0x1e8] sm:$0xf]  ;;  %v6523_v8 = vld [vmem:[%s9948_s1 + $0x1f4] sm:$0xf0]  ;;  %3410 = vmatpush.bf16.msra.mxu2 %v5347_v23 }
 0x1c1   : > { %v2703_v20 = vpop.f32.mrf.mxu0  ;;  %v10165_v23 = vld [vmem:[#allocation33_spill] sm:$0xff] }
 0x1c2   : > { %v2704_v35 = vadd.f32 %v2703_v20, %v7776_v37  ;;  %v2811_v26 = vpop.f32.mrf.mxu2 }
 0x1c4   : > { %v2758_v38 = vadd.f32 %v2757_v3, %v2704_v35  ;;  %2913 = vmatmul.bf16.gmra.mxu0 %v8078_v7  ;;  %3075 = vmatmul.bf16.gmra.mxu3 %v7346_v2  ;;  %v2759_v37 = vpop.f32.mrf.mxu1  ;;  %v5475_v3 = vor.u32 %v6523_v8, %v5474_v10 }
 0x1c6   : > { %v2812_v62 = vadd.f32 %v2811_v26, %v2758_v38  ;;  %v6744_v38 = vld [vmem:[%s9948_s1 + $0x8e4] sm:$0xf]  ;;  %v6364_v26 = vld [vmem:[%s9948_s1 + $0x8f0] sm:$0xf0]  ;;  %3464 = vmatpush.bf16.msra.mxu3 %v5475_v3 }
 0x1c7   : > { %v2865_v63 = vpop.f32.mrf.mxu3 }
 0x1c8   : > { %v8097_v51 = vadd.f32 %v2865_v63, %v2812_v62  ;;  %v5222_v62 = vld [vmem:[%s7027_s22 + $0x260] sm:$0xf]  ;;  %v6459_v63 = vld [vmem:[%s7027_s22 + $0x280] sm:$0xf0] }
 0x1c9   : > { %v2705_v21 = vpop.f32.mrf.mxu0  ;;  %v8116_v60 = vor.u32 %v6459_v63, %v5222_v62  ;;  %v5330_v62 = vld [vmem:[%s9948_s1 + $0xc8] sm:$0xf]  ;;  %v6487_v63 = vld [vmem:[%s9948_s1 + $0xd4] sm:$0xf0] }
 0x1ca   : > { %v2706_v16 = vadd.f32 %v2705_v21, %v7801_v47  ;;  %v6236_v47 = vld [vmem:[%s9948_s1 + $0x7f0] sm:$0xf0]  ;;  %v6367_v21 = vor.u32 %v6744_v38, %v6364_v26  ;;  %v2813_v61 = vpop.f32.mrf.mxu2 }
 0x1cb   : > { %v6239_v35 = vor.u32 %v6712_v31, %v6236_v47  ;;  %10164 = vst [vmem:[#allocation76_spill] sm:$0xff] %v8116_v60 }
 0x1cc   : > { %v2760_v20 = vadd.f32 %v2759_v37, %v2706_v16  ;;  %3356 = vmatpush.bf16.msra.mxu1 %v6367_v21  ;;  %v2933_v10 = vpop.f32.mrf.mxu1 }
 0x1cd   : > { %3302 = vmatpush.bf16.msra.mxu0 %v6239_v35 }
 0x1ce   : > { %v2814_v16 = vadd.f32 %v2813_v61, %v2760_v20  ;;  %2972 = vmatmul.bf16.gmra.mxu1 %v7386_v44  ;;  %v5331_v61 = vor.u32 %v6487_v63, %v5330_v62 }
 0x1cf   : > { %v2867_v37 = vpop.f32.mrf.mxu3  ;;  %3026 = vmatmul.bf16.gmra.mxu2 %v7388_v46 }
 0x1d0   : > { %v8121_v8 = vadd.f32 %v2867_v37, %v2814_v16  ;;  %v6708_v16 = vld [vmem:[%s9948_s1 + $0x7c4] sm:$0xf]  ;;  %v5458_v37 = vld [vmem:[%s9948_s1 + $0x1c8] sm:$0xf]  ;;  %3411 = vmatpush.bf16.msra.mxu2 %v5331_v61 }
 0x1d1   : > { %v2879_v31 = vpop.f32.mrf.mxu0 }
 0x1d2   : > { %v8119_v47 = vadd.f32 %v2879_v31, %v7814_v18  ;;  %v2987_v35 = vpop.f32.mrf.mxu2 }
 0x1d3   : > { %v2988_v3 = vadd.f32 %v2987_v35, %v2933_v10  ;;  %v6519_v10 = vld [vmem:[%s9948_s1 + $0x1d4] sm:$0xf0] }
 0x1d4   : > { %2918 = vmatmul.bf16.gmra.mxu0 %v8116_v60  ;;  %3080 = vmatmul.bf16.gmra.mxu3 %v10165_v23  ;;  %v2935_v18 = vpop.f32.mrf.mxu1  ;;  %v5459_v35 = vor.u32 %v6519_v10, %v5458_v37  ;;  %v10169_v10 = vld [vmem:[#allocation36_spill] sm:$0xff] }
 0x1d6   : > { %3465 = vmatpush.bf16.msra.mxu3 %v5459_v35 }
 0x1d7   : > { %v3041_v38 = vpop.f32.mrf.mxu3 }
 0x1d8   : > { %v8136_v21 = vadd.f32 %v3041_v38, %v2988_v3 }
 0x1d9   : > { %v2881_v20 = vpop.f32.mrf.mxu0 }
 0x1da   : > { %v8128_v26 = vadd.f32 %v2881_v20, %v7839_v58  ;;  %v6220_v58 = vld [vmem:[%s9948_s1 + $0x7d0] sm:$0xf0]  ;;  %v2989_v3 = vpop.f32.mrf.mxu2 }
 0x1db   : > { %v6223_v31 = vor.u32 %v6708_v16, %v6220_v58  ;;  %v2990_v38 = vadd.f32 %v2989_v3, %v2935_v18  ;;  %v6740_v16 = vld [vmem:[%s9948_s1 + $0x8c4] sm:$0xf]  ;;  %v6348_v58 = vld [vmem:[%s9948_s1 + $0x8d0] sm:$0xf0]  ;;  %v10168_v18 = vld [vmem:[#allocation35_spill] sm:$0xff] }
 0x1dc   : > { %v2938_v23 = vpop.f32.mrf.mxu1  ;;  %v6351_v37 = vor.u32 %v6740_v16, %v6348_v58  ;;  %v6483_v16 = vld [vmem:[%s9948_s1 + $0xb4] sm:$0xf0] }
 0x1dd   : > { %3303 = vmatpush.bf16.msra.mxu0 %v6223_v31  ;;  %v10167_v31 = vld [vmem:[#allocation5_spill] sm:$0xff] }
 0x1de   : > { %3148 = vmatmul.bf16.vlgmr.msrb.gmra.mxu1 %v10168_v18 }
 0x1df   : > { %v3043_v20 = vpop.f32.mrf.mxu3  ;;  %3202 = vmatmul.bf16.vlgmr.msrb.gmra.mxu2 %v10169_v10  ;;  %3357 = vmatpush.bf16.msra.mxu1 %v6351_v37  ;;  %v10174_v10 = vld [vmem:[#allocation39_spill] sm:$0xff] }
 0x1e0   : > { %v8159_v61 = vadd.f32 %v3043_v20, %v2990_v38  ;;  %v5314_v20 = vld [vmem:[%s9948_s1 + $0xa8] sm:$0xf] }
 0x1e1   : > { %v2884_v62 = vpop.f32.mrf.mxu0  ;;  %v5315_v58 = vor.u32 %v6483_v16, %v5314_v20  ;;  %v5442_v20 = vld [vmem:[%s9948_s1 + $0x1a8] sm:$0xf] }
 0x1e2   : > { %v8151_v63 = vadd.f32 %v2884_v62, %v7846_v59  ;;  %v10170_v59 = vld [vmem:[#allocation37_spill] sm:$0xff]  ;;  %v2992_v35 = vpop.f32.mrf.mxu2 }
 0x1e3   : > { %v2993_v3 = vadd.f32 %v2992_v35, %v2938_v23  ;;  %3412 = vmatpush.bf16.msra.mxu2 %v5315_v58  ;;  %v6332_v58 = vld [vmem:[%s9948_s1 + $0x8b0] sm:$0xf0] }
 0x1e4   : > { %10166 = vst [vmem:[#allocation77_spill] sm:$0xff] %v8151_v63  ;;  %3094 = vmatmul.bf16.vlgmr.msrb.gmra.mxu0 %v10167_v31  ;;  %3256 = vmatmul.bf16.vlgmr.msrb.gmra.mxu3 %v10170_v59  ;;  %v2940_v42 = vpop.f32.mrf.mxu1 }
 0x1e7   : > { %v3046_v62 = vpop.f32.mrf.mxu3 }
 0x1e8   : > { %v8168_v38 = vadd.f32 %v3046_v62, %v2993_v3  ;;  %v6704_v3 = vld [vmem:[%s9948_s1 + $0x7a4] sm:$0xf]  ;;  %v6204_v62 = vld [vmem:[%s9948_s1 + $0x7b0] sm:$0xf0] }
 0x1e9   : > { %v2886_v2 = vpop.f32.mrf.mxu0 }
 0x1ea   : > { %v8166_v30 = vadd.f32 %v2886_v2, %v7877_v54  ;;  %v2994_v37 = vpop.f32.mrf.mxu2 }
 0x1eb   : > { %v2995_v23 = vadd.f32 %v2994_v37, %v2940_v42  ;;  %v6207_v42 = vor.u32 %v6704_v3, %v6204_v62  ;;  %v10173_v37 = vld [vmem:[#allocation8_spill] sm:$0xff] }
 0x1ec   : > { %10171 = vst [vmem:[#allocation78_spill] sm:$0xff] %v8166_v30  ;;  %v2943_v2 = vpop.f32.mrf.mxu1 }
 0x1ed   : > { %3304 = vmatpush.bf16.msra.mxu0 %v6207_v42 }
 0x1ee   : > { %3153 = vmatmul.bf16.gmra.mxu1 %v10174_v10 }
 0x1ef   : > { %v3048_v35 = vpop.f32.mrf.mxu3 }
 0x1f0   : > { %v8188_v16 = vadd.f32 %v3048_v35, %v2995_v23  ;;  %v10175_v23 = vld [vmem:[#allocation40_spill] sm:$0xff]  ;;  %v10176_v35 = vld [vmem:[#allocation41_spill] sm:$0xff] }
 0x1f1   : > { %v2889_v59 = vpop.f32.mrf.mxu0  ;;  %3207 = vmatmul.bf16.gmra.mxu2 %v10175_v23 }
 0x1f2   : > { %v8177_v54 = vadd.f32 %v2889_v59, %v7884_v55  ;;  %v6515_v55 = vld [vmem:[%s9948_s1 + $0x1b4] sm:$0xf0]  ;;  %v6736_v59 = vld [vmem:[%s9948_s1 + $0x8a4] sm:$0xf]  ;;  %v2997_v3 = vpop.f32.mrf.mxu2 }
 0x1f3   : > { %v6335_v30 = vor.u32 %v6736_v59, %v6332_v58  ;;  %v2998_v62 = vadd.f32 %v2997_v3, %v2943_v2  ;;  %v6511_v2 = vld [vmem:[%s9948_s1 + $0x194] sm:$0xf0]  ;;  %v10179_v3 = vld [vmem:[#allocation11_spill] sm:$0xff] }
 0x1f4   : > { %10172 = vst [vmem:[#allocation79_spill] sm:$0xff] %v8177_v54  ;;  %3099 = vmatmul.bf16.gmra.mxu0 %v10173_v37  ;;  %v5443_v54 = vor.u32 %v6515_v55, %v5442_v20  ;;  %3261 = vmatmul.bf16.gmra.mxu3 %v10176_v35  ;;  %v2945_v46 = vpop.f32.mrf.mxu1  ;;  %v10182_v35 = vld [vmem:[#allocation45_spill] sm:$0xff] }
 0x1f5   : > { %3358 = vmatpush.bf16.msra.mxu1 %v6335_v30  ;;  %v5298_v30 = vld [vmem:[%s9948_s1 + $0x88] sm:$0xf] }
 0x1f6   : > { %3466 = vmatpush.bf16.msra.mxu3 %v5443_v54  ;;  %v5426_v54 = vld [vmem:[%s9948_s1 + $0x188] sm:$0xf] }
 0x1f7   : > { %v3051_v18 = vpop.f32.mrf.mxu3 }
 0x1f8   : > { %v8206_v37 = vadd.f32 %v3051_v18, %v2998_v62 }
 0x1f9   : > { %v2891_v31 = vpop.f32.mrf.mxu0 }
 0x1fa   : > { %v8204_v63 = vadd.f32 %v2891_v31, %v7915_v22  ;;  %v2999_v20 = vpop.f32.mrf.mxu2  ;;  %v6479_v22 = vld [vmem:[%s9948_s1 + $0x94] sm:$0xf0]  ;;  %v6700_v31 = vld [vmem:[%s9948_s1 + $0x784] sm:$0xf] }
 0x1fb   : > { %v3000_v55 = vadd.f32 %v2999_v20, %v2945_v46  ;;  %v5299_v46 = vor.u32 %v6479_v22, %v5298_v30  ;;  %v5427_v20 = vor.u32 %v6511_v2, %v5426_v54  ;;  %v10181_v30 = vld [vmem:[#allocation44_spill] sm:$0xff] }
 0x1fc   : > { %10177 = vst [vmem:[#allocation80_spill] sm:$0xff] %v8204_v63  ;;  %v2948_v42 = vpop.f32.mrf.mxu1 }
 0x1fd   : > { %3413 = vmatpush.bf16.msra.mxu2 %v5299_v46  ;;  %3467 = vmatpush.bf16.msra.mxu3 %v5427_v20 }
 0x1ff   : > { %v3053_v59 = vpop.f32.mrf.mxu3 }
 0x200   : > { %v8220_v18 = vadd.f32 %v3053_v59, %v3000_v55  ;;  %v6732_v55 = vld [vmem:[%s9948_s1 + $0x884] sm:$0xf]  ;;  %v6316_v59 = vld [vmem:[%s9948_s1 + $0x890] sm:$0xf0] }
 0x201   : > { %v2894_v58 = vpop.f32.mrf.mxu0  ;;  %3212 = vmatmul.bf16.gmra.mxu2 %v10181_v30  ;;  %v6319_v22 = vor.u32 %v6732_v55, %v6316_v59 }
 0x202   : > { %v8209_v23 = vadd.f32 %v2894_v58, %v7922_v15  ;;  %v6188_v15 = vld [vmem:[%s9948_s1 + $0x790] sm:$0xf0]  ;;  %v10180_v58 = vld [vmem:[#allocation43_spill] sm:$0xff] }
 0x203   : > { %v6191_v62 = vor.u32 %v6700_v31, %v6188_v15  ;;  %3158 = vmatmul.bf16.gmra.mxu1 %v10180_v58  ;;  %v3002_v31 = vpop.f32.mrf.mxu2 }
 0x204   : > { %10178 = vst [vmem:[#allocation81_spill] sm:$0xff] %v8209_v23  ;;  %3104 = vmatmul.bf16.gmra.mxu0 %v10179_v3  ;;  %3266 = vmatmul.bf16.gmra.mxu3 %v10182_v35  ;;  %v3003_v15 = vadd.f32 %v3002_v31, %v2948_v42  ;;  %v2950_v23 = vpop.f32.mrf.mxu1  ;;  %v5282_v42 = vld [vmem:[%s9948_s1 + $0x68] sm:$0xf]  ;;  %v10185_v31 = vld [vmem:[#allocation14_spill] sm:$0xff] }
 0x205   : > { %3305 = vmatpush.bf16.msra.mxu0 %v6191_v62  ;;  %3359 = vmatpush.bf16.msra.mxu1 %v6319_v22  ;;  %v6696_v62 = vld [vmem:[%s9948_s1 + $0x764] sm:$0xf]  ;;  %v6507_v22 = vld [vmem:[%s9948_s1 + $0x174] sm:$0xf0] }
 0x207   : > { %v3056_v54 = vpop.f32.mrf.mxu3 }
 0x208   : > { %v8244_v63 = vadd.f32 %v3056_v54, %v3003_v15 }
 0x209   : > { %v2896_v2 = vpop.f32.mrf.mxu0 }
 0x20a   : > { %v8242_v3 = vadd.f32 %v2896_v2, %v7947_v34  ;;  %v6475_v34 = vld [vmem:[%s9948_s1 + $0x74] sm:$0xf0]  ;;  %v10186_v2 = vld [vmem:[#allocation47_spill] sm:$0xff] }
 0x20b   : > { %v3004_v58 = vpop.f32.mrf.mxu2 }
 0x20c   : > { %10183 = vst [vmem:[#allocation82_spill] sm:$0xff] %v8242_v3  ;;  %v3005_v10 = vadd.f32 %v3004_v58, %v2950_v23  ;;  %v2953_v46 = vpop.f32.mrf.mxu1  ;;  %v5283_v23 = vor.u32 %v6475_v34, %v5282_v42  ;;  %v5410_v58 = vld [vmem:[%s9948_s1 + $0x168] sm:$0xf]  ;;  %v10188_v34 = vld [vmem:[#allocation49_spill] sm:$0xff] }
 0x20d   : > { %v5411_v54 = vor.u32 %v6507_v22, %v5410_v58 }
 0x20e   : > { %3414 = vmatpush.bf16.msra.mxu2 %v5283_v23 }
 0x20f   : > { %v3058_v30 = vpop.f32.mrf.mxu3  ;;  %3468 = vmatpush.bf16.msra.mxu3 %v5411_v54 }
 0x210   : > { %v8258_v20 = vadd.f32 %v3058_v30, %v3005_v10  ;;  %v6728_v10 = vld [vmem:[%s9948_s1 + $0x864] sm:$0xf]  ;;  %v6300_v30 = vld [vmem:[%s9948_s1 + $0x870] sm:$0xf0] }
 0x211   : > { %v2899_v55 = vpop.f32.mrf.mxu0  ;;  %v6303_v42 = vor.u32 %v6728_v10, %v6300_v30 }
 0x212   : > { %v8247_v59 = vadd.f32 %v2899_v55, %v7960_v53  ;;  %v6172_v53 = vld [vmem:[%s9948_s1 + $0x770] sm:$0xf0] }
 0x213   : > { %v6175_v15 = vor.u32 %v6696_v62, %v6172_v53  ;;  %3163 = vmatmul.bf16.gmra.mxu1 %v10186_v2  ;;  %v10187_v55 = vld [vmem:[#allocation48_spill] sm:$0xff]  ;;  %v3007_v62 = vpop.f32.mrf.mxu2 }
 0x214   : > { %10184 = vst [vmem:[#allocation83_spill] sm:$0xff] %v8247_v59  ;;  %3109 = vmatmul.bf16.gmra.mxu0 %v10185_v31  ;;  %3217 = vmatmul.bf16.gmra.mxu2 %v10187_v55  ;;  %v3008_v53 = vadd.f32 %v3007_v62, %v2953_v46  ;;  %v2955_v31 = vpop.f32.mrf.mxu1  ;;  %v5266_v46 = vld [vmem:[%s9948_s1 + $0x48] sm:$0xf] }
 0x215   : > { %3271 = vmatmul.bf16.gmra.mxu3 %v10188_v34  ;;  %3306 = vmatpush.bf16.msra.mxu0 %v6175_v15 }
 0x216   : > { %3360 = vmatpush.bf16.msra.mxu1 %v6303_v42  ;;  %v10191_v42 = vld [vmem:[#allocation18_spill] sm:$0xff] }
 0x217   : > { %v3061_v58 = vpop.f32.mrf.mxu3 }
 0x218   : > { %v8282_v59 = vadd.f32 %v3061_v58, %v3008_v53  ;;  %v10193_v53 = vld [vmem:[#allocation52_spill] sm:$0xff] }
 0x219   : > { %v2901_v22 = vpop.f32.mrf.mxu0 }
 0x21a   : > { %v8280_v35 = vadd.f32 %v2901_v22, %v7973_v32  ;;  %v6471_v32 = vld [vmem:[%s9948_s1 + $0x54] sm:$0xf0] }
 0x21b   : > { %v3009_v2 = vpop.f32.mrf.mxu2  ;;  %v5267_v54 = vor.u32 %v6471_v32, %v5266_v46  ;;  %v10194_v22 = vld [vmem:[#allocation53_spill] sm:$0xff] }
 0x21c   : > { %10189 = vst [vmem:[#allocation84_spill] sm:$0xff] %v8280_v35  ;;  %v3010_v3 = vadd.f32 %v3009_v2, %v2955_v31  ;;  %v2958_v23 = vpop.f32.mrf.mxu1  ;;  %v6692_v31 = vld [vmem:[%s9948_s1 + $0x744] sm:$0xf]  ;;  %v5394_v2 = vld [vmem:[%s9948_s1 + $0x148] sm:$0xf] }
 0x21d   : > { %3415 = vmatpush.bf16.msra.mxu2 %v5267_v54 }
 0x21f   : > { %v3063_v55 = vpop.f32.mrf.mxu3 }
 0x220   : > { %v8293_v15 = vadd.f32 %v3063_v55, %v3010_v3  ;;  %v6503_v3 = vld [vmem:[%s9948_s1 + $0x154] sm:$0xf0]  ;;  %v10192_v55 = vld [vmem:[#allocation51_spill] sm:$0xff] }
 0x221   : > { %v2904_v10 = vpop.f32.mrf.mxu0  ;;  %v5395_v58 = vor.u32 %v6503_v3, %v5394_v2  ;;  %v6284_v2 = vld [vmem:[%s9948_s1 + $0x850] sm:$0xf0] }
 0x222   : > { %v8285_v30 = vadd.f32 %v2904_v10, %v7998_v39  ;;  %v6156_v39 = vld [vmem:[%s9948_s1 + $0x750] sm:$0xf0] }
 0x223   : > { %v6159_v62 = vor.u32 %v6692_v31, %v6156_v39  ;;  %3168 = vmatmul.bf16.gmra.mxu1 %v10192_v55  ;;  %3469 = vmatpush.bf16.msra.mxu3 %v5395_v58  ;;  %v3012_v10 = vpop.f32.mrf.mxu2  ;;  %v6724_v55 = vld [vmem:[%s9948_s1 + $0x844] sm:$0xf] }
 0x224   : > { %10190 = vst [vmem:[#allocation85_spill] sm:$0xff] %v8285_v30  ;;  %3114 = vmatmul.bf16.gmra.mxu0 %v10191_v42  ;;  %3222 = vmatmul.bf16.gmra.mxu2 %v10193_v53  ;;  %v3013_v46 = vadd.f32 %v3012_v10, %v2958_v23  ;;  %v2960_v39 = vpop.f32.mrf.mxu1  ;;  %v6287_v54 = vor.u32 %v6724_v55, %v6284_v2  ;;  %v10197_v55 = vld [vmem:[#allocation22_spill] sm:$0xff]  ;;  %v10199_v2 = vld [vmem:[#allocation56_spill] sm:$0xff] }
 0x225   : > { %3276 = vmatmul.bf16.gmra.mxu3 %v10194_v22  ;;  %3307 = vmatpush.bf16.msra.mxu0 %v6159_v62  ;;  %v10203_v42 = vld [vmem:[#allocation26_spill] sm:$0xff] }
 0x226   : > { %3361 = vmatpush.bf16.msra.mxu1 %v6287_v54 }
 0x227   : > { %v3066_v32 = vpop.f32.mrf.mxu3 }
 0x228   : > { %v8320_v3 = vadd.f32 %v3066_v32, %v3013_v46  ;;  %v6467_v46 = vld [vmem:[%s9948_s1 + $0x34] sm:$0xf0] }
 0x229   : > { %v2906_v34 = vpop.f32.mrf.mxu0 }
 0x22a   : > { %v8312_v31 = vadd.f32 %v2906_v34, %v8005_v27 }
 0x22b   : > { %v3014_v62 = vpop.f32.mrf.mxu2 }
 0x22c   : > { %10195 = vst [vmem:[#allocation86_spill] sm:$0xff] %v8312_v31  ;;  %v3015_v23 = vadd.f32 %v3014_v62, %v2960_v39  ;;  %v2963_v34 = vpop.f32.mrf.mxu1  ;;  %v5250_v31 = vld [vmem:[%s9948_s1 + $0x28] sm:$0xf] }
 0x22d   : > { %v5251_v32 = vor.u32 %v6467_v46, %v5250_v31  ;;  %v10198_v39 = vld [vmem:[#allocation55_spill] sm:$0xff]  ;;  %v6140_v31 = vld [vmem:[%s9948_s1 + $0x730] sm:$0xf0] }
 0x22e   : > { %v5378_v46 = vld [vmem:[%s9948_s1 + $0x128] sm:$0xf] }
 0x22f   : > { %v3068_v58 = vpop.f32.mrf.mxu3  ;;  %3416 = vmatpush.bf16.msra.mxu2 %v5251_v32 }
 0x230   : > { %v8325_v22 = vadd.f32 %v3068_v58, %v3015_v23 }
 0x231   : > { %v2909_v10 = vpop.f32.mrf.mxu0 }
 0x232   : > { %v8323_v27 = vadd.f32 %v2909_v10, %v8036_v17  ;;  %v10200_v17 = vld [vmem:[#allocation57_spill] sm:$0xff] }
 0x233   : > { %3173 = vmatmul.bf16.gmra.mxu1 %v10198_v39  ;;  %v3017_v54 = vpop.f32.mrf.mxu2 }
 0x234   : > { %10196 = vst [vmem:[#allocation87_spill] sm:$0xff] %v8323_v27  ;;  %3119 = vmatmul.bf16.gmra.mxu0 %v10197_v55  ;;  %3227 = vmatmul.bf16.gmra.mxu2 %v10199_v2  ;;  %v3018_v62 = vadd.f32 %v3017_v54, %v2963_v34  ;;  %v2965_v27 = vpop.f32.mrf.mxu1  ;;  %v6688_v55 = vld [vmem:[%s9948_s1 + $0x724] sm:$0xf] }
 0x235   : > { %3281 = vmatmul.bf16.gmra.mxu3 %v10200_v17  ;;  %v6143_v34 = vor.u32 %v6688_v55, %v6140_v31  ;;  %v6720_v54 = vld [vmem:[%s9948_s1 + $0x824] sm:$0xf] }
 0x237   : > { %v3071_v23 = vpop.f32.mrf.mxu3  ;;  %3308 = vmatpush.bf16.msra.mxu0 %v6143_v34 }
 0x238   : > { %v8349_v32 = vadd.f32 %v3071_v23, %v3018_v62 }
 0x239   : > { %v2911_v58 = vpop.f32.mrf.mxu0 }
 0x23a   : > { %v8338_v10 = vadd.f32 %v2911_v58, %v8043_v9  ;;  %v6499_v9 = vld [vmem:[%s9948_s1 + $0x134] sm:$0xf0]  ;;  %v6268_v58 = vld [vmem:[%s9948_s1 + $0x830] sm:$0xf0] }
 0x23b   : > { %v5379_v17 = vor.u32 %v6499_v9, %v5378_v46  ;;  %v6271_v2 = vor.u32 %v6720_v54, %v6268_v58  ;;  %v3019_v62 = vpop.f32.mrf.mxu2  ;;  %v5234_v46 = vld [vmem:[%s9948_s1 + $0x8] sm:$0xf]  ;;  %v6684_v9 = vld [vmem:[%s9948_s1 + $0x704] sm:$0xf]  ;;  %v6124_v54 = vld [vmem:[%s9948_s1 + $0x710] sm:$0xf0] }
 0x23c   : > { %10201 = vst [vmem:[#allocation88_spill] sm:$0xff] %v8338_v10  ;;  %v3020_v23 = vadd.f32 %v3019_v62, %v2965_v27  ;;  %v2968_v10 = vpop.f32.mrf.mxu1  ;;  %v10205_v27 = vld [vmem:[#allocation60_spill] sm:$0xff]  ;;  %v5362_v58 = vld [vmem:[%s9948_s1 + $0x108] sm:$0xf]  ;;  %v6127_v62 = vor.u32 %v6684_v9, %v6124_v54 }
 0x23d   : > { %3470 = vmatpush.bf16.msra.mxu3 %v5379_v17  ;;  %3362 = vmatpush.bf16.msra.mxu1 %v6271_v2  ;;  %v6463_v2 = vld [vmem:[%s9948_s1 + $0x14] sm:$0xf0]  ;;  %v10204_v17 = vld [vmem:[#allocation59_spill] sm:$0xff] }
 0x23e   : > { %v5235_v34 = vor.u32 %v6463_v2, %v5234_v46  ;;  %3309 = vmatpush.bf16.msra.mxu0 %v6127_v62  ;;  %v10208_v62 = vld [vmem:[#allocation63_spill] sm:$0xff] }
 0x23f   : > { %v3073_v55 = vpop.f32.mrf.mxu3 }
 0x240   : > { %v8363_v53 = vadd.f32 %v3073_v55, %v3020_v23  ;;  %3417 = vmatpush.bf16.msra.mxu2 %v5235_v34  ;;  %v6495_v23 = vld [vmem:[%s9948_s1 + $0x114] sm:$0xf0]  ;;  %v6716_v55 = vld [vmem:[%s9948_s1 + $0x804] sm:$0xf] }
 0x241   : > { %v2914_v31 = vpop.f32.mrf.mxu0  ;;  %v5363_v2 = vor.u32 %v6495_v23, %v5362_v58  ;;  %v10207_v23 = vld [vmem:[#allocation30_spill] sm:$0xff] }
 0x242   : > { %v8361_v39 = vadd.f32 %v2914_v31, %v8059_v14  ;;  %v10206_v14 = vld [vmem:[#allocation61_spill] sm:$0xff]  ;;  %v6252_v31 = vld [vmem:[%s9948_s1 + $0x810] sm:$0xf0] }
 0x243   : > { %3178 = vmatmul.bf16.gmra.mxu1 %v10204_v17  ;;  %v3022_v46 = vpop.f32.mrf.mxu2  ;;  %3471 = vmatpush.bf16.msra.mxu3 %v5363_v2 }
 0x244   : > { %10202 = vst [vmem:[#allocation89_spill] sm:$0xff] %v8361_v39  ;;  %3124 = vmatmul.bf16.gmra.mxu0 %v10203_v42  ;;  %3232 = vmatmul.bf16.gmra.mxu2 %v10205_v27  ;;  %v3023_v27 = vadd.f32 %v3022_v46, %v2968_v10  ;;  %v2970_v9 = vpop.f32.mrf.mxu1 }
 0x245   : > { %3286 = vmatmul.bf16.gmra.mxu3 %v10206_v14  ;;  %v6255_v14 = vor.u32 %v6716_v55, %v6252_v31 }
 0x247   : > { %v3076_v17 = vpop.f32.mrf.mxu3  ;;  %3363 = vmatpush.bf16.msra.mxu1 %v6255_v14 }
 0x248   : > { %v8396_v54 = vadd.f32 %v3076_v17, %v3023_v27  ;;  %v5986_v17 = vld [vmem:[%s9948_s1 + $0x5e8] sm:$0xf]  ;;  %v6651_v27 = vld [vmem:[%s9948_s1 + $0x5f4] sm:$0xf0] }
 0x249   : > { %v2916_v42 = vpop.f32.mrf.mxu0  ;;  %v5987_v31 = vor.u32 %v6651_v27, %v5986_v17 }
 0x24a   : > { %v8394_v34 = vadd.f32 %v2916_v42, %v8081_v56  ;;  %v10209_v56 = vld [vmem:[#allocation64_spill] sm:$0xff]  ;;  %v10210_v42 = vld [vmem:[#allocation65_spill] sm:$0xff] }
 0x24b   : > { %v3024_v39 = vpop.f32.mrf.mxu2  ;;  %3680 = vmatpush.bf16.msrb.mxu3 %v5987_v31 }
 0x24c   : > { %v3025_v30 = vadd.f32 %v3024_v39, %v2970_v9  ;;  %v2973_v58 = vpop.f32.mrf.mxu1  ;;  %v5858_v39 = vld [vmem:[%s9948_s1 + $0x4e8] sm:$0xf] }
 0x24f   : > { %v3078_v35 = vpop.f32.mrf.mxu3 }
 0x250   : > { %v8401_v10 = vadd.f32 %v3078_v35, %v3025_v30  ;;  %v6555_v30 = vld [vmem:[%s9948_s1 + $0x2f4] sm:$0xf0] }
 0x251   : > { %v2919_v44 = vpop.f32.mrf.mxu0 }
 0x252   : > { %v8399_v60 = vadd.f32 %v2919_v44, %v8097_v51  ;;  %v6619_v44 = vld [vmem:[%s9948_s1 + $0x4f4] sm:$0xf0]  ;;  %v5602_v51 = vld [vmem:[%s9948_s1 + $0x2e8] sm:$0xf] }
 0x253   : > { %3183 = vmatmul.bf16.gmra.mxu1 %v10208_v62  ;;  %v5859_v35 = vor.u32 %v6619_v44, %v5858_v39  ;;  %v3027_v14 = vpop.f32.mrf.mxu2  ;;  %v5603_v55 = vor.u32 %v6555_v30, %v5602_v51  ;;  %v6587_v51 = vld [vmem:[%s9948_s1 + $0x3f4] sm:$0xf0] }
 0x254   : > { %3129 = vmatmul.bf16.gmra.mxu0 %v10207_v23  ;;  %3237 = vmatmul.bf16.gmra.mxu2 %v10209_v56  ;;  %v3028_v46 = vadd.f32 %v3027_v14, %v2973_v58  ;;  %v2975_v44 = vpop.f32.mrf.mxu1  ;;  %v5730_v56 = vld [vmem:[%s9948_s1 + $0x3e8] sm:$0xf] }
 0x255   : > { %3291 = vmatmul.bf16.gmra.mxu3 %v10210_v42  ;;  %3626 = vmatpush.bf16.msrb.mxu2 %v5859_v35  ;;  %v5731_v58 = vor.u32 %v6587_v51, %v5730_v56  ;;  %v5842_v56 = vld [vmem:[%s9948_s1 + $0x4c8] sm:$0xf] }
 0x256   : > { %3518 = vmatpush.bf16.msrb.mxu0 %v5603_v55 }
 0x257   : > { %v3081_v2 = vpop.f32.mrf.mxu3  ;;  %3572 = vmatpush.bf16.msrb.mxu1 %v5731_v58 }
 0x258   : > { %v8428_v42 = vadd.f32 %v3081_v2, %v3028_v46  ;;  %v10211_v46 = vld [vmem:[#allocation34_spill] sm:$0xff]  ;;  %v10212_v2 = vld [vmem:[#allocation69_spill] sm:$0xff] }
 0x259   : > { %v2921_v9 = vpop.f32.mrf.mxu0 }
 0x25a   : > { %v8426_v39 = vadd.f32 %v2921_v9, %v8121_v8 }
 0x25b   : > { %v3029_v30 = vpop.f32.mrf.mxu2 }
 0x25c   : > { %v3030_v35 = vadd.f32 %v3029_v30, %v2975_v44  ;;  %v3149_v14 = vpop.f32.mrf.mxu1 }
 0x25f   : > { %v3083_v17 = vpop.f32.mrf.mxu3 }
 0x260   : > { %v8437_v55 = vadd.f32 %v3083_v17, %v3030_v35 }
 0x261   : > { %v3095_v8 = vpop.f32.mrf.mxu0 }
 0x262   : > { %v3096_v27 = vadd.f32 %v3095_v8, %v8136_v21  ;;  %v6615_v21 = vld [vmem:[%s9948_s1 + $0x4d4] sm:$0xf0] }
 0x263   : > { %3188 = vmatmul.bf16.gmra.mxu1 %v7792_v33  ;;  %v5843_v9 = vor.u32 %v6615_v21, %v5842_v56  ;;  %v3203_v44 = vpop.f32.mrf.mxu2 }
 0x264   : > { %v3150_v31 = vadd.f32 %v3149_v14, %v3096_v27  ;;  %3134 = vmatmul.bf16.gmra.mxu0 %v10211_v46  ;;  %3242 = vmatmul.bf16.gmra.mxu2 %v7794_v45  ;;  %v3151_v17 = vpop.f32.mrf.mxu1  ;;  %v5586_v27 = vld [vmem:[%s9948_s1 + $0x2c8] sm:$0xf]  ;;  %v6551_v14 = vld [vmem:[%s9948_s1 + $0x2d4] sm:$0xf0]  ;;  %v10213_v46 = vld [vmem:[#allocation38_spill] sm:$0xff] }
 0x265   : > { %3296 = vmatmul.bf16.gmra.mxu3 %v10212_v2  ;;  %3627 = vmatpush.bf16.msrb.mxu2 %v5843_v9  ;;  %v5587_v21 = vor.u32 %v6551_v14, %v5586_v27  ;;  %v5714_v9 = vld [vmem:[%s9948_s1 + $0x3c8] sm:$0xf] }
 0x266   : > { %v3204_v51 = vadd.f32 %v3203_v44, %v3150_v31  ;;  %v5970_v31 = vld [vmem:[%s9948_s1 + $0x5c8] sm:$0xf]  ;;  %v6583_v44 = vld [vmem:[%s9948_s1 + $0x3d4] sm:$0xf0] }
 0x267   : > { %v3257_v58 = vpop.f32.mrf.mxu3  ;;  %3519 = vmatpush.bf16.msrb.mxu0 %v5587_v21 }
 0x268   : > { %v8450_v8 = vadd.f32 %v3257_v58, %v3204_v51  ;;  %v5715_v58 = vor.u32 %v6583_v44, %v5714_v9 }
 0x269   : > { %v3097_v30 = vpop.f32.mrf.mxu0 }
 0x26a   : > { %v3098_v35 = vadd.f32 %v3097_v30, %v8159_v61  ;;  %v6647_v61 = vld [vmem:[%s9948_s1 + $0x5d4] sm:$0xf0]  ;;  %3573 = vmatpush.bf16.msrb.mxu1 %v5715_v58 }
 0x26b   : > { %v5971_v51 = vor.u32 %v6647_v61, %v5970_v31  ;;  %v3205_v30 = vpop.f32.mrf.mxu2  ;;  %v10214_v31 = vld [vmem:[#allocation3_spill] sm:$0xff]  ;;  %v6611_v58 = vld [vmem:[%s9948_s1 + $0x4b4] sm:$0xf0] }
 0x26c   : > { %v3152_v56 = vadd.f32 %v3151_v17, %v3098_v35  ;;  %v3154_v2 = vpop.f32.mrf.mxu1 }
 0x26d   : > { %3681 = vmatpush.bf16.msrb.mxu3 %v5971_v51 }
 0x26e   : > { %v3206_v35 = vadd.f32 %v3205_v30, %v3152_v56 }
 0x26f   : > { %v3259_v17 = vpop.f32.mrf.mxu3 }
 0x270   : > { %v8471_v45 = vadd.f32 %v3259_v17, %v3206_v35  ;;  %v5954_v17 = vld [vmem:[%s9948_s1 + $0x5a8] sm:$0xf] }
 0x271   : > { %v3100_v27 = vpop.f32.mrf.mxu0 }
 0x272   : > { %v3101_v14 = vadd.f32 %v3100_v27, %v8168_v38 }
 0x273   : > { %3364 = vmatmul.bf16.vlgmr.msra.gmra.mxu1 %v7836_v19  ;;  %v10215_v19 = vld [vmem:[#allocation42_spill] sm:$0xff] }
 0x274   : > { %v3155_v33 = vadd.f32 %v3154_v2, %v3101_v14  ;;  %3310 = vmatmul.bf16.vlgmr.msra.gmra.mxu0 %v10213_v46  ;;  %3418 = vmatmul.bf16.vlgmr.msra.gmra.mxu2 %v7041_v49  ;;  %v3208_v21 = vpop.f32.mrf.mxu2  ;;  %v3156_v51 = vpop.f32.mrf.mxu1  ;;  %v5826_v2 = vld [vmem:[%s9948_s1 + $0x4a8] sm:$0xf]  ;;  %v6643_v14 = vld [vmem:[%s9948_s1 + $0x5b4] sm:$0xf0] }
 0x275   : > { %3472 = vmatmul.bf16.vlgmr.msra.gmra.mxu3 %v10214_v31  ;;  %v5827_v35 = vor.u32 %v6611_v58, %v5826_v2 }
 0x276   : > { %v3209_v61 = vadd.f32 %v3208_v21, %v3155_v33  ;;  %v5570_v33 = vld [vmem:[%s9948_s1 + $0x2a8] sm:$0xf] }
 0x277   : > { %v3262_v9 = vpop.f32.mrf.mxu3  ;;  %v5698_v21 = vld [vmem:[%s9948_s1 + $0x3a8] sm:$0xf]  ;;  %3628 = vmatpush.bf16.msrb.mxu2 %v5827_v35 }
 0x278   : > { %v8478_v38 = vadd.f32 %v3262_v9, %v3209_v61  ;;  %v6579_v61 = vld [vmem:[%s9948_s1 + $0x3b4] sm:$0xf0]  ;;  %v5955_v9 = vor.u32 %v6643_v14, %v5954_v17 }
 0x279   : > { %v3102_v56 = vpop.f32.mrf.mxu0 }
 0x27a   : > { %v3103_v44 = vadd.f32 %v3102_v56, %v8188_v16  ;;  %v6547_v16 = vld [vmem:[%s9948_s1 + $0x2b4] sm:$0xf0]  ;;  %v5699_v56 = vor.u32 %v6579_v61, %v5698_v21  ;;  %3682 = vmatpush.bf16.msrb.mxu3 %v5955_v9  ;;  %v5810_v9 = vld [vmem:[%s9948_s1 + $0x488] sm:$0xf] }
 0x27b   : > { %v5571_v27 = vor.u32 %v6547_v16, %v5570_v33 }
 0x27c   : > { %v3157_v30 = vadd.f32 %v3156_v51, %v3103_v44  ;;  %v3210_v44 = vpop.f32.mrf.mxu2  ;;  %3574 = vmatpush.bf16.msrb.mxu1 %v5699_v56  ;;  %v6607_v56 = vld [vmem:[%s9948_s1 + $0x494] sm:$0xf0] }
 0x27d   : > { %3520 = vmatpush.bf16.msrb.mxu0 %v5571_v27 }
 0x27e   : > { %v3211_v51 = vadd.f32 %v3210_v44, %v3157_v30  ;;  %v5811_v44 = vor.u32 %v6607_v56, %v5810_v9 }
 0x27f   : > { %v3264_v2 = vpop.f32.mrf.mxu3 }
 0x280   : > { %v3159_v16 = vpop.f32.mrf.mxu1  ;;  %v8505_v31 = vadd.f32 %v3264_v2, %v3211_v51  ;;  %v5938_v51 = vld [vmem:[%s9948_s1 + $0x588] sm:$0xf]  ;;  %v6639_v2 = vld [vmem:[%s9948_s1 + $0x594] sm:$0xf0]  ;;  %3629 = vmatpush.bf16.msrb.mxu2 %v5811_v44 }
 0x281   : > { %v3105_v58 = vpop.f32.mrf.mxu0 }
 0x282   : > { %v3106_v33 = vadd.f32 %v3105_v58, %v8206_v37 }
 0x283   : > { %3369 = vmatmul.bf16.gmra.mxu1 %v7874_v57 }
 0x284   : > { %v3160_v49 = vadd.f32 %v3159_v16, %v3106_v33  ;;  %3315 = vmatmul.bf16.gmra.mxu0 %v10215_v19  ;;  %3423 = vmatmul.bf16.gmra.mxu2 %v7102_v24  ;;  %v3213_v35 = vpop.f32.mrf.mxu2  ;;  %v5939_v33 = vor.u32 %v6639_v2, %v5938_v51  ;;  %v5682_v16 = vld [vmem:[%s9948_s1 + $0x388] sm:$0xf]  ;;  %v10216_v51 = vld [vmem:[#allocation46_spill] sm:$0xff] }
 0x285   : > { %3477 = vmatmul.bf16.gmra.mxu3 %v7104_v25 }
 0x286   : > { %v3214_v17 = vadd.f32 %v3213_v35, %v3160_v49  ;;  %v5554_v49 = vld [vmem:[%s9948_s1 + $0x288] sm:$0xf]  ;;  %v6575_v35 = vld [vmem:[%s9948_s1 + $0x394] sm:$0xf0]  ;;  %3683 = vmatpush.bf16.msrb.mxu3 %v5939_v33 }
 0x287   : > { %v3267_v27 = vpop.f32.mrf.mxu3 }
 0x288   : > { %v3161_v21 = vpop.f32.mrf.mxu1  ;;  %v8512_v37 = vadd.f32 %v3267_v27, %v3214_v17  ;;  %v5683_v17 = vor.u32 %v6575_v35, %v5682_v16 }
 0x289   : > { %v3107_v30 = vpop.f32.mrf.mxu0 }
 0x28a   : > { %v3108_v14 = vadd.f32 %v3107_v30, %v8220_v18  ;;  %v6543_v18 = vld [vmem:[%s9948_s1 + $0x294] sm:$0xf0]  ;;  %3575 = vmatpush.bf16.msrb.mxu1 %v5683_v17  ;;  %v5794_v17 = vld [vmem:[%s9948_s1 + $0x468] sm:$0xf] }
 0x28b   : > { %v5555_v58 = vor.u32 %v6543_v18, %v5554_v49 }
 0x28c   : > { %v3162_v61 = vadd.f32 %v3161_v21, %v3108_v14  ;;  %v3215_v27 = vpop.f32.mrf.mxu2 }
 0x28d   : > { %3521 = vmatpush.bf16.msrb.mxu0 %v5555_v58 }
 0x28e   : > { %v3216_v30 = vadd.f32 %v3215_v27, %v3162_v61  ;;  %v6603_v27 = vld [vmem:[%s9948_s1 + $0x474] sm:$0xf0] }
 0x28f   : > { %v3269_v14 = vpop.f32.mrf.mxu3 }
 0x290   : > { %v3164_v56 = vpop.f32.mrf.mxu1  ;;  %v8539_v49 = vadd.f32 %v3269_v14, %v3216_v30  ;;  %v5538_v30 = vld [vmem:[%s9948_s1 + $0x268] sm:$0xf]  ;;  %v5795_v14 = vor.u32 %v6603_v27, %v5794_v17 }
 0x291   : > { %v3110_v21 = vpop.f32.mrf.mxu0  ;;  %v5666_v27 = vld [vmem:[%s9948_s1 + $0x368] sm:$0xf] }
 0x292   : > { %v3111_v9 = vadd.f32 %v3110_v21, %v8244_v63  ;;  %v5922_v21 = vld [vmem:[%s9948_s1 + $0x568] sm:$0xf]  ;;  %3630 = vmatpush.bf16.msrb.mxu2 %v5795_v14 }
 0x293   : > { %3374 = vmatmul.bf16.gmra.mxu1 %v7912_v36 }
 0x294   : > { %v3165_v18 = vadd.f32 %v3164_v56, %v3111_v9  ;;  %3320 = vmatmul.bf16.gmra.mxu0 %v10216_v51  ;;  %3428 = vmatmul.bf16.gmra.mxu2 %v7146_v48  ;;  %v6635_v9 = vld [vmem:[%s9948_s1 + $0x574] sm:$0xf0] }
 0x295   : > { %3482 = vmatmul.bf16.gmra.mxu3 %v7148_v50 }
 0x297   : > { %v3218_v44 = vpop.f32.mrf.mxu2 }
 0x298   : > { %v3219_v2 = vadd.f32 %v3218_v44, %v3165_v18  ;;  %v3272_v61 = vpop.f32.mrf.mxu3  ;;  %v3166_v16 = vpop.f32.mrf.mxu1  ;;  %v5923_v18 = vor.u32 %v6635_v9, %v5922_v21 }
 0x299   : > { %v3112_v58 = vpop.f32.mrf.mxu0 }
 0x29a   : > { %v3113_v33 = vadd.f32 %v3112_v58, %v8258_v20  ;;  %v8546_v63 = vadd.f32 %v3272_v61, %v3219_v2  ;;  %v6539_v20 = vld [vmem:[%s9948_s1 + $0x274] sm:$0xf0]  ;;  %3684 = vmatpush.bf16.msrb.mxu3 %v5923_v18 }
 0x29b   : > { %v5539_v56 = vor.u32 %v6539_v20, %v5538_v30  ;;  %v6571_v30 = vld [vmem:[%s9948_s1 + $0x374] sm:$0xf0]  ;;  %v10217_v20 = vld [vmem:[#allocation50_spill] sm:$0xff] }
 0x29c   : > { %v3167_v35 = vadd.f32 %v3166_v16, %v3113_v33  ;;  %v5667_v21 = vor.u32 %v6571_v30, %v5666_v27 }
 0x29d   : > { %3522 = vmatpush.bf16.msrb.mxu0 %v5539_v56 }
 0x29e   : > { %3576 = vmatpush.bf16.msrb.mxu1 %v5667_v21 }
 0x29f   : > { %v3220_v44 = vpop.f32.mrf.mxu2 }
 0x2a0   : > { %v3221_v2 = vadd.f32 %v3220_v44, %v3167_v35  ;;  %v3274_v61 = vpop.f32.mrf.mxu3  ;;  %v3169_v16 = vpop.f32.mrf.mxu1 }
 0x2a1   : > { %v3115_v58 = vpop.f32.mrf.mxu0 }
 0x2a2   : > { %v3116_v33 = vadd.f32 %v3115_v58, %v8282_v59  ;;  %v8567_v17 = vadd.f32 %v3274_v61, %v3221_v2  ;;  %v5778_v58 = vld [vmem:[%s9948_s1 + $0x448] sm:$0xf] }
 0x2a3   : > { %3379 = vmatmul.bf16.gmra.mxu1 %v7944_v52 }
 0x2a4   : > { %v3170_v14 = vadd.f32 %v3169_v16, %v3116_v33  ;;  %3325 = vmatmul.bf16.gmra.mxu0 %v10217_v20  ;;  %3433 = vmatmul.bf16.gmra.mxu2 %v7190_v12  ;;  %v6599_v33 = vld [vmem:[%s9948_s1 + $0x454] sm:$0xf0] }
 0x2a5   : > { %3487 = vmatmul.bf16.gmra.mxu3 %v7192_v13  ;;  %v5779_v16 = vor.u32 %v6599_v33, %v5778_v58  ;;  %v5650_v33 = vld [vmem:[%s9948_s1 + $0x348] sm:$0xf] }
 0x2a7   : > { %v3223_v59 = vpop.f32.mrf.mxu2  ;;  %3631 = vmatpush.bf16.msrb.mxu2 %v5779_v16  ;;  %v6567_v16 = vld [vmem:[%s9948_s1 + $0x354] sm:$0xf0] }
 0x2a8   : > { %v3224_v35 = vadd.f32 %v3223_v59, %v3170_v14  ;;  %v3277_v9 = vpop.f32.mrf.mxu3  ;;  %v3171_v44 = vpop.f32.mrf.mxu1 }
 0x2a9   : > { %v3117_v56 = vpop.f32.mrf.mxu0 }
 0x2aa   : > { %v3118_v18 = vadd.f32 %v3117_v56, %v8293_v15  ;;  %v8580_v2 = vadd.f32 %v3277_v9, %v3224_v35  ;;  %v5522_v9 = vld [vmem:[%s9948_s1 + $0x248] sm:$0xf]  ;;  %v6535_v56 = vld [vmem:[%s9948_s1 + $0x254] sm:$0xf0] }
 0x2ab   : > { %v5523_v58 = vor.u32 %v6535_v56, %v5522_v9 }
 0x2ac   : > { %v3172_v61 = vadd.f32 %v3171_v44, %v3118_v18  ;;  %v5906_v18 = vld [vmem:[%s9948_s1 + $0x548] sm:$0xf] }
 0x2ad   : > { %3523 = vmatpush.bf16.msrb.mxu0 %v5523_v58 }
 0x2af   : > { %v3225_v27 = vpop.f32.mrf.mxu2 }
 0x2b0   : > { %v3226_v30 = vadd.f32 %v3225_v27, %v3172_v61  ;;  %v3279_v14 = vpop.f32.mrf.mxu3  ;;  %v3174_v59 = vpop.f32.mrf.mxu1  ;;  %v10218_v61 = vld [vmem:[#allocation54_spill] sm:$0xff] }
 0x2b1   : > { %v3120_v21 = vpop.f32.mrf.mxu0 }
 0x2b2   : > { %v3121_v15 = vadd.f32 %v3120_v21, %v8320_v3  ;;  %v8589_v35 = vadd.f32 %v3279_v14, %v3226_v30  ;;  %v6631_v3 = vld [vmem:[%s9948_s1 + $0x554] sm:$0xf0]  ;;  %v5651_v30 = vor.u32 %v6567_v16, %v5650_v33 }
 0x2b3   : > { %3384 = vmatmul.bf16.gmra.mxu1 %v7970_v11  ;;  %v5907_v27 = vor.u32 %v6631_v3, %v5906_v18 }
 0x2b4   : > { %v3175_v44 = vadd.f32 %v3174_v59, %v3121_v15  ;;  %3330 = vmatmul.bf16.gmra.mxu0 %v10218_v61  ;;  %3438 = vmatmul.bf16.gmra.mxu2 %v7234_v40 }
 0x2b5   : > { %3492 = vmatmul.bf16.gmra.mxu3 %v7236_v41  ;;  %3577 = vmatpush.bf16.msrb.mxu1 %v5651_v30 }
 0x2b6   : > { %3685 = vmatpush.bf16.msrb.mxu3 %v5907_v27  ;;  %v10219_v27 = vld [vmem:[#allocation58_spill] sm:$0xff] }
 0x2b7   : > { %v3228_v14 = vpop.f32.mrf.mxu2 }
 0x2b8   : > { %v3229_v21 = vadd.f32 %v3228_v14, %v3175_v44  ;;  %v3282_v15 = vpop.f32.mrf.mxu3  ;;  %v3176_v56 = vpop.f32.mrf.mxu1  ;;  %v5762_v44 = vld [vmem:[%s9948_s1 + $0x428] sm:$0xf] }
 0x2b9   : > { %v3122_v59 = vpop.f32.mrf.mxu0 }
 0x2ba   : > { %v3123_v9 = vadd.f32 %v3122_v59, %v8325_v22  ;;  %v8614_v13 = vadd.f32 %v3282_v15, %v3229_v21  ;;  %v6595_v22 = vld [vmem:[%s9948_s1 + $0x434] sm:$0xf0]  ;;  %v5634_v21 = vld [vmem:[%s9948_s1 + $0x328] sm:$0xf] }
 0x2bb   : > { %v5763_v30 = vor.u32 %v6595_v22, %v5762_v44  ;;  %v6563_v15 = vld [vmem:[%s9948_s1 + $0x334] sm:$0xf0] }
 0x2bc   : > { %v3177_v50 = vadd.f32 %v3176_v56, %v3123_v9  ;;  %v5635_v59 = vor.u32 %v6563_v15, %v5634_v21 }
 0x2bd   : > { %3632 = vmatpush.bf16.msrb.mxu2 %v5763_v30 }
 0x2be   : > { %3578 = vmatpush.bf16.msrb.mxu1 %v5635_v59 }
 0x2bf   : > { %v3230_v25 = vpop.f32.mrf.mxu2 }
 0x2c0   : > { %v3231_v11 = vadd.f32 %v3230_v25, %v3177_v50  ;;  %v3284_v40 = vpop.f32.mrf.mxu3  ;;  %v3179_v33 = vpop.f32.mrf.mxu1  ;;  %v5506_v25 = vld [vmem:[%s9948_s1 + $0x228] sm:$0xf]  ;;  %v6531_v50 = vld [vmem:[%s9948_s1 + $0x234] sm:$0xf0] }
 0x2c1   : > { %v3125_v18 = vpop.f32.mrf.mxu0 }
 0x2c2   : > { %v3126_v3 = vadd.f32 %v3125_v18, %v8349_v32  ;;  %v8617_v58 = vadd.f32 %v3284_v40, %v3231_v11  ;;  %v5890_v40 = vld [vmem:[%s9948_s1 + $0x528] sm:$0xf]  ;;  %v5507_v11 = vor.u32 %v6531_v50, %v5506_v25  ;;  %v6627_v32 = vld [vmem:[%s9948_s1 + $0x534] sm:$0xf0] }
 0x2c3   : > { %3389 = vmatmul.bf16.gmra.mxu1 %v8002_v43  ;;  %v5891_v14 = vor.u32 %v6627_v32, %v5890_v40 }
 0x2c4   : > { %v3180_v16 = vadd.f32 %v3179_v33, %v3126_v3  ;;  %3335 = vmatmul.bf16.gmra.mxu0 %v10219_v27  ;;  %3443 = vmatmul.bf16.gmra.mxu2 %v7272_v5 }
 0x2c5   : > { %3497 = vmatmul.bf16.gmra.mxu3 %v7274_v6  ;;  %3524 = vmatpush.bf16.msrb.mxu0 %v5507_v11 }
 0x2c6   : > { %3686 = vmatpush.bf16.msrb.mxu3 %v5891_v14 }
 0x2c7   : > { %v3233_v9 = vpop.f32.mrf.mxu2 }
 0x2c8   : > { %v3234_v56 = vadd.f32 %v3233_v9, %v3180_v16  ;;  %v3287_v18 = vpop.f32.mrf.mxu3  ;;  %v3181_v44 = vpop.f32.mrf.mxu1  ;;  %v10220_v16 = vld [vmem:[#allocation62_spill] sm:$0xff] }
 0x2c9   : > { %v3127_v3 = vpop.f32.mrf.mxu0 }
 0x2ca   : > { %v3128_v33 = vadd.f32 %v3127_v3, %v8363_v53  ;;  %v8648_v22 = vadd.f32 %v3287_v18, %v3234_v56 }
 0x2cc   : > { %v3182_v30 = vadd.f32 %v3181_v44, %v3128_v33  ;;  %v6591_v33 = vld [vmem:[%s9948_s1 + $0x414] sm:$0xf0]  ;;  %v5490_v44 = vld [vmem:[%s9948_s1 + $0x208] sm:$0xf] }
 0x2cf   : > { %v3235_v25 = vpop.f32.mrf.mxu2 }
 0x2d0   : > { %v3236_v50 = vadd.f32 %v3235_v25, %v3182_v30  ;;  %v3289_v40 = vpop.f32.mrf.mxu3  ;;  %v3184_v11 = vpop.f32.mrf.mxu1 }
 0x2d1   : > { %v3130_v32 = vpop.f32.mrf.mxu0 }
 0x2d2   : > { %v3131_v6 = vadd.f32 %v3130_v32, %v8396_v54  ;;  %v8651_v21 = vadd.f32 %v3289_v40, %v3236_v50  ;;  %v5874_v50 = vld [vmem:[%s9948_s1 + $0x508] sm:$0xf]  ;;  %v6623_v40 = vld [vmem:[%s9948_s1 + $0x514] sm:$0xf0] }
 0x2d3   : > { %3394 = vmatmul.bf16.gmra.mxu1 %v8040_v4  ;;  %v10227_v4 = vld [vmem:[#allocation4_spill] sm:$0xff] }
 0x2d4   : > { %v3185_v14 = vadd.f32 %v3184_v11, %v3131_v6  ;;  %3340 = vmatmul.bf16.gmra.mxu0 %v10220_v16  ;;  %3448 = vmatmul.bf16.gmra.mxu2 %v7298_v28  ;;  %v5746_v6 = vld [vmem:[%s9948_s1 + $0x408] sm:$0xf] }
 0x2d5   : > { %3502 = vmatmul.bf16.gmra.mxu3 %v7300_v29  ;;  %v5747_v25 = vor.u32 %v6591_v33, %v5746_v6 }
 0x2d7   : > { %v3238_v53 = vpop.f32.mrf.mxu2  ;;  %3633 = vmatpush.bf16.msrb.mxu2 %v5747_v25 }
 0x2d8   : > { %v3239_v15 = vadd.f32 %v3238_v53, %v3185_v14  ;;  %v3292_v59 = vpop.f32.mrf.mxu3  ;;  %v3186_v18 = vpop.f32.mrf.mxu1 }
 0x2d9   : > { %v3132_v9 = vpop.f32.mrf.mxu0 }
 0x2da   : > { %v3133_v56 = vadd.f32 %v3132_v9, %v8401_v10  ;;  %v8658_v54 = vadd.f32 %v3292_v59, %v3239_v15  ;;  %v6527_v10 = vld [vmem:[%s9948_s1 + $0x214] sm:$0xf0]  ;;  %v5875_v15 = vor.u32 %v6623_v40, %v5874_v50  ;;  %v5618_v59 = vld [vmem:[%s9948_s1 + $0x308] sm:$0xf] }
 0x2db   : > { %v5491_v53 = vor.u32 %v6527_v10, %v5490_v44  ;;  %v6559_v9 = vld [vmem:[%s9948_s1 + $0x314] sm:$0xf0]  ;;  %v10221_v44 = vld [vmem:[#allocation66_spill] sm:$0xff] }
 0x2dc   : > { %v3187_v3 = vadd.f32 %v3186_v18, %v3133_v56  ;;  %v5619_v6 = vor.u32 %v6559_v9, %v5618_v59  ;;  %3687 = vmatpush.bf16.msrb.mxu3 %v5875_v15  ;;  %v6370_v9 = vld [vmem:[%s9948_s1 + $0x8e8] sm:$0xf] }
 0x2dd   : > { %3525 = vmatpush.bf16.msrb.mxu0 %v5491_v53 }
 0x2de   : > { %3579 = vmatpush.bf16.msrb.mxu1 %v5619_v6 }
 0x2df   : > { %v3240_v30 = vpop.f32.mrf.mxu2 }
 0x2e0   : > { %v3241_v32 = vadd.f32 %v3240_v30, %v3187_v3  ;;  %v3294_v11 = vpop.f32.mrf.mxu3  ;;  %v3189_v18 = vpop.f32.mrf.mxu1 }
 0x2e1   : > { %v3135_v14 = vpop.f32.mrf.mxu0 }
 0x2e2   : > { %v3136_v56 = vadd.f32 %v3135_v14, %v8428_v42  ;;  %v8685_v33 = vadd.f32 %v3294_v11, %v3241_v32  ;;  %v4382_v42 = vld [vmem:[%s9949_s2] sm:$0xf] }
 0x2e3   : > { %3399 = vmatmul.bf16.gmra.mxu1 %v8078_v7  ;;  %v4464_v11 = vld [vmem:[%s9950_s3] sm:$0xf]  ;;  %v8700_v53 = vperm.slane %v4382_v42, 0 }
 0x2e4   : > { %v3190_v3 = vadd.f32 %v3189_v18, %v3136_v56  ;;  %3345 = vmatmul.bf16.gmra.mxu0 %v10221_v44  ;;  %3453 = vmatmul.bf16.gmra.mxu2 %v7342_v0  ;;  %v8702_v59 = vperm.slane %v4464_v11, 0  ;;  %v6114_v56 = vld [vmem:[%s9948_s1 + $0x6e8] sm:$0xf]  ;;  %v8731_v0 = vperm.slane %v4382_v42, 1  ;;  %v10223_v42 = vld [vmem:[#allocation76_spill] sm:$0xff] }
 0x2e5   : > { %3507 = vmatmul.bf16.gmra.mxu3 %v7344_v1  ;;  %v4392_v18 = vmul.f32 %v8700_v53, %v8119_v47  ;;  %v6242_v47 = vld [vmem:[%s9948_s1 + $0x7e8] sm:$0xf] }
 0x2e7   : > { %v3243_v30 = vpop.f32.mrf.mxu2 }
 0x2e8   : > { %v3244_v25 = vadd.f32 %v3243_v30, %v3190_v3  ;;  %v3297_v10 = vpop.f32.mrf.mxu3  ;;  %v3191_v32 = vpop.f32.mrf.mxu1  ;;  %v6683_v30 = vld [vmem:[%s9948_s1 + $0x6f4] sm:$0xf0] }
 0x2e9   : > { %v3137_v50 = vpop.f32.mrf.mxu0  ;;  %v6115_v1 = vor.u32 %v6683_v30, %v6114_v56  ;;  %v4474_v56 = vadd.f32 %v8702_v59, %v4392_v18  ;;  %v8736_v30 = vperm.slane %v4464_v11, 1 }
 0x2ea   : > { %v3138_v40 = vadd.f32 %v3137_v50, %v8437_v55  ;;  %v8698_v14 = vadd.f32 %v3297_v10, %v3244_v25  ;;  %v6747_v55 = vld [vmem:[%s9948_s1 + $0x8f4] sm:$0xf0]  ;;  %v6489_v25 = vld [vmem:[%s9948_s1 + $0xec] sm:$0xf]  ;;  %v5348_v10 = vld [vmem:[%s9948_s1 + $0xf8] sm:$0xf0] }
 0x2eb   : > { %v6371_v3 = vor.u32 %v6747_v55, %v6370_v9  ;;  %v5351_v29 = vor.u32 %v6489_v25, %v5348_v10  ;;  %v6715_v9 = vld [vmem:[%s9948_s1 + $0x7f4] sm:$0xf0]  ;;  %3734 = vmatpush.bf16.msra.mxu0 %v6115_v1  ;;  %v10222_v25 = vld [vmem:[#allocation70_spill] sm:$0xff]  ;;  %v10225_v1 = vld [vmem:[#allocation32_spill] sm:$0xff]  ;;  %vm4546_vm0 = vcmp.ge.f32.partialorder %v4474_v56, 0.0 }
 0x2ec   : > { %v3192_v15 = vadd.f32 %v3191_v32, %v3138_v40  ;;  %v6243_v7 = vor.u32 %v6715_v9, %v6242_v47 }
 0x2ed   : > { %3842 = vmatpush.bf16.msra.mxu2 %v6371_v3  ;;  %3896 = vmatpush.bf16.msra.mxu3 %v5351_v29  ;;  %v10224_v3 = vld [vmem:[#allocation31_spill] sm:$0xff]  ;;  %v4618_v29 = vmul.f32 0.01, %v4474_v56 }
 0x2ee   : > { %3788 = vmatpush.bf16.msra.mxu1 %v6243_v7 }
 0x2ef   : > { %v3245_v6 = vpop.f32.mrf.mxu2  ;;  %v4690_v9 = vsel %vm4546_vm0, %v4474_v56, %v4618_v29  ;;  %v6098_v56 = vld [vmem:[%s9948_s1 + $0x6c8] sm:$0xf]  ;;  %v10226_v29 = vld [vmem:[#allocation77_spill] sm:$0xff] }
 0x2f0   : > { %v3246_v50 = vadd.f32 %v3245_v6, %v3192_v15  ;;  %v3299_v40 = vpop.f32.mrf.mxu3  ;;  %v3365_v41 = vpop.f32.mrf.mxu1 }
 0x2f1   : > { %v3311_v32 = vpop.f32.mrf.mxu0 }
 0x2f2   : > { %v3312_v55 = vadd.f32 %v3311_v32, %v8450_v8  ;;  %v8733_v15 = vadd.f32 %v3299_v40, %v3246_v50  ;;  %v4396_v8 = vmul.f32 %v8700_v53, %v8128_v26 }
 0x2f3   : > { %3404 = vmatmul.bf16.gmra.mxu1 %v10223_v42 }
 0x2f4   : > { %v3366_v6 = vadd.f32 %v3365_v41, %v3312_v55  ;;  %3350 = vmatmul.bf16.gmra.mxu0 %v10222_v25  ;;  %3458 = vmatmul.bf16.gmra.mxu2 %v10224_v3  ;;  %v4478_v11 = vadd.f32 %v8702_v59, %v4396_v8 }
 0x2f5   : > { %3512 = vmatmul.bf16.gmra.mxu3 %v10225_v1 }
 0x2f6   : > { %v4393_v10 = vmul.f32 %v8731_v0, %v3366_v6  ;;  %vm4550_vm2 = vcmp.ge.f32.partialorder %v4478_v11, 0.0 }
 0x2f7   : > { %v3419_v41 = vpop.f32.mrf.mxu2 }
 0x2f8   : > { %v4475_v18 = vadd.f32 %v8736_v30, %v4393_v10  ;;  %v3473_v7 = vpop.f32.mrf.mxu3  ;;  %v3367_v47 = vpop.f32.mrf.mxu1  ;;  %v4622_v10 = vmul.f32 0.01, %v4478_v11 }
 0x2f9   : > { %v3313_v50 = vpop.f32.mrf.mxu0  ;;  %v8748_v40 = vadd.f32 %v3473_v7, %v3419_v41  ;;  %v6354_v41 = vld [vmem:[%s9948_s1 + $0x8c8] sm:$0xf] }
 0x2fa   : > { %vm4547_vm1 = vcmp.ge.f32.partialorder %v4475_v18, 0.0  ;;  %v4619_v26 = vmul.f32 0.01, %v4475_v18  ;;  %v3314_v32 = vadd.f32 %v3313_v50, %v8471_v45  ;;  %v6743_v45 = vld [vmem:[%s9948_s1 + $0x8d4] sm:$0xf0]  ;;  %v4694_v42 = vsel %vm4550_vm2, %v4478_v11, %v4622_v10  ;;  %v10231_v10 = vld [vmem:[#allocation78_spill] sm:$0xff] }
 0x2fc   : > { %v4691_v55 = vsel %vm4547_vm1, %v4475_v18, %v4619_v26  ;;  %v3368_v6 = vadd.f32 %v3367_v47, %v3314_v32  ;;  %v4400_v18 = vmul.f32 %v8700_v53, %v10226_v29  ;;  %v6355_v26 = vor.u32 %v6743_v45, %v6354_v41  ;;  %v6679_v32 = vld [vmem:[%s9948_s1 + $0x6d4] sm:$0xf0]  ;;  %v6485_v47 = vld [vmem:[%s9948_s1 + $0xcc] sm:$0xf] }
 0x2fd   : > { %v4762_v8 = vpack.c.bf16 %v4691_v55, %v4690_v9  ;;  %v5332_v9 = vld [vmem:[%s9948_s1 + $0xd8] sm:$0xf0] }
 0x2fe   : > { %v4397_v1 = vmul.f32 %v8731_v0, %v3368_v6  ;;  %v5335_v29 = vor.u32 %v6485_v47, %v5332_v9  ;;  %3843 = vmatpush.bf16.msra.mxu2 %v6355_v26  ;;  %v4482_v25 = vadd.f32 %v8702_v59, %v4400_v18  ;;  %v10229_v47 = vld [vmem:[#allocation35_spill] sm:$0xff]  ;;  %v10230_v9 = vld [vmem:[#allocation36_spill] sm:$0xff] }
 0x2ff   : > { %4798 = vst [vmem:[%s8754_s11] sm:$0xff] %v4762_v8  ;;  %v3421_v50 = vpop.f32.mrf.mxu2  ;;  %v6099_v8 = vor.u32 %v6679_v32, %v6098_v56  ;;  %v10228_v32 = vld [vmem:[#allocation5_spill] sm:$0xff] }
 0x300   : > { %v4479_v7 = vadd.f32 %v8736_v30, %v4397_v1  ;;  %v3475_v55 = vpop.f32.mrf.mxu3  ;;  %v3370_v3 = vpop.f32.mrf.mxu1  ;;  %3897 = vmatpush.bf16.msra.mxu3 %v5335_v29  ;;  %v4626_v11 = vmul.f32 0.01, %v4482_v25  ;;  %vm4554_vm4 = vcmp.ge.f32.partialorder %v4482_v25, 0.0 }
 0x301   : > { %v3316_v6 = vpop.f32.mrf.mxu0  ;;  %v8779_v41 = vadd.f32 %v3475_v55, %v3421_v50  ;;  %3735 = vmatpush.bf16.msra.mxu0 %v6099_v8 }
 0x302   : > { %vm4551_vm3 = vcmp.ge.f32.partialorder %v4479_v7, 0.0  ;;  %v4623_v1 = vmul.f32 0.01, %v4479_v7  ;;  %v3317_v45 = vadd.f32 %v3316_v6, %v8478_v38  ;;  %v6226_v38 = vld [vmem:[%s9948_s1 + $0x7c8] sm:$0xf] }
 0x303   : > { %3580 = vmatmul.bf16.vlgmr.msrb.gmra.mxu1 %v10228_v32  ;;  %v10236_v32 = vld [vmem:[#allocation40_spill] sm:$0xff] }
 0x304   : > { %v4695_v44 = vsel %vm4551_vm3, %v4479_v7, %v4623_v1  ;;  %v3371_v28 = vadd.f32 %v3370_v3, %v3317_v45  ;;  %3526 = vmatmul.bf16.vlgmr.msrb.gmra.mxu0 %v10227_v4  ;;  %3634 = vmatmul.bf16.vlgmr.msrb.gmra.mxu2 %v10229_v47  ;;  %v6711_v3 = vld [vmem:[%s9948_s1 + $0x7d4] sm:$0xf0]  ;;  %v4698_v1 = vsel %vm4554_vm4, %v4482_v25, %v4626_v11 }
 0x305   : > { %v4764_v56 = vpack.c.bf16 %v4695_v44, %v4694_v42  ;;  %3688 = vmatmul.bf16.vlgmr.msrb.gmra.mxu3 %v10230_v9  ;;  %v4404_v44 = vmul.f32 %v8700_v53, %v10231_v10  ;;  %v6227_v7 = vor.u32 %v6711_v3, %v6226_v38 }
 0x306   : > { %v4401_v50 = vmul.f32 %v8731_v0, %v3371_v28 }
 0x307   : > { %4800 = vst [vmem:[%s8754_s11 + $0x10] sm:$0xff] %v4764_v56  ;;  %v3424_v18 = vpop.f32.mrf.mxu2  ;;  %3789 = vmatpush.bf16.msra.mxu1 %v6227_v7  ;;  %v4486_v45 = vadd.f32 %v8702_v59, %v4404_v44 }
 0x308   : > { %v4483_v42 = vadd.f32 %v8736_v30, %v4401_v50  ;;  %v3478_v28 = vpop.f32.mrf.mxu3  ;;  %v3372_v29 = vpop.f32.mrf.mxu1  ;;  %v10232_v50 = vld [vmem:[#allocation79_spill] sm:$0xff] }
 0x309   : > { %v3318_v26 = vpop.f32.mrf.mxu0  ;;  %v8798_v6 = vadd.f32 %v3478_v28, %v3424_v18  ;;  %v4408_v38 = vmul.f32 %v8700_v53, %v10232_v50  ;;  %v6338_v18 = vld [vmem:[%s9948_s1 + $0x8a8] sm:$0xf]  ;;  %v4630_v25 = vmul.f32 0.01, %v4486_v45  ;;  %vm4558_vm6 = vcmp.ge.f32.partialorder %v4486_v45, 0.0 }
 0x30a   : > { %vm4555_vm5 = vcmp.ge.f32.partialorder %v4483_v42, 0.0  ;;  %v4627_v55 = vmul.f32 0.01, %v4483_v42  ;;  %v3319_v8 = vadd.f32 %v3318_v26, %v8505_v31  ;;  %v6739_v31 = vld [vmem:[%s9948_s1 + $0x8b4] sm:$0xf0] }
 0x30b   : > { %v4490_v7 = vadd.f32 %v8702_v59, %v4408_v38  ;;  %v10235_v38 = vld [vmem:[#allocation39_spill] sm:$0xff] }
 0x30c   : > { %v4699_v56 = vsel %vm4555_vm5, %v4483_v42, %v4627_v55  ;;  %v3373_v10 = vadd.f32 %v3372_v29, %v3319_v8  ;;  %v6339_v42 = vor.u32 %v6739_v31, %v6338_v18  ;;  %v10234_v18 = vld [vmem:[#allocation8_spill] sm:$0xff] }
 0x30d   : > { %v4766_v3 = vpack.c.bf16 %v4699_v56, %v4698_v1  ;;  %v4702_v56 = vsel %vm4558_vm6, %v4486_v45, %v4630_v25  ;;  %v4634_v31 = vmul.f32 0.01, %v4490_v7  ;;  %v6675_v45 = vld [vmem:[%s9948_s1 + $0x6b4] sm:$0xf0]  ;;  %v10237_v25 = vld [vmem:[#allocation80_spill] sm:$0xff]  ;;  %vm4562_vm8 = vcmp.ge.f32.partialorder %v4490_v7, 0.0 }
 0x30e   : > { %v4405_v9 = vmul.f32 %v8731_v0, %v3373_v10  ;;  %3844 = vmatpush.bf16.msra.mxu2 %v6339_v42 }
 0x30f   : > { %4802 = vst [vmem:[%s8754_s11 + $0x20] sm:$0xff] %v4766_v3  ;;  %v3426_v44 = vpop.f32.mrf.mxu2 }
 0x310   : > { %v4487_v11 = vadd.f32 %v8736_v30, %v4405_v9  ;;  %v3480_v28 = vpop.f32.mrf.mxu3  ;;  %v3375_v1 = vpop.f32.mrf.mxu1  ;;  %v10233_v9 = vld [vmem:[#allocation7_spill] sm:$0xff] }
 0x311   : > { %v3321_v26 = vpop.f32.mrf.mxu0  ;;  %v8814_v8 = vadd.f32 %v3480_v28, %v3426_v44 }
 0x312   : > { %vm4559_vm7 = vcmp.ge.f32.partialorder %v4487_v11, 0.0  ;;  %v4631_v55 = vmul.f32 0.01, %v4487_v11  ;;  %v3322_v29 = vadd.f32 %v3321_v26, %v8512_v37  ;;  %v6082_v37 = vld [vmem:[%s9948_s1 + $0x6a8] sm:$0xf] }
 0x313   : > { %3585 = vmatmul.bf16.gmra.mxu1 %v10234_v18  ;;  %v6083_v28 = vor.u32 %v6675_v45, %v6082_v37  ;;  %v6481_v26 = vld [vmem:[%s9948_s1 + $0xac] sm:$0xf] }
 0x314   : > { %v4703_v10 = vsel %vm4559_vm7, %v4487_v11, %v4631_v55  ;;  %v3376_v50 = vadd.f32 %v3375_v1, %v3322_v29  ;;  %3531 = vmatmul.bf16.gmra.mxu0 %v10233_v9  ;;  %3639 = vmatmul.bf16.gmra.mxu2 %v10235_v38  ;;  %v4412_v11 = vmul.f32 %v8700_v53, %v10237_v25  ;;  %v5316_v55 = vld [vmem:[%s9948_s1 + $0xb8] sm:$0xf0]  ;;  %v6210_v29 = vld [vmem:[%s9948_s1 + $0x7a8] sm:$0xf] }
 0x315   : > { %v4768_v3 = vpack.c.bf16 %v4703_v10, %v4702_v56  ;;  %3693 = vmatmul.bf16.gmra.mxu3 %v10236_v32  ;;  %v5319_v10 = vor.u32 %v6481_v26, %v5316_v55  ;;  %3736 = vmatpush.bf16.msra.mxu0 %v6083_v28  ;;  %v4706_v32 = vsel %vm4562_vm8, %v4490_v7, %v4634_v31  ;;  %v10238_v55 = vld [vmem:[#allocation81_spill] sm:$0xff] }
 0x316   : > { %v4409_v47 = vmul.f32 %v8731_v0, %v3376_v50  ;;  %v4494_v38 = vadd.f32 %v8702_v59, %v4412_v11  ;;  %v4416_v9 = vmul.f32 %v8700_v53, %v10238_v55 }
 0x317   : > { %4804 = vst [vmem:[%s8754_s11 + $0x30] sm:$0xff] %v4768_v3  ;;  %v3429_v42 = vpop.f32.mrf.mxu2  ;;  %3898 = vmatpush.bf16.msra.mxu3 %v5319_v10  ;;  %v10239_v10 = vld [vmem:[#allocation10_spill] sm:$0xff] }
 0x318   : > { %v4491_v44 = vadd.f32 %v8736_v30, %v4409_v47  ;;  %v3483_v1 = vpop.f32.mrf.mxu3  ;;  %v6707_v47 = vld [vmem:[%s9948_s1 + $0x7b4] sm:$0xf0]  ;;  %v3377_v45 = vpop.f32.mrf.mxu1  ;;  %vm4566_vm10 = vcmp.ge.f32.partialorder %v4494_v38, 0.0  ;;  %v4498_v28 = vadd.f32 %v8702_v59, %v4416_v9 }
 0x319   : > { %v3323_v56 = vpop.f32.mrf.mxu0  ;;  %v8844_v3 = vadd.f32 %v3483_v1, %v3429_v42  ;;  %v6211_v25 = vor.u32 %v6707_v47, %v6210_v29  ;;  %v4638_v42 = vmul.f32 0.01, %v4494_v38  ;;  %v10240_v47 = vld [vmem:[#allocation11_spill] sm:$0xff] }
 0x31a   : > { %vm4563_vm9 = vcmp.ge.f32.partialorder %v4491_v44, 0.0  ;;  %v4635_v50 = vmul.f32 0.01, %v4491_v44  ;;  %v3324_v37 = vadd.f32 %v3323_v56, %v8539_v49  ;;  %v4642_v9 = vmul.f32 0.01, %v4498_v28 }
 0x31b   : > { %3790 = vmatpush.bf16.msra.mxu1 %v6211_v25  ;;  %v4710_v29 = vsel %vm4566_vm10, %v4494_v38, %v4638_v42  ;;  %vm4570_vm12 = vcmp.ge.f32.partialorder %v4498_v28, 0.0  ;;  %v6735_v38 = vld [vmem:[%s9948_s1 + $0x894] sm:$0xf0]  ;;  %v10243_v25 = vld [vmem:[#allocation82_spill] sm:$0xff] }
 0x31c   : > { %v4707_v18 = vsel %vm4563_vm9, %v4491_v44, %v4635_v50  ;;  %v3378_v26 = vadd.f32 %v3377_v45, %v3324_v37  ;;  %v10241_v50 = vld [vmem:[#allocation43_spill] sm:$0xff]  ;;  %v10242_v45 = vld [vmem:[#allocation44_spill] sm:$0xff] }
 0x31d   : > { %v4770_v4 = vpack.c.bf16 %v4707_v18, %v4706_v32 }
 0x31e   : > { %v4413_v16 = vmul.f32 %v8731_v0, %v3378_v26  ;;  %v4420_v26 = vmul.f32 %v8700_v53, %v10243_v25 }
 0x31f   : > { %4806 = vst [vmem:[%s8754_s11 + $0x40] sm:$0xff] %v4770_v4  ;;  %v3431_v1 = vpop.f32.mrf.mxu2 }
 0x320   : > { %v4495_v49 = vadd.f32 %v8736_v30, %v4413_v16  ;;  %v3485_v7 = vpop.f32.mrf.mxu3  ;;  %v3380_v18 = vpop.f32.mrf.mxu1 }
 0x321   : > { %v3326_v31 = vpop.f32.mrf.mxu0  ;;  %v8854_v44 = vadd.f32 %v3485_v7, %v3431_v1  ;;  %v6066_v1 = vld [vmem:[%s9948_s1 + $0x688] sm:$0xf]  ;;  %v6671_v7 = vld [vmem:[%s9948_s1 + $0x694] sm:$0xf0] }
 0x322   : > { %vm4567_vm11 = vcmp.ge.f32.partialorder %v4495_v49, 0.0  ;;  %v4639_v11 = vmul.f32 0.01, %v4495_v49  ;;  %v3327_v32 = vadd.f32 %v3326_v31, %v8546_v63  ;;  %v6322_v63 = vld [vmem:[%s9948_s1 + $0x888] sm:$0xf] }
 0x323   : > { %3590 = vmatmul.bf16.gmra.mxu1 %v10240_v47  ;;  %v6477_v31 = vld [vmem:[%s9948_s1 + $0x8c] sm:$0xf] }
 0x324   : > { %v4711_v56 = vsel %vm4567_vm11, %v4495_v49, %v4639_v11  ;;  %v3381_v4 = vadd.f32 %v3380_v18, %v3327_v32  ;;  %3536 = vmatmul.bf16.gmra.mxu0 %v10239_v10  ;;  %3644 = vmatmul.bf16.gmra.mxu2 %v10241_v50  ;;  %v6323_v49 = vor.u32 %v6735_v38, %v6322_v63  ;;  %v10244_v10 = vld [vmem:[#allocation83_spill] sm:$0xff] }
 0x325   : > { %v4772_v16 = vpack.c.bf16 %v4711_v56, %v4710_v29  ;;  %3698 = vmatmul.bf16.gmra.mxu3 %v10242_v45  ;;  %v6067_v18 = vor.u32 %v6671_v7, %v6066_v1  ;;  %v5300_v29 = vld [vmem:[%s9948_s1 + $0x98] sm:$0xf0]  ;;  %v6194_v56 = vld [vmem:[%s9948_s1 + $0x788] sm:$0xf]  ;;  %v4714_v7 = vsel %vm4570_vm12, %v4498_v28, %v4642_v9  ;;  %v4502_v45 = vadd.f32 %v8702_v59, %v4420_v26 }
 0x326   : > { %v4417_v37 = vmul.f32 %v8731_v0, %v3381_v4  ;;  %v6703_v4 = vld [vmem:[%s9948_s1 + $0x794] sm:$0xf0]  ;;  %3845 = vmatpush.bf16.msra.mxu2 %v6323_v49  ;;  %v5303_v25 = vor.u32 %v6477_v31, %v5300_v29  ;;  %v4424_v5 = vmul.f32 %v8700_v53, %v10244_v10 }
 0x327   : > { %4808 = vst [vmem:[%s8754_s11 + $0x50] sm:$0xff] %v4772_v16  ;;  %v3434_v42 = vpop.f32.mrf.mxu2  ;;  %3737 = vmatpush.bf16.msra.mxu0 %v6067_v18  ;;  %v6195_v1 = vor.u32 %v6703_v4, %v6194_v56  ;;  %vm4574_vm14 = vcmp.ge.f32.partialorder %v4502_v45, 0.0  ;;  %v10245_v18 = vld [vmem:[#allocation13_spill] sm:$0xff]  ;;  %v10246_v56 = vld [vmem:[#allocation14_spill] sm:$0xff]  ;;  %v10247_v4 = vld [vmem:[#allocation47_spill] sm:$0xff] }
 0x328   : > { %v4499_v55 = vadd.f32 %v8736_v30, %v4417_v37  ;;  %v3488_v11 = vpop.f32.mrf.mxu3  ;;  %v3382_v38 = vpop.f32.mrf.mxu1  ;;  %3899 = vmatpush.bf16.msra.mxu3 %v5303_v25  ;;  %v4506_v28 = vadd.f32 %v8702_v59, %v4424_v5 }
 0x329   : > { %v3328_v32 = vpop.f32.mrf.mxu0  ;;  %v8890_v37 = vadd.f32 %v3488_v11, %v3434_v42  ;;  %3791 = vmatpush.bf16.msra.mxu1 %v6195_v1 }
 0x32a   : > { %vm4571_vm13 = vcmp.ge.f32.partialorder %v4499_v55, 0.0  ;;  %v4643_v16 = vmul.f32 0.01, %v4499_v55  ;;  %v3329_v63 = vadd.f32 %v3328_v32, %v8567_v17  ;;  %v4646_v17 = vmul.f32 0.01, %v4502_v45 }
 0x32b   : > { %v4650_v5 = vmul.f32 0.01, %v4506_v28  ;;  %vm4578_vm0 = vcmp.ge.f32.partialorder %v4506_v28, 0.0 }
 0x32c   : > { %v4715_v50 = vsel %vm4571_vm13, %v4499_v55, %v4643_v16  ;;  %v3383_v47 = vadd.f32 %v3382_v38, %v3329_v63  ;;  %v4718_v32 = vsel %vm4574_vm14, %v4502_v45, %v4646_v17  ;;  %v10248_v63 = vld [vmem:[#allocation48_spill] sm:$0xff]  ;;  %v6731_v45 = vld [vmem:[%s9948_s1 + $0x874] sm:$0xf0]  ;;  %v6050_v17 = vld [vmem:[%s9948_s1 + $0x668] sm:$0xf] }
 0x32d   : > { %v4774_v43 = vpack.c.bf16 %v4715_v50, %v4714_v7  ;;  %v10249_v38 = vld [vmem:[#allocation84_spill] sm:$0xff] }
 0x32e   : > { %v4421_v42 = vmul.f32 %v8731_v0, %v3383_v47  ;;  %v4428_v25 = vmul.f32 %v8700_v53, %v10249_v38  ;;  %v4722_v38 = vsel %vm4578_vm0, %v4506_v28, %v4650_v5 }
 0x32f   : > { %4810 = vst [vmem:[%s8754_s11 + $0x60] sm:$0xff] %v4774_v43  ;;  %v3436_v31 = vpop.f32.mrf.mxu2 }
 0x330   : > { %v4503_v49 = vadd.f32 %v8736_v30, %v4421_v42  ;;  %v3490_v9 = vpop.f32.mrf.mxu3  ;;  %v3385_v50 = vpop.f32.mrf.mxu1 }
 0x331   : > { %v3331_v26 = vpop.f32.mrf.mxu0  ;;  %v8901_v11 = vadd.f32 %v3490_v9, %v3436_v31  ;;  %v6473_v31 = vld [vmem:[%s9948_s1 + $0x6c] sm:$0xf] }
 0x332   : > { %vm4575_vm15 = vcmp.ge.f32.partialorder %v4503_v49, 0.0  ;;  %v4647_v55 = vmul.f32 0.01, %v4503_v49  ;;  %v3332_v10 = vadd.f32 %v3331_v26, %v8580_v2  ;;  %v6306_v2 = vld [vmem:[%s9948_s1 + $0x868] sm:$0xf] }
 0x333   : > { %3595 = vmatmul.bf16.gmra.mxu1 %v10246_v56  ;;  %v6307_v42 = vor.u32 %v6731_v45, %v6306_v2 }
 0x334   : > { %v4719_v47 = vsel %vm4575_vm15, %v4503_v49, %v4647_v55  ;;  %v3386_v43 = vadd.f32 %v3385_v50, %v3332_v10  ;;  %3541 = vmatmul.bf16.gmra.mxu0 %v10245_v18  ;;  %3649 = vmatmul.bf16.gmra.mxu2 %v10247_v4  ;;  %v6667_v49 = vld [vmem:[%s9948_s1 + $0x674] sm:$0xf0]  ;;  %v5284_v10 = vld [vmem:[%s9948_s1 + $0x78] sm:$0xf0]  ;;  %v6178_v50 = vld [vmem:[%s9948_s1 + $0x768] sm:$0xf] }
 0x335   : > { %v4776_v29 = vpack.c.bf16 %v4719_v47, %v4718_v32  ;;  %3703 = vmatmul.bf16.gmra.mxu3 %v10248_v63  ;;  %v6051_v55 = vor.u32 %v6667_v49, %v6050_v17  ;;  %v6699_v32 = vld [vmem:[%s9948_s1 + $0x774] sm:$0xf0]  ;;  %3846 = vmatpush.bf16.msra.mxu2 %v6307_v42  ;;  %v5287_v2 = vor.u32 %v6473_v31, %v5284_v10 }
 0x336   : > { %v4425_v16 = vmul.f32 %v8731_v0, %v3386_v43  ;;  %v6179_v45 = vor.u32 %v6699_v32, %v6178_v50  ;;  %v4510_v17 = vadd.f32 %v8702_v59, %v4428_v25  ;;  %v10250_v4 = vld [vmem:[#allocation85_spill] sm:$0xff]  ;;  %v10252_v32 = vld [vmem:[#allocation18_spill] sm:$0xff] }
 0x337   : > { %4812 = vst [vmem:[%s8754_s11 + $0x70] sm:$0xff] %v4776_v29  ;;  %v3439_v7 = vpop.f32.mrf.mxu2  ;;  %3738 = vmatpush.bf16.msra.mxu0 %v6051_v55  ;;  %v4432_v56 = vmul.f32 %v8700_v53, %v10250_v4  ;;  %3900 = vmatpush.bf16.msra.mxu3 %v5287_v2  ;;  %v10251_v10 = vld [vmem:[#allocation17_spill] sm:$0xff] }
 0x338   : > { %v4507_v1 = vadd.f32 %v8736_v30, %v4425_v16  ;;  %v3493_v9 = vpop.f32.mrf.mxu3  ;;  %v3387_v16 = vpop.f32.mrf.mxu1  ;;  %3792 = vmatpush.bf16.msra.mxu1 %v6179_v45  ;;  %vm4582_vm2 = vcmp.ge.f32.partialorder %v4510_v17, 0.0  ;;  %v6727_v2 = vld [vmem:[%s9948_s1 + $0x854] sm:$0xf0]  ;;  %v10255_v45 = vld [vmem:[#allocation86_spill] sm:$0xff] }
 0x339   : > { %v3333_v26 = vpop.f32.mrf.mxu0  ;;  %v8937_v43 = vadd.f32 %v3493_v9, %v3439_v7  ;;  %v4514_v28 = vadd.f32 %v8702_v59, %v4432_v56 }
 0x33a   : > { %vm4579_vm1 = vcmp.ge.f32.partialorder %v4507_v1, 0.0  ;;  %v4651_v47 = vmul.f32 0.01, %v4507_v1  ;;  %v3334_v29 = vadd.f32 %v3333_v26, %v8589_v35  ;;  %v4654_v35 = vmul.f32 0.01, %v4510_v17 }
 0x33b   : > { %v4658_v56 = vmul.f32 0.01, %v4514_v28  ;;  %vm4586_vm4 = vcmp.ge.f32.partialorder %v4514_v28, 0.0 }
 0x33c   : > { %v4723_v49 = vsel %vm4579_vm1, %v4507_v1, %v4651_v47  ;;  %v3388_v63 = vadd.f32 %v3387_v16, %v3334_v29  ;;  %v4726_v55 = vsel %vm4582_vm2, %v4510_v17, %v4654_v35  ;;  %v10253_v47 = vld [vmem:[#allocation51_spill] sm:$0xff]  ;;  %v10254_v16 = vld [vmem:[#allocation52_spill] sm:$0xff] }
 0x33d   : > { %v4778_v18 = vpack.c.bf16 %v4723_v49, %v4722_v38  ;;  %v4436_v38 = vmul.f32 %v8700_v53, %v10255_v45  ;;  %v6034_v35 = vld [vmem:[%s9948_s1 + $0x648] sm:$0xf] }
 0x33e   : > { %v4429_v7 = vmul.f32 %v8731_v0, %v3388_v63 }
 0x33f   : > { %4814 = vst [vmem:[%s8754_s11 + $0x80] sm:$0xff] %v4778_v18  ;;  %v3441_v31 = vpop.f32.mrf.mxu2 }
 0x340   : > { %v4511_v42 = vadd.f32 %v8736_v30, %v4429_v7  ;;  %v3495_v5 = vpop.f32.mrf.mxu3  ;;  %v3390_v26 = vpop.f32.mrf.mxu1 }
 0x341   : > { %v3336_v25 = vpop.f32.mrf.mxu0  ;;  %v8948_v9 = vadd.f32 %v3495_v5, %v3441_v31  ;;  %v6469_v31 = vld [vmem:[%s9948_s1 + $0x4c] sm:$0xf] }
 0x342   : > { %vm4583_vm3 = vcmp.ge.f32.partialorder %v4511_v42, 0.0  ;;  %v4655_v1 = vmul.f32 0.01, %v4511_v42  ;;  %v3337_v4 = vadd.f32 %v3336_v25, %v8614_v13  ;;  %v6290_v13 = vld [vmem:[%s9948_s1 + $0x848] sm:$0xf] }
 0x343   : > { %3600 = vmatmul.bf16.gmra.mxu1 %v10252_v32  ;;  %v6291_v7 = vor.u32 %v6727_v2, %v6290_v13  ;;  %v4518_v13 = vadd.f32 %v8702_v59, %v4436_v38 }
 0x344   : > { %v4727_v63 = vsel %vm4583_vm3, %v4511_v42, %v4655_v1  ;;  %v3391_v18 = vadd.f32 %v3390_v26, %v3337_v4  ;;  %3546 = vmatmul.bf16.gmra.mxu0 %v10251_v10  ;;  %3654 = vmatmul.bf16.gmra.mxu2 %v10253_v47  ;;  %v6663_v42 = vld [vmem:[%s9948_s1 + $0x654] sm:$0xf0]  ;;  %v5268_v4 = vld [vmem:[%s9948_s1 + $0x58] sm:$0xf0] }
 0x345   : > { %v4780_v50 = vpack.c.bf16 %v4727_v63, %v4726_v55  ;;  %3708 = vmatmul.bf16.gmra.mxu3 %v10254_v16  ;;  %v6035_v1 = vor.u32 %v6663_v42, %v6034_v35  ;;  %3847 = vmatpush.bf16.msra.mxu2 %v6291_v7  ;;  %v4662_v7 = vmul.f32 0.01, %v4518_v13  ;;  %vm4590_vm6 = vcmp.ge.f32.partialorder %v4518_v13, 0.0 }
 0x346   : > { %v4433_v29 = vmul.f32 %v8731_v0, %v3391_v18 }
 0x347   : > { %4816 = vst [vmem:[%s8754_s11 + $0x90] sm:$0xff] %v4780_v50  ;;  %v3444_v49 = vpop.f32.mrf.mxu2  ;;  %3739 = vmatpush.bf16.msra.mxu0 %v6035_v1  ;;  %v5271_v50 = vor.u32 %v6469_v31, %v5268_v4  ;;  %v10256_v31 = vld [vmem:[#allocation87_spill] sm:$0xff] }
 0x348   : > { %v4515_v17 = vadd.f32 %v8736_v30, %v4433_v29  ;;  %v3498_v5 = vpop.f32.mrf.mxu3  ;;  %v3392_v18 = vpop.f32.mrf.mxu1  ;;  %v4730_v29 = vsel %vm4586_vm4, %v4514_v28, %v4658_v56  ;;  %v4440_v28 = vmul.f32 %v8700_v53, %v10256_v31  ;;  %v10260_v31 = vld [vmem:[#allocation55_spill] sm:$0xff] }
 0x349   : > { %v3338_v25 = vpop.f32.mrf.mxu0  ;;  %v8978_v55 = vadd.f32 %v3498_v5, %v3444_v49  ;;  %3901 = vmatpush.bf16.msra.mxu3 %v5271_v50  ;;  %v6162_v49 = vld [vmem:[%s9948_s1 + $0x748] sm:$0xf] }
 0x34a   : > { %vm4587_vm5 = vcmp.ge.f32.partialorder %v4515_v17, 0.0  ;;  %v4659_v26 = vmul.f32 0.01, %v4515_v17  ;;  %v3339_v63 = vadd.f32 %v3338_v25, %v8617_v58  ;;  %v6695_v58 = vld [vmem:[%s9948_s1 + $0x754] sm:$0xf0]  ;;  %v4522_v50 = vadd.f32 %v8702_v59, %v4440_v28 }
 0x34c   : > { %v4731_v2 = vsel %vm4587_vm5, %v4515_v17, %v4659_v26  ;;  %v3393_v45 = vadd.f32 %v3392_v18, %v3339_v63  ;;  %v6163_v17 = vor.u32 %v6695_v58, %v6162_v49  ;;  %v4734_v18 = vsel %vm4590_vm6, %v4518_v13, %v4662_v7  ;;  %v10259_v58 = vld [vmem:[#allocation22_spill] sm:$0xff]  ;;  %v6274_v13 = vld [vmem:[%s9948_s1 + $0x828] sm:$0xf]  ;;  %v6723_v7 = vld [vmem:[%s9948_s1 + $0x834] sm:$0xf0] }
 0x34d   : > { %v4782_v35 = vpack.c.bf16 %v4731_v2, %v4730_v29  ;;  %v4666_v28 = vmul.f32 0.01, %v4522_v50  ;;  %vm4594_vm8 = vcmp.ge.f32.partialorder %v4522_v50, 0.0 }
 0x34e   : > { %v4437_v42 = vmul.f32 %v8731_v0, %v3393_v45  ;;  %3793 = vmatpush.bf16.msra.mxu1 %v6163_v17  ;;  %v10257_v45 = vld [vmem:[#allocation21_spill] sm:$0xff] }
 0x34f   : > { %4818 = vst [vmem:[%s8754_s11 + $0xa0] sm:$0xff] %v4782_v35  ;;  %v3446_v38 = vpop.f32.mrf.mxu2  ;;  %v10258_v35 = vld [vmem:[#allocation88_spill] sm:$0xff] }
 0x350   : > { %v4519_v56 = vadd.f32 %v8736_v30, %v4437_v42  ;;  %v3500_v5 = vpop.f32.mrf.mxu3  ;;  %v3395_v63 = vpop.f32.mrf.mxu1  ;;  %v4444_v42 = vmul.f32 %v8700_v53, %v10258_v35  ;;  %v4738_v35 = vsel %vm4594_vm8, %v4522_v50, %v4666_v28 }
 0x351   : > { %v3341_v25 = vpop.f32.mrf.mxu0  ;;  %v8993_v4 = vadd.f32 %v3500_v5, %v3446_v38  ;;  %v6275_v5 = vor.u32 %v6723_v7, %v6274_v13 }
 0x352   : > { %vm4591_vm7 = vcmp.ge.f32.partialorder %v4519_v56, 0.0  ;;  %v4663_v1 = vmul.f32 0.01, %v4519_v56  ;;  %v3342_v26 = vadd.f32 %v3341_v25, %v8648_v22  ;;  %v10261_v22 = vld [vmem:[#allocation56_spill] sm:$0xff]  ;;  %v4526_v25 = vadd.f32 %v8702_v59, %v4444_v42 }
 0x353   : > { %3605 = vmatmul.bf16.gmra.mxu1 %v10259_v58  ;;  %3848 = vmatpush.bf16.msra.mxu2 %v6275_v5  ;;  %v6465_v5 = vld [vmem:[%s9948_s1 + $0x2c] sm:$0xf]  ;;  %v10263_v58 = vld [vmem:[#allocation25_spill] sm:$0xff] }
 0x354   : > { %v4735_v29 = vsel %vm4591_vm7, %v4519_v56, %v4663_v1  ;;  %v3396_v2 = vadd.f32 %v3395_v63, %v3342_v26  ;;  %3551 = vmatmul.bf16.gmra.mxu0 %v10257_v45  ;;  %3659 = vmatmul.bf16.gmra.mxu2 %v10260_v31  ;;  %v4670_v16 = vmul.f32 0.01, %v4526_v25  ;;  %vm4598_vm10 = vcmp.ge.f32.partialorder %v4526_v25, 0.0  ;;  %v10265_v45 = vld [vmem:[#allocation59_spill] sm:$0xff] }
 0x355   : > { %v4784_v49 = vpack.c.bf16 %v4735_v29, %v4734_v18  ;;  %3713 = vmatmul.bf16.gmra.mxu3 %v10261_v22 }
 0x356   : > { %v4441_v38 = vmul.f32 %v8731_v0, %v3396_v2 }
 0x357   : > { %4820 = vst [vmem:[%s8754_s11 + $0xb0] sm:$0xff] %v4784_v49  ;;  %v3449_v17 = vpop.f32.mrf.mxu2 }
 0x358   : > { %v4523_v56 = vadd.f32 %v8736_v30, %v4441_v38  ;;  %v3503_v1 = vpop.f32.mrf.mxu3  ;;  %v3397_v2 = vpop.f32.mrf.mxu1  ;;  %v10262_v38 = vld [vmem:[#allocation89_spill] sm:$0xff] }
 0x359   : > { %v3343_v26 = vpop.f32.mrf.mxu0  ;;  %v9013_v18 = vadd.f32 %v3503_v1, %v3449_v17  ;;  %v4448_v13 = vmul.f32 %v8700_v53, %v10262_v38  ;;  %v6018_v17 = vld [vmem:[%s9948_s1 + $0x628] sm:$0xf] }
 0x35a   : > { %vm4595_vm9 = vcmp.ge.f32.partialorder %v4523_v56, 0.0  ;;  %v4667_v63 = vmul.f32 0.01, %v4523_v56  ;;  %v3344_v29 = vadd.f32 %v3343_v26, %v8651_v21  ;;  %v6659_v21 = vld [vmem:[%s9948_s1 + $0x634] sm:$0xf0] }
 0x35b   : > { %v6146_v1 = vld [vmem:[%s9948_s1 + $0x728] sm:$0xf]  ;;  %v4530_v26 = vadd.f32 %v8702_v59, %v4448_v13 }
 0x35c   : > { %v4739_v49 = vsel %vm4595_vm9, %v4523_v56, %v4667_v63  ;;  %v3398_v22 = vadd.f32 %v3397_v2, %v3344_v29  ;;  %v6019_v56 = vor.u32 %v6659_v21, %v6018_v17  ;;  %v4742_v21 = vsel %vm4598_vm10, %v4526_v25, %v4670_v16  ;;  %v6719_v16 = vld [vmem:[%s9948_s1 + $0x814] sm:$0xf0] }
 0x35d   : > { %v4786_v7 = vpack.c.bf16 %v4739_v49, %v4738_v35  ;;  %v6691_v35 = vld [vmem:[%s9948_s1 + $0x734] sm:$0xf0]  ;;  %v4674_v47 = vmul.f32 0.01, %v4530_v26  ;;  %vm4602_vm12 = vcmp.ge.f32.partialorder %v4530_v26, 0.0  ;;  %v4452_v25 = vmul.f32 %v8700_v53, %v8394_v34 }
 0x35e   : > { %v4445_v42 = vmul.f32 %v8731_v0, %v3398_v22  ;;  %v5252_v22 = vld [vmem:[%s9948_s1 + $0x38] sm:$0xf0]  ;;  %3740 = vmatpush.bf16.msra.mxu0 %v6019_v56  ;;  %v6147_v17 = vor.u32 %v6691_v35, %v6146_v1  ;;  %v6002_v1 = vld [vmem:[%s9948_s1 + $0x608] sm:$0xf] }
 0x35f   : > { %4822 = vst [vmem:[%s8754_s11 + $0xc0] sm:$0xff] %v4786_v7  ;;  %v3451_v28 = vpop.f32.mrf.mxu2  ;;  %v5255_v2 = vor.u32 %v6465_v5, %v5252_v22  ;;  %v10264_v22 = vld [vmem:[#allocation26_spill] sm:$0xff]  ;;  %v5236_v34 = vld [vmem:[%s9948_s1 + $0x18] sm:$0xf0] }
 0x360   : > { %v4527_v50 = vadd.f32 %v8736_v30, %v4445_v42  ;;  %v3505_v63 = vpop.f32.mrf.mxu3  ;;  %v3400_v42 = vpop.f32.mrf.mxu1  ;;  %3794 = vmatpush.bf16.msra.mxu1 %v6147_v17  ;;  %v6687_v17 = vld [vmem:[%s9948_s1 + $0x714] sm:$0xf0] }
 0x361   : > { %v3346_v29 = vpop.f32.mrf.mxu0  ;;  %v9040_v38 = vadd.f32 %v3505_v63, %v3451_v28  ;;  %3902 = vmatpush.bf16.msra.mxu3 %v5255_v2  ;;  %v10266_v63 = vld [vmem:[#allocation60_spill] sm:$0xff]  ;;  %v6461_v2 = vld [vmem:[%s9948_s1 + $0xc] sm:$0xf] }
 0x362   : > { %vm4599_vm11 = vcmp.ge.f32.partialorder %v4527_v50, 0.0  ;;  %v4671_v49 = vmul.f32 0.01, %v4527_v50  ;;  %v3347_v7 = vadd.f32 %v3346_v29, %v8658_v54  ;;  %v6258_v54 = vld [vmem:[%s9948_s1 + $0x808] sm:$0xf] }
 0x363   : > { %3610 = vmatmul.bf16.gmra.mxu1 %v10264_v22  ;;  %v6655_v29 = vld [vmem:[%s9948_s1 + $0x614] sm:$0xf0]  ;;  %v4456_v22 = vmul.f32 %v8700_v53, %v8399_v60 }
 0x364   : > { %v4743_v13 = vsel %vm4599_vm11, %v4527_v50, %v4671_v49  ;;  %v3401_v31 = vadd.f32 %v3400_v42, %v3347_v7  ;;  %3556 = vmatmul.bf16.gmra.mxu0 %v10263_v58  ;;  %3664 = vmatmul.bf16.gmra.mxu2 %v10265_v45  ;;  %v6003_v7 = vor.u32 %v6655_v29, %v6002_v1  ;;  %v6130_v42 = vld [vmem:[%s9948_s1 + $0x708] sm:$0xf] }
 0x365   : > { %v4788_v5 = vpack.c.bf16 %v4743_v13, %v4742_v21  ;;  %3718 = vmatmul.bf16.gmra.mxu3 %v10266_v63  ;;  %v4746_v1 = vsel %vm4602_vm12, %v4530_v26, %v4674_v47  ;;  %v4534_v29 = vadd.f32 %v8702_v59, %v4452_v25  ;;  %v4538_v47 = vadd.f32 %v8702_v59, %v4456_v22 }
 0x366   : > { %v4449_v28 = vmul.f32 %v8731_v0, %v3401_v31  ;;  %v6259_v31 = vor.u32 %v6719_v16, %v6258_v54  ;;  %3741 = vmatpush.bf16.msra.mxu0 %v6003_v7  ;;  %v5239_v54 = vor.u32 %v6461_v2, %v5236_v34  ;;  %v6131_v16 = vor.u32 %v6687_v17, %v6130_v42  ;;  %v10267_v7 = vld [vmem:[#allocation29_spill] sm:$0xff]  ;;  %v10268_v17 = vld [vmem:[#allocation64_spill] sm:$0xff] }
 0x367   : > { %4824 = vst [vmem:[%s8754_s11 + $0xd0] sm:$0xff] %v4788_v5  ;;  %v3454_v56 = vpop.f32.mrf.mxu2  ;;  %vm4606_vm14 = vcmp.ge.f32.partialorder %v4534_v29, 0.0  ;;  %v4682_v34 = vmul.f32 0.01, %v4538_v47  ;;  %vm4610_vm0 = vcmp.ge.f32.partialorder %v4538_v47, 0.0 }
 0x368   : > { %v4531_v50 = vadd.f32 %v8736_v30, %v4449_v28  ;;  %v3508_v35 = vpop.f32.mrf.mxu3  ;;  %v3402_v28 = vpop.f32.mrf.mxu1  ;;  %3849 = vmatpush.bf16.msra.mxu2 %v6259_v31  ;;  %3903 = vmatpush.bf16.msra.mxu3 %v5239_v54  ;;  %v5476_v54 = vld [vmem:[%s9948_s1 + $0x1f8] sm:$0xf0] }
 0x369   : > { %v3348_v49 = vpop.f32.mrf.mxu0  ;;  %v9076_v13 = vadd.f32 %v3508_v35, %v3454_v56  ;;  %3795 = vmatpush.bf16.msra.mxu1 %v6131_v16  ;;  %v6617_v16 = vld [vmem:[%s9948_s1 + $0x4ec] sm:$0xf] }
 0x36a   : > { %vm4603_vm13 = vcmp.ge.f32.partialorder %v4531_v50, 0.0  ;;  %v4675_v21 = vmul.f32 0.01, %v4531_v50  ;;  %v3349_v5 = vadd.f32 %v3348_v49, %v8685_v33  ;;  %v4678_v33 = vmul.f32 0.01, %v4534_v29 }
 0x36c   : > { %v4747_v63 = vsel %vm4603_vm13, %v4531_v50, %v4675_v21  ;;  %v3403_v45 = vadd.f32 %v3402_v28, %v3349_v5  ;;  %v4750_v49 = vsel %vm4606_vm14, %v4534_v29, %v4678_v33  ;;  %v5732_v21 = vld [vmem:[%s9948_s1 + $0x3f8] sm:$0xf0]  ;;  %v6521_v5 = vld [vmem:[%s9948_s1 + $0x1ec] sm:$0xf] }
 0x36d   : > { %v4790_v58 = vpack.c.bf16 %v4747_v63, %v4746_v1  ;;  %v4460_v1 = vmul.f32 %v8700_v53, %v8426_v39  ;;  %v5479_v33 = vor.u32 %v6521_v5, %v5476_v54  ;;  %v4754_v53 = vsel %vm4610_vm0, %v4538_v47, %v4682_v34 }
 0x36e   : > { %v4453_v56 = vmul.f32 %v8731_v0, %v3403_v45 }
 0x36f   : > { %4826 = vst [vmem:[%s8754_s11 + $0xe0] sm:$0xff] %v4790_v58  ;;  %v3456_v2 = vpop.f32.mrf.mxu2  ;;  %3950 = vmatpush.bf16.msrb.mxu0 %v5479_v33 }
 0x370   : > { %v4535_v31 = vadd.f32 %v8736_v30, %v4453_v56  ;;  %v3510_v26 = vpop.f32.mrf.mxu3  ;;  %v3405_v63 = vpop.f32.mrf.mxu1 }
 0x371   : > { %v3351_v25 = vpop.f32.mrf.mxu0  ;;  %v9087_v35 = vadd.f32 %v3510_v26, %v3456_v2 }
 0x372   : > { %vm4607_vm15 = vcmp.ge.f32.partialorder %v4535_v31, 0.0  ;;  %v4679_v50 = vmul.f32 0.01, %v4535_v31  ;;  %v3352_v60 = vadd.f32 %v3351_v25, %v8698_v14  ;;  %v6585_v14 = vld [vmem:[%s9948_s1 + $0x3ec] sm:$0xf] }
 0x373   : > { %3615 = vmatmul.bf16.gmra.mxu1 %v10207_v23  ;;  %v5735_v28 = vor.u32 %v6585_v14, %v5732_v21 }
 0x374   : > { %v4751_v45 = vsel %vm4607_vm15, %v4535_v31, %v4679_v50  ;;  %v3406_v58 = vadd.f32 %v3405_v63, %v3352_v60  ;;  %3561 = vmatmul.bf16.gmra.mxu0 %v10267_v7  ;;  %3669 = vmatmul.bf16.gmra.mxu2 %v10208_v62  ;;  %v5860_v31 = vld [vmem:[%s9948_s1 + $0x4f8] sm:$0xf0] }
 0x375   : > { %v4792_v42 = vpack.c.bf16 %v4751_v45, %v4750_v49  ;;  %3723 = vmatmul.bf16.gmra.mxu3 %v10268_v17  ;;  %4058 = vmatpush.bf16.msrb.mxu2 %v5735_v28  ;;  %v5863_v25 = vor.u32 %v6617_v16, %v5860_v31  ;;  %v6553_v49 = vld [vmem:[%s9948_s1 + $0x2ec] sm:$0xf]  ;;  %v5604_v45 = vld [vmem:[%s9948_s1 + $0x2f8] sm:$0xf0] }
 0x376   : > { %v4457_v22 = vmul.f32 %v8731_v0, %v3406_v58  ;;  %v4542_v58 = vadd.f32 %v8702_v59, %v4460_v1  ;;  %v5607_v14 = vor.u32 %v6553_v49, %v5604_v45  ;;  %v10269_v31 = vld [vmem:[#allocation33_spill] sm:$0xff] }
 0x377   : > { %4828 = vst [vmem:[%s8754_s11 + $0xf0] sm:$0xff] %v4792_v42  ;;  %v3459_v56 = vpop.f32.mrf.mxu2  ;;  %4112 = vmatpush.bf16.msrb.mxu3 %v5863_v25  ;;  %v10272_v25 = vld [vmem:[#allocation68_spill] sm:$0xff] }
 0x378   : > { %v4539_v29 = vadd.f32 %v8736_v30, %v4457_v22  ;;  %v3513_v2 = vpop.f32.mrf.mxu3  ;;  %v3407_v39 = vpop.f32.mrf.mxu1  ;;  %4004 = vmatpush.bf16.msrb.mxu1 %v5607_v14  ;;  %v4686_v47 = vmul.f32 0.01, %v4542_v58  ;;  %vm4614_vm2 = vcmp.ge.f32.partialorder %v4542_v58, 0.0  ;;  %v6517_v14 = vld [vmem:[%s9948_s1 + $0x1cc] sm:$0xf] }
 0x379   : > { %v3353_v26 = vpop.f32.mrf.mxu0  ;;  %v9117_v60 = vadd.f32 %v3513_v2, %v3459_v56 }
 0x37a   : > { %vm4611_vm1 = vcmp.ge.f32.partialorder %v4539_v29, 0.0  ;;  %v4683_v50 = vmul.f32 0.01, %v4539_v29  ;;  %v3354_v63 = vadd.f32 %v3353_v26, %v8733_v15  ;;  %v10270_v26 = vld [vmem:[#allocation34_spill] sm:$0xff] }
 0x37c   : > { %v4755_v42 = vsel %vm4611_vm1, %v4539_v29, %v4683_v50  ;;  %v3408_v22 = vadd.f32 %v3407_v39, %v3354_v63  ;;  %v4758_v29 = vsel %vm4614_vm2, %v4542_v58, %v4686_v47  ;;  %v6581_v50 = vld [vmem:[%s9948_s1 + $0x3cc] sm:$0xf] }
 0x37d   : > { %v4794_v21 = vpack.c.bf16 %v4755_v42, %v4754_v53 }
 0x37e   : > { %v4461_v15 = vmul.f32 %v8731_v0, %v3408_v22 }
 0x37f   : > { %4830 = vst [vmem:[%s8754_s11 + $0x100] sm:$0xff] %v4794_v21  ;;  %v3461_v5 = vpop.f32.mrf.mxu2  ;;  %v5460_v21 = vld [vmem:[%s9948_s1 + $0x1d8] sm:$0xf0] }
 0x380   : > { %v4543_v34 = vadd.f32 %v8736_v30, %v4461_v15  ;;  %v3515_v28 = vpop.f32.mrf.mxu3  ;;  %v3581_v1 = vpop.f32.mrf.mxu1  ;;  %v10271_v30 = vld [vmem:[#allocation67_spill] sm:$0xff] }
 0x381   : > { %v3527_v54 = vpop.f32.mrf.mxu0  ;;  %v9131_v56 = vadd.f32 %v3515_v28, %v3461_v5  ;;  %v6613_v15 = vld [vmem:[%s9948_s1 + $0x4cc] sm:$0xf]  ;;  %v5588_v28 = vld [vmem:[%s9948_s1 + $0x2d8] sm:$0xf0] }
 0x382   : > { %vm4615_vm3 = vcmp.ge.f32.partialorder %v4543_v34, 0.0  ;;  %v4687_v16 = vmul.f32 0.01, %v4543_v34  ;;  %v3528_v59 = vadd.f32 %v3527_v54, %v8748_v40  ;;  %v5716_v40 = vld [vmem:[%s9948_s1 + $0x3d8] sm:$0xf0] }
 0x383   : > { %3620 = vmatmul.bf16.gmra.mxu1 %v10270_v26  ;;  %v5719_v63 = vor.u32 %v6581_v50, %v5716_v40  ;;  %v6549_v5 = vld [vmem:[%s9948_s1 + $0x2cc] sm:$0xf] }
 0x384   : > { %v4759_v33 = vsel %vm4615_vm3, %v4543_v34, %v4687_v16  ;;  %v3582_v0 = vadd.f32 %v3581_v1, %v3528_v59  ;;  %3566 = vmatmul.bf16.gmra.mxu0 %v10269_v31  ;;  %3674 = vmatmul.bf16.gmra.mxu2 %v10271_v30  ;;  %v5463_v34 = vor.u32 %v6517_v14, %v5460_v21 }
 0x385   : > { %v4796_v2 = vpack.c.bf16 %v4759_v33, %v4758_v29  ;;  %3728 = vmatmul.bf16.gmra.mxu3 %v10272_v25  ;;  %4059 = vmatpush.bf16.msrb.mxu2 %v5719_v63  ;;  %v5591_v16 = vor.u32 %v6549_v5, %v5588_v28  ;;  %v10273_v63 = vld [vmem:[#allocation37_spill] sm:$0xff]  ;;  %v6513_v5 = vld [vmem:[%s9948_s1 + $0x1ac] sm:$0xf] }
 0x386   : > { %3951 = vmatpush.bf16.msrb.mxu0 %v5463_v34  ;;  %v6609_v28 = vld [vmem:[%s9948_s1 + $0x4ac] sm:$0xf] }
 0x387   : > { %4832 = vst [vmem:[%s8754_s11 + $0x110] sm:$0xff] %v4796_v2  ;;  %v3635_v39 = vpop.f32.mrf.mxu2  ;;  %4005 = vmatpush.bf16.msrb.mxu1 %v5591_v16  ;;  %v5828_v16 = vld [vmem:[%s9948_s1 + $0x4b8] sm:$0xf0] }
 0x388   : > { %v3636_v53 = vadd.f32 %v3635_v39, %v3582_v0  ;;  %v3689_v49 = vpop.f32.mrf.mxu3  ;;  %v3583_v42 = vpop.f32.mrf.mxu1  ;;  %v10274_v39 = vld [vmem:[#allocation71_spill] sm:$0xff] }
 0x389   : > { %v3529_v45 = vpop.f32.mrf.mxu0 }
 0x38a   : > { %v3530_v58 = vadd.f32 %v3529_v45, %v8779_v41  ;;  %v9146_v22 = vadd.f32 %v3689_v49, %v3636_v53  ;;  %v5844_v41 = vld [vmem:[%s9948_s1 + $0x4d8] sm:$0xf0]  ;;  %v10275_v53 = vld [vmem:[#allocation2_spill] sm:$0xff] }
 0x38b   : > { %v5847_v54 = vor.u32 %v6613_v15, %v5844_v41  ;;  %v6577_v15 = vld [vmem:[%s9948_s1 + $0x3ac] sm:$0xf] }
 0x38c   : > { %v3584_v47 = vadd.f32 %v3583_v42, %v3530_v58 }
 0x38d   : > { %4113 = vmatpush.bf16.msrb.mxu3 %v5847_v54 }
 0x38f   : > { %v3637_v59 = vpop.f32.mrf.mxu2 }
 0x390   : > { %v3638_v1 = vadd.f32 %v3637_v59, %v3584_v47  ;;  %v3691_v29 = vpop.f32.mrf.mxu3  ;;  %v3586_v2 = vpop.f32.mrf.mxu1  ;;  %v5700_v47 = vld [vmem:[%s9948_s1 + $0x3b8] sm:$0xf0]  ;;  %v6545_v59 = vld [vmem:[%s9948_s1 + $0x2ac] sm:$0xf] }
 0x391   : > { %v3532_v33 = vpop.f32.mrf.mxu0  ;;  %v5703_v41 = vor.u32 %v6577_v15, %v5700_v47 }
 0x392   : > { %v3533_v0 = vadd.f32 %v3532_v33, %v8798_v6  ;;  %v9167_v50 = vadd.f32 %v3691_v29, %v3638_v1  ;;  %v5572_v1 = vld [vmem:[%s9948_s1 + $0x2b8] sm:$0xf0]  ;;  %v5831_v29 = vor.u32 %v6609_v28, %v5828_v16  ;;  %v6573_v28 = vld [vmem:[%s9948_s1 + $0x38c] sm:$0xf] }
 0x393   : > { %3796 = vmatmul.bf16.vlgmr.msra.gmra.mxu1 %v10213_v46  ;;  %4060 = vmatpush.bf16.msrb.mxu2 %v5703_v41  ;;  %v5575_v33 = vor.u32 %v6545_v59, %v5572_v1  ;;  %v6605_v59 = vld [vmem:[%s9948_s1 + $0x48c] sm:$0xf]  ;;  %v5812_v1 = vld [vmem:[%s9948_s1 + $0x498] sm:$0xf0] }
 0x394   : > { %v3587_v40 = vadd.f32 %v3586_v2, %v3533_v0  ;;  %3742 = vmatmul.bf16.vlgmr.msra.gmra.mxu0 %v10273_v63  ;;  %3850 = vmatmul.bf16.vlgmr.msra.gmra.mxu2 %v10274_v39 }
 0x395   : > { %3904 = vmatmul.bf16.vlgmr.msra.gmra.mxu3 %v10275_v53  ;;  %4006 = vmatpush.bf16.msrb.mxu1 %v5575_v33  ;;  %v5815_v33 = vor.u32 %v6605_v59, %v5812_v1  ;;  %v6569_v59 = vld [vmem:[%s9948_s1 + $0x36c] sm:$0xf]  ;;  %v5668_v1 = vld [vmem:[%s9948_s1 + $0x378] sm:$0xf0] }
 0x396   : > { %4114 = vmatpush.bf16.msrb.mxu3 %v5831_v29 }
 0x397   : > { %v3640_v49 = vpop.f32.mrf.mxu2 }
 0x398   : > { %v3641_v45 = vadd.f32 %v3640_v49, %v3587_v40  ;;  %v3694_v58 = vpop.f32.mrf.mxu3  ;;  %v3588_v21 = vpop.f32.mrf.mxu1 }
 0x399   : > { %v3534_v42 = vpop.f32.mrf.mxu0 }
 0x39a   : > { %v3535_v14 = vadd.f32 %v3534_v42, %v8814_v8  ;;  %v9174_v6 = vadd.f32 %v3694_v58, %v3641_v45  ;;  %v5444_v8 = vld [vmem:[%s9948_s1 + $0x1b8] sm:$0xf0]  ;;  %4115 = vmatpush.bf16.msrb.mxu3 %v5815_v33  ;;  %v6601_v33 = vld [vmem:[%s9948_s1 + $0x46c] sm:$0xf] }
 0x39b   : > { %v5447_v54 = vor.u32 %v6513_v5, %v5444_v8 }
 0x39c   : > { %v3589_v34 = vadd.f32 %v3588_v21, %v3535_v14  ;;  %v10276_v14 = vld [vmem:[#allocation41_spill] sm:$0xff] }
 0x39d   : > { %3952 = vmatpush.bf16.msrb.mxu0 %v5447_v54  ;;  %v5684_v54 = vld [vmem:[%s9948_s1 + $0x398] sm:$0xf0] }
 0x39e   : > { %v5687_v16 = vor.u32 %v6573_v28, %v5684_v54 }
 0x39f   : > { %v3642_v0 = vpop.f32.mrf.mxu2 }
 0x3a0   : > { %v3643_v2 = vadd.f32 %v3642_v0, %v3589_v34  ;;  %v3696_v40 = vpop.f32.mrf.mxu3  ;;  %v3591_v45 = vpop.f32.mrf.mxu1  ;;  %v6541_v0 = vld [vmem:[%s9948_s1 + $0x28c] sm:$0xf]  ;;  %4061 = vmatpush.bf16.msrb.mxu2 %v5687_v16 }
 0x3a1   : > { %v3537_v53 = vpop.f32.mrf.mxu0 }
 0x3a2   : > { %v3538_v49 = vadd.f32 %v3537_v53, %v8844_v3  ;;  %v9201_v58 = vadd.f32 %v3696_v40, %v3643_v2  ;;  %v5556_v2 = vld [vmem:[%s9948_s1 + $0x298] sm:$0xf0] }
 0x3a3   : > { %3801 = vmatmul.bf16.gmra.mxu1 %v10215_v19  ;;  %v5559_v40 = vor.u32 %v6541_v0, %v5556_v2  ;;  %v5796_v0 = vld [vmem:[%s9948_s1 + $0x478] sm:$0xf0] }
 0x3a4   : > { %v3592_v42 = vadd.f32 %v3591_v45, %v3538_v49  ;;  %3747 = vmatmul.bf16.gmra.mxu0 %v10276_v14  ;;  %3855 = vmatmul.bf16.gmra.mxu2 %v7874_v57 }
 0x3a5   : > { %3909 = vmatmul.bf16.gmra.mxu3 %v7102_v24  ;;  %v6509_v24 = vld [vmem:[%s9948_s1 + $0x18c] sm:$0xf]  ;;  %4007 = vmatpush.bf16.msrb.mxu1 %v5559_v40  ;;  %v5799_v40 = vor.u32 %v6601_v33, %v5796_v0  ;;  %v5652_v0 = vld [vmem:[%s9948_s1 + $0x358] sm:$0xf0] }
 0x3a6   : > { %v6565_v33 = vld [vmem:[%s9948_s1 + $0x34c] sm:$0xf] }
 0x3a7   : > { %v3645_v21 = vpop.f32.mrf.mxu2  ;;  %4116 = vmatpush.bf16.msrb.mxu3 %v5799_v40 }
 0x3a8   : > { %v3646_v15 = vadd.f32 %v3645_v21, %v3592_v42  ;;  %v3699_v47 = vpop.f32.mrf.mxu3  ;;  %v3593_v5 = vpop.f32.mrf.mxu1 }
 0x3a9   : > { %v3539_v34 = vpop.f32.mrf.mxu0 }
 0x3aa   : > { %v3540_v41 = vadd.f32 %v3539_v34, %v8854_v44  ;;  %v9208_v3 = vadd.f32 %v3699_v47, %v3646_v15  ;;  %v5428_v44 = vld [vmem:[%s9948_s1 + $0x198] sm:$0xf0] }
 0x3ab   : > { %v5431_v29 = vor.u32 %v6509_v24, %v5428_v44 }
 0x3ac   : > { %v3594_v8 = vadd.f32 %v3593_v5, %v3540_v41  ;;  %v10277_v41 = vld [vmem:[#allocation45_spill] sm:$0xff] }
 0x3ad   : > { %3953 = vmatpush.bf16.msrb.mxu0 %v5431_v29  ;;  %v5671_v29 = vor.u32 %v6569_v59, %v5668_v1 }
 0x3af   : > { %v3647_v53 = vpop.f32.mrf.mxu2  ;;  %4062 = vmatpush.bf16.msrb.mxu2 %v5671_v29 }
 0x3b0   : > { %v3648_v49 = vadd.f32 %v3647_v53, %v3594_v8  ;;  %v3701_v45 = vpop.f32.mrf.mxu3  ;;  %v3596_v15 = vpop.f32.mrf.mxu1 }
 0x3b1   : > { %v3542_v42 = vpop.f32.mrf.mxu0 }
 0x3b2   : > { %v3543_v21 = vadd.f32 %v3542_v42, %v8890_v37  ;;  %v9235_v47 = vadd.f32 %v3701_v45, %v3648_v49 }
 0x3b3   : > { %3806 = vmatmul.bf16.gmra.mxu1 %v10216_v51 }
 0x3b4   : > { %v3597_v34 = vadd.f32 %v3596_v15, %v3543_v21  ;;  %3752 = vmatmul.bf16.gmra.mxu0 %v10277_v41  ;;  %3860 = vmatmul.bf16.gmra.mxu2 %v7912_v36 }
 0x3b5   : > { %3914 = vmatmul.bf16.gmra.mxu3 %v7146_v48  ;;  %v6505_v48 = vld [vmem:[%s9948_s1 + $0x16c] sm:$0xf] }
 0x3b7   : > { %v3650_v5 = vpop.f32.mrf.mxu2 }
 0x3b8   : > { %v3651_v28 = vadd.f32 %v3650_v5, %v3597_v34  ;;  %v3704_v8 = vpop.f32.mrf.mxu3  ;;  %v3598_v16 = vpop.f32.mrf.mxu1  ;;  %v6537_v5 = vld [vmem:[%s9948_s1 + $0x26c] sm:$0xf] }
 0x3b9   : > { %v3544_v54 = vpop.f32.mrf.mxu0 }
 0x3ba   : > { %v3545_v24 = vadd.f32 %v3544_v54, %v8901_v11  ;;  %v9242_v37 = vadd.f32 %v3704_v8, %v3651_v28  ;;  %v5412_v11 = vld [vmem:[%s9948_s1 + $0x178] sm:$0xf0] }
 0x3bb   : > { %v5415_v2 = vor.u32 %v6505_v48, %v5412_v11  ;;  %v5540_v28 = vld [vmem:[%s9948_s1 + $0x278] sm:$0xf0] }
 0x3bc   : > { %v3599_v44 = vadd.f32 %v3598_v16, %v3545_v24  ;;  %v10278_v54 = vld [vmem:[#allocation49_spill] sm:$0xff]  ;;  %v5543_v24 = vor.u32 %v6537_v5, %v5540_v28  ;;  %v6597_v5 = vld [vmem:[%s9948_s1 + $0x44c] sm:$0xf] }
 0x3bd   : > { %3954 = vmatpush.bf16.msrb.mxu0 %v5415_v2 }
 0x3be   : > { %4008 = vmatpush.bf16.msrb.mxu1 %v5543_v24 }
 0x3bf   : > { %v3652_v53 = vpop.f32.mrf.mxu2 }
 0x3c0   : > { %v3653_v49 = vadd.f32 %v3652_v53, %v3599_v44  ;;  %v3706_v45 = vpop.f32.mrf.mxu3  ;;  %v3601_v15 = vpop.f32.mrf.mxu1 }
 0x3c1   : > { %v3547_v42 = vpop.f32.mrf.mxu0 }
 0x3c2   : > { %v3548_v21 = vadd.f32 %v3547_v42, %v8937_v43  ;;  %v9263_v34 = vadd.f32 %v3706_v45, %v3653_v49 }
 0x3c3   : > { %3811 = vmatmul.bf16.gmra.mxu1 %v10217_v20 }
 0x3c4   : > { %v3602_v8 = vadd.f32 %v3601_v15, %v3548_v21  ;;  %3757 = vmatmul.bf16.gmra.mxu0 %v10278_v54  ;;  %3865 = vmatmul.bf16.gmra.mxu2 %v7944_v52  ;;  %v6501_v21 = vld [vmem:[%s9948_s1 + $0x14c] sm:$0xf]  ;;  %v5396_v15 = vld [vmem:[%s9948_s1 + $0x158] sm:$0xf0] }
 0x3c5   : > { %3919 = vmatmul.bf16.gmra.mxu3 %v7190_v12  ;;  %v5655_v12 = vor.u32 %v6565_v33, %v5652_v0  ;;  %v5399_v24 = vor.u32 %v6501_v21, %v5396_v15 }
 0x3c7   : > { %v3655_v43 = vpop.f32.mrf.mxu2  ;;  %4063 = vmatpush.bf16.msrb.mxu2 %v5655_v12  ;;  %3955 = vmatpush.bf16.msrb.mxu0 %v5399_v24 }
 0x3c8   : > { %v3656_v16 = vadd.f32 %v3655_v43, %v3602_v8  ;;  %v3709_v44 = vpop.f32.mrf.mxu3  ;;  %v3603_v48 = vpop.f32.mrf.mxu1  ;;  %v10279_v8 = vld [vmem:[#allocation53_spill] sm:$0xff]  ;;  %v6533_v43 = vld [vmem:[%s9948_s1 + $0x24c] sm:$0xf] }
 0x3c9   : > { %v3549_v59 = vpop.f32.mrf.mxu0 }
 0x3ca   : > { %v3550_v1 = vadd.f32 %v3549_v59, %v8948_v9  ;;  %v9276_v29 = vadd.f32 %v3709_v44, %v3656_v16  ;;  %v5524_v16 = vld [vmem:[%s9948_s1 + $0x258] sm:$0xf0]  ;;  %v10280_v44 = vld [vmem:[#allocation72_spill] sm:$0xff] }
 0x3cc   : > { %v3604_v11 = vadd.f32 %v3603_v48, %v3550_v1  ;;  %v5527_v1 = vor.u32 %v6533_v43, %v5524_v16  ;;  %v10281_v48 = vld [vmem:[#allocation15_spill] sm:$0xff]  ;;  %v10282_v16 = vld [vmem:[#allocation57_spill] sm:$0xff] }
 0x3ce   : > { %4009 = vmatpush.bf16.msrb.mxu1 %v5527_v1  ;;  %v6497_v1 = vld [vmem:[%s9948_s1 + $0x12c] sm:$0xf] }
 0x3cf   : > { %v3657_v2 = vpop.f32.mrf.mxu2 }
 0x3d0   : > { %v3658_v40 = vadd.f32 %v3657_v2, %v3604_v11  ;;  %v3711_v53 = vpop.f32.mrf.mxu3  ;;  %v3606_v45 = vpop.f32.mrf.mxu1 }
 0x3d1   : > { %v3552_v49 = vpop.f32.mrf.mxu0 }
 0x3d2   : > { %v3553_v9 = vadd.f32 %v3552_v49, %v8978_v55  ;;  %v9285_v42 = vadd.f32 %v3711_v53, %v3658_v40  ;;  %v5780_v55 = vld [vmem:[%s9948_s1 + $0x458] sm:$0xf0] }
 0x3d3   : > { %3816 = vmatmul.bf16.gmra.mxu1 %v10218_v61  ;;  %v5783_v59 = vor.u32 %v6597_v5, %v5780_v55 }
 0x3d4   : > { %v3607_v28 = vadd.f32 %v3606_v45, %v3553_v9  ;;  %3762 = vmatmul.bf16.gmra.mxu0 %v10279_v8  ;;  %3870 = vmatmul.bf16.gmra.mxu2 %v10280_v44 }
 0x3d5   : > { %3924 = vmatmul.bf16.gmra.mxu3 %v10281_v48  ;;  %v6593_v48 = vld [vmem:[%s9948_s1 + $0x42c] sm:$0xf] }
 0x3d6   : > { %4117 = vmatpush.bf16.msrb.mxu3 %v5783_v59 }
 0x3d7   : > { %v3660_v11 = vpop.f32.mrf.mxu2 }
 0x3d8   : > { %v3661_v33 = vadd.f32 %v3660_v11, %v3607_v28  ;;  %v3714_v0 = vpop.f32.mrf.mxu3  ;;  %v3608_v40 = vpop.f32.mrf.mxu1  ;;  %v6561_v28 = vld [vmem:[%s9948_s1 + $0x32c] sm:$0xf]  ;;  %v10283_v11 = vld [vmem:[#allocation73_spill] sm:$0xff] }
 0x3d9   : > { %v3554_v12 = vpop.f32.mrf.mxu0 }
 0x3da   : > { %v3555_v2 = vadd.f32 %v3554_v12, %v8993_v4  ;;  %v9310_v53 = vadd.f32 %v3714_v0, %v3661_v33  ;;  %v5636_v4 = vld [vmem:[%s9948_s1 + $0x338] sm:$0xf0]  ;;  %v10284_v12 = vld [vmem:[#allocation19_spill] sm:$0xff] }
 0x3db   : > { %v5639_v59 = vor.u32 %v6561_v28, %v5636_v4  ;;  %v5764_v0 = vld [vmem:[%s9948_s1 + $0x438] sm:$0xf0] }
 0x3dc   : > { %v3609_v49 = vadd.f32 %v3608_v40, %v3555_v2  ;;  %v5767_v2 = vor.u32 %v6593_v48, %v5764_v0  ;;  %v6529_v40 = vld [vmem:[%s9948_s1 + $0x22c] sm:$0xf] }
 0x3dd   : > { %4064 = vmatpush.bf16.msrb.mxu2 %v5639_v59 }
 0x3de   : > { %4118 = vmatpush.bf16.msrb.mxu3 %v5767_v2 }
 0x3df   : > { %v3662_v9 = vpop.f32.mrf.mxu2 }
 0x3e0   : > { %v3663_v45 = vadd.f32 %v3662_v9, %v3609_v49  ;;  %v3716_v21 = vpop.f32.mrf.mxu3  ;;  %v3611_v55 = vpop.f32.mrf.mxu1  ;;  %v5508_v49 = vld [vmem:[%s9948_s1 + $0x238] sm:$0xf0] }
 0x3e1   : > { %v3557_v15 = vpop.f32.mrf.mxu0  ;;  %v5511_v9 = vor.u32 %v6529_v40, %v5508_v49  ;;  %v5620_v49 = vld [vmem:[%s9948_s1 + $0x318] sm:$0xf0] }
 0x3e2   : > { %v3558_v5 = vadd.f32 %v3557_v15, %v9013_v18  ;;  %v9313_v24 = vadd.f32 %v3716_v21, %v3663_v45  ;;  %v5380_v18 = vld [vmem:[%s9948_s1 + $0x138] sm:$0xf0] }
 0x3e3   : > { %3821 = vmatmul.bf16.gmra.mxu1 %v10219_v27  ;;  %v5383_v33 = vor.u32 %v6497_v1, %v5380_v18 }
 0x3e4   : > { %v3612_v43 = vadd.f32 %v3611_v55, %v3558_v5  ;;  %3767 = vmatmul.bf16.gmra.mxu0 %v10282_v16  ;;  %3875 = vmatmul.bf16.gmra.mxu2 %v10283_v11 }
 0x3e5   : > { %3929 = vmatmul.bf16.gmra.mxu3 %v10284_v12  ;;  %3956 = vmatpush.bf16.msrb.mxu0 %v5383_v33 }
 0x3e6   : > { %4010 = vmatpush.bf16.msrb.mxu1 %v5511_v9  ;;  %v10286_v9 = vld [vmem:[#allocation62_spill] sm:$0xff] }
 0x3e7   : > { %v3665_v45 = vpop.f32.mrf.mxu2 }
 0x3e8   : > { %v3666_v21 = vadd.f32 %v3665_v45, %v3612_v43  ;;  %v3719_v15 = vpop.f32.mrf.mxu3  ;;  %v3613_v28 = vpop.f32.mrf.mxu1  ;;  %v10285_v43 = vld [vmem:[#allocation61_spill] sm:$0xff]  ;;  %v10287_v45 = vld [vmem:[#allocation74_spill] sm:$0xff] }
 0x3e9   : > { %v3559_v5 = vpop.f32.mrf.mxu0 }
 0x3ea   : > { %v3560_v55 = vadd.f32 %v3559_v5, %v9040_v38  ;;  %v9344_v4 = vadd.f32 %v3719_v15, %v3666_v21  ;;  %v6557_v38 = vld [vmem:[%s9948_s1 + $0x30c] sm:$0xf]  ;;  %v5364_v5 = vld [vmem:[%s9948_s1 + $0x118] sm:$0xf0] }
 0x3eb   : > { %v5623_v21 = vor.u32 %v6557_v38, %v5620_v49  ;;  %v6493_v15 = vld [vmem:[%s9948_s1 + $0x10c] sm:$0xf] }
 0x3ec   : > { %v3614_v59 = vadd.f32 %v3613_v28, %v3560_v55  ;;  %v6589_v55 = vld [vmem:[%s9948_s1 + $0x40c] sm:$0xf]  ;;  %v5367_v28 = vor.u32 %v6493_v15, %v5364_v5 }
 0x3ed   : > { %4065 = vmatpush.bf16.msrb.mxu2 %v5623_v21 }
 0x3ee   : > { %3957 = vmatpush.bf16.msrb.mxu0 %v5367_v28  ;;  %v10290_v28 = vld [vmem:[#allocation66_spill] sm:$0xff] }
 0x3ef   : > { %v3667_v1 = vpop.f32.mrf.mxu2 }
 0x3f0   : > { %v3668_v18 = vadd.f32 %v3667_v1, %v3614_v59  ;;  %v3721_v48 = vpop.f32.mrf.mxu3  ;;  %v3616_v33 = vpop.f32.mrf.mxu1  ;;  %v5748_v59 = vld [vmem:[%s9948_s1 + $0x418] sm:$0xf0]  ;;  %v6525_v1 = vld [vmem:[%s9948_s1 + $0x20c] sm:$0xf] }
 0x3f1   : > { %v3562_v0 = vpop.f32.mrf.mxu0 }
 0x3f2   : > { %v3563_v12 = vadd.f32 %v3562_v0, %v9076_v13  ;;  %v9347_v40 = vadd.f32 %v3721_v48, %v3668_v18  ;;  %v10288_v13 = vld [vmem:[#allocation23_spill] sm:$0xff]  ;;  %v5492_v18 = vld [vmem:[%s9948_s1 + $0x218] sm:$0xf0]  ;;  %v5751_v0 = vor.u32 %v6589_v55, %v5748_v59 }
 0x3f3   : > { %3826 = vmatmul.bf16.gmra.mxu1 %v10286_v9 }
 0x3f4   : > { %v3617_v2 = vadd.f32 %v3616_v33, %v3563_v12  ;;  %3772 = vmatmul.bf16.gmra.mxu0 %v10285_v43  ;;  %3880 = vmatmul.bf16.gmra.mxu2 %v10287_v45  ;;  %v5495_v12 = vor.u32 %v6525_v1, %v5492_v18  ;;  %v10289_v1 = vld [vmem:[#allocation65_spill] sm:$0xff]  ;;  %v10292_v18 = vld [vmem:[#allocation27_spill] sm:$0xff] }
 0x3f5   : > { %3934 = vmatmul.bf16.gmra.mxu3 %v10288_v13 }
 0x3f6   : > { %4119 = vmatpush.bf16.msrb.mxu3 %v5751_v0  ;;  %4011 = vmatpush.bf16.msrb.mxu1 %v5495_v12 }
 0x3f7   : > { %v3670_v48 = vpop.f32.mrf.mxu2 }
 0x3f8   : > { %v3671_v33 = vadd.f32 %v3670_v48, %v3617_v2  ;;  %v3724_v38 = vpop.f32.mrf.mxu3  ;;  %v3618_v13 = vpop.f32.mrf.mxu1 }
 0x3f9   : > { %v3564_v49 = vpop.f32.mrf.mxu0 }
 0x3fa   : > { %v3565_v21 = vadd.f32 %v3564_v49, %v9087_v35  ;;  %v9378_v15 = vadd.f32 %v3724_v38, %v3671_v33  ;;  %v10291_v35 = vld [vmem:[#allocation75_spill] sm:$0xff]  ;;  %v5988_v38 = vld [vmem:[%s9948_s1 + $0x5f8] sm:$0xf0] }
 0x3fb   : > { %v6745_v49 = vld [vmem:[%s9948_s1 + $0x8ec] sm:$0xf] }
 0x3fc   : > { %v3619_v5 = vadd.f32 %v3618_v13, %v3565_v21  ;;  %v6372_v21 = vld [vmem:[%s9948_s1 + $0x8f8] sm:$0xf0] }
 0x3ff   : > { %v3672_v25 = vpop.f32.mrf.mxu2 }
 0x400   : > { %v3673_v17 = vadd.f32 %v3672_v25, %v3619_v5  ;;  %v3726_v45 = vpop.f32.mrf.mxu3  ;;  %v3621_v55 = vpop.f32.mrf.mxu1 }
 0x401   : > { %v3567_v9 = vpop.f32.mrf.mxu0 }
 0x402   : > { %v3568_v43 = vadd.f32 %v3567_v9, %v9117_v60  ;;  %v9381_v59 = vadd.f32 %v3726_v45, %v3673_v17  ;;  %v6713_v60 = vld [vmem:[%s9948_s1 + $0x7ec] sm:$0xf]  ;;  %v6244_v17 = vld [vmem:[%s9948_s1 + $0x7f8] sm:$0xf0] }
 0x403   : > { %3831 = vmatmul.bf16.gmra.mxu1 %v10290_v28  ;;  %v6247_v33 = vor.u32 %v6713_v60, %v6244_v17  ;;  %v6681_v60 = vld [vmem:[%s9948_s1 + $0x6ec] sm:$0xf]  ;;  %v6116_v17 = vld [vmem:[%s9948_s1 + $0x6f8] sm:$0xf0] }
 0x404   : > { %v3622_v2 = vadd.f32 %v3621_v55, %v3568_v43  ;;  %3777 = vmatmul.bf16.gmra.mxu0 %v10289_v1  ;;  %3885 = vmatmul.bf16.gmra.mxu2 %v10291_v35  ;;  %v6649_v43 = vld [vmem:[%s9948_s1 + $0x5ec] sm:$0xf]  ;;  %v6375_v55 = vor.u32 %v6745_v49, %v6372_v21  ;;  %v10295_v49 = vld [vmem:[#allocation76_spill] sm:$0xff] }
 0x405   : > { %3939 = vmatmul.bf16.gmra.mxu3 %v10292_v18  ;;  %v5991_v5 = vor.u32 %v6649_v43, %v5988_v38  ;;  %4274 = vmatpush.bf16.msra.mxu2 %v6247_v33  ;;  %v6119_v43 = vor.u32 %v6681_v60, %v6116_v17  ;;  %v10293_v33 = vld [vmem:[#allocation69_spill] sm:$0xff]  ;;  %v10294_v38 = vld [vmem:[#allocation70_spill] sm:$0xff]  ;;  %v10296_v21 = vld [vmem:[#allocation31_spill] sm:$0xff] }
 0x406   : > { %4328 = vmatpush.bf16.msra.mxu3 %v6375_v55 }
 0x407   : > { %v3675_v48 = vpop.f32.mrf.mxu2  ;;  %4166 = vmatpush.bf16.msra.mxu0 %v5991_v5  ;;  %4220 = vmatpush.bf16.msra.mxu1 %v6119_v43 }
 0x408   : > { %v3676_v0 = vadd.f32 %v3675_v48, %v3622_v2  ;;  %v3729_v12 = vpop.f32.mrf.mxu3  ;;  %v3623_v45 = vpop.f32.mrf.mxu1 }
 0x409   : > { %v3569_v25 = vpop.f32.mrf.mxu0 }
 0x40a   : > { %v3570_v9 = vadd.f32 %v3569_v25, %v9131_v56  ;;  %v9406_v13 = vadd.f32 %v3729_v12, %v3676_v0 }
 0x40c   : > { %v3624_v2 = vadd.f32 %v3623_v45, %v3570_v9 }
 0x40f   : > { %v3677_v56 = vpop.f32.mrf.mxu2 }
 0x410   : > { %v3678_v18 = vadd.f32 %v3677_v56, %v3624_v2  ;;  %v3731_v48 = vpop.f32.mrf.mxu3  ;;  %v3797_v12 = vpop.f32.mrf.mxu1  ;;  %v6709_v56 = vld [vmem:[%s9948_s1 + $0x7cc] sm:$0xf] }
 0x411   : > { %v3743_v25 = vpop.f32.mrf.mxu0 }
 0x412   : > { %v3744_v0 = vadd.f32 %v3743_v25, %v9146_v22  ;;  %v9415_v9 = vadd.f32 %v3731_v48, %v3678_v18  ;;  %v6228_v18 = vld [vmem:[%s9948_s1 + $0x7d8] sm:$0xf0] }
 0x413   : > { %3836 = vmatmul.bf16.gmra.mxu1 %v10294_v38  ;;  %v6231_v60 = vor.u32 %v6709_v56, %v6228_v18 }
 0x414   : > { %v3798_v45 = vadd.f32 %v3797_v12, %v3744_v0  ;;  %3782 = vmatmul.bf16.gmra.mxu0 %v10293_v33  ;;  %3890 = vmatmul.bf16.gmra.mxu2 %v10295_v49 }
 0x415   : > { %3944 = vmatmul.bf16.gmra.mxu3 %v10296_v21  ;;  %4275 = vmatpush.bf16.msra.mxu2 %v6231_v60  ;;  %v6645_v21 = vld [vmem:[%s9948_s1 + $0x5cc] sm:$0xf]  ;;  %v6100_v60 = vld [vmem:[%s9948_s1 + $0x6d8] sm:$0xf0] }
 0x417   : > { %v3851_v5 = vpop.f32.mrf.mxu2 }
 0x418   : > { %v9421_v55 = vadd.f32 %v3851_v5, %v3798_v45  ;;  %v9423_v2 = vpop.f32.mrf.mxu3  ;;  %v3799_v25 = vpop.f32.mrf.mxu1  ;;  %v5972_v5 = vld [vmem:[%s9948_s1 + $0x5d8] sm:$0xf0] }
 0x419   : > { %v3745_v22 = vpop.f32.mrf.mxu0  ;;  %v5975_v18 = vor.u32 %v6645_v21, %v5972_v5  ;;  %v10302_v21 = vld [vmem:[#allocation35_spill] sm:$0xff] }
 0x41a   : > { %10297 = vst [vmem:[#allocation30_spill] sm:$0xff] %v9421_v55  ;;  %v3746_v48 = vadd.f32 %v3745_v22, %v9167_v50  ;;  %v6741_v50 = vld [vmem:[%s9948_s1 + $0x8cc] sm:$0xf] }
 0x41b   : > { %v10299_v55 = vld [vmem:[#allocation3_spill] sm:$0xff]  ;;  %4167 = vmatpush.bf16.msra.mxu0 %v5975_v18 }
 0x41c   : > { %v3800_v17 = vadd.f32 %v3799_v25, %v3746_v48  ;;  %v6356_v48 = vld [vmem:[%s9948_s1 + $0x8d8] sm:$0xf0]  ;;  %v6677_v25 = vld [vmem:[%s9948_s1 + $0x6cc] sm:$0xf] }
 0x41d   : > { %v6705_v18 = vld [vmem:[%s9948_s1 + $0x7ac] sm:$0xf] }
 0x41f   : > { %v3853_v0 = vpop.f32.mrf.mxu2 }
 0x420   : > { %v9432_v12 = vadd.f32 %v3853_v0, %v3800_v17  ;;  %v9434_v43 = vpop.f32.mrf.mxu3  ;;  %v3802_v56 = vpop.f32.mrf.mxu1  ;;  %v6359_v17 = vor.u32 %v6741_v50, %v6356_v48  ;;  %v6103_v0 = vor.u32 %v6677_v25, %v6100_v60 }
 0x421   : > { %v3748_v45 = vpop.f32.mrf.mxu0 }
 0x422   : > { %10298 = vst [vmem:[#allocation63_spill] sm:$0xff] %v9432_v12  ;;  %v3749_v22 = vadd.f32 %v3748_v45, %v9174_v6  ;;  %v10300_v6 = vld [vmem:[#allocation4_spill] sm:$0xff]  ;;  %v10301_v45 = vld [vmem:[#allocation5_spill] sm:$0xff]  ;;  %4329 = vmatpush.bf16.msra.mxu3 %v6359_v17  ;;  %4221 = vmatpush.bf16.msra.mxu1 %v6103_v0 }
 0x423   : > { %4012 = vmatmul.bf16.vlgmr.msrb.gmra.mxu1 %v10300_v6  ;;  %v5956_v6 = vld [vmem:[%s9948_s1 + $0x5b8] sm:$0xf0] }
 0x424   : > { %v3803_v12 = vadd.f32 %v3802_v56, %v3749_v22  ;;  %3958 = vmatmul.bf16.vlgmr.msrb.gmra.mxu0 %v10299_v55  ;;  %4066 = vmatmul.bf16.vlgmr.msrb.gmra.mxu2 %v10301_v45  ;;  %v6737_v45 = vld [vmem:[%s9948_s1 + $0x8ac] sm:$0xf] }
 0x425   : > { %4120 = vmatmul.bf16.vlgmr.msrb.gmra.mxu3 %v10302_v21  ;;  %v6340_v21 = vld [vmem:[%s9948_s1 + $0x8b8] sm:$0xf0] }
 0x427   : > { %v3856_v5 = vpop.f32.mrf.mxu2 }
 0x428   : > { %v9459_v49 = vadd.f32 %v3856_v5, %v3803_v12  ;;  %v9461_v38 = vpop.f32.mrf.mxu3  ;;  %v3804_v22 = vpop.f32.mrf.mxu1  ;;  %v6212_v12 = vld [vmem:[%s9948_s1 + $0x7b8] sm:$0xf0] }
 0x429   : > { %v3750_v33 = vpop.f32.mrf.mxu0  ;;  %v6215_v0 = vor.u32 %v6705_v18, %v6212_v12  ;;  %v10306_v18 = vld [vmem:[#allocation7_spill] sm:$0xff]  ;;  %v10307_v12 = vld [vmem:[#allocation8_spill] sm:$0xff] }
 0x42a   : > { %10303 = vst [vmem:[#allocation38_spill] sm:$0xff] %v9459_v49  ;;  %v3751_v50 = vadd.f32 %v3750_v33, %v9201_v58  ;;  %v6641_v58 = vld [vmem:[%s9948_s1 + $0x5ac] sm:$0xf] }
 0x42b   : > { %v5959_v5 = vor.u32 %v6641_v58, %v5956_v6  ;;  %4276 = vmatpush.bf16.msra.mxu2 %v6215_v0 }
 0x42c   : > { %v3805_v56 = vadd.f32 %v3804_v22, %v3751_v50  ;;  %v6343_v50 = vor.u32 %v6737_v45, %v6340_v21  ;;  %v6084_v22 = vld [vmem:[%s9948_s1 + $0x6b8] sm:$0xf0] }
 0x42d   : > { %4168 = vmatpush.bf16.msra.mxu0 %v5959_v5  ;;  %v6196_v5 = vld [vmem:[%s9948_s1 + $0x798] sm:$0xf0] }
 0x42e   : > { %4330 = vmatpush.bf16.msra.mxu3 %v6343_v50 }
 0x42f   : > { %v3858_v55 = vpop.f32.mrf.mxu2 }
 0x430   : > { %v9464_v48 = vadd.f32 %v3858_v55, %v3805_v56  ;;  %v9466_v25 = vpop.f32.mrf.mxu3  ;;  %v3807_v17 = vpop.f32.mrf.mxu1  ;;  %v10305_v55 = vld [vmem:[#allocation6_spill] sm:$0xff] }
 0x431   : > { %v3753_v60 = vpop.f32.mrf.mxu0 }
 0x432   : > { %10304 = vst [vmem:[#allocation42_spill] sm:$0xff] %v9464_v48  ;;  %v3754_v33 = vadd.f32 %v3753_v60, %v9208_v3  ;;  %v6673_v3 = vld [vmem:[%s9948_s1 + $0x6ac] sm:$0xf] }
 0x433   : > { %v6087_v60 = vor.u32 %v6673_v3, %v6084_v22  ;;  %4017 = vmatmul.bf16.gmra.mxu1 %v10306_v18  ;;  %v10308_v48 = vld [vmem:[#allocation39_spill] sm:$0xff] }
 0x434   : > { %v3808_v56 = vadd.f32 %v3807_v17, %v3754_v33  ;;  %3963 = vmatmul.bf16.gmra.mxu0 %v10305_v55  ;;  %4071 = vmatmul.bf16.gmra.mxu2 %v10307_v12  ;;  %v5940_v12 = vld [vmem:[%s9948_s1 + $0x598] sm:$0xf0] }
 0x435   : > { %4125 = vmatmul.bf16.gmra.mxu3 %v10308_v48  ;;  %4222 = vmatpush.bf16.msra.mxu1 %v6087_v60  ;;  %v6701_v48 = vld [vmem:[%s9948_s1 + $0x78c] sm:$0xf] }
 0x436   : > { %v6199_v60 = vor.u32 %v6701_v48, %v6196_v5  ;;  %v10312_v5 = vld [vmem:[#allocation10_spill] sm:$0xff] }
 0x437   : > { %v3861_v58 = vpop.f32.mrf.mxu2 }
 0x438   : > { %v9497_v6 = vadd.f32 %v3861_v58, %v3808_v56  ;;  %v9499_v45 = vpop.f32.mrf.mxu3  ;;  %v3809_v17 = vpop.f32.mrf.mxu1  ;;  %v6733_v58 = vld [vmem:[%s9948_s1 + $0x88c] sm:$0xf]  ;;  %4277 = vmatpush.bf16.msra.mxu2 %v6199_v60 }
 0x439   : > { %v3755_v21 = vpop.f32.mrf.mxu0 }
 0x43a   : > { %10309 = vst [vmem:[#allocation46_spill] sm:$0xff] %v9497_v6  ;;  %v3756_v33 = vadd.f32 %v3755_v21, %v9235_v47  ;;  %v6637_v47 = vld [vmem:[%s9948_s1 + $0x58c] sm:$0xf]  ;;  %v6324_v21 = vld [vmem:[%s9948_s1 + $0x898] sm:$0xf0] }
 0x43b   : > { %v10314_v6 = vld [vmem:[#allocation43_spill] sm:$0xff] }
 0x43c   : > { %v3810_v0 = vadd.f32 %v3809_v17, %v3756_v33  ;;  %v5943_v33 = vor.u32 %v6637_v47, %v5940_v12  ;;  %v6327_v17 = vor.u32 %v6733_v58, %v6324_v21 }
 0x43e   : > { %4169 = vmatpush.bf16.msra.mxu0 %v5943_v33  ;;  %4331 = vmatpush.bf16.msra.mxu3 %v6327_v17  ;;  %v6180_v33 = vld [vmem:[%s9948_s1 + $0x778] sm:$0xf0] }
 0x43f   : > { %v3863_v3 = vpop.f32.mrf.mxu2 }
 0x440   : > { %v9502_v22 = vadd.f32 %v3863_v3, %v3810_v0  ;;  %v9504_v55 = vpop.f32.mrf.mxu3  ;;  %v3812_v56 = vpop.f32.mrf.mxu1  ;;  %v6068_v0 = vld [vmem:[%s9948_s1 + $0x698] sm:$0xf0] }
 0x441   : > { %v3758_v18 = vpop.f32.mrf.mxu0 }
 0x442   : > { %10310 = vst [vmem:[#allocation50_spill] sm:$0xff] %v9502_v22  ;;  %v3759_v50 = vadd.f32 %v3758_v18, %v9242_v37  ;;  %v6669_v37 = vld [vmem:[%s9948_s1 + $0x68c] sm:$0xf]  ;;  %v10311_v18 = vld [vmem:[#allocation9_spill] sm:$0xff] }
 0x443   : > { %v6071_v48 = vor.u32 %v6669_v37, %v6068_v0  ;;  %4022 = vmatmul.bf16.gmra.mxu1 %v10312_v5  ;;  %v10313_v22 = vld [vmem:[#allocation11_spill] sm:$0xff]  ;;  %v5924_v5 = vld [vmem:[%s9948_s1 + $0x578] sm:$0xf0] }
 0x444   : > { %v3813_v3 = vadd.f32 %v3812_v56, %v3759_v50  ;;  %3968 = vmatmul.bf16.gmra.mxu0 %v10311_v18  ;;  %4076 = vmatmul.bf16.gmra.mxu2 %v10313_v22 }
 0x445   : > { %4130 = vmatmul.bf16.gmra.mxu3 %v10314_v6  ;;  %4223 = vmatpush.bf16.msra.mxu1 %v6071_v48  ;;  %v6697_v6 = vld [vmem:[%s9948_s1 + $0x76c] sm:$0xf] }
 0x446   : > { %v6183_v48 = vor.u32 %v6697_v6, %v6180_v33  ;;  %v10320_v6 = vld [vmem:[#allocation47_spill] sm:$0xff] }
 0x447   : > { %v3866_v47 = vpop.f32.mrf.mxu2 }
 0x448   : > { %v9535_v12 = vadd.f32 %v3866_v47, %v3813_v3  ;;  %v9537_v58 = vpop.f32.mrf.mxu3  ;;  %v3814_v56 = vpop.f32.mrf.mxu1  ;;  %v6729_v47 = vld [vmem:[%s9948_s1 + $0x86c] sm:$0xf]  ;;  %4278 = vmatpush.bf16.msra.mxu2 %v6183_v48 }
 0x449   : > { %v3760_v21 = vpop.f32.mrf.mxu0 }
 0x44a   : > { %10315 = vst [vmem:[#allocation54_spill] sm:$0xff] %v9535_v12  ;;  %v3761_v50 = vadd.f32 %v3760_v21, %v9263_v34  ;;  %v6633_v34 = vld [vmem:[%s9948_s1 + $0x56c] sm:$0xf]  ;;  %v6308_v21 = vld [vmem:[%s9948_s1 + $0x878] sm:$0xf0] }
 0x44c   : > { %v3815_v60 = vadd.f32 %v3814_v56, %v3761_v50  ;;  %v5927_v50 = vor.u32 %v6633_v34, %v5924_v5  ;;  %v6311_v56 = vor.u32 %v6729_v47, %v6308_v21  ;;  %v6665_v34 = vld [vmem:[%s9948_s1 + $0x66c] sm:$0xf] }
 0x44e   : > { %4170 = vmatpush.bf16.msra.mxu0 %v5927_v50  ;;  %4332 = vmatpush.bf16.msra.mxu3 %v6311_v56 }
 0x44f   : > { %v3868_v37 = vpop.f32.mrf.mxu2 }
 0x450   : > { %v9540_v0 = vadd.f32 %v3868_v37, %v3815_v60  ;;  %v9542_v18 = vpop.f32.mrf.mxu3  ;;  %v3817_v3 = vpop.f32.mrf.mxu1  ;;  %v10317_v37 = vld [vmem:[#allocation12_spill] sm:$0xff] }
 0x451   : > { %v3763_v22 = vpop.f32.mrf.mxu0 }
 0x452   : > { %10316 = vst [vmem:[#allocation58_spill] sm:$0xff] %v9540_v0  ;;  %v3764_v17 = vadd.f32 %v3763_v22, %v9276_v29  ;;  %v10318_v29 = vld [vmem:[#allocation13_spill] sm:$0xff]  ;;  %v10319_v22 = vld [vmem:[#allocation14_spill] sm:$0xff] }
 0x453   : > { %4027 = vmatmul.bf16.gmra.mxu1 %v10318_v29  ;;  %v6164_v29 = vld [vmem:[%s9948_s1 + $0x758] sm:$0xf0] }
 0x454   : > { %v3818_v60 = vadd.f32 %v3817_v3, %v3764_v17  ;;  %3973 = vmatmul.bf16.gmra.mxu0 %v10317_v37  ;;  %4081 = vmatmul.bf16.gmra.mxu2 %v10319_v22  ;;  %v6052_v17 = vld [vmem:[%s9948_s1 + $0x678] sm:$0xf0]  ;;  %v6693_v37 = vld [vmem:[%s9948_s1 + $0x74c] sm:$0xf] }
 0x455   : > { %4135 = vmatmul.bf16.gmra.mxu3 %v10320_v6  ;;  %v6055_v5 = vor.u32 %v6665_v34, %v6052_v17  ;;  %v6167_v22 = vor.u32 %v6693_v37, %v6164_v29  ;;  %v10323_v34 = vld [vmem:[#allocation51_spill] sm:$0xff]  ;;  %v6292_v37 = vld [vmem:[%s9948_s1 + $0x858] sm:$0xf0] }
 0x456   : > { %v6661_v29 = vld [vmem:[%s9948_s1 + $0x64c] sm:$0xf] }
 0x457   : > { %v3871_v33 = vpop.f32.mrf.mxu2  ;;  %4224 = vmatpush.bf16.msra.mxu1 %v6055_v5  ;;  %4279 = vmatpush.bf16.msra.mxu2 %v6167_v22 }
 0x458   : > { %v9567_v0 = vadd.f32 %v3871_v33, %v3818_v60  ;;  %v9569_v12 = vpop.f32.mrf.mxu3  ;;  %v3819_v48 = vpop.f32.mrf.mxu1  ;;  %v10322_v33 = vld [vmem:[#allocation16_spill] sm:$0xff] }
 0x459   : > { %v3765_v49 = vpop.f32.mrf.mxu0 }
 0x45a   : > { %v3766_v3 = vadd.f32 %v3765_v49, %v9285_v42 }
 0x45c   : > { %v3820_v47 = vadd.f32 %v3819_v48, %v3766_v3 }
 0x45f   : > { %v3873_v21 = vpop.f32.mrf.mxu2 }
 0x460   : > { %v9578_v50 = vadd.f32 %v3873_v21, %v3820_v47  ;;  %v9580_v56 = vpop.f32.mrf.mxu3  ;;  %v3822_v49 = vpop.f32.mrf.mxu1  ;;  %v5908_v47 = vld [vmem:[%s9948_s1 + $0x558] sm:$0xf0] }
 0x461   : > { %v3768_v60 = vpop.f32.mrf.mxu0 }
 0x462   : > { %10321 = vst [vmem:[#allocation77_spill] sm:$0xff] %v9578_v50  ;;  %v3769_v42 = vadd.f32 %v3768_v60, %v9310_v53  ;;  %v6629_v53 = vld [vmem:[%s9948_s1 + $0x54c] sm:$0xf]  ;;  %v10326_v50 = vld [vmem:[#allocation21_spill] sm:$0xff] }
 0x463   : > { %4032 = vmatmul.bf16.gmra.mxu1 %v10251_v10  ;;  %v6725_v10 = vld [vmem:[%s9948_s1 + $0x84c] sm:$0xf]  ;;  %v5911_v60 = vor.u32 %v6629_v53, %v5908_v47 }
 0x464   : > { %v3823_v6 = vadd.f32 %v3822_v49, %v3769_v42  ;;  %3978 = vmatmul.bf16.gmra.mxu0 %v10322_v33  ;;  %4086 = vmatmul.bf16.gmra.mxu2 %v10252_v32  ;;  %v6036_v42 = vld [vmem:[%s9948_s1 + $0x658] sm:$0xf0]  ;;  %v6295_v49 = vor.u32 %v6725_v10, %v6292_v37  ;;  %v10327_v10 = vld [vmem:[#allocation22_spill] sm:$0xff] }
 0x465   : > { %4140 = vmatmul.bf16.gmra.mxu3 %v10323_v34  ;;  %v6039_v22 = vor.u32 %v6661_v29, %v6036_v42  ;;  %4171 = vmatpush.bf16.msra.mxu0 %v5911_v60 }
 0x466   : > { %4333 = vmatpush.bf16.msra.mxu3 %v6295_v49 }
 0x467   : > { %v3876_v17 = vpop.f32.mrf.mxu2  ;;  %4225 = vmatpush.bf16.msra.mxu1 %v6039_v22 }
 0x468   : > { %v9593_v3 = vadd.f32 %v3876_v17, %v3823_v6  ;;  %v9595_v48 = vpop.f32.mrf.mxu3  ;;  %v3824_v21 = vpop.f32.mrf.mxu1 }
 0x469   : > { %v3770_v5 = vpop.f32.mrf.mxu0 }
 0x46a   : > { %10324 = vst [vmem:[#allocation78_spill] sm:$0xff] %v9593_v3  ;;  %v3771_v32 = vadd.f32 %v3770_v5, %v9313_v24  ;;  %v10325_v3 = vld [vmem:[#allocation20_spill] sm:$0xff] }
 0x46c   : > { %v3825_v6 = vadd.f32 %v3824_v21, %v3771_v32  ;;  %v10328_v32 = vld [vmem:[#allocation55_spill] sm:$0xff] }
 0x46f   : > { %v3878_v24 = vpop.f32.mrf.mxu2 }
 0x470   : > { %v9616_v33 = vadd.f32 %v3878_v24, %v3825_v6  ;;  %v9618_v34 = vpop.f32.mrf.mxu3  ;;  %v3827_v53 = vpop.f32.mrf.mxu1  ;;  %v5892_v6 = vld [vmem:[%s9948_s1 + $0x538] sm:$0xf0]  ;;  %v6721_v24 = vld [vmem:[%s9948_s1 + $0x82c] sm:$0xf] }
 0x471   : > { %v3773_v17 = vpop.f32.mrf.mxu0 }
 0x472   : > { %v3774_v5 = vadd.f32 %v3773_v17, %v9344_v4  ;;  %v6689_v4 = vld [vmem:[%s9948_s1 + $0x72c] sm:$0xf]  ;;  %v6276_v17 = vld [vmem:[%s9948_s1 + $0x838] sm:$0xf0] }
 0x473   : > { %4037 = vmatmul.bf16.gmra.mxu1 %v10326_v50  ;;  %v6625_v50 = vld [vmem:[%s9948_s1 + $0x52c] sm:$0xf] }
 0x474   : > { %v3828_v47 = vadd.f32 %v3827_v53, %v3774_v5  ;;  %3983 = vmatmul.bf16.gmra.mxu0 %v10325_v3  ;;  %4091 = vmatmul.bf16.gmra.mxu2 %v10327_v10  ;;  %v6148_v3 = vld [vmem:[%s9948_s1 + $0x738] sm:$0xf0]  ;;  %v5895_v5 = vor.u32 %v6625_v50, %v5892_v6  ;;  %v6279_v53 = vor.u32 %v6721_v24, %v6276_v17  ;;  %v10330_v17 = vld [vmem:[#allocation24_spill] sm:$0xff] }
 0x475   : > { %4145 = vmatmul.bf16.gmra.mxu3 %v10328_v32  ;;  %v6151_v22 = vor.u32 %v6689_v4, %v6148_v3 }
 0x476   : > { %4172 = vmatpush.bf16.msra.mxu0 %v5895_v5  ;;  %4334 = vmatpush.bf16.msra.mxu3 %v6279_v53 }
 0x477   : > { %v3881_v21 = vpop.f32.mrf.mxu2  ;;  %4280 = vmatpush.bf16.msra.mxu2 %v6151_v22 }
 0x478   : > { %v9625_v60 = vadd.f32 %v3881_v21, %v3828_v47  ;;  %v9627_v37 = vpop.f32.mrf.mxu3  ;;  %v3829_v49 = vpop.f32.mrf.mxu1  ;;  %v6020_v47 = vld [vmem:[%s9948_s1 + $0x638] sm:$0xf0] }
 0x479   : > { %v3775_v29 = vpop.f32.mrf.mxu0 }
 0x47a   : > { %10329 = vst [vmem:[#allocation79_spill] sm:$0xff] %v9625_v60  ;;  %v3776_v42 = vadd.f32 %v3775_v29, %v9347_v40  ;;  %v6657_v40 = vld [vmem:[%s9948_s1 + $0x62c] sm:$0xf]  ;;  %v10331_v60 = vld [vmem:[#allocation25_spill] sm:$0xff] }
 0x47b   : > { %v6023_v32 = vor.u32 %v6657_v40, %v6020_v47  ;;  %v6132_v47 = vld [vmem:[%s9948_s1 + $0x718] sm:$0xf0] }
 0x47c   : > { %v3830_v10 = vadd.f32 %v3829_v49, %v3776_v42  ;;  %v10332_v42 = vld [vmem:[#allocation26_spill] sm:$0xff]  ;;  %v10333_v49 = vld [vmem:[#allocation59_spill] sm:$0xff] }
 0x47d   : > { %4226 = vmatpush.bf16.msra.mxu1 %v6023_v32 }
 0x47f   : > { %v3883_v21 = vpop.f32.mrf.mxu2 }
 0x480   : > { %v9654_v29 = vadd.f32 %v3883_v21, %v3830_v10  ;;  %v9656_v4 = vpop.f32.mrf.mxu3  ;;  %v3832_v6 = vpop.f32.mrf.mxu1 }
 0x481   : > { %v3778_v3 = vpop.f32.mrf.mxu0 }
 0x482   : > { %v3779_v50 = vadd.f32 %v3778_v3, %v9378_v15  ;;  %v6685_v15 = vld [vmem:[%s9948_s1 + $0x70c] sm:$0xf]  ;;  %v5876_v3 = vld [vmem:[%s9948_s1 + $0x518] sm:$0xf0] }
 0x483   : > { %4042 = vmatmul.bf16.gmra.mxu1 %v10331_v60  ;;  %v6621_v60 = vld [vmem:[%s9948_s1 + $0x50c] sm:$0xf]  ;;  %v6135_v21 = vor.u32 %v6685_v15, %v6132_v47 }
 0x484   : > { %v3833_v24 = vadd.f32 %v3832_v6, %v3779_v50  ;;  %3988 = vmatmul.bf16.gmra.mxu0 %v10330_v17  ;;  %4096 = vmatmul.bf16.gmra.mxu2 %v10332_v42  ;;  %v6717_v50 = vld [vmem:[%s9948_s1 + $0x80c] sm:$0xf]  ;;  %v6260_v6 = vld [vmem:[%s9948_s1 + $0x818] sm:$0xf0] }
 0x485   : > { %4150 = vmatmul.bf16.gmra.mxu3 %v10333_v49  ;;  %v6263_v17 = vor.u32 %v6717_v50, %v6260_v6  ;;  %v6004_v42 = vld [vmem:[%s9948_s1 + $0x618] sm:$0xf0]  ;;  %4281 = vmatpush.bf16.msra.mxu2 %v6135_v21 }
 0x487   : > { %v3886_v22 = vpop.f32.mrf.mxu2  ;;  %4335 = vmatpush.bf16.msra.mxu3 %v6263_v17 }
 0x488   : > { %v9663_v5 = vadd.f32 %v3886_v22, %v3833_v24  ;;  %v9665_v53 = vpop.f32.mrf.mxu3  ;;  %v3834_v32 = vpop.f32.mrf.mxu1  ;;  %v5879_v24 = vor.u32 %v6621_v60, %v5876_v3 }
 0x489   : > { %v3780_v40 = vpop.f32.mrf.mxu0 }
 0x48a   : > { %10334 = vst [vmem:[#allocation80_spill] sm:$0xff] %v9663_v5  ;;  %v3781_v10 = vadd.f32 %v3780_v40, %v9381_v59  ;;  %v6653_v59 = vld [vmem:[%s9948_s1 + $0x60c] sm:$0xf]  ;;  %4173 = vmatpush.bf16.msra.mxu0 %v5879_v24  ;;  %v10335_v5 = vld [vmem:[#allocation28_spill] sm:$0xff] }
 0x48b   : > { %v6007_v22 = vor.u32 %v6653_v59, %v6004_v42 }
 0x48c   : > { %v3835_v49 = vadd.f32 %v3834_v32, %v3781_v10 }
 0x48d   : > { %4227 = vmatpush.bf16.msra.mxu1 %v6007_v22 }
 0x48f   : > { %v3888_v40 = vpop.f32.mrf.mxu2 }
 0x490   : > { %v9692_v15 = vadd.f32 %v3888_v40, %v3835_v49  ;;  %v9694_v47 = vpop.f32.mrf.mxu3  ;;  %v3837_v50 = vpop.f32.mrf.mxu1  ;;  %v10336_v40 = vld [vmem:[#allocation32_spill] sm:$0xff] }
 0x491   : > { %v3783_v60 = vpop.f32.mrf.mxu0 }
 0x492   : > { %v3784_v3 = vadd.f32 %v3783_v60, %v9406_v13 }
 0x493   : > { %4047 = vmatmul.bf16.gmra.mxu1 %v10267_v7 }
 0x494   : > { %v3838_v6 = vadd.f32 %v3837_v50, %v3784_v3  ;;  %3993 = vmatmul.bf16.gmra.mxu0 %v10335_v5  ;;  %4101 = vmatmul.bf16.gmra.mxu2 %v10207_v23 }
 0x495   : > { %4155 = vmatmul.bf16.gmra.mxu3 %v10208_v62 }
 0x497   : > { %v3891_v10 = vpop.f32.mrf.mxu2 }
 0x498   : > { %v9701_v32 = vadd.f32 %v3891_v10, %v3838_v6  ;;  %v9703_v21 = vpop.f32.mrf.mxu3  ;;  %v3839_v59 = vpop.f32.mrf.mxu1 }
 0x499   : > { %v3785_v24 = vpop.f32.mrf.mxu0 }
 0x49a   : > { %v3786_v17 = vadd.f32 %v3785_v24, %v9415_v9 }
 0x49c   : > { %v3840_v13 = vadd.f32 %v3839_v59, %v3786_v17 }
 0x49f   : > { %v3893_v42 = vpop.f32.mrf.mxu2 }
 0x4a0   : > { %v9706_v49 = vadd.f32 %v3893_v42, %v3840_v13  ;;  %v9708_v5 = vpop.f32.mrf.mxu3  ;;  %v4013_v22 = vpop.f32.mrf.mxu1 }
 0x4a1   : > { %v3959_v7 = vpop.f32.mrf.mxu0 }
 0x4a2   : > { %v3960_v23 = vadd.f32 %v3959_v7, %v9423_v2 }
 0x4a3   : > { %4052 = vmatmul.bf16.gmra.mxu1 %v10269_v31 }
 0x4a4   : > { %v4014_v62 = vadd.f32 %v4013_v22, %v3960_v23  ;;  %3998 = vmatmul.bf16.gmra.mxu0 %v10336_v40  ;;  %4106 = vmatmul.bf16.gmra.mxu2 %v10270_v26  ;;  %v10337_v23 = vld [vmem:[#allocation36_spill] sm:$0xff] }
 0x4a5   : > { %4160 = vmatmul.bf16.gmra.mxu3 %v10271_v30 }
 0x4a7   : > { %v4067_v9 = vpop.f32.mrf.mxu2 }
 0x4a8   : > { %v4068_v60 = vadd.f32 %v4067_v9, %v4014_v62  ;;  %v4121_v3 = vpop.f32.mrf.mxu3  ;;  %v4015_v10 = vpop.f32.mrf.mxu1 }
 0x4a9   : > { %v3961_v50 = vpop.f32.mrf.mxu0 }
 0x4aa   : > { %v3962_v6 = vadd.f32 %v3961_v50, %v9434_v43  ;;  %v9716_v24 = vadd.f32 %v4121_v3, %v4068_v60 }
 0x4ac   : > { %v4016_v2 = vadd.f32 %v4015_v10, %v3962_v6 }
 0x4af   : > { %v4069_v17 = vpop.f32.mrf.mxu2 }
 0x4b0   : > { %v4070_v59 = vadd.f32 %v4069_v17, %v4016_v2  ;;  %v4123_v13 = vpop.f32.mrf.mxu3  ;;  %v4018_v7 = vpop.f32.mrf.mxu1 }
 0x4b1   : > { %v3964_v42 = vpop.f32.mrf.mxu0 }
 0x4b2   : > { %v3965_v31 = vadd.f32 %v3964_v42, %v9461_v38  ;;  %v9719_v26 = vadd.f32 %v4123_v13, %v4070_v59  ;;  %v10338_v59 = vld [vmem:[#allocation40_spill] sm:$0xff] }
 0x4b3   : > { %4228 = vmatmul.bf16.vlgmr.msra.gmra.mxu1 %v10273_v63 }
 0x4b4   : > { %v4019_v30 = vadd.f32 %v4018_v7, %v3965_v31  ;;  %4174 = vmatmul.bf16.vlgmr.msra.gmra.mxu0 %v10337_v23  ;;  %4282 = vmatmul.bf16.vlgmr.msra.gmra.mxu2 %v10213_v46 }
 0x4b5   : > { %4336 = vmatmul.bf16.vlgmr.msra.gmra.mxu3 %v10274_v39 }
 0x4b7   : > { %v4072_v43 = vpop.f32.mrf.mxu2 }
 0x4b8   : > { %v4073_v22 = vadd.f32 %v4072_v43, %v4019_v30  ;;  %v4126_v62 = vpop.f32.mrf.mxu3  ;;  %v4020_v60 = vpop.f32.mrf.mxu1 }
 0x4b9   : > { %v3966_v40 = vpop.f32.mrf.mxu0 }
 0x4ba   : > { %v3967_v9 = vadd.f32 %v3966_v40, %v9466_v25  ;;  %v9726_v38 = vadd.f32 %v4126_v62, %v4073_v22 }
 0x4bc   : > { %v4021_v3 = vadd.f32 %v4020_v60, %v3967_v9  ;;  %v10339_v60 = vld [vmem:[#allocation44_spill] sm:$0xff] }
 0x4bf   : > { %v4074_v50 = vpop.f32.mrf.mxu2 }
 0x4c0   : > { %v4075_v6 = vadd.f32 %v4074_v50, %v4021_v3  ;;  %v4128_v10 = vpop.f32.mrf.mxu3  ;;  %v4023_v17 = vpop.f32.mrf.mxu1 }
 0x4c1   : > { %v3969_v2 = vpop.f32.mrf.mxu0 }
 0x4c2   : > { %v3970_v63 = vadd.f32 %v3969_v2, %v9499_v45  ;;  %v9729_v46 = vadd.f32 %v4128_v10, %v4075_v6 }
 0x4c3   : > { %4233 = vmatmul.bf16.gmra.mxu1 %v10276_v14 }
 0x4c4   : > { %v4024_v39 = vadd.f32 %v4023_v17, %v3970_v63  ;;  %4179 = vmatmul.bf16.gmra.mxu0 %v10338_v59  ;;  %4287 = vmatmul.bf16.gmra.mxu2 %v10215_v19 }
 0x4c5   : > { %4341 = vmatmul.bf16.gmra.mxu3 %v7874_v57 }
 0x4c7   : > { %v4077_v25 = vpop.f32.mrf.mxu2 }
 0x4c8   : > { %v4078_v13 = vadd.f32 %v4077_v25, %v4024_v39  ;;  %v4131_v42 = vpop.f32.mrf.mxu3  ;;  %v4025_v30 = vpop.f32.mrf.mxu1 }
 0x4c9   : > { %v3971_v31 = vpop.f32.mrf.mxu0 }
 0x4ca   : > { %v3972_v7 = vadd.f32 %v3971_v31, %v9504_v55  ;;  %v9736_v45 = vadd.f32 %v4131_v42, %v4078_v13  ;;  %v10340_v42 = vld [vmem:[#allocation48_spill] sm:$0xff] }
 0x4cc   : > { %v4026_v23 = vadd.f32 %v4025_v30, %v3972_v7 }
 0x4cf   : > { %v4079_v43 = vpop.f32.mrf.mxu2 }
 0x4d0   : > { %v4080_v22 = vadd.f32 %v4079_v43, %v4026_v23  ;;  %v4133_v62 = vpop.f32.mrf.mxu3  ;;  %v4028_v9 = vpop.f32.mrf.mxu1 }
 0x4d1   : > { %v3974_v40 = vpop.f32.mrf.mxu0 }
 0x4d2   : > { %v3975_v14 = vadd.f32 %v3974_v40, %v9537_v58  ;;  %v9739_v19 = vadd.f32 %v4133_v62, %v4080_v22 }
 0x4d3   : > { %4238 = vmatmul.bf16.gmra.mxu1 %v10277_v41 }
 0x4d4   : > { %v4029_v57 = vadd.f32 %v4028_v9, %v3975_v14  ;;  %4184 = vmatmul.bf16.gmra.mxu0 %v10339_v60  ;;  %4292 = vmatmul.bf16.gmra.mxu2 %v10216_v51  ;;  %v10341_v60 = vld [vmem:[#allocation52_spill] sm:$0xff] }
 0x4d5   : > { %4346 = vmatmul.bf16.gmra.mxu3 %v7912_v36 }
 0x4d7   : > { %v4082_v55 = vpop.f32.mrf.mxu2 }
 0x4d8   : > { %v4083_v3 = vadd.f32 %v4082_v55, %v4029_v57  ;;  %v4136_v50 = vpop.f32.mrf.mxu3  ;;  %v4030_v2 = vpop.f32.mrf.mxu1 }
 0x4d9   : > { %v3976_v6 = vpop.f32.mrf.mxu0 }
 0x4da   : > { %v3977_v10 = vadd.f32 %v3976_v6, %v9542_v18  ;;  %v9746_v58 = vadd.f32 %v4136_v50, %v4083_v3 }
 0x4dc   : > { %v4031_v63 = vadd.f32 %v4030_v2, %v3977_v10 }
 0x4df   : > { %v4084_v17 = vpop.f32.mrf.mxu2 }
 0x4e0   : > { %v4085_v39 = vadd.f32 %v4084_v17, %v4031_v63  ;;  %v4138_v59 = vpop.f32.mrf.mxu3  ;;  %v4033_v13 = vpop.f32.mrf.mxu1 }
 0x4e1   : > { %v3979_v25 = vpop.f32.mrf.mxu0 }
 0x4e2   : > { %v3980_v41 = vadd.f32 %v3979_v25, %v9569_v12  ;;  %v9749_v51 = vadd.f32 %v4138_v59, %v4085_v39 }
 0x4e3   : > { %4243 = vmatmul.bf16.gmra.mxu1 %v10278_v54 }
 0x4e4   : > { %v4034_v36 = vadd.f32 %v4033_v13, %v3980_v41  ;;  %4189 = vmatmul.bf16.gmra.mxu0 %v10340_v42  ;;  %4297 = vmatmul.bf16.gmra.mxu2 %v10217_v20  ;;  %v10342_v41 = vld [vmem:[#allocation56_spill] sm:$0xff] }
 0x4e5   : > { %4351 = vmatmul.bf16.gmra.mxu3 %v7944_v52 }
 0x4e7   : > { %v4087_v18 = vpop.f32.mrf.mxu2 }
 0x4e8   : > { %v4088_v31 = vadd.f32 %v4087_v18, %v4034_v36  ;;  %v4141_v7 = vpop.f32.mrf.mxu3  ;;  %v4035_v43 = vpop.f32.mrf.mxu1 }
 0x4e9   : > { %v3981_v30 = vpop.f32.mrf.mxu0 }
 0x4ea   : > { %v3982_v23 = vadd.f32 %v3981_v30, %v9580_v56  ;;  %v9756_v12 = vadd.f32 %v4141_v7, %v4088_v31 }
 0x4ec   : > { %v4036_v22 = vadd.f32 %v4035_v43, %v3982_v23 }
 0x4ef   : > { %v4089_v62 = vpop.f32.mrf.mxu2 }
 0x4f0   : > { %v4090_v40 = vadd.f32 %v4089_v62, %v4036_v22  ;;  %v4143_v14 = vpop.f32.mrf.mxu3  ;;  %v4038_v57 = vpop.f32.mrf.mxu1 }
 0x4f1   : > { %v3984_v9 = vpop.f32.mrf.mxu0 }
 0x4f2   : > { %v3985_v54 = vadd.f32 %v3984_v9, %v9595_v48  ;;  %v9759_v20 = vadd.f32 %v4143_v14, %v4090_v40  ;;  %v10343_v40 = vld [vmem:[#allocation60_spill] sm:$0xff]  ;;  %v10344_v14 = vld [vmem:[#allocation61_spill] sm:$0xff]  ;;  %v10345_v9 = vld [vmem:[#allocation62_spill] sm:$0xff] }
 0x4f3   : > { %4248 = vmatmul.bf16.gmra.mxu1 %v10279_v8 }
 0x4f4   : > { %v4039_v52 = vadd.f32 %v4038_v57, %v3985_v54  ;;  %4194 = vmatmul.bf16.gmra.mxu0 %v10341_v60  ;;  %4302 = vmatmul.bf16.gmra.mxu2 %v10218_v61 }
 0x4f5   : > { %4356 = vmatmul.bf16.gmra.mxu3 %v10280_v44 }
 0x4f7   : > { %v4092_v56 = vpop.f32.mrf.mxu2 }
 0x4f8   : > { %v4093_v55 = vadd.f32 %v4092_v56, %v4039_v52  ;;  %v4146_v3 = vpop.f32.mrf.mxu3  ;;  %v4040_v10 = vpop.f32.mrf.mxu1 }
 0x4f9   : > { %v3986_v50 = vpop.f32.mrf.mxu0 }
 0x4fa   : > { %v3987_v6 = vadd.f32 %v3986_v50, %v9618_v34  ;;  %v9766_v48 = vadd.f32 %v4146_v3, %v4093_v55 }
 0x4fc   : > { %v4041_v2 = vadd.f32 %v4040_v10, %v3987_v6 }
 0x4ff   : > { %v4094_v63 = vpop.f32.mrf.mxu2 }
 0x500   : > { %v4095_v17 = vadd.f32 %v4094_v63, %v4041_v2  ;;  %v4148_v39 = vpop.f32.mrf.mxu3  ;;  %v4043_v25 = vpop.f32.mrf.mxu1 }
 0x501   : > { %v3989_v59 = vpop.f32.mrf.mxu0 }
 0x502   : > { %v3990_v8 = vadd.f32 %v3989_v59, %v9627_v37  ;;  %v9769_v61 = vadd.f32 %v4148_v39, %v4095_v17 }
 0x503   : > { %4253 = vmatmul.bf16.gmra.mxu1 %v10282_v16 }
 0x504   : > { %v4044_v44 = vadd.f32 %v4043_v25, %v3990_v8  ;;  %4199 = vmatmul.bf16.gmra.mxu0 %v10342_v41  ;;  %4307 = vmatmul.bf16.gmra.mxu2 %v10219_v27  ;;  %v10347_v8 = vld [vmem:[#allocation64_spill] sm:$0xff] }
 0x505   : > { %4361 = vmatmul.bf16.gmra.mxu3 %v10283_v11 }
 0x507   : > { %v4097_v34 = vpop.f32.mrf.mxu2 }
 0x508   : > { %v4098_v13 = vadd.f32 %v4097_v34, %v4044_v44  ;;  %v4151_v36 = vpop.f32.mrf.mxu3  ;;  %v4045_v31 = vpop.f32.mrf.mxu1 }
 0x509   : > { %v3991_v42 = vpop.f32.mrf.mxu0 }
 0x50a   : > { %v3992_v18 = vadd.f32 %v3991_v42, %v9656_v4  ;;  %v9776_v37 = vadd.f32 %v4151_v36, %v4098_v13  ;;  %v10346_v4 = vld [vmem:[#allocation74_spill] sm:$0xff] }
 0x50c   : > { %v4046_v7 = vadd.f32 %v4045_v31, %v3992_v18 }
 0x50f   : > { %v4099_v30 = vpop.f32.mrf.mxu2 }
 0x510   : > { %v4100_v23 = vadd.f32 %v4099_v30, %v4046_v7  ;;  %v4153_v43 = vpop.f32.mrf.mxu3  ;;  %v4048_v62 = vpop.f32.mrf.mxu1 }
 0x511   : > { %v3994_v22 = vpop.f32.mrf.mxu0 }
 0x512   : > { %v3995_v16 = vadd.f32 %v3994_v22, %v9665_v53  ;;  %v9779_v27 = vadd.f32 %v4153_v43, %v4100_v23  ;;  %v10349_v43 = vld [vmem:[#allocation69_spill] sm:$0xff]  ;;  %v10350_v22 = vld [vmem:[#allocation70_spill] sm:$0xff] }
 0x513   : > { %4258 = vmatmul.bf16.gmra.mxu1 %v10344_v14 }
 0x514   : > { %v4049_v11 = vadd.f32 %v4048_v62, %v3995_v16  ;;  %4204 = vmatmul.bf16.gmra.mxu0 %v10343_v40  ;;  %4312 = vmatmul.bf16.gmra.mxu2 %v10345_v9  ;;  %v10351_v16 = vld [vmem:[#allocation76_spill] sm:$0xff]  ;;  %v10352_v62 = vld [vmem:[#allocation30_spill] sm:$0xff] }
 0x515   : > { %4366 = vmatmul.bf16.gmra.mxu3 %v10346_v4  ;;  %v6758_v40 = vld [vmem:[%s9950_s3] sm:$0xf] }
 0x516   : > { %v9815_v14 = vperm.slane %v6758_v40, 2 }
 0x517   : > { %v4102_v54 = vpop.f32.mrf.mxu2 }
 0x518   : > { %v4103_v57 = vadd.f32 %v4102_v54, %v4049_v11  ;;  %v4156_v52 = vpop.f32.mrf.mxu3  ;;  %v4050_v55 = vpop.f32.mrf.mxu1 }
 0x519   : > { %v3996_v60 = vpop.f32.mrf.mxu0 }
 0x51a   : > { %v3997_v56 = vadd.f32 %v3996_v60, %v9694_v47  ;;  %v9786_v53 = vadd.f32 %v4156_v52, %v4103_v57 }
 0x51c   : > { %v4051_v3 = vadd.f32 %v4050_v55, %v3997_v56 }
 0x51f   : > { %v4104_v50 = vpop.f32.mrf.mxu2 }
 0x520   : > { %v4105_v6 = vadd.f32 %v4104_v50, %v4051_v3  ;;  %v4158_v10 = vpop.f32.mrf.mxu3  ;;  %v4053_v17 = vpop.f32.mrf.mxu1  ;;  %v9820_v3 = vperm.slane %v6758_v40, 3 }
 0x521   : > { %v3999_v2 = vpop.f32.mrf.mxu0 }
 0x522   : > { %v4000_v63 = vadd.f32 %v3999_v2, %v9703_v21  ;;  %v9789_v39 = vadd.f32 %v4158_v10, %v4105_v6  ;;  %v10353_v10 = vld [vmem:[#allocation63_spill] sm:$0xff] }
 0x523   : > { %4263 = vmatmul.bf16.gmra.mxu1 %v10289_v1  ;;  %v6757_v1 = vld [vmem:[%s9949_s2] sm:$0xf] }
 0x524   : > { %v4054_v59 = vadd.f32 %v4053_v17, %v4000_v63  ;;  %4209 = vmatmul.bf16.gmra.mxu0 %v10347_v8  ;;  %4317 = vmatmul.bf16.gmra.mxu2 %v10290_v28  ;;  %v9801_v28 = vperm.slane %v6757_v1, 2  ;;  %v9817_v57 = vperm.slane %v6757_v1, 3  ;;  %v10354_v1 = vld [vmem:[#allocation38_spill] sm:$0xff] }
 0x525   : > { %4371 = vmatmul.bf16.gmra.mxu3 %v10291_v35 }
 0x526   : > { %v4394_v11 = vmul.f32 %v9801_v28, %v10352_v62  ;;  %v4398_v2 = vmul.f32 %v9801_v28, %v10353_v10 }
 0x527   : > { %v4107_v47 = vpop.f32.mrf.mxu2 }
 0x528   : > { %v4108_v25 = vadd.f32 %v4107_v47, %v4054_v59  ;;  %v4161_v44 = vpop.f32.mrf.mxu3  ;;  %v4055_v13 = vpop.f32.mrf.mxu1  ;;  %v4476_v56 = vadd.f32 %v9815_v14, %v4394_v11 }
 0x529   : > { %v4001_v41 = vpop.f32.mrf.mxu0 }
 0x52a   : > { %v4002_v34 = vadd.f32 %v4001_v41, %v9708_v5  ;;  %v9796_v21 = vadd.f32 %v4161_v44, %v4108_v25  ;;  %v10348_v5 = vld [vmem:[#allocation68_spill] sm:$0xff]  ;;  %v4620_v63 = vmul.f32 0.01, %v4476_v56  ;;  %vm4548_vm4 = vcmp.ge.f32.partialorder %v4476_v56, 0.0 }
 0x52c   : > { %v4056_v36 = vadd.f32 %v4055_v13, %v4002_v34  ;;  %v4480_v34 = vadd.f32 %v9815_v14, %v4398_v2  ;;  %v4692_v13 = vsel %vm4548_vm4, %v4476_v56, %v4620_v63 }
 0x52e   : > { %vm4552_vm6 = vcmp.ge.f32.partialorder %v4480_v34, 0.0 }
 0x52f   : > { %v4109_v42 = vpop.f32.mrf.mxu2 }
 0x530   : > { %v4110_v18 = vadd.f32 %v4109_v42, %v4056_v36  ;;  %v4163_v31 = vpop.f32.mrf.mxu3  ;;  %v4229_v30 = vpop.f32.mrf.mxu1 }
 0x531   : > { %v4175_v7 = vpop.f32.mrf.mxu0 }
 0x532   : > { %v9803_v35 = vadd.f32 %v4163_v31, %v4110_v18  ;;  %v4176_v23 = vadd.f32 %v4175_v7, %v9716_v24 }
 0x533   : > { %4268 = vmatmul.bf16.gmra.mxu1 %v10349_v43 }
 0x534   : > { %4214 = vmatmul.bf16.gmra.mxu0 %v10348_v5  ;;  %4322 = vmatmul.bf16.gmra.mxu2 %v10350_v22  ;;  %v4230_v9 = vadd.f32 %v4229_v30, %v4176_v23  ;;  %v4624_v30 = vmul.f32 0.01, %v4480_v34  ;;  %v4402_v23 = vmul.f32 %v9801_v28, %v10354_v1 }
 0x535   : > { %4376 = vmatmul.bf16.gmra.mxu3 %v10351_v16 }
 0x537   : > { %v4283_v4 = vpop.f32.mrf.mxu2 }
 0x538   : > { %v4284_v24 = vadd.f32 %v4283_v4, %v4230_v9  ;;  %v4337_v54 = vpop.f32.mrf.mxu3  ;;  %v4231_v60 = vpop.f32.mrf.mxu1  ;;  %v4484_v4 = vadd.f32 %v9815_v14, %v4402_v23 }
 0x539   : > { %v4177_v52 = vpop.f32.mrf.mxu0 }
 0x53a   : > { %v4338_v55 = vadd.f32 %v4337_v54, %v4284_v24  ;;  %v4178_v50 = vadd.f32 %v4177_v52, %v9719_v26  ;;  %vm4556_vm8 = vcmp.ge.f32.partialorder %v4484_v4, 0.0 }
 0x53c   : > { %v4395_v6 = vmul.f32 %v9817_v57, %v4338_v55  ;;  %v4232_v59 = vadd.f32 %v4231_v60, %v4178_v50  ;;  %v10355_v55 = vld [vmem:[#allocation42_spill] sm:$0xff] }
 0x53d   : > { %v4406_v50 = vmul.f32 %v9801_v28, %v10355_v55 }
 0x53e   : > { %v4477_v17 = vadd.f32 %v9820_v3, %v4395_v6  ;;  %v4628_v6 = vmul.f32 0.01, %v4484_v4 }
 0x53f   : > { %v4285_v8 = vpop.f32.mrf.mxu2 }
 0x540   : > { %vm4549_vm5 = vcmp.ge.f32.partialorder %v4477_v17, 0.0  ;;  %v4621_v47 = vmul.f32 0.01, %v4477_v17  ;;  %v4286_v25 = vadd.f32 %v4285_v8, %v4232_v59  ;;  %v4339_v44 = vpop.f32.mrf.mxu3  ;;  %v4234_v26 = vpop.f32.mrf.mxu1 }
 0x541   : > { %v4180_v41 = vpop.f32.mrf.mxu0 }
 0x542   : > { %v4693_v36 = vsel %vm4549_vm5, %v4477_v17, %v4621_v47  ;;  %v4340_v42 = vadd.f32 %v4339_v44, %v4286_v25  ;;  %v4181_v18 = vadd.f32 %v4180_v41, %v9726_v38  ;;  %v4696_v38 = vsel %vm4552_vm6, %v4480_v34, %v4624_v30 }
 0x543   : > { %v4763_v31 = vpack.c.bf16 %v4693_v36, %v4692_v13  ;;  %v4700_v44 = vsel %vm4556_vm8, %v4484_v4, %v4628_v6 }
 0x544   : > { %v4399_v7 = vmul.f32 %v9817_v57, %v4340_v42  ;;  %v4235_v43 = vadd.f32 %v4234_v26, %v4181_v18  ;;  %v10356_v18 = vld [vmem:[#allocation46_spill] sm:$0xff] }
 0x545   : > { %4799 = vst [vmem:[%s8754_s11 + $0x8] sm:$0xff] %v4763_v31  ;;  %v4410_v31 = vmul.f32 %v9801_v28, %v10356_v18 }
 0x546   : > { %v4481_v5 = vadd.f32 %v9820_v3, %v4399_v7 }
 0x547   : > { %v4288_v22 = vpop.f32.mrf.mxu2 }
 0x548   : > { %vm4553_vm7 = vcmp.ge.f32.partialorder %v4481_v5, 0.0  ;;  %v4625_v16 = vmul.f32 0.01, %v4481_v5  ;;  %v4289_v62 = vadd.f32 %v4288_v22, %v4235_v43  ;;  %v4342_v11 = vpop.f32.mrf.mxu3  ;;  %v4236_v9 = vpop.f32.mrf.mxu1 }
 0x549   : > { %v4182_v40 = vpop.f32.mrf.mxu0 }
 0x54a   : > { %v4697_v24 = vsel %vm4553_vm7, %v4481_v5, %v4625_v16  ;;  %v4343_v54 = vadd.f32 %v4342_v11, %v4289_v62  ;;  %v4183_v52 = vadd.f32 %v4182_v40, %v9729_v46  ;;  %v4488_v46 = vadd.f32 %v9815_v14, %v4406_v50 }
 0x54b   : > { %v4765_v60 = vpack.c.bf16 %v4697_v24, %v4696_v38  ;;  %v4492_v62 = vadd.f32 %v9815_v14, %v4410_v31  ;;  %v10357_v24 = vld [vmem:[#allocation50_spill] sm:$0xff] }
 0x54c   : > { %v4403_v56 = vmul.f32 %v9817_v57, %v4343_v54  ;;  %v4237_v2 = vadd.f32 %v4236_v9, %v4183_v52  ;;  %v4632_v42 = vmul.f32 0.01, %v4488_v46  ;;  %vm4560_vm10 = vcmp.ge.f32.partialorder %v4488_v46, 0.0 }
 0x54d   : > { %4801 = vst [vmem:[%s8754_s11 + $0x18] sm:$0xff] %v4765_v60  ;;  %v4414_v54 = vmul.f32 %v9801_v28, %v10357_v24  ;;  %v4636_v52 = vmul.f32 0.01, %v4492_v62  ;;  %vm4564_vm12 = vcmp.ge.f32.partialorder %v4492_v62, 0.0 }
 0x54e   : > { %v4485_v10 = vadd.f32 %v9820_v3, %v4403_v56 }
 0x54f   : > { %v4290_v63 = vpop.f32.mrf.mxu2 }
 0x550   : > { %vm4557_vm9 = vcmp.ge.f32.partialorder %v4485_v10, 0.0  ;;  %v4629_v17 = vmul.f32 0.01, %v4485_v10  ;;  %v4291_v59 = vadd.f32 %v4290_v63, %v4237_v2  ;;  %v4344_v8 = vpop.f32.mrf.mxu3  ;;  %v4239_v25 = vpop.f32.mrf.mxu1 }
 0x551   : > { %v4185_v47 = vpop.f32.mrf.mxu0 }
 0x552   : > { %v4701_v41 = vsel %vm4557_vm9, %v4485_v10, %v4629_v17  ;;  %v4345_v34 = vadd.f32 %v4344_v8, %v4291_v59  ;;  %v4186_v26 = vadd.f32 %v4185_v47, %v9736_v45  ;;  %v4704_v45 = vsel %vm4560_vm10, %v4488_v46, %v4632_v42 }
 0x553   : > { %v4767_v13 = vpack.c.bf16 %v4701_v41, %v4700_v44  ;;  %v4708_v17 = vsel %vm4564_vm12, %v4492_v62, %v4636_v52  ;;  %v10358_v41 = vld [vmem:[#allocation54_spill] sm:$0xff] }
 0x554   : > { %v4407_v36 = vmul.f32 %v9817_v57, %v4345_v34  ;;  %v4240_v30 = vadd.f32 %v4239_v25, %v4186_v26  ;;  %v4418_v34 = vmul.f32 %v9801_v28, %v10358_v41 }
 0x555   : > { %4803 = vst [vmem:[%s8754_s11 + $0x28] sm:$0xff] %v4767_v13 }
 0x556   : > { %v4489_v7 = vadd.f32 %v9820_v3, %v4407_v36 }
 0x557   : > { %v4293_v1 = vpop.f32.mrf.mxu2 }
 0x558   : > { %vm4561_vm11 = vcmp.ge.f32.partialorder %v4489_v7, 0.0  ;;  %v4633_v23 = vmul.f32 0.01, %v4489_v7  ;;  %v4294_v5 = vadd.f32 %v4293_v1, %v4240_v30  ;;  %v4347_v43 = vpop.f32.mrf.mxu3  ;;  %v4241_v16 = vpop.f32.mrf.mxu1  ;;  %v4500_v1 = vadd.f32 %v9815_v14, %v4418_v34 }
 0x559   : > { %v4187_v22 = vpop.f32.mrf.mxu0 }
 0x55a   : > { %v4705_v11 = vsel %vm4561_vm11, %v4489_v7, %v4633_v23  ;;  %v4348_v40 = vadd.f32 %v4347_v43, %v4294_v5  ;;  %v4188_v38 = vadd.f32 %v4187_v22, %v9739_v19  ;;  %v4496_v19 = vadd.f32 %v9815_v14, %v4414_v54 }
 0x55b   : > { %v4769_v9 = vpack.c.bf16 %v4705_v11, %v4704_v45  ;;  %v4644_v11 = vmul.f32 0.01, %v4500_v1  ;;  %vm4572_vm0 = vcmp.ge.f32.partialorder %v4500_v1, 0.0 }
 0x55c   : > { %v4411_v4 = vmul.f32 %v9817_v57, %v4348_v40  ;;  %v4242_v56 = vadd.f32 %v4241_v16, %v4188_v38  ;;  %v4640_v44 = vmul.f32 0.01, %v4496_v19  ;;  %vm4568_vm14 = vcmp.ge.f32.partialorder %v4496_v19, 0.0  ;;  %v10359_v16 = vld [vmem:[#allocation58_spill] sm:$0xff] }
 0x55d   : > { %4805 = vst [vmem:[%s8754_s11 + $0x38] sm:$0xff] %v4769_v9  ;;  %v4422_v62 = vmul.f32 %v9801_v28, %v10359_v16 }
 0x55e   : > { %v4493_v60 = vadd.f32 %v9820_v3, %v4411_v4 }
 0x55f   : > { %v4295_v55 = vpop.f32.mrf.mxu2 }
 0x560   : > { %vm4565_vm13 = vcmp.ge.f32.partialorder %v4493_v60, 0.0  ;;  %v4637_v50 = vmul.f32 0.01, %v4493_v60  ;;  %v4296_v6 = vadd.f32 %v4295_v55, %v4242_v56  ;;  %v4349_v10 = vpop.f32.mrf.mxu3  ;;  %v4244_v63 = vpop.f32.mrf.mxu1  ;;  %v4716_v56 = vsel %vm4572_vm0, %v4500_v1, %v4644_v11 }
 0x561   : > { %v4190_v2 = vpop.f32.mrf.mxu0 }
 0x562   : > { %v4709_v59 = vsel %vm4565_vm13, %v4493_v60, %v4637_v50  ;;  %v4350_v8 = vadd.f32 %v4349_v10, %v4296_v6  ;;  %v4191_v47 = vadd.f32 %v4190_v2, %v9746_v58  ;;  %v4712_v58 = vsel %vm4568_vm14, %v4496_v19, %v4640_v44 }
 0x563   : > { %v4771_v46 = vpack.c.bf16 %v4709_v59, %v4708_v17 }
 0x564   : > { %v4415_v25 = vmul.f32 %v9817_v57, %v4350_v8  ;;  %v4245_v13 = vadd.f32 %v4244_v63, %v4191_v47  ;;  %v4426_v63 = vmul.f32 %v9801_v28, %v9567_v0 }
 0x565   : > { %4807 = vst [vmem:[%s8754_s11 + $0x48] sm:$0xff] %v4771_v46 }
 0x566   : > { %v4497_v26 = vadd.f32 %v9820_v3, %v4415_v25  ;;  %v4508_v34 = vadd.f32 %v9815_v14, %v4426_v63 }
 0x567   : > { %v4298_v36 = vpop.f32.mrf.mxu2 }
 0x568   : > { %vm4569_vm15 = vcmp.ge.f32.partialorder %v4497_v26, 0.0  ;;  %v4641_v42 = vmul.f32 0.01, %v4497_v26  ;;  %v4299_v18 = vadd.f32 %v4298_v36, %v4245_v13  ;;  %v4352_v31 = vpop.f32.mrf.mxu3  ;;  %v4246_v30 = vpop.f32.mrf.mxu1  ;;  %vm4580_vm4 = vcmp.ge.f32.partialorder %v4508_v34, 0.0 }
 0x569   : > { %v4192_v7 = vpop.f32.mrf.mxu0 }
 0x56a   : > { %v4713_v23 = vsel %vm4569_vm15, %v4497_v26, %v4641_v42  ;;  %v4353_v5 = vadd.f32 %v4352_v31, %v4299_v18  ;;  %v4193_v43 = vadd.f32 %v4192_v7, %v9749_v51  ;;  %v4504_v51 = vadd.f32 %v9815_v14, %v4422_v62  ;;  %v10360_v18 = vld [vmem:[#allocation77_spill] sm:$0xff] }
 0x56b   : > { %v4773_v22 = vpack.c.bf16 %v4713_v23, %v4712_v58  ;;  %v4430_v31 = vmul.f32 %v9801_v28, %v10360_v18  ;;  %v4652_v7 = vmul.f32 0.01, %v4508_v34 }
 0x56c   : > { %v4419_v45 = vmul.f32 %v9817_v57, %v4353_v5  ;;  %v4247_v38 = vadd.f32 %v4246_v30, %v4193_v43  ;;  %v4648_v19 = vmul.f32 0.01, %v4504_v51  ;;  %vm4576_vm2 = vcmp.ge.f32.partialorder %v4504_v51, 0.0 }
 0x56d   : > { %4809 = vst [vmem:[%s8754_s11 + $0x58] sm:$0xff] %v4773_v22  ;;  %v4724_v16 = vsel %vm4580_vm4, %v4508_v34, %v4652_v7 }
 0x56e   : > { %v4501_v40 = vadd.f32 %v9820_v3, %v4419_v45 }
 0x56f   : > { %v4300_v9 = vpop.f32.mrf.mxu2 }
 0x570   : > { %vm4573_vm1 = vcmp.ge.f32.partialorder %v4501_v40, 0.0  ;;  %v4645_v4 = vmul.f32 0.01, %v4501_v40  ;;  %v4301_v24 = vadd.f32 %v4300_v9, %v4247_v38  ;;  %v4354_v54 = vpop.f32.mrf.mxu3  ;;  %v4249_v60 = vpop.f32.mrf.mxu1 }
 0x571   : > { %v4195_v52 = vpop.f32.mrf.mxu0 }
 0x572   : > { %v4717_v55 = vsel %vm4573_vm1, %v4501_v40, %v4645_v4  ;;  %v4355_v50 = vadd.f32 %v4354_v54, %v4301_v24  ;;  %v4196_v6 = vadd.f32 %v4195_v52, %v9756_v12  ;;  %v4720_v12 = vsel %vm4576_vm2, %v4504_v51, %v4648_v19  ;;  %v10361_v24 = vld [vmem:[#allocation78_spill] sm:$0xff] }
 0x573   : > { %v4775_v10 = vpack.c.bf16 %v4717_v55, %v4716_v56  ;;  %v4434_v54 = vmul.f32 %v9801_v28, %v10361_v24 }
 0x574   : > { %v4423_v2 = vmul.f32 %v9817_v57, %v4355_v50  ;;  %v4250_v59 = vadd.f32 %v4249_v60, %v4196_v6 }
 0x575   : > { %4811 = vst [vmem:[%s8754_s11 + $0x68] sm:$0xff] %v4775_v10 }
 0x576   : > { %v4505_v17 = vadd.f32 %v9820_v3, %v4423_v2  ;;  %v4516_v2 = vadd.f32 %v9815_v14, %v4434_v54  ;;  %v4446_v54 = vmul.f32 %v9801_v28, %v9654_v29 }
 0x577   : > { %v4303_v8 = vpop.f32.mrf.mxu2 }
 0x578   : > { %vm4577_vm3 = vcmp.ge.f32.partialorder %v4505_v17, 0.0  ;;  %v4649_v47 = vmul.f32 0.01, %v4505_v17  ;;  %v4304_v46 = vadd.f32 %v4303_v8, %v4250_v59  ;;  %v4357_v25 = vpop.f32.mrf.mxu3  ;;  %v4251_v41 = vpop.f32.mrf.mxu1  ;;  %vm4588_vm8 = vcmp.ge.f32.partialorder %v4516_v2, 0.0 }
 0x579   : > { %v4197_v44 = vpop.f32.mrf.mxu0 }
 0x57a   : > { %v4721_v26 = vsel %vm4577_vm3, %v4505_v17, %v4649_v47  ;;  %v4358_v13 = vadd.f32 %v4357_v25, %v4304_v46  ;;  %v4198_v36 = vadd.f32 %v4197_v44, %v9759_v20  ;;  %v4512_v20 = vadd.f32 %v9815_v14, %v4430_v31 }
 0x57b   : > { %v4777_v42 = vpack.c.bf16 %v4721_v26, %v4720_v12  ;;  %v4438_v47 = vmul.f32 %v9801_v28, %v9616_v33  ;;  %v4660_v46 = vmul.f32 0.01, %v4516_v2 }
 0x57c   : > { %v4427_v0 = vmul.f32 %v9817_v57, %v4358_v13  ;;  %v4252_v30 = vadd.f32 %v4251_v41, %v4198_v36  ;;  %v4656_v4 = vmul.f32 0.01, %v4512_v20  ;;  %vm4584_vm6 = vcmp.ge.f32.partialorder %v4512_v20, 0.0 }
 0x57d   : > { %4813 = vst [vmem:[%s8754_s11 + $0x78] sm:$0xff] %v4777_v42  ;;  %v4732_v42 = vsel %vm4588_vm8, %v4516_v2, %v4660_v46 }
 0x57e   : > { %v4509_v58 = vadd.f32 %v9820_v3, %v4427_v0 }
 0x57f   : > { %v4305_v1 = vpop.f32.mrf.mxu2 }
 0x580   : > { %vm4581_vm5 = vcmp.ge.f32.partialorder %v4509_v58, 0.0  ;;  %v4653_v23 = vmul.f32 0.01, %v4509_v58  ;;  %v4306_v5 = vadd.f32 %v4305_v1, %v4252_v30  ;;  %v4359_v43 = vpop.f32.mrf.mxu3  ;;  %v4254_v45 = vpop.f32.mrf.mxu1  ;;  %v10362_v30 = vld [vmem:[#allocation79_spill] sm:$0xff] }
 0x581   : > { %v4200_v22 = vpop.f32.mrf.mxu0  ;;  %v4442_v1 = vmul.f32 %v9801_v28, %v10362_v30 }
 0x582   : > { %v4725_v62 = vsel %vm4581_vm5, %v4509_v58, %v4653_v23  ;;  %v4360_v11 = vadd.f32 %v4359_v43, %v4306_v5  ;;  %v4201_v40 = vadd.f32 %v4200_v22, %v9766_v48  ;;  %v4728_v48 = vsel %vm4584_vm6, %v4512_v20, %v4656_v4 }
 0x583   : > { %v4779_v38 = vpack.c.bf16 %v4725_v62, %v4724_v16 }
 0x584   : > { %v4431_v9 = vmul.f32 %v9817_v57, %v4360_v11  ;;  %v4255_v51 = vadd.f32 %v4254_v45, %v4201_v40  ;;  %v4524_v11 = vadd.f32 %v9815_v14, %v4442_v1 }
 0x585   : > { %4815 = vst [vmem:[%s8754_s11 + $0x88] sm:$0xff] %v4779_v38 }
 0x586   : > { %v4513_v52 = vadd.f32 %v9820_v3, %v4431_v9  ;;  %vm4596_vm12 = vcmp.ge.f32.partialorder %v4524_v11, 0.0 }
 0x587   : > { %v4308_v60 = vpop.f32.mrf.mxu2 }
 0x588   : > { %vm4585_vm7 = vcmp.ge.f32.partialorder %v4513_v52, 0.0  ;;  %v4657_v56 = vmul.f32 0.01, %v4513_v52  ;;  %v4309_v55 = vadd.f32 %v4308_v60, %v4255_v51  ;;  %v4362_v50 = vpop.f32.mrf.mxu3  ;;  %v4256_v10 = vpop.f32.mrf.mxu1 }
 0x589   : > { %v4202_v6 = vpop.f32.mrf.mxu0 }
 0x58a   : > { %v4729_v19 = vsel %vm4585_vm7, %v4513_v52, %v4657_v56  ;;  %v4363_v63 = vadd.f32 %v4362_v50, %v4309_v55  ;;  %v4203_v17 = vadd.f32 %v4202_v6, %v9769_v61  ;;  %v4520_v61 = vadd.f32 %v9815_v14, %v4438_v47  ;;  %v10363_v47 = vld [vmem:[#allocation80_spill] sm:$0xff] }
 0x58b   : > { %v4781_v59 = vpack.c.bf16 %v4729_v19, %v4728_v48  ;;  %v4668_v52 = vmul.f32 0.01, %v4524_v11  ;;  %v4450_v46 = vmul.f32 %v9801_v28, %v10363_v47 }
 0x58c   : > { %v4435_v8 = vmul.f32 %v9817_v57, %v4363_v63  ;;  %v4257_v44 = vadd.f32 %v4256_v10, %v4203_v17  ;;  %v4664_v58 = vmul.f32 0.01, %v4520_v61  ;;  %vm4592_vm10 = vcmp.ge.f32.partialorder %v4520_v61, 0.0 }
 0x58d   : > { %4817 = vst [vmem:[%s8754_s11 + $0x98] sm:$0xff] %v4781_v59  ;;  %v4740_v2 = vsel %vm4596_vm12, %v4524_v11, %v4668_v52 }
 0x58e   : > { %v4517_v25 = vadd.f32 %v9820_v3, %v4435_v8 }
 0x58f   : > { %v4310_v12 = vpop.f32.mrf.mxu2 }
 0x590   : > { %vm4589_vm9 = vcmp.ge.f32.partialorder %v4517_v25, 0.0  ;;  %v4661_v41 = vmul.f32 0.01, %v4517_v25  ;;  %v4311_v34 = vadd.f32 %v4310_v12, %v4257_v44  ;;  %v4364_v26 = vpop.f32.mrf.mxu3  ;;  %v4259_v36 = vpop.f32.mrf.mxu1 }
 0x591   : > { %v4205_v13 = vpop.f32.mrf.mxu0 }
 0x592   : > { %v4733_v0 = vsel %vm4589_vm9, %v4517_v25, %v4661_v41  ;;  %v4365_v18 = vadd.f32 %v4364_v26, %v4311_v34  ;;  %v4206_v33 = vadd.f32 %v4205_v13, %v9776_v37  ;;  %v4736_v37 = vsel %vm4592_vm10, %v4520_v61, %v4664_v58 }
 0x593   : > { %v4783_v31 = vpack.c.bf16 %v4733_v0, %v4732_v42 }
 0x594   : > { %v4439_v7 = vmul.f32 %v9817_v57, %v4365_v18  ;;  %v4260_v5 = vadd.f32 %v4259_v36, %v4206_v33  ;;  %v4532_v36 = vadd.f32 %v9815_v14, %v4450_v46 }
 0x595   : > { %4819 = vst [vmem:[%s8754_s11 + $0xa8] sm:$0xff] %v4783_v31 }
 0x596   : > { %v4521_v23 = vadd.f32 %v9820_v3, %v4439_v7  ;;  %v4454_v7 = vmul.f32 %v9801_v28, %v9692_v15  ;;  %v4676_v58 = vmul.f32 0.01, %v4532_v36  ;;  %vm4604_vm0 = vcmp.ge.f32.partialorder %v4532_v36, 0.0 }
 0x597   : > { %v4313_v43 = vpop.f32.mrf.mxu2 }
 0x598   : > { %vm4593_vm11 = vcmp.ge.f32.partialorder %v4521_v23, 0.0  ;;  %v4665_v22 = vmul.f32 0.01, %v4521_v23  ;;  %v4314_v20 = vadd.f32 %v4313_v43, %v4260_v5  ;;  %v4367_v45 = vpop.f32.mrf.mxu3  ;;  %v4261_v62 = vpop.f32.mrf.mxu1 }
 0x599   : > { %v4207_v16 = vpop.f32.mrf.mxu0 }
 0x59a   : > { %v4737_v40 = vsel %vm4593_vm11, %v4521_v23, %v4665_v22  ;;  %v4368_v38 = vadd.f32 %v4367_v45, %v4314_v20  ;;  %v4208_v9 = vadd.f32 %v4207_v16, %v9779_v27  ;;  %v4528_v27 = vadd.f32 %v9815_v14, %v4446_v54 }
 0x59b   : > { %v4785_v4 = vpack.c.bf16 %v4737_v40, %v4736_v37  ;;  %v4748_v45 = vsel %vm4604_vm0, %v4532_v36, %v4676_v58 }
 0x59c   : > { %v4443_v24 = vmul.f32 %v9817_v57, %v4368_v38  ;;  %v4262_v60 = vadd.f32 %v4261_v62, %v4208_v9  ;;  %v4672_v8 = vmul.f32 0.01, %v4528_v27  ;;  %vm4600_vm14 = vcmp.ge.f32.partialorder %v4528_v27, 0.0 }
 0x59d   : > { %4821 = vst [vmem:[%s8754_s11 + $0xb8] sm:$0xff] %v4785_v4  ;;  %v4458_v9 = vmul.f32 %v9801_v28, %v9701_v32 }
 0x59e   : > { %v4525_v51 = vadd.f32 %v9820_v3, %v4443_v24 }
 0x59f   : > { %v4315_v56 = vpop.f32.mrf.mxu2 }
 0x5a0   : > { %vm4597_vm13 = vcmp.ge.f32.partialorder %v4525_v51, 0.0  ;;  %v4669_v55 = vmul.f32 0.01, %v4525_v51  ;;  %v4316_v50 = vadd.f32 %v4315_v56, %v4262_v60  ;;  %v4369_v6 = vpop.f32.mrf.mxu3  ;;  %v4264_v10 = vpop.f32.mrf.mxu1 }
 0x5a1   : > { %v4210_v48 = vpop.f32.mrf.mxu0 }
 0x5a2   : > { %v4741_v19 = vsel %vm4597_vm13, %v4525_v51, %v4669_v55  ;;  %v4370_v63 = vadd.f32 %v4369_v6, %v4316_v50  ;;  %v4211_v29 = vadd.f32 %v4210_v48, %v9786_v53  ;;  %v4744_v53 = vsel %vm4600_vm14, %v4528_v27, %v4672_v8 }
 0x5a3   : > { %v4787_v17 = vpack.c.bf16 %v4741_v19, %v4740_v2  ;;  %v4540_v55 = vadd.f32 %v9815_v14, %v4458_v9  ;;  %v4462_v19 = vmul.f32 %v9801_v28, %v9706_v49 }
 0x5a4   : > { %v4447_v59 = vmul.f32 %v9817_v57, %v4370_v63  ;;  %v4265_v44 = vadd.f32 %v4264_v10, %v4211_v29 }
 0x5a5   : > { %4823 = vst [vmem:[%s8754_s11 + $0xc8] sm:$0xff] %v4787_v17  ;;  %v4684_v2 = vmul.f32 0.01, %v4540_v55  ;;  %vm4612_vm4 = vcmp.ge.f32.partialorder %v4540_v55, 0.0  ;;  %v4544_v46 = vadd.f32 %v9815_v14, %v4462_v19 }
 0x5a6   : > { %v4529_v25 = vadd.f32 %v9820_v3, %v4447_v59 }
 0x5a7   : > { %v4318_v12 = vpop.f32.mrf.mxu2  ;;  %v4688_v49 = vmul.f32 0.01, %v4544_v46  ;;  %vm4616_vm6 = vcmp.ge.f32.partialorder %v4544_v46, 0.0 }
 0x5a8   : > { %vm4601_vm15 = vcmp.ge.f32.partialorder %v4529_v25, 0.0  ;;  %v4673_v41 = vmul.f32 0.01, %v4529_v25  ;;  %v4319_v34 = vadd.f32 %v4318_v12, %v4265_v44  ;;  %v4372_v26 = vpop.f32.mrf.mxu3  ;;  %v4266_v61 = vpop.f32.mrf.mxu1 }
 0x5a9   : > { %v4212_v13 = vpop.f32.mrf.mxu0 }
 0x5aa   : > { %v4745_v42 = vsel %vm4601_vm15, %v4529_v25, %v4673_v41  ;;  %v4373_v0 = vadd.f32 %v4372_v26, %v4319_v34  ;;  %v4213_v18 = vadd.f32 %v4212_v13, %v9789_v39  ;;  %v4536_v39 = vadd.f32 %v9815_v14, %v4454_v7 }
 0x5ab   : > { %v4789_v33 = vpack.c.bf16 %v4745_v42, %v4744_v53  ;;  %v4760_v26 = vsel %vm4616_vm6, %v4544_v46, %v4688_v49 }
 0x5ac   : > { %v4451_v31 = vmul.f32 %v9817_v57, %v4373_v0  ;;  %v4267_v1 = vadd.f32 %v4266_v61, %v4213_v18  ;;  %v4680_v38 = vmul.f32 0.01, %v4536_v39  ;;  %vm4608_vm2 = vcmp.ge.f32.partialorder %v4536_v39, 0.0 }
 0x5ad   : > { %4825 = vst [vmem:[%s8754_s11 + $0xd8] sm:$0xff] %v4789_v33 }
 0x5ae   : > { %v4533_v30 = vadd.f32 %v9820_v3, %v4451_v31  ;;  %v4752_v56 = vsel %vm4608_vm2, %v4536_v39, %v4680_v38 }
 0x5af   : > { %v4320_v23 = vpop.f32.mrf.mxu2 }
 0x5b0   : > { %vm4605_vm1 = vcmp.ge.f32.partialorder %v4533_v30, 0.0  ;;  %v4677_v5 = vmul.f32 0.01, %v4533_v30  ;;  %v4321_v43 = vadd.f32 %v4320_v23, %v4267_v1  ;;  %v4374_v22 = vpop.f32.mrf.mxu3  ;;  %v4269_v11 = vpop.f32.mrf.mxu1 }
 0x5b1   : > { %v4215_v20 = vpop.f32.mrf.mxu0 }
 0x5b2   : > { %v4749_v16 = vsel %vm4605_vm1, %v4533_v30, %v4677_v5  ;;  %v4375_v37 = vadd.f32 %v4374_v22, %v4321_v43  ;;  %v4216_v15 = vadd.f32 %v4215_v20, %v9796_v21 }
 0x5b3   : > { %v4791_v62 = vpack.c.bf16 %v4749_v16, %v4748_v45 }
 0x5b4   : > { %v4455_v40 = vmul.f32 %v9817_v57, %v4375_v37  ;;  %v4270_v24 = vadd.f32 %v4269_v11, %v4216_v15 }
 0x5b5   : > { %4827 = vst [vmem:[%s8754_s11 + $0xe8] sm:$0xff] %v4791_v62 }
 0x5b6   : > { %v4537_v4 = vadd.f32 %v9820_v3, %v4455_v40 }
 0x5b7   : > { %v4323_v54 = vpop.f32.mrf.mxu2 }
 0x5b8   : > { %vm4609_vm3 = vcmp.ge.f32.partialorder %v4537_v4, 0.0  ;;  %v4681_v52 = vmul.f32 0.01, %v4537_v4  ;;  %v4324_v51 = vadd.f32 %v4323_v54, %v4270_v24  ;;  %v4377_v60 = vpop.f32.mrf.mxu3  ;;  %v4271_v10 = vpop.f32.mrf.mxu1 }
 0x5b9   : > { %v4217_v21 = vpop.f32.mrf.mxu0 }
 0x5ba   : > { %v4753_v50 = vsel %vm4609_vm3, %v4537_v4, %v4681_v52  ;;  %v4378_v6 = vadd.f32 %v4377_v60, %v4324_v51  ;;  %v4218_v48 = vadd.f32 %v4217_v21, %v9803_v35  ;;  %v4756_v35 = vsel %vm4612_vm4, %v4540_v55, %v4684_v2 }
 0x5bb   : > { %v4793_v27 = vpack.c.bf16 %v4753_v50, %v4752_v56 }
 0x5bc   : > { %v4459_v32 = vmul.f32 %v9817_v57, %v4378_v6  ;;  %v4272_v29 = vadd.f32 %v4271_v10, %v4218_v48 }
 0x5bd   : > { %4829 = vst [vmem:[%s8754_s11 + $0xf8] sm:$0xff] %v4793_v27 }
 0x5be   : > { %v4541_v63 = vadd.f32 %v9820_v3, %v4459_v32 }
 0x5bf   : > { %v4325_v17 = vpop.f32.mrf.mxu2 }
 0x5c0   : > { %vm4613_vm5 = vcmp.ge.f32.partialorder %v4541_v63, 0.0  ;;  %v4685_v59 = vmul.f32 0.01, %v4541_v63  ;;  %v4326_v8 = vadd.f32 %v4325_v17, %v4272_v29  ;;  %v4379_v47 = vpop.f32.mrf.mxu3 }
 0x5c2   : > { %v4757_v25 = vsel %vm4613_vm5, %v4541_v63, %v4685_v59  ;;  %v4380_v44 = vadd.f32 %v4379_v47, %v4326_v8 }
 0x5c3   : > { %v4795_v12 = vpack.c.bf16 %v4757_v25, %v4756_v35 }
 0x5c4   : > { %v4463_v41 = vmul.f32 %v9817_v57, %v4380_v44 }
 0x5c5   : > { %4831 = vst [vmem:[%s8754_s11 + $0x108] sm:$0xff] %v4795_v12 }
 0x5c6   : > { %v4545_v28 = vadd.f32 %v9820_v3, %v4463_v41 }
 0x5c8   : > { %vm4617_vm7 = vcmp.ge.f32.partialorder %v4545_v28, 0.0  ;;  %v4689_v34 = vmul.f32 0.01, %v4545_v28 }
 0x5ca   : > { %v4761_v13 = vsel %vm4617_vm7, %v4545_v28, %v4689_v34 }
 0x5cb   : > { %v4797_v53 = vpack.c.bf16 %v4761_v13, %v4760_v26 }
 0x5cd   : > { %4833 = vst [vmem:[%s8754_s11 + $0x118] sm:$0xff] %v4797_v53 }
 0x5ce PF: > { %s14_s15 = sadd.s32 1, %s6765_s15  }
 0x5cf   : > { %p11_p4 = scmp.ge.s32.totalorder %s14_s15, 4  }
 0x5d1   :  { %13 = sbr.rel (!%p11_p4) target bundleno = 1 (0x1), region = 66 }

// kernel: circle_detector_forward.12
= control target key start
LH: loop header
LB: loop body
LE: loop exit
PB: predicated region body
PF: predicated region fallthrough
CT: control target
= control target key end

     0   :  { %s240_s6 = smov 0   ;;  %s257_s0 = inlined_call_operand.vmem [shape: bf16[4,2,2,128], index: 0, kind: input, shape index: {}]   ;;  %s258_s1 = inlined_call_operand.vmem [shape: bf16[4,2,64], index: 1, kind: output, shape index: {}]  }
   0x1 LB: > { %s197_s7 = sadd.s32 4294967295, %s227_s6   ;;  %p201_p0 = scmp.ge.s32.totalorder %s227_s6, 1  ;;  %s227_s6 = sphi %s240_s6, %s11_s6  }
   0x2   : > { %p88_p1 = scmp.lt.s32.totalorder %s227_s6, 3 }
   0x4   : > { %p89_p2 = pnand %p201_p0, %p88_p1 }
   0x5   : > { %s202_s8 = sshll.u32 (!%p89_p2), %s197_s7, 1  ;;  %s229_s13 = smov (!%p89_p2), 64  }
   0x6   : > { %92 = sbr.rel (%p89_p2) target bundleno = 145 (0x91), region = 24  ;;  %p108_p3 = scmp.lt.s32.totalorder (!%p89_p2), %s202_s8, 3 }
   0xb   : > { %s260_s8 = smov (!%p108_p3, %s202_s8), 3  ;;  %vm144_vm0 = vcmask 516096  }
   0xc   : > { %s203_s9 = sshll.u32 %s260_s8, 1  ;;  %s116_s16 = scalar_lea.vmem %s258_s1, %s260_s8 }
   0xd   : > { %s111_s12 = scalar_lea.vmem %s257_s0, %s203_s9 }
   0xe   : > { %v118_v0 = vld [vmem:[%s111_s12] sm:$0x1]  ;;  %v119_v1 = vld [vmem:[%s111_s12 + $0x1] sm:$0x1]  ;;  %v120_v2 = vld [vmem:[%s111_s12 + $0x2] sm:$0x1] }
   0xf   : > { %v121_v3 = vld [vmem:[%s111_s12 + $0x3] sm:$0x1]  ;;  %v122_v4 = vunpack.c.l.bf16 %v118_v0  ;;  %v123_v5 = vunpack.c.l.bf16 %v120_v2  ;;  %v124_v6 = vunpack.c.l.bf16 %v119_v1 }
  0x10   : > { %v125_v7 = vunpack.c.l.bf16 %v121_v3 }
  0x11   : > { %v126_v8 = vmax.f32 %v122_v4, %v124_v6 }
  0x12   : > { %v127_v9 = vmax.f32 %v123_v5, %v125_v7 }
  0x14   : > { %v216_v10 = vpack.i.bf16 %v127_v9, %v126_v8 }
  0x16   : > { %217 = vrot.lane.b32.xlu0 %v216_v10, %s229_s13 }
  0x88   : > { %v218_v11 = vpop.permute.xlu0 %217 }
  0x89   : > { %v220_v12 = vunpack.i.h.bf16 %v218_v11  ;;  %v219_v13 = vunpack.i.l.bf16 %v218_v11 }
  0x8b   : > { %v141_v14 = vmax.f32 %v127_v9, %v220_v12  ;;  %v140_v15 = vmax.f32 %v126_v8, %v219_v13 }
  0x8d   : > { %v143_v16 = vpack.c.bf16 %v141_v14, %v141_v14  ;;  %v142_v17 = vpack.c.bf16 %v140_v15, %v140_v15 }
  0x8f   : > { %145 = vst.msk [vmem:[%s116_s16] sm:$0x1] %vm144_vm0, %v142_v17 }
  0x90   : > { %146 = vst.msk [vmem:[%s116_s16 + $0x1] sm:$0x1] %vm144_vm0, %v143_v16 }
  0x91 PF: > { %s11_s6 = sadd.s32 1, %s227_s6  }
  0x92   : > { %p8_p4 = scmp.ge.s32.totalorder %s11_s6, 4  }
  0x94   :  { %10 = sbr.rel (!%p8_p4) target bundleno = 1 (0x1), region = 54 }

// kernel: circle_detector_forward.11
= control target key start
LH: loop header
LB: loop body
LE: loop exit
PB: predicated region body
PF: predicated region fallthrough
CT: control target
= control target key end

     0   :  { %vm3469_vm1 = vcmask 519168   ;;  %s6662_s1 = inlined_call_operand.vmem [shape: bf16[4608,64], index: 1, kind: input, shape index: {}]   ;;  %s6663_s0 = inlined_call_operand.vmem [shape: bf16[32,4608], index: 0, kind: input, shape index: {}]   ;;  %s6664_s2 = inlined_call_operand.vmem [shape: f32[1,64], index: 2, kind: input, shape index: {}]   ;;  %s6665_s3 = inlined_call_operand.vmem [shape: f32[1,64], index: 3, kind: input, shape index: {}]   ;;  %s6666_s4 = inlined_call_operand.vmem [shape: bf16[32,64], index: 4, kind: output, shape index: {}]  }
   0x1   :  { %v4997_v0 = vld [vmem:[%s6662_s1 + $0x38] sm:$0xff]  ;;  %v4996_v4 = vld [vmem:[%s6662_s1 + $0x30] sm:$0xff]  ;;  %v4995_v8 = vld [vmem:[%s6662_s1 + $0x28] sm:$0xff] }
   0x2   :  { %v5005_v1 = vld [vmem:[%s6662_s1 + $0x78] sm:$0xff]  ;;  %2753 = vmatpush.bf16.msra.mxu0 %v4997_v0  ;;  %v5004_v5 = vld [vmem:[%s6662_s1 + $0x70] sm:$0xff]  ;;  %v5003_v9 = vld [vmem:[%s6662_s1 + $0x68] sm:$0xff] }
   0x3   :  { %v5013_v2 = vld [vmem:[%s6662_s1 + $0xb8] sm:$0xff]  ;;  %2772 = vmatpush.bf16.msra.mxu1 %v5005_v1  ;;  %v5012_v6 = vld [vmem:[%s6662_s1 + $0xb0] sm:$0xff]  ;;  %v5011_v10 = vld [vmem:[%s6662_s1 + $0xa8] sm:$0xff] }
   0x4   :  { %v5021_v3 = vld [vmem:[%s6662_s1 + $0xf8] sm:$0xff]  ;;  %2791 = vmatpush.bf16.msra.mxu2 %v5013_v2  ;;  %v5020_v7 = vld [vmem:[%s6662_s1 + $0xf0] sm:$0xff]  ;;  %v5019_v11 = vld [vmem:[%s6662_s1 + $0xe8] sm:$0xff] }
   0x5   :  { %2810 = vmatpush.bf16.msra.mxu3 %v5021_v3  ;;  %v4994_v12 = vld [vmem:[%s6662_s1 + $0x20] sm:$0xff]  ;;  %v4993_v16 = vld [vmem:[%s6662_s1 + $0x18] sm:$0xff]  ;;  %v4992_v20 = vld [vmem:[%s6662_s1 + $0x10] sm:$0xff] }
   0x6   :  { %2754 = vmatpush.bf16.msra.mxu0 %v4996_v4  ;;  %v5002_v13 = vld [vmem:[%s6662_s1 + $0x60] sm:$0xff]  ;;  %v5001_v17 = vld [vmem:[%s6662_s1 + $0x58] sm:$0xff]  ;;  %v5000_v21 = vld [vmem:[%s6662_s1 + $0x50] sm:$0xff] }
   0x7   :  { %2773 = vmatpush.bf16.msra.mxu1 %v5004_v5  ;;  %v5010_v14 = vld [vmem:[%s6662_s1 + $0xa0] sm:$0xff]  ;;  %v5009_v18 = vld [vmem:[%s6662_s1 + $0x98] sm:$0xff]  ;;  %v5008_v22 = vld [vmem:[%s6662_s1 + $0x90] sm:$0xff] }
   0x8   :  { %2792 = vmatpush.bf16.msra.mxu2 %v5012_v6  ;;  %v5018_v15 = vld [vmem:[%s6662_s1 + $0xe0] sm:$0xff]  ;;  %v5017_v19 = vld [vmem:[%s6662_s1 + $0xd8] sm:$0xff]  ;;  %v5016_v23 = vld [vmem:[%s6662_s1 + $0xd0] sm:$0xff] }
   0x9   :  { %2811 = vmatpush.bf16.msra.mxu3 %v5020_v7  ;;  %v4991_v24 = vld [vmem:[%s6662_s1 + $0x8] sm:$0xff]  ;;  %v4990_v28 = vld [vmem:[%s6662_s1] sm:$0xff]  ;;  %v4936_v33 = vld [vmem:[%s6663_s0 + $0x8c] sm:$0xf0] }
   0xa   :  { %2755 = vmatpush.bf16.msra.mxu0 %v4995_v8  ;;  %v4999_v25 = vld [vmem:[%s6662_s1 + $0x48] sm:$0xff]  ;;  %v4998_v29 = vld [vmem:[%s6662_s1 + $0x40] sm:$0xff]  ;;  %v3482_v35 = vld [vmem:[%s6663_s0 + $0x90] sm:$0xf0] }
   0xb   :  { %2774 = vmatpush.bf16.msra.mxu1 %v5003_v9  ;;  %v5007_v26 = vld [vmem:[%s6662_s1 + $0x88] sm:$0xff]  ;;  %v5006_v30 = vld [vmem:[%s6662_s1 + $0x80] sm:$0xff]  ;;  %v4937_v37 = vld [vmem:[%s6663_s0 + $0x94] sm:$0xf0] }
   0xc   :  { %2793 = vmatpush.bf16.msra.mxu2 %v5011_v10  ;;  %v5015_v27 = vld [vmem:[%s6662_s1 + $0xc8] sm:$0xff]  ;;  %v5014_v31 = vld [vmem:[%s6662_s1 + $0xc0] sm:$0xff]  ;;  %v3490_v39 = vld [vmem:[%s6663_s0 + $0x98] sm:$0xf0] }
   0xd   :  { %2812 = vmatpush.bf16.msra.mxu3 %v5019_v11  ;;  %v3480_v32 = vld [vmem:[%s6663_s0] sm:$0xf]  ;;  %v4918_v34 = vld [vmem:[%s6663_s0 + $0x4] sm:$0xf]  ;;  %v3488_v36 = vld [vmem:[%s6663_s0 + $0x8] sm:$0xf] }
   0xe   :  { %2756 = vmatpush.bf16.msra.mxu0 %v4994_v12  ;;  %v4919_v38 = vld [vmem:[%s6663_s0 + $0xc] sm:$0xf]  ;;  %v5045_v40 = vld [vmem:[%s6662_s1 + $0x1b8] sm:$0xff]  ;;  %v3481_v42 = vor.u32 %v4936_v33, %v3480_v32  ;;  %v3485_v43 = vor.u32 %v4918_v34, %v3482_v35  ;;  %v3489_v44 = vor.u32 %v4937_v37, %v3488_v36  ;;  %v5044_v48 = vld [vmem:[%s6662_s1 + $0x1b0] sm:$0xff] }
   0xf   :  { %2775 = vmatpush.bf16.msra.mxu1 %v5002_v13  ;;  %v5029_v41 = vld [vmem:[%s6662_s1 + $0x138] sm:$0xff]  ;;  %v3493_v45 = vor.u32 %v4919_v38, %v3490_v39  ;;  %v5028_v49 = vld [vmem:[%s6662_s1 + $0x130] sm:$0xff]  ;;  %v5043_v52 = vld [vmem:[%s6662_s1 + $0x1a8] sm:$0xff] }
  0x10   :  { %2794 = vmatpush.bf16.msra.mxu2 %v5010_v14  ;;  %v5037_v46 = vld [vmem:[%s6662_s1 + $0x178] sm:$0xff]  ;;  %v5036_v50 = vld [vmem:[%s6662_s1 + $0x170] sm:$0xff]  ;;  %v5027_v53 = vld [vmem:[%s6662_s1 + $0x128] sm:$0xff] }
  0x11   :  { %2813 = vmatpush.bf16.msra.mxu3 %v5018_v15  ;;  %v5053_v47 = vld [vmem:[%s6662_s1 + $0x1f8] sm:$0xff]  ;;  %v5052_v51 = vld [vmem:[%s6662_s1 + $0x1f0] sm:$0xff]  ;;  %v5035_v54 = vld [vmem:[%s6662_s1 + $0x168] sm:$0xff] }
  0x12   :  { %2757 = vmatpush.bf16.msra.mxu0 %v4993_v16  ;;  %v5051_v55 = vld [vmem:[%s6662_s1 + $0x1e8] sm:$0xff]  ;;  %v5042_v56 = vld [vmem:[%s6662_s1 + $0x1a0] sm:$0xff]  ;;  %v4972_v61 = vld [vmem:[%s6663_s0 + $0x1ac] sm:$0xf0] }
  0x13   :  { %2776 = vmatpush.bf16.msra.mxu1 %v5001_v17  ;;  %v5026_v57 = vld [vmem:[%s6662_s1 + $0x120] sm:$0xff]  ;;  %v3626_v63 = vld [vmem:[%s6663_s0 + $0x1b0] sm:$0xf0]  ;;  %v3632_v0 = vld [vmem:[%s6663_s0 + $0x128] sm:$0xf] }
  0x14   :  { %2795 = vmatpush.bf16.msra.mxu2 %v5009_v18  ;;  %v5034_v58 = vld [vmem:[%s6662_s1 + $0x160] sm:$0xff]  ;;  %v4973_v1 = vld [vmem:[%s6663_s0 + $0x1b4] sm:$0xf0]  ;;  %v4955_v2 = vld [vmem:[%s6663_s0 + $0x12c] sm:$0xf] }
  0x15   :  { %2814 = vmatpush.bf16.msra.mxu3 %v5017_v19  ;;  %v5050_v59 = vld [vmem:[%s6662_s1 + $0x1e0] sm:$0xff]  ;;  %v3634_v3 = vld [vmem:[%s6663_s0 + $0x1b8] sm:$0xf0]  ;;  %v3633_v8 = vor.u32 %v4973_v1, %v3632_v0  ;;  %v5040_v12 = vld [vmem:[%s6662_s1 + $0x190] sm:$0xff] }
  0x16   :  { %2758 = vmatpush.bf16.msra.mxu0 %v4992_v20  ;;  %v3624_v60 = vld [vmem:[%s6663_s0 + $0x120] sm:$0xf]  ;;  %v4954_v62 = vld [vmem:[%s6663_s0 + $0x124] sm:$0xf]  ;;  %v5041_v4 = vld [vmem:[%s6662_s1 + $0x198] sm:$0xff]  ;;  %v3637_v9 = vor.u32 %v4955_v2, %v3634_v3 }
  0x17   :  { %2777 = vmatpush.bf16.msra.mxu1 %v5000_v21  ;;  %v5025_v5 = vld [vmem:[%s6662_s1 + $0x118] sm:$0xff]  ;;  %v3625_v6 = vor.u32 %v4972_v61, %v3624_v60  ;;  %v3629_v7 = vor.u32 %v4954_v62, %v3626_v63  ;;  %v5024_v13 = vld [vmem:[%s6662_s1 + $0x110] sm:$0xff]  ;;  %v5039_v16 = vld [vmem:[%s6662_s1 + $0x188] sm:$0xff] }
  0x18   :  { %2796 = vmatpush.bf16.msra.mxu2 %v5008_v22  ;;  %v5033_v10 = vld [vmem:[%s6662_s1 + $0x158] sm:$0xff]  ;;  %v5032_v14 = vld [vmem:[%s6662_s1 + $0x150] sm:$0xff]  ;;  %v5023_v17 = vld [vmem:[%s6662_s1 + $0x108] sm:$0xff] }
  0x19   :  { %2815 = vmatpush.bf16.msra.mxu3 %v5016_v23  ;;  %v5049_v11 = vld [vmem:[%s6662_s1 + $0x1d8] sm:$0xff]  ;;  %v5048_v15 = vld [vmem:[%s6662_s1 + $0x1d0] sm:$0xff]  ;;  %v5031_v18 = vld [vmem:[%s6662_s1 + $0x148] sm:$0xff] }
  0x1a   :  { %2759 = vmatpush.bf16.msra.mxu0 %v4991_v24  ;;  %v5047_v19 = vld [vmem:[%s6662_s1 + $0x1c8] sm:$0xff]  ;;  %v5038_v20 = vld [vmem:[%s6662_s1 + $0x180] sm:$0xff]  ;;  %v3496_v24 = vld [vmem:[%s6663_s0 + $0x10] sm:$0xf] }
  0x1b   :  { %2778 = vmatpush.bf16.msra.mxu1 %v4999_v25  ;;  %v5022_v21 = vld [vmem:[%s6662_s1 + $0x100] sm:$0xff]  ;;  %v5077_v25 = vld [vmem:[%s6662_s1 + $0x2b8] sm:$0xff]  ;;  %v3506_v33 = vld [vmem:[%s6663_s0 + $0xa8] sm:$0xf0] }
  0x1c   :  { %2797 = vmatpush.bf16.msra.mxu2 %v5007_v26  ;;  %v5030_v22 = vld [vmem:[%s6662_s1 + $0x140] sm:$0xff]  ;;  %v5061_v26 = vld [vmem:[%s6662_s1 + $0x238] sm:$0xff]  ;;  %v5076_v37 = vld [vmem:[%s6662_s1 + $0x2b0] sm:$0xff] }
  0x1d   :  { %2816 = vmatpush.bf16.msra.mxu3 %v5015_v27  ;;  %v5046_v23 = vld [vmem:[%s6662_s1 + $0x1c0] sm:$0xff]  ;;  %v4921_v32 = vld [vmem:[%s6663_s0 + $0x1c] sm:$0xf]  ;;  %v3650_v61 = vld [vmem:[%s6663_s0 + $0x1c8] sm:$0xf0] }
  0x1e   :  { %2760 = vmatpush.bf16.msra.mxu0 %v4990_v28  ;;  %v4938_v27 = vld [vmem:[%s6663_s0 + $0x9c] sm:$0xf0]  ;;  %v4920_v28 = vld [vmem:[%s6663_s0 + $0x14] sm:$0xf]  ;;  %v5069_v34 = vld [vmem:[%s6662_s1 + $0x278] sm:$0xff] }
  0x1f   :  { %2779 = vmatpush.bf16.msra.mxu1 %v4998_v29  ;;  %v3498_v29 = vld [vmem:[%s6663_s0 + $0xa0] sm:$0xf0]  ;;  %v5085_v35 = vld [vmem:[%s6662_s1 + $0x2f8] sm:$0xff]  ;;  %v3497_v36 = vor.u32 %v4938_v27, %v3496_v24  ;;  %v5072_v1 = vld [vmem:[%s6662_s1 + $0x290] sm:$0xff] }
  0x20   :  { %2798 = vmatpush.bf16.msra.mxu2 %v5006_v30  ;;  %v3504_v30 = vld [vmem:[%s6663_s0 + $0x18] sm:$0xf]  ;;  %v3501_v38 = vor.u32 %v4920_v28, %v3498_v29  ;;  %v3514_v24 = vld [vmem:[%s6663_s0 + $0xb0] sm:$0xf0]  ;;  %v4923_v27 = vld [vmem:[%s6663_s0 + $0x2c] sm:$0xf] }
  0x21   :  { %2817 = vmatpush.bf16.msra.mxu3 %v5014_v31  ;;  %2761 = vmatmul.bf16.vlgmr.msra.gmra.mxu0 %v3481_v42  ;;  %v4939_v31 = vld [vmem:[%s6663_s0 + $0xa4] sm:$0xf0]  ;;  %v5068_v42 = vld [vmem:[%s6662_s1 + $0x270] sm:$0xff]  ;;  %v5057_v60 = vld [vmem:[%s6662_s1 + $0x218] sm:$0xff] }
  0x22   :  { %2829 = vmatpush.bf16.msrb.mxu0 %v5029_v41  ;;  %2780 = vmatmul.bf16.vlgmr.msra.gmra.mxu1 %v3485_v43  ;;  %v3505_v39 = vor.u32 %v4939_v31, %v3504_v30  ;;  %v5060_v41 = vld [vmem:[%s6662_s1 + $0x230] sm:$0xff]  ;;  %v5065_v62 = vld [vmem:[%s6662_s1 + $0x258] sm:$0xff] }
  0x23   :  { %2799 = vmatmul.bf16.vlgmr.msra.gmra.mxu2 %v3489_v44  ;;  %2848 = vmatpush.bf16.msrb.mxu1 %v5037_v46  ;;  %v5084_v43 = vld [vmem:[%s6662_s1 + $0x2f0] sm:$0xff]  ;;  %v5075_v44 = vld [vmem:[%s6662_s1 + $0x2a8] sm:$0xff]  ;;  %v5081_v63 = vld [vmem:[%s6662_s1 + $0x2d8] sm:$0xff] }
  0x24   :  { %2867 = vmatpush.bf16.msrb.mxu2 %v5045_v40  ;;  %2818 = vmatmul.bf16.vlgmr.msra.gmra.mxu3 %v3493_v45  ;;  %v3509_v40 = vor.u32 %v4921_v32, %v3506_v33  ;;  %v5059_v45 = vld [vmem:[%s6662_s1 + $0x228] sm:$0xff]  ;;  %v3522_v28 = vld [vmem:[%s6663_s0 + $0xb8] sm:$0xf0]  ;;  %v5100_v30 = vld [vmem:[%s6662_s1 + $0x370] sm:$0xff] }
  0x25   :  { %2886 = vmatpush.bf16.msrb.mxu3 %v5053_v47  ;;  %v5067_v46 = vld [vmem:[%s6662_s1 + $0x268] sm:$0xff]  ;;  %v3525_v33 = vor.u32 %v4923_v27, %v3522_v28 }
  0x26   :  { %2830 = vmatpush.bf16.msrb.mxu0 %v5028_v49  ;;  %v5083_v47 = vld [vmem:[%s6662_s1 + $0x2e8] sm:$0xff]  ;;  %v5058_v49 = vld [vmem:[%s6662_s1 + $0x220] sm:$0xff] }
  0x27   :  { %2849 = vmatpush.bf16.msrb.mxu1 %v5036_v50  ;;  %v5066_v50 = vld [vmem:[%s6662_s1 + $0x260] sm:$0xff]  ;;  %v5139_v28 = vld [vmem:[%s6662_s1 + $0x4a8] sm:$0xff] }
  0x28   :  { %2868 = vmatpush.bf16.msrb.mxu2 %v5044_v48  ;;  %v5074_v48 = vld [vmem:[%s6662_s1 + $0x2a0] sm:$0xff] }
  0x29   :  { %2887 = vmatpush.bf16.msrb.mxu3 %v5052_v51  ;;  %v5082_v51 = vld [vmem:[%s6662_s1 + $0x2e0] sm:$0xff] }
  0x2a   :  { %2831 = vmatpush.bf16.msrb.mxu0 %v5027_v53  ;;  %v4974_v53 = vld [vmem:[%s6663_s0 + $0x1bc] sm:$0xf0] }
  0x2b   :  { %2850 = vmatpush.bf16.msrb.mxu1 %v5035_v54  ;;  %v5073_v54 = vld [vmem:[%s6662_s1 + $0x298] sm:$0xff] }
  0x2c   :  { %2869 = vmatpush.bf16.msrb.mxu2 %v5043_v52  ;;  %v3640_v52 = vld [vmem:[%s6663_s0 + $0x130] sm:$0xf] }
  0x2d   :  { %2888 = vmatpush.bf16.msrb.mxu3 %v5051_v55  ;;  %v4956_v55 = vld [vmem:[%s6663_s0 + $0x134] sm:$0xf]  ;;  %v3641_v0 = vor.u32 %v4974_v53, %v3640_v52  ;;  %v4959_v52 = vld [vmem:[%s6663_s0 + $0x14c] sm:$0xf]  ;;  %v5089_v53 = vld [vmem:[%s6662_s1 + $0x318] sm:$0xff] }
  0x2e   :  { %2832 = vmatpush.bf16.msrb.mxu0 %v5026_v57  ;;  %v3648_v57 = vld [vmem:[%s6663_s0 + $0x138] sm:$0xf] }
  0x2f   :  { %2851 = vmatpush.bf16.msrb.mxu1 %v5034_v58  ;;  %v4975_v58 = vld [vmem:[%s6663_s0 + $0x1c4] sm:$0xf0] }
  0x30   :  { %2870 = vmatpush.bf16.msrb.mxu2 %v5042_v56  ;;  %v3642_v56 = vld [vmem:[%s6663_s0 + $0x1c0] sm:$0xf0]  ;;  %v3649_v3 = vor.u32 %v4975_v58, %v3648_v57  ;;  %v5096_v58 = vld [vmem:[%s6662_s1 + $0x350] sm:$0xff] }
  0x31   :  { %2889 = vmatpush.bf16.msrb.mxu3 %v5050_v59  ;;  %2766 = vmatmul.bf16.gmra.mxu0 %v3625_v6  ;;  %v4957_v59 = vld [vmem:[%s6663_s0 + $0x13c] sm:$0xf]  ;;  %v3645_v2 = vor.u32 %v4956_v55, %v3642_v56  ;;  %v5064_v6 = vld [vmem:[%s6662_s1 + $0x250] sm:$0xff] }
  0x32   :  { %2833 = vmatpush.bf16.msrb.mxu0 %v5025_v5  ;;  %2785 = vmatmul.bf16.gmra.mxu1 %v3629_v7  ;;  %v5056_v5 = vld [vmem:[%s6662_s1 + $0x210] sm:$0xff]  ;;  %v5113_v55 = vld [vmem:[%s6662_s1 + $0x3d8] sm:$0xff] }
  0x33   :  { %2804 = vmatmul.bf16.gmra.mxu2 %v3633_v8  ;;  %2852 = vmatpush.bf16.msrb.mxu1 %v5033_v10  ;;  %v5080_v7 = vld [vmem:[%s6662_s1 + $0x2d0] sm:$0xff]  ;;  %v5071_v8 = vld [vmem:[%s6662_s1 + $0x288] sm:$0xff] }
  0x34   :  { %2871 = vmatpush.bf16.msrb.mxu2 %v5041_v4  ;;  %2823 = vmatmul.bf16.gmra.mxu3 %v3637_v9  ;;  %v3653_v4 = vor.u32 %v4957_v59, %v3650_v61  ;;  %v5055_v9 = vld [vmem:[%s6662_s1 + $0x208] sm:$0xff]  ;;  %v5104_v56 = vld [vmem:[%s6662_s1 + $0x390] sm:$0xff] }
  0x35   :  { %2890 = vmatpush.bf16.msrb.mxu3 %v5049_v11  ;;  %v5063_v10 = vld [vmem:[%s6662_s1 + $0x248] sm:$0xff] }
  0x36   :  { %2834 = vmatpush.bf16.msrb.mxu0 %v5024_v13  ;;  %v5079_v11 = vld [vmem:[%s6662_s1 + $0x2c8] sm:$0xff]  ;;  %v5109_v13 = vld [vmem:[%s6662_s1 + $0x3b8] sm:$0xff] }
  0x37   :  { %2853 = vmatpush.bf16.msrb.mxu1 %v5032_v14  ;;  %v5054_v14 = vld [vmem:[%s6662_s1 + $0x200] sm:$0xff] }
  0x38   :  { %2872 = vmatpush.bf16.msrb.mxu2 %v5040_v12  ;;  %v5070_v12 = vld [vmem:[%s6662_s1 + $0x280] sm:$0xff] }
  0x39   :  { %2891 = vmatpush.bf16.msrb.mxu3 %v5048_v15  ;;  %v5062_v15 = vld [vmem:[%s6662_s1 + $0x240] sm:$0xff] }
  0x3a   :  { %2835 = vmatpush.bf16.msrb.mxu0 %v5023_v17  ;;  %v3512_v17 = vld [vmem:[%s6663_s0 + $0x20] sm:$0xf] }
  0x3b   :  { %2854 = vmatpush.bf16.msrb.mxu1 %v5031_v18  ;;  %v4940_v18 = vld [vmem:[%s6663_s0 + $0xac] sm:$0xf0] }
  0x3c   :  { %2873 = vmatpush.bf16.msrb.mxu2 %v5039_v16  ;;  %v5078_v16 = vld [vmem:[%s6662_s1 + $0x2c0] sm:$0xff]  ;;  %v3513_v29 = vor.u32 %v4940_v18, %v3512_v17  ;;  %v3536_v18 = vld [vmem:[%s6663_s0 + $0x38] sm:$0xf] }
  0x3d   :  { %2892 = vmatpush.bf16.msrb.mxu3 %v5047_v19  ;;  %v5093_v19 = vld [vmem:[%s6662_s1 + $0x338] sm:$0xff]  ;;  %v3530_v17 = vld [vmem:[%s6663_s0 + $0xc0] sm:$0xf0] }
  0x3e   :  { %2836 = vmatpush.bf16.msrb.mxu0 %v5022_v21  ;;  %v4922_v21 = vld [vmem:[%s6663_s0 + $0x24] sm:$0xf] }
  0x3f   :  { %2855 = vmatpush.bf16.msrb.mxu1 %v5030_v22  ;;  %v5117_v22 = vld [vmem:[%s6662_s1 + $0x3f8] sm:$0xff]  ;;  %v3517_v31 = vor.u32 %v4922_v21, %v3514_v24  ;;  %v3538_v21 = vld [vmem:[%s6663_s0 + $0xc8] sm:$0xf0]  ;;  %v5148_v24 = vld [vmem:[%s6662_s1 + $0x4f0] sm:$0xff] }
  0x40   :  { %2874 = vmatpush.bf16.msrb.mxu2 %v5038_v20  ;;  %v5101_v20 = vld [vmem:[%s6662_s1 + $0x378] sm:$0xff] }
  0x41   :  { %2893 = vmatpush.bf16.msrb.mxu3 %v5046_v23  ;;  %2837 = vmatmul.bf16.vlgmr.msrb.gmra.mxu0 %v3497_v36  ;;  %v5108_v23 = vld [vmem:[%s6662_s1 + $0x3b0] sm:$0xff]  ;;  %v5107_v36 = vld [vmem:[%s6662_s1 + $0x3a8] sm:$0xff] }
  0x42   :  { %2905 = vmatpush.bf16.msra.mxu0 %v5061_v26  ;;  %2856 = vmatmul.bf16.vlgmr.msrb.gmra.mxu1 %v3501_v38  ;;  %v4941_v26 = vld [vmem:[%s6663_s0 + $0xb4] sm:$0xf0]  ;;  %v5091_v38 = vld [vmem:[%s6662_s1 + $0x328] sm:$0xff] }
  0x43   :  { %2924 = vmatpush.bf16.msra.mxu1 %v5069_v34  ;;  %2875 = vmatmul.bf16.vlgmr.msrb.gmra.mxu2 %v3505_v39  ;;  %v5092_v34 = vld [vmem:[%s6662_s1 + $0x330] sm:$0xff]  ;;  %v5115_v39 = vld [vmem:[%s6662_s1 + $0x3e8] sm:$0xff] }
  0x44   :  { %2943 = vmatpush.bf16.msra.mxu2 %v5077_v25  ;;  %2894 = vmatmul.bf16.vlgmr.msrb.gmra.mxu3 %v3509_v40  ;;  %v3520_v25 = vld [vmem:[%s6663_s0 + $0x28] sm:$0xf]  ;;  %v5106_v40 = vld [vmem:[%s6662_s1 + $0x3a0] sm:$0xff] }
  0x45   :  { %2962 = vmatpush.bf16.msra.mxu3 %v5085_v35  ;;  %v3521_v32 = vor.u32 %v4941_v26, %v3520_v25  ;;  %v5116_v35 = vld [vmem:[%s6662_s1 + $0x3f0] sm:$0xff] }
  0x46   :  { %2906 = vmatpush.bf16.msra.mxu0 %v5060_v41  ;;  %v5098_v41 = vld [vmem:[%s6662_s1 + $0x360] sm:$0xff] }
  0x47   :  { %2925 = vmatpush.bf16.msra.mxu1 %v5068_v42  ;;  %v5090_v42 = vld [vmem:[%s6662_s1 + $0x320] sm:$0xff] }
  0x48   :  { %2944 = vmatpush.bf16.msra.mxu2 %v5076_v37  ;;  %v5099_v37 = vld [vmem:[%s6662_s1 + $0x368] sm:$0xff] }
  0x49   :  { %2963 = vmatpush.bf16.msra.mxu3 %v5084_v43  ;;  %v5114_v43 = vld [vmem:[%s6662_s1 + $0x3e0] sm:$0xff] }
  0x4a   :  { %2907 = vmatpush.bf16.msra.mxu0 %v5059_v45  ;;  %v3656_v45 = vld [vmem:[%s6663_s0 + $0x140] sm:$0xf] }
  0x4b   :  { %2926 = vmatpush.bf16.msra.mxu1 %v5067_v46  ;;  %v4976_v46 = vld [vmem:[%s6663_s0 + $0x1cc] sm:$0xf0] }
  0x4c   :  { %2945 = vmatpush.bf16.msra.mxu2 %v5075_v44  ;;  %v5105_v44 = vld [vmem:[%s6662_s1 + $0x398] sm:$0xff]  ;;  %v3657_v57 = vor.u32 %v4976_v46, %v3656_v45  ;;  %v4979_v45 = vld [vmem:[%s6663_s0 + $0x1e4] sm:$0xf0] }
  0x4d   :  { %2964 = vmatpush.bf16.msra.mxu3 %v5083_v47  ;;  %v5097_v47 = vld [vmem:[%s6662_s1 + $0x358] sm:$0xff] }
  0x4e   :  { %2908 = vmatpush.bf16.msra.mxu0 %v5058_v49  ;;  %v3658_v49 = vld [vmem:[%s6663_s0 + $0x1d0] sm:$0xf0]  ;;  %v4961_v46 = vld [vmem:[%s6663_s0 + $0x15c] sm:$0xf] }
  0x4f   :  { %2927 = vmatpush.bf16.msra.mxu1 %v5066_v50  ;;  %v3664_v50 = vld [vmem:[%s6663_s0 + $0x148] sm:$0xf] }
  0x50   :  { %2946 = vmatpush.bf16.msra.mxu2 %v5074_v48  ;;  %v4958_v48 = vld [vmem:[%s6663_s0 + $0x144] sm:$0xf] }
  0x51   :  { %2965 = vmatpush.bf16.msra.mxu3 %v5082_v51  ;;  %2842 = vmatmul.bf16.gmra.mxu0 %v3641_v0  ;;  %v4977_v51 = vld [vmem:[%s6663_s0 + $0x1d4] sm:$0xf0]  ;;  %v3661_v59 = vor.u32 %v4958_v48, %v3658_v49  ;;  %v5103_v0 = vld [vmem:[%s6662_s1 + $0x388] sm:$0xff]  ;;  %v5120_v49 = vld [vmem:[%s6662_s1 + $0x410] sm:$0xff] }
  0x52   :  { %2909 = vmatpush.bf16.msra.mxu0 %v5057_v60  ;;  %2861 = vmatmul.bf16.gmra.mxu1 %v3645_v2  ;;  %v3665_v60 = vor.u32 %v4977_v51, %v3664_v50  ;;  %v5087_v2 = vld [vmem:[%s6662_s1 + $0x308] sm:$0xff]  ;;  %v5128_v50 = vld [vmem:[%s6662_s1 + $0x450] sm:$0xff] }
  0x53   :  { %2928 = vmatpush.bf16.msra.mxu1 %v5065_v62  ;;  %2880 = vmatmul.bf16.gmra.mxu2 %v3649_v3  ;;  %v5088_v62 = vld [vmem:[%s6662_s1 + $0x310] sm:$0xff]  ;;  %v5111_v3 = vld [vmem:[%s6662_s1 + $0x3c8] sm:$0xff] }
  0x54   :  { %2947 = vmatpush.bf16.msra.mxu2 %v5073_v54  ;;  %2899 = vmatmul.bf16.gmra.mxu3 %v3653_v4  ;;  %v3666_v54 = vld [vmem:[%s6663_s0 + $0x1d8] sm:$0xf0]  ;;  %v5102_v4 = vld [vmem:[%s6662_s1 + $0x380] sm:$0xff]  ;;  %v3682_v48 = vld [vmem:[%s6663_s0 + $0x1e8] sm:$0xf0] }
  0x55   :  { %2966 = vmatpush.bf16.msra.mxu3 %v5081_v63  ;;  %v3669_v61 = vor.u32 %v4959_v52, %v3666_v54  ;;  %v5112_v63 = vld [vmem:[%s6662_s1 + $0x3d0] sm:$0xff] }
  0x56   :  { %2910 = vmatpush.bf16.msra.mxu0 %v5056_v5  ;;  %v5094_v5 = vld [vmem:[%s6662_s1 + $0x340] sm:$0xff]  ;;  %v5144_v52 = vld [vmem:[%s6662_s1 + $0x4d0] sm:$0xff] }
  0x57   :  { %2929 = vmatpush.bf16.msra.mxu1 %v5064_v6  ;;  %v5141_v6 = vld [vmem:[%s6662_s1 + $0x4b8] sm:$0xff] }
  0x58   :  { %2948 = vmatpush.bf16.msra.mxu2 %v5072_v1  ;;  %v5095_v1 = vld [vmem:[%s6662_s1 + $0x348] sm:$0xff] }
  0x59   :  { %2967 = vmatpush.bf16.msra.mxu3 %v5080_v7  ;;  %v5133_v7 = vld [vmem:[%s6662_s1 + $0x478] sm:$0xff] }
  0x5a   :  { %2911 = vmatpush.bf16.msra.mxu0 %v5055_v9  ;;  %v5110_v9 = vld [vmem:[%s6662_s1 + $0x3c0] sm:$0xff] }
  0x5b   :  { %2930 = vmatpush.bf16.msra.mxu1 %v5063_v10  ;;  %v5125_v10 = vld [vmem:[%s6662_s1 + $0x438] sm:$0xff] }
  0x5c   :  { %2949 = vmatpush.bf16.msra.mxu2 %v5071_v8  ;;  %v5086_v8 = vld [vmem:[%s6662_s1 + $0x300] sm:$0xff] }
  0x5d   :  { %2968 = vmatpush.bf16.msra.mxu3 %v5079_v11  ;;  %v3528_v11 = vld [vmem:[%s6663_s0 + $0x30] sm:$0xf] }
  0x5e   :  { %2912 = vmatpush.bf16.msra.mxu0 %v5054_v14  ;;  %v4942_v14 = vld [vmem:[%s6663_s0 + $0xbc] sm:$0xf0] }
  0x5f   :  { %2931 = vmatpush.bf16.msra.mxu1 %v5062_v15  ;;  %v4924_v15 = vld [vmem:[%s6663_s0 + $0x34] sm:$0xf] }
  0x60   :  { %2950 = vmatpush.bf16.msra.mxu2 %v5070_v12  ;;  %v5149_v12 = vld [vmem:[%s6662_s1 + $0x4f8] sm:$0xff]  ;;  %v3533_v25 = vor.u32 %v4924_v15, %v3530_v17  ;;  %v5171_v17 = vld [vmem:[%s6662_s1 + $0x5a8] sm:$0xff] }
  0x61   :  { %2969 = vmatpush.bf16.msra.mxu3 %v5078_v16  ;;  %2913 = vmatmul.bf16.vlgmr.msra.gmra.mxu0 %v3513_v29  ;;  %v5132_v16 = vld [vmem:[%s6662_s1 + $0x470] sm:$0xff]  ;;  %v5123_v29 = vld [vmem:[%s6662_s1 + $0x428] sm:$0xff]  ;;  %v3554_v15 = vld [vmem:[%s6663_s0 + $0xd8] sm:$0xf0] }
  0x62   :  { %2981 = vmatpush.bf16.msrb.mxu0 %v5093_v19  ;;  %2932 = vmatmul.bf16.vlgmr.msra.gmra.mxu1 %v3517_v31  ;;  %v4943_v19 = vld [vmem:[%s6663_s0 + $0xc4] sm:$0xf0] }
  0x63   :  { %3000 = vmatpush.bf16.msrb.mxu1 %v5101_v20  ;;  %2951 = vmatmul.bf16.vlgmr.msra.gmra.mxu2 %v3521_v32  ;;  %v4925_v20 = vld [vmem:[%s6663_s0 + $0x3c] sm:$0xf]  ;;  %v3537_v26 = vor.u32 %v4943_v19, %v3536_v18  ;;  %v5147_v31 = vld [vmem:[%s6662_s1 + $0x4e8] sm:$0xff]  ;;  %v5138_v32 = vld [vmem:[%s6662_s1 + $0x4a0] sm:$0xff] }
  0x64   :  { %3019 = vmatpush.bf16.msrb.mxu2 %v5109_v13  ;;  %2970 = vmatmul.bf16.vlgmr.msra.gmra.mxu3 %v3525_v33  ;;  %v5140_v13 = vld [vmem:[%s6662_s1 + $0x4b0] sm:$0xff]  ;;  %v3541_v27 = vor.u32 %v4925_v20, %v3538_v21  ;;  %v5122_v33 = vld [vmem:[%s6662_s1 + $0x420] sm:$0xff] }
  0x65   :  { %3038 = vmatpush.bf16.msrb.mxu3 %v5117_v22  ;;  %v5124_v22 = vld [vmem:[%s6662_s1 + $0x430] sm:$0xff] }
  0x66   :  { %2982 = vmatpush.bf16.msrb.mxu0 %v5092_v34  ;;  %v5130_v34 = vld [vmem:[%s6662_s1 + $0x460] sm:$0xff] }
  0x67   :  { %3001 = vmatpush.bf16.msrb.mxu1 %v5100_v30  ;;  %v5131_v30 = vld [vmem:[%s6662_s1 + $0x468] sm:$0xff] }
  0x68   :  { %3020 = vmatpush.bf16.msrb.mxu2 %v5108_v23  ;;  %v3529_v23 = vor.u32 %v4942_v14, %v3528_v11  ;;  %v3552_v11 = vld [vmem:[%s6663_s0 + $0x48] sm:$0xf]  ;;  %v4927_v14 = vld [vmem:[%s6663_s0 + $0x4c] sm:$0xf] }
  0x69   :  { %3039 = vmatpush.bf16.msrb.mxu3 %v5116_v35  ;;  %v5146_v35 = vld [vmem:[%s6662_s1 + $0x4e0] sm:$0xff] }
  0x6a   :  { %2983 = vmatpush.bf16.msrb.mxu0 %v5091_v38  ;;  %v5129_v38 = vld [vmem:[%s6662_s1 + $0x458] sm:$0xff] }
  0x6b   :  { %3002 = vmatpush.bf16.msrb.mxu1 %v5099_v37  ;;  %v5121_v37 = vld [vmem:[%s6662_s1 + $0x418] sm:$0xff] }
  0x6c   :  { %3021 = vmatpush.bf16.msrb.mxu2 %v5107_v36  ;;  %v5137_v36 = vld [vmem:[%s6662_s1 + $0x498] sm:$0xff] }
  0x6d   :  { %3040 = vmatpush.bf16.msrb.mxu3 %v5115_v39  ;;  %v3672_v39 = vld [vmem:[%s6663_s0 + $0x150] sm:$0xf] }
  0x6e   :  { %2984 = vmatpush.bf16.msrb.mxu0 %v5090_v42  ;;  %v4960_v42 = vld [vmem:[%s6663_s0 + $0x154] sm:$0xf] }
  0x6f   :  { %3003 = vmatpush.bf16.msrb.mxu1 %v5098_v41  ;;  %v5145_v41 = vld [vmem:[%s6662_s1 + $0x4d8] sm:$0xff] }
  0x70   :  { %3022 = vmatpush.bf16.msrb.mxu2 %v5106_v40  ;;  %v4978_v40 = vld [vmem:[%s6663_s0 + $0x1dc] sm:$0xf0] }
  0x71   :  { %3041 = vmatpush.bf16.msrb.mxu3 %v5114_v43  ;;  %2918 = vmatmul.bf16.gmra.mxu0 %v3657_v57  ;;  %v3674_v43 = vld [vmem:[%s6663_s0 + $0x1e0] sm:$0xf0]  ;;  %v3673_v51 = vor.u32 %v4978_v40, %v3672_v39  ;;  %v5119_v57 = vld [vmem:[%s6662_s1 + $0x408] sm:$0xff]  ;;  %v5161_v40 = vld [vmem:[%s6662_s1 + $0x558] sm:$0xff] }
  0x72   :  { %2985 = vmatpush.bf16.msrb.mxu0 %v5089_v53  ;;  %2937 = vmatmul.bf16.gmra.mxu1 %v3661_v59  ;;  %v3677_v53 = vor.u32 %v4960_v42, %v3674_v43  ;;  %v5143_v59 = vld [vmem:[%s6662_s1 + $0x4c8] sm:$0xff]  ;;  %v3688_v42 = vld [vmem:[%s6663_s0 + $0x160] sm:$0xf]  ;;  %v4980_v43 = vld [vmem:[%s6663_s0 + $0x1ec] sm:$0xf0] }
  0x73   :  { %3004 = vmatpush.bf16.msrb.mxu1 %v5097_v47  ;;  %2956 = vmatmul.bf16.gmra.mxu2 %v3665_v60  ;;  %v5136_v47 = vld [vmem:[%s6662_s1 + $0x490] sm:$0xff]  ;;  %v5134_v60 = vld [vmem:[%s6662_s1 + $0x480] sm:$0xff] }
  0x74   :  { %3023 = vmatpush.bf16.msrb.mxu2 %v5105_v44  ;;  %2975 = vmatmul.bf16.gmra.mxu3 %v3669_v61  ;;  %v3680_v44 = vld [vmem:[%s6663_s0 + $0x158] sm:$0xf]  ;;  %v5118_v61 = vld [vmem:[%s6662_s1 + $0x400] sm:$0xff] }
  0x75   :  { %3042 = vmatpush.bf16.msrb.mxu3 %v5113_v55  ;;  %v3681_v54 = vor.u32 %v4979_v45, %v3680_v44  ;;  %v3685_v55 = vor.u32 %v4961_v46, %v3682_v48  ;;  %v5168_v44 = vld [vmem:[%s6662_s1 + $0x590] sm:$0xff]  ;;  %v4962_v45 = vld [vmem:[%s6663_s0 + $0x164] sm:$0xf]  ;;  %v4981_v48 = vld [vmem:[%s6663_s0 + $0x1f4] sm:$0xf0] }
  0x76   :  { %2986 = vmatpush.bf16.msrb.mxu0 %v5088_v62  ;;  %v5126_v62 = vld [vmem:[%s6662_s1 + $0x440] sm:$0xff]  ;;  %v3690_v46 = vld [vmem:[%s6663_s0 + $0x1f0] sm:$0xf0] }
  0x77   :  { %3005 = vmatpush.bf16.msrb.mxu1 %v5096_v58  ;;  %v5127_v58 = vld [vmem:[%s6662_s1 + $0x448] sm:$0xff] }
  0x78   :  { %3024 = vmatpush.bf16.msrb.mxu2 %v5104_v56  ;;  %v5135_v56 = vld [vmem:[%s6662_s1 + $0x488] sm:$0xff] }
  0x79   :  { %3043 = vmatpush.bf16.msrb.mxu3 %v5112_v63  ;;  %v5142_v63 = vld [vmem:[%s6662_s1 + $0x4c0] sm:$0xff] }
  0x7a   :  { %2987 = vmatpush.bf16.msrb.mxu0 %v5087_v2  ;;  %v5165_v2 = vld [vmem:[%s6662_s1 + $0x578] sm:$0xff] }
  0x7b   :  { %3006 = vmatpush.bf16.msrb.mxu1 %v5095_v1  ;;  %v5157_v1 = vld [vmem:[%s6662_s1 + $0x538] sm:$0xff] }
  0x7c   :  { %3025 = vmatpush.bf16.msrb.mxu2 %v5103_v0  ;;  %v5173_v0 = vld [vmem:[%s6662_s1 + $0x5b8] sm:$0xff] }
  0x7d   :  { %3044 = vmatpush.bf16.msrb.mxu3 %v5111_v3  ;;  %v5181_v3 = vld [vmem:[%s6662_s1 + $0x5f8] sm:$0xff] }
  0x7e   :  { %2988 = vmatpush.bf16.msrb.mxu0 %v5086_v8  ;;  %v3546_v8 = vld [vmem:[%s6663_s0 + $0xd0] sm:$0xf0] }
  0x7f   :  { %3007 = vmatpush.bf16.msrb.mxu1 %v5094_v5  ;;  %v4944_v5 = vld [vmem:[%s6663_s0 + $0xcc] sm:$0xf0] }
  0x80   :  { %3026 = vmatpush.bf16.msrb.mxu2 %v5102_v4  ;;  %v3544_v4 = vld [vmem:[%s6663_s0 + $0x40] sm:$0xf] }
  0x81   :  { %3045 = vmatpush.bf16.msrb.mxu3 %v5110_v9  ;;  %2989 = vmatmul.bf16.vlgmr.msrb.gmra.mxu0 %v3529_v23  ;;  %v5156_v9 = vld [vmem:[%s6662_s1 + $0x530] sm:$0xff]  ;;  %v3557_v23 = vor.u32 %v4927_v14, %v3554_v15 }
  0x82   :  { %3057 = vmatpush.bf16.msra.mxu0 %v5125_v10  ;;  %3008 = vmatmul.bf16.vlgmr.msrb.gmra.mxu1 %v3533_v25  ;;  %v5164_v10 = vld [vmem:[%s6662_s1 + $0x570] sm:$0xff]  ;;  %v5163_v25 = vld [vmem:[%s6662_s1 + $0x568] sm:$0xff] }
  0x83   :  { %3076 = vmatpush.bf16.msra.mxu1 %v5133_v7  ;;  %3027 = vmatmul.bf16.vlgmr.msrb.gmra.mxu2 %v3537_v26  ;;  %v5172_v7 = vld [vmem:[%s6662_s1 + $0x5b0] sm:$0xff]  ;;  %v5179_v26 = vld [vmem:[%s6662_s1 + $0x5e8] sm:$0xff] }
  0x84   :  { %3095 = vmatpush.bf16.msra.mxu2 %v5141_v6  ;;  %3046 = vmatmul.bf16.vlgmr.msrb.gmra.mxu3 %v3541_v27  ;;  %v4926_v6 = vld [vmem:[%s6663_s0 + $0x44] sm:$0xf] }
  0x85   :  { %3114 = vmatpush.bf16.msra.mxu3 %v5149_v12  ;;  %v4945_v12 = vld [vmem:[%s6663_s0 + $0xd4] sm:$0xf0]  ;;  %v3549_v20 = vor.u32 %v4926_v6, %v3546_v8  ;;  %v5170_v27 = vld [vmem:[%s6662_s1 + $0x5a0] sm:$0xff] }
  0x86   :  { %3058 = vmatpush.bf16.msra.mxu0 %v5124_v22  ;;  %v3553_v21 = vor.u32 %v4945_v12, %v3552_v11  ;;  %v5205_v6 = vld [vmem:[%s6662_s1 + $0x6b8] sm:$0xff]  ;;  %v5158_v8 = vld [vmem:[%s6662_s1 + $0x540] sm:$0xff] }
  0x87   :  { %3077 = vmatpush.bf16.msra.mxu1 %v5132_v16  ;;  %v3545_v16 = vor.u32 %v4944_v5, %v3544_v4  ;;  %v5175_v4 = vld [vmem:[%s6662_s1 + $0x5c8] sm:$0xff]  ;;  %v5166_v5 = vld [vmem:[%s6662_s1 + $0x580] sm:$0xff]  ;;  %v5189_v12 = vld [vmem:[%s6662_s1 + $0x638] sm:$0xff] }
  0x88   :  { %3096 = vmatpush.bf16.msra.mxu2 %v5140_v13  ;;  %v5180_v13 = vld [vmem:[%s6662_s1 + $0x5f0] sm:$0xff] }
  0x89   :  { %3115 = vmatpush.bf16.msra.mxu3 %v5148_v24  ;;  %v5155_v24 = vld [vmem:[%s6662_s1 + $0x528] sm:$0xff] }
  0x8a   :  { %3059 = vmatpush.bf16.msra.mxu0 %v5123_v29  ;;  %v5162_v29 = vld [vmem:[%s6662_s1 + $0x560] sm:$0xff] }
  0x8b   :  { %3078 = vmatpush.bf16.msra.mxu1 %v5131_v30  ;;  %v5178_v30 = vld [vmem:[%s6662_s1 + $0x5e0] sm:$0xff] }
  0x8c   :  { %3097 = vmatpush.bf16.msra.mxu2 %v5139_v28  ;;  %v5154_v28 = vld [vmem:[%s6662_s1 + $0x520] sm:$0xff] }
  0x8d   :  { %3116 = vmatpush.bf16.msra.mxu3 %v5147_v31 }
  0x8e   :  { %3060 = vmatpush.bf16.msra.mxu0 %v5122_v33  ;;  %v5169_v33 = vld [vmem:[%s6662_s1 + $0x598] sm:$0xff] }
  0x8f   :  { %3079 = vmatpush.bf16.msra.mxu1 %v5130_v34 }
  0x90   :  { %3098 = vmatpush.bf16.msra.mxu2 %v5138_v32 }
  0x91   :  { %3117 = vmatpush.bf16.msra.mxu3 %v5146_v35  ;;  %2994 = vmatmul.bf16.gmra.mxu0 %v3673_v51  ;;  %v3698_v51 = vld [vmem:[%s6663_s0 + $0x1f8] sm:$0xf0] }
  0x92   :  { %3061 = vmatpush.bf16.msra.mxu0 %v5121_v37  ;;  %3013 = vmatmul.bf16.gmra.mxu1 %v3677_v53  ;;  %v5176_v53 = vld [vmem:[%s6662_s1 + $0x5d0] sm:$0xff] }
  0x93   :  { %3080 = vmatpush.bf16.msra.mxu1 %v5129_v38  ;;  %3032 = vmatmul.bf16.gmra.mxu2 %v3681_v54  ;;  %v5153_v38 = vld [vmem:[%s6662_s1 + $0x518] sm:$0xff] }
  0x94   :  { %3099 = vmatpush.bf16.msra.mxu2 %v5137_v36  ;;  %3051 = vmatmul.bf16.gmra.mxu3 %v3685_v55 }
  0x95   :  { %3118 = vmatpush.bf16.msra.mxu3 %v5145_v41  ;;  %v5177_v41 = vld [vmem:[%s6662_s1 + $0x5d8] sm:$0xff] }
  0x96   :  { %3062 = vmatpush.bf16.msra.mxu0 %v5120_v49  ;;  %v4963_v49 = vld [vmem:[%s6663_s0 + $0x16c] sm:$0xf] }
  0x97   :  { %3081 = vmatpush.bf16.msra.mxu1 %v5128_v50  ;;  %v5152_v50 = vld [vmem:[%s6662_s1 + $0x510] sm:$0xff] }
  0x98   :  { %3100 = vmatpush.bf16.msra.mxu2 %v5136_v47  ;;  %v3696_v47 = vld [vmem:[%s6663_s0 + $0x168] sm:$0xf] }
  0x99   :  { %3119 = vmatpush.bf16.msra.mxu3 %v5144_v52  ;;  %v5160_v52 = vld [vmem:[%s6662_s1 + $0x550] sm:$0xff] }
  0x9a   :  { %3063 = vmatpush.bf16.msra.mxu0 %v5119_v57  ;;  %v5167_v57 = vld [vmem:[%s6662_s1 + $0x588] sm:$0xff] }
  0x9b   :  { %3082 = vmatpush.bf16.msra.mxu1 %v5127_v58 }
  0x9c   :  { %3101 = vmatpush.bf16.msra.mxu2 %v5135_v56  ;;  %v3689_v56 = vor.u32 %v4980_v43, %v3688_v42 }
  0x9d   :  { %3120 = vmatpush.bf16.msra.mxu3 %v5143_v59 }
  0x9e   :  { %3064 = vmatpush.bf16.msra.mxu0 %v5118_v61  ;;  %v2762_v18 = vpop.f32.mrf.mxu0  ;;  %v3693_v61 = vor.u32 %v4962_v45, %v3690_v46  ;;  %v5187_v45 = vld [vmem:[%s6662_s1 + $0x628] sm:$0xff] }
  0x9f   :  { %3083 = vmatpush.bf16.msra.mxu1 %v5126_v62  ;;  %v2781_v19 = vpop.f32.mrf.mxu1  ;;  %v3697_v62 = vor.u32 %v4981_v48, %v3696_v47  ;;  %v5211_v47 = vld [vmem:[%s6662_s1 + $0x6e8] sm:$0xff]  ;;  %v5202_v48 = vld [vmem:[%s6662_s1 + $0x6a0] sm:$0xff] }
  0xa0   :  { %3102 = vmatpush.bf16.msra.mxu2 %v5134_v60  ;;  %v2782_v22 = vadd.f32 %v2781_v19, %v2762_v18  ;;  %v5204_v18 = vld [vmem:[%s6662_s1 + $0x6b0] sm:$0xff] }
  0xa1   :  { %3121 = vmatpush.bf16.msra.mxu3 %v5142_v63  ;;  %3065 = vmatmul.bf16.vlgmr.msra.gmra.mxu0 %v3545_v16 }
  0xa2   :  { %3133 = vmatpush.bf16.msrb.mxu0 %v5157_v1  ;;  %3084 = vmatmul.bf16.vlgmr.msra.gmra.mxu1 %v3549_v20  ;;  %v5151_v1 = vld [vmem:[%s6662_s1 + $0x508] sm:$0xff] }
  0xa3   :  { %3152 = vmatpush.bf16.msrb.mxu1 %v5165_v2  ;;  %3103 = vmatmul.bf16.vlgmr.msra.gmra.mxu2 %v3553_v21  ;;  %v3560_v21 = vld [vmem:[%s6663_s0 + $0x50] sm:$0xf] }
  0xa4   :  { %3171 = vmatpush.bf16.msrb.mxu2 %v5173_v0  ;;  %3122 = vmatmul.bf16.vlgmr.msra.gmra.mxu3 %v3557_v23  ;;  %v3701_v0 = vor.u32 %v4963_v49, %v3698_v51  ;;  %v5188_v23 = vld [vmem:[%s6662_s1 + $0x630] sm:$0xff]  ;;  %v5210_v51 = vld [vmem:[%s6662_s1 + $0x6e0] sm:$0xff] }
  0xa5   :  { %3190 = vmatpush.bf16.msrb.mxu3 %v5181_v3  ;;  %v5159_v3 = vld [vmem:[%s6662_s1 + $0x548] sm:$0xff] }
  0xa6   :  { %3134 = vmatpush.bf16.msrb.mxu0 %v5156_v9  ;;  %v2800_v31 = vpop.f32.mrf.mxu2  ;;  %v2764_v35 = vpop.f32.mrf.mxu0  ;;  %v5174_v9 = vld [vmem:[%s6662_s1 + $0x5c0] sm:$0xff] }
  0xa7   :  { %3153 = vmatpush.bf16.msrb.mxu1 %v5164_v10  ;;  %v2819_v32 = vpop.f32.mrf.mxu3  ;;  %v2801_v34 = vadd.f32 %v2800_v31, %v2782_v22  ;;  %v2783_v36 = vpop.f32.mrf.mxu1  ;;  %v4946_v22 = vld [vmem:[%s6663_s0 + $0xdc] sm:$0xf0]  ;;  %v4929_v31 = vld [vmem:[%s6663_s0 + $0x5c] sm:$0xf] }
  0xa8   :  { %3172 = vmatpush.bf16.msrb.mxu2 %v5172_v7  ;;  %v2784_v37 = vadd.f32 %v2783_v36, %v2764_v35  ;;  %v5150_v7 = vld [vmem:[%s6662_s1 + $0x500] sm:$0xff]  ;;  %v3561_v35 = vor.u32 %v4946_v22, %v3560_v21  ;;  %v5195_v36 = vld [vmem:[%s6662_s1 + $0x668] sm:$0xff] }
  0xa9   :  { %3191 = vmatpush.bf16.msrb.mxu3 %v5180_v13  ;;  %v6055_v39 = vadd.f32 %v2819_v32, %v2801_v34  ;;  %v5197_v13 = vld [vmem:[%s6662_s1 + $0x678] sm:$0xff]  ;;  %v3570_v32 = vld [vmem:[%s6663_s0 + $0xe8] sm:$0xf0] }
  0xaa   :  { %3135 = vmatpush.bf16.msrb.mxu0 %v5155_v24  ;;  %v5196_v24 = vld [vmem:[%s6662_s1 + $0x670] sm:$0xff] }
  0xab   :  { %3154 = vmatpush.bf16.msrb.mxu1 %v5163_v25  ;;  %v4928_v25 = vld [vmem:[%s6663_s0 + $0x54] sm:$0xf] }
  0xac   :  { %3173 = vmatpush.bf16.msrb.mxu2 %v5171_v17  ;;  %v5213_v17 = vld [vmem:[%s6662_s1 + $0x6f8] sm:$0xff] }
  0xad   :  { %3192 = vmatpush.bf16.msrb.mxu3 %v5179_v26  ;;  %v5212_v26 = vld [vmem:[%s6662_s1 + $0x6f0] sm:$0xff] }
  0xae   :  { %3136 = vmatpush.bf16.msrb.mxu0 %v5154_v28  ;;  %v2802_v54 = vpop.f32.mrf.mxu2  ;;  %v2767_v59 = vpop.f32.mrf.mxu0  ;;  %v3562_v28 = vld [vmem:[%s6663_s0 + $0xe0] sm:$0xf0] }
  0xaf   :  { %3155 = vmatpush.bf16.msrb.mxu1 %v5162_v29  ;;  %v2821_v55 = vpop.f32.mrf.mxu3  ;;  %v2803_v58 = vadd.f32 %v2802_v54, %v2784_v37  ;;  %v2786_v60 = vpop.f32.mrf.mxu1  ;;  %v3568_v29 = vld [vmem:[%s6663_s0 + $0x58] sm:$0xf] }
  0xb0   :  { %3174 = vmatpush.bf16.msrb.mxu2 %v5170_v27  ;;  %v2787_v63 = vadd.f32 %v2786_v60, %v2767_v59  ;;  %v5203_v27 = vld [vmem:[%s6662_s1 + $0x6a8] sm:$0xff]  ;;  %v5193_v54 = vld [vmem:[%s6662_s1 + $0x658] sm:$0xff] }
  0xb1   :  { %3193 = vmatpush.bf16.msrb.mxu3 %v5178_v30  ;;  %v6105_v2 = vadd.f32 %v2821_v55, %v2803_v58  ;;  %3070 = vmatmul.bf16.gmra.mxu0 %v3689_v56  ;;  %v4947_v30 = vld [vmem:[%s6663_s0 + $0xe4] sm:$0xf0]  ;;  %v5185_v60 = vld [vmem:[%s6662_s1 + $0x618] sm:$0xff] }
  0xb2   :  { %3137 = vmatpush.bf16.msrb.mxu0 %v5153_v38  ;;  %3089 = vmatmul.bf16.gmra.mxu1 %v3693_v61 }
  0xb3   :  { %3156 = vmatpush.bf16.msrb.mxu1 %v5161_v40  ;;  %3108 = vmatmul.bf16.gmra.mxu2 %v3697_v62  ;;  %v3565_v40 = vor.u32 %v4928_v25, %v3562_v28  ;;  %v5209_v62 = vld [vmem:[%s6662_s1 + $0x6d8] sm:$0xff]  ;;  %v5183_v25 = vld [vmem:[%s6662_s1 + $0x608] sm:$0xff]  ;;  %v5198_v28 = vld [vmem:[%s6662_s1 + $0x680] sm:$0xff] }
  0xb4   :  { %3175 = vmatpush.bf16.msrb.mxu2 %v5169_v33  ;;  %3127 = vmatmul.bf16.gmra.mxu3 %v3701_v0 }
  0xb5   :  { %3194 = vmatpush.bf16.msrb.mxu3 %v5177_v41  ;;  %v3569_v41 = vor.u32 %v4947_v30, %v3568_v29  ;;  %v5190_v29 = vld [vmem:[%s6662_s1 + $0x640] sm:$0xff]  ;;  %v5237_v30 = vld [vmem:[%s6662_s1 + $0x7b8] sm:$0xff] }
  0xb6   :  { %3138 = vmatpush.bf16.msrb.mxu0 %v5152_v50  ;;  %v2805_v10 = vpop.f32.mrf.mxu2  ;;  %v2769_v15 = vpop.f32.mrf.mxu0  ;;  %v5186_v50 = vld [vmem:[%s6662_s1 + $0x620] sm:$0xff] }
  0xb7   :  { %3157 = vmatpush.bf16.msrb.mxu1 %v5160_v52  ;;  %v2824_v11 = vpop.f32.mrf.mxu3  ;;  %v2806_v14 = vadd.f32 %v2805_v10, %v2787_v63  ;;  %v2788_v16 = vpop.f32.mrf.mxu1  ;;  %v5201_v52 = vld [vmem:[%s6662_s1 + $0x698] sm:$0xff]  ;;  %v5200_v63 = vld [vmem:[%s6662_s1 + $0x690] sm:$0xff]  ;;  %v3714_v10 = vld [vmem:[%s6663_s0 + $0x208] sm:$0xf0] }
  0xb8   :  { %3176 = vmatpush.bf16.msrb.mxu2 %v5168_v44  ;;  %v2789_v19 = vadd.f32 %v2788_v16, %v2769_v15  ;;  %v3573_v44 = vor.u32 %v4929_v31, %v3570_v32  ;;  %v5191_v15 = vld [vmem:[%s6662_s1 + $0x648] sm:$0xff]  ;;  %v5229_v31 = vld [vmem:[%s6662_s1 + $0x778] sm:$0xff]  ;;  %v5182_v32 = vld [vmem:[%s6662_s1 + $0x600] sm:$0xff] }
  0xb9   :  { %3195 = vmatpush.bf16.msrb.mxu3 %v5176_v53  ;;  %v6140_v20 = vadd.f32 %v2824_v11, %v2806_v14  ;;  %v5208_v11 = vld [vmem:[%s6662_s1 + $0x6d0] sm:$0xff] }
  0xba   :  { %3139 = vmatpush.bf16.msrb.mxu0 %v5151_v1  ;;  %v3704_v1 = vld [vmem:[%s6663_s0 + $0x170] sm:$0xf] }
  0xbb   :  { %3158 = vmatpush.bf16.msrb.mxu1 %v5159_v3  ;;  %v5192_v3 = vld [vmem:[%s6662_s1 + $0x650] sm:$0xff] }
  0xbc   :  { %3177 = vmatpush.bf16.msrb.mxu2 %v5167_v57 }
  0xbd   :  { %3196 = vmatpush.bf16.msrb.mxu3 %v5175_v4  ;;  %v4964_v4 = vld [vmem:[%s6663_s0 + $0x174] sm:$0xf] }
  0xbe   :  { %3140 = vmatpush.bf16.msrb.mxu0 %v5150_v7  ;;  %v2807_v33 = vpop.f32.mrf.mxu2  ;;  %v2838_v38 = vpop.f32.mrf.mxu0  ;;  %v4983_v7 = vld [vmem:[%s6663_s0 + $0x204] sm:$0xf0] }
  0xbf   :  { %3159 = vmatpush.bf16.msrb.mxu1 %v5158_v8  ;;  %v2826_v34 = vpop.f32.mrf.mxu3  ;;  %v2808_v37 = vadd.f32 %v2807_v33, %v2789_v19  ;;  %v2839_v42 = vadd.f32 %v2838_v38, %v6055_v39  ;;  %v2857_v43 = vpop.f32.mrf.mxu1  ;;  %v5194_v39 = vld [vmem:[%s6662_s1 + $0x660] sm:$0xff]  ;;  %v4965_v8 = vld [vmem:[%s6663_s0 + $0x17c] sm:$0xf] }
  0xc0   :  { %3178 = vmatpush.bf16.msrb.mxu2 %v5166_v5  ;;  %v3706_v5 = vld [vmem:[%s6663_s0 + $0x200] sm:$0xf0] }
  0xc1   :  { %3197 = vmatpush.bf16.msrb.mxu3 %v5174_v9  ;;  %v6185_v46 = vadd.f32 %v2826_v34, %v2808_v37  ;;  %v2858_v49 = vadd.f32 %v2857_v43, %v2839_v42  ;;  %3141 = vmatmul.bf16.vlgmr.msrb.gmra.mxu0 %v3561_v35  ;;  %v5184_v9 = vld [vmem:[%s6662_s1 + $0x610] sm:$0xff]  ;;  %v3709_v19 = vor.u32 %v4964_v4, %v3706_v5  ;;  %v5206_v33 = vld [vmem:[%s6662_s1 + $0x6c0] sm:$0xff]  ;;  %v5221_v34 = vld [vmem:[%s6662_s1 + $0x738] sm:$0xff] }
  0xc2   :  { %3209 = vmatpush.bf16.msra.mxu0 %v5189_v12  ;;  %3160 = vmatmul.bf16.vlgmr.msrb.gmra.mxu1 %v3565_v40  ;;  %v5199_v12 = vld [vmem:[%s6662_s1 + $0x688] sm:$0xff]  ;;  %v5236_v37 = vld [vmem:[%s6662_s1 + $0x7b0] sm:$0xff] }
  0xc3   :  { %3228 = vmatpush.bf16.msra.mxu1 %v5197_v13  ;;  %3179 = vmatmul.bf16.vlgmr.msrb.gmra.mxu2 %v3569_v41  ;;  %v5228_v42 = vld [vmem:[%s6662_s1 + $0x770] sm:$0xff] }
  0xc4   :  { %3247 = vmatpush.bf16.msra.mxu2 %v5205_v6  ;;  %3198 = vmatmul.bf16.vlgmr.msrb.gmra.mxu3 %v3573_v44  ;;  %v3712_v6 = vld [vmem:[%s6663_s0 + $0x178] sm:$0xf] }
  0xc5   :  { %3266 = vmatpush.bf16.msra.mxu3 %v5213_v17  ;;  %v3713_v21 = vor.u32 %v4983_v7, %v3712_v6  ;;  %v5234_v7 = vld [vmem:[%s6662_s1 + $0x7a0] sm:$0xff] }
  0xc6   :  { %3210 = vmatpush.bf16.msra.mxu0 %v5188_v23  ;;  %v2876_v53 = vpop.f32.mrf.mxu2  ;;  %v2840_v57 = vpop.f32.mrf.mxu0 }
  0xc7   :  { %3229 = vmatpush.bf16.msra.mxu1 %v5196_v24  ;;  %v2877_v55 = vadd.f32 %v2876_v53, %v2858_v49  ;;  %v2895_v56 = vpop.f32.mrf.mxu3  ;;  %v2841_v58 = vadd.f32 %v2840_v57, %v6105_v2  ;;  %v2859_v59 = vpop.f32.mrf.mxu1  ;;  %v4982_v2 = vld [vmem:[%s6663_s0 + $0x1fc] sm:$0xf0]  ;;  %v3717_v24 = vor.u32 %v4965_v8, %v3714_v10  ;;  %v3578_v53 = vld [vmem:[%s6663_s0 + $0xf0] sm:$0xf0]  ;;  %v3586_v57 = vld [vmem:[%s6663_s0 + $0xf8] sm:$0xf0] }
  0xc8   :  { %3248 = vmatpush.bf16.msra.mxu2 %v5204_v18  ;;  %v3705_v14 = vor.u32 %v4982_v2, %v3704_v1  ;;  %v3576_v49 = vld [vmem:[%s6663_s0 + $0x60] sm:$0xf] }
  0xc9   :  { %3267 = vmatpush.bf16.msra.mxu3 %v5212_v26  ;;  %v6212_v61 = vadd.f32 %v2895_v56, %v2877_v55  ;;  %v2860_v0 = vadd.f32 %v2859_v59, %v2841_v58  ;;  %v4949_v55 = vld [vmem:[%s6663_s0 + $0xf4] sm:$0xf0]  ;;  %v4931_v56 = vld [vmem:[%s6663_s0 + $0x6c] sm:$0xf]  ;;  %v5226_v10 = vld [vmem:[%s6662_s1 + $0x760] sm:$0xff] }
  0xca   :  { %3211 = vmatpush.bf16.msra.mxu0 %v5187_v45  ;;  %v5219_v58 = vld [vmem:[%s6662_s1 + $0x728] sm:$0xff]  ;;  %v3589_v6 = vor.u32 %v4931_v56, %v3586_v57  ;;  %v5269_v56 = vld [vmem:[%s6662_s1 + $0x8b8] sm:$0xff] }
  0xcb   :  { %3230 = vmatpush.bf16.msra.mxu1 %v5195_v36  ;;  %v5245_v36 = vld [vmem:[%s6662_s1 + $0x7f8] sm:$0xff] }
  0xcc   :  { %3249 = vmatpush.bf16.msra.mxu2 %v5203_v27  ;;  %v5207_v27 = vld [vmem:[%s6662_s1 + $0x6c8] sm:$0xff]  ;;  %v5253_v57 = vld [vmem:[%s6662_s1 + $0x838] sm:$0xff] }
  0xcd   :  { %3268 = vmatpush.bf16.msra.mxu3 %v5211_v47  ;;  %v5220_v47 = vld [vmem:[%s6662_s1 + $0x730] sm:$0xff] }
  0xce   :  { %3212 = vmatpush.bf16.msra.mxu0 %v5186_v50  ;;  %v2878_v13 = vpop.f32.mrf.mxu2  ;;  %v2843_v18 = vpop.f32.mrf.mxu0  ;;  %v4948_v50 = vld [vmem:[%s6663_s0 + $0xec] sm:$0xf0] }
  0xcf   :  { %3231 = vmatpush.bf16.msra.mxu1 %v5194_v39  ;;  %v2879_v16 = vadd.f32 %v2878_v13, %v2860_v0  ;;  %v2897_v17 = vpop.f32.mrf.mxu3  ;;  %v2844_v22 = vadd.f32 %v2843_v18, %v6140_v20  ;;  %v2862_v23 = vpop.f32.mrf.mxu1  ;;  %v5235_v39 = vld [vmem:[%s6662_s1 + $0x7a8] sm:$0xff]  ;;  %v5217_v13 = vld [vmem:[%s6662_s1 + $0x718] sm:$0xff] }
  0xd0   :  { %3250 = vmatpush.bf16.msra.mxu2 %v5202_v48 }
  0xd1   :  { %3269 = vmatpush.bf16.msra.mxu3 %v5210_v51  ;;  %v6263_v26 = vadd.f32 %v2897_v17, %v2879_v16  ;;  %v2863_v20 = vadd.f32 %v2862_v23, %v2844_v22  ;;  %3146 = vmatmul.bf16.gmra.mxu0 %v3705_v14  ;;  %v4930_v51 = vld [vmem:[%s6663_s0 + $0x64] sm:$0xf]  ;;  %v5225_v14 = vld [vmem:[%s6662_s1 + $0x758] sm:$0xff]  ;;  %v5232_v23 = vld [vmem:[%s6662_s1 + $0x790] sm:$0xff] }
  0xd2   :  { %3213 = vmatpush.bf16.msra.mxu0 %v5185_v60  ;;  %3165 = vmatmul.bf16.gmra.mxu1 %v3709_v19  ;;  %v3577_v60 = vor.u32 %v4948_v50, %v3576_v49  ;;  %v3581_v2 = vor.u32 %v4930_v51, %v3578_v53  ;;  %v5241_v16 = vld [vmem:[%s6662_s1 + $0x7d8] sm:$0xff]  ;;  %v5230_v51 = vld [vmem:[%s6662_s1 + $0x780] sm:$0xff] }
  0xd3   :  { %3232 = vmatpush.bf16.msra.mxu1 %v5193_v54  ;;  %3184 = vmatmul.bf16.gmra.mxu2 %v3713_v21  ;;  %v3584_v54 = vld [vmem:[%s6663_s0 + $0x68] sm:$0xf]  ;;  %v5214_v53 = vld [vmem:[%s6662_s1 + $0x700] sm:$0xff] }
  0xd4   :  { %3251 = vmatpush.bf16.msra.mxu2 %v5201_v52  ;;  %3203 = vmatmul.bf16.gmra.mxu3 %v3717_v24  ;;  %v5227_v52 = vld [vmem:[%s6662_s1 + $0x768] sm:$0xff] }
  0xd5   :  { %3270 = vmatpush.bf16.msra.mxu3 %v5209_v62  ;;  %v5243_v62 = vld [vmem:[%s6662_s1 + $0x7e8] sm:$0xff] }
  0xd6   :  { %3214 = vmatpush.bf16.msra.mxu0 %v5184_v9  ;;  %v2881_v35 = vpop.f32.mrf.mxu2  ;;  %v2845_v41 = vpop.f32.mrf.mxu0  ;;  %v5218_v9 = vld [vmem:[%s6662_s1 + $0x720] sm:$0xff] }
  0xd7   :  { %3233 = vmatpush.bf16.msra.mxu1 %v5192_v3  ;;  %v2882_v38 = vadd.f32 %v2881_v35, %v2863_v20  ;;  %v2900_v40 = vpop.f32.mrf.mxu3  ;;  %v2846_v43 = vadd.f32 %v2845_v41, %v6185_v46  ;;  %v2864_v44 = vpop.f32.mrf.mxu1  ;;  %v5244_v46 = vld [vmem:[%s6662_s1 + $0x7f0] sm:$0xff]  ;;  %v3585_v3 = vor.u32 %v4949_v55, %v3584_v54  ;;  %v5231_v35 = vld [vmem:[%s6662_s1 + $0x788] sm:$0xff]  ;;  %v5222_v54 = vld [vmem:[%s6662_s1 + $0x740] sm:$0xff] }
  0xd8   :  { %3252 = vmatpush.bf16.msra.mxu2 %v5200_v63  ;;  %v4984_v20 = vld [vmem:[%s6663_s0 + $0x20c] sm:$0xf0]  ;;  %v5238_v55 = vld [vmem:[%s6662_s1 + $0x7c0] sm:$0xff] }
  0xd9   :  { %3271 = vmatpush.bf16.msra.mxu3 %v5208_v11  ;;  %v6299_v45 = vadd.f32 %v2900_v40, %v2882_v38  ;;  %v2865_v48 = vadd.f32 %v2864_v44, %v2846_v43  ;;  %v5223_v38 = vld [vmem:[%s6662_s1 + $0x748] sm:$0xff] }
  0xda   :  { %3215 = vmatpush.bf16.msra.mxu0 %v5183_v25  ;;  %v5216_v25 = vld [vmem:[%s6662_s1 + $0x710] sm:$0xff] }
  0xdb   :  { %3234 = vmatpush.bf16.msra.mxu1 %v5191_v15 }
  0xdc   :  { %3253 = vmatpush.bf16.msra.mxu2 %v5199_v12  ;;  %v5233_v12 = vld [vmem:[%s6662_s1 + $0x798] sm:$0xff] }
  0xdd   :  { %3272 = vmatpush.bf16.msra.mxu3 %v5207_v27  ;;  %v5224_v27 = vld [vmem:[%s6662_s1 + $0x750] sm:$0xff] }
  0xde   :  { %3216 = vmatpush.bf16.msra.mxu0 %v5182_v32  ;;  %v2883_v59 = vpop.f32.mrf.mxu2  ;;  %v2914_v1 = vpop.f32.mrf.mxu0  ;;  %v3728_v32 = vld [vmem:[%s6663_s0 + $0x188] sm:$0xf] }
  0xdf   :  { %3235 = vmatpush.bf16.msra.mxu1 %v5190_v29  ;;  %v2884_v63 = vadd.f32 %v2883_v59, %v2865_v48  ;;  %v2902_v0 = vpop.f32.mrf.mxu3  ;;  %v2915_v4 = vadd.f32 %v2914_v1, %v6212_v61  ;;  %v2933_v5 = vpop.f32.mrf.mxu1  ;;  %v5242_v61 = vld [vmem:[%s6662_s1 + $0x7e0] sm:$0xff]  ;;  %v5240_v29 = vld [vmem:[%s6662_s1 + $0x7d0] sm:$0xff]  ;;  %v5277_v59 = vld [vmem:[%s6662_s1 + $0x8f8] sm:$0xff] }
  0xe0   :  { %3254 = vmatpush.bf16.msra.mxu2 %v5198_v28 }
  0xe1   :  { %3273 = vmatpush.bf16.msra.mxu3 %v5206_v33  ;;  %v6347_v8 = vadd.f32 %v2902_v0, %v2884_v63  ;;  %v2934_v11 = vadd.f32 %v2933_v5, %v2915_v4  ;;  %3217 = vmatmul.bf16.vlgmr.msra.gmra.mxu0 %v3577_v60  ;;  %v4985_v33 = vld [vmem:[%s6663_s0 + $0x214] sm:$0xf0] }
  0xe2   :  { %3285 = vmatpush.bf16.msrb.mxu0 %v5221_v34  ;;  %3236 = vmatmul.bf16.vlgmr.msra.gmra.mxu1 %v3581_v2  ;;  %v4967_v34 = vld [vmem:[%s6663_s0 + $0x18c] sm:$0xf]  ;;  %v3729_v49 = vor.u32 %v4985_v33, %v3728_v32  ;;  %v5252_v2 = vld [vmem:[%s6662_s1 + $0x830] sm:$0xff]  ;;  %v5250_v32 = vld [vmem:[%s6662_s1 + $0x820] sm:$0xff] }
  0xe3   :  { %3304 = vmatpush.bf16.msrb.mxu1 %v5229_v31  ;;  %3255 = vmatmul.bf16.vlgmr.msra.gmra.mxu2 %v3585_v3  ;;  %v3722_v31 = vld [vmem:[%s6663_s0 + $0x210] sm:$0xf0] }
  0xe4   :  { %3323 = vmatpush.bf16.msrb.mxu2 %v5237_v30  ;;  %3274 = vmatmul.bf16.vlgmr.msra.gmra.mxu3 %v3589_v6  ;;  %v4966_v30 = vld [vmem:[%s6663_s0 + $0x184] sm:$0xf]  ;;  %v5260_v3 = vld [vmem:[%s6662_s1 + $0x870] sm:$0xff] }
  0xe5   :  { %3342 = vmatpush.bf16.msrb.mxu3 %v5245_v36  ;;  %v3730_v36 = vld [vmem:[%s6663_s0 + $0x218] sm:$0xf0]  ;;  %v3725_v48 = vor.u32 %v4966_v30, %v3722_v31  ;;  %v5276_v6 = vld [vmem:[%s6662_s1 + $0x8f0] sm:$0xff] }
  0xe6   :  { %3286 = vmatpush.bf16.msrb.mxu0 %v5220_v47  ;;  %v2952_v15 = vpop.f32.mrf.mxu2  ;;  %v2916_v19 = vpop.f32.mrf.mxu0  ;;  %v3733_v50 = vor.u32 %v4967_v34, %v3730_v36  ;;  %v5258_v34 = vld [vmem:[%s6662_s1 + $0x860] sm:$0xff] }
  0xe7   :  { %3305 = vmatpush.bf16.msrb.mxu1 %v5228_v42  ;;  %v2953_v17 = vadd.f32 %v2952_v15, %v2934_v11  ;;  %v2971_v18 = vpop.f32.mrf.mxu3  ;;  %v2917_v21 = vadd.f32 %v2916_v19, %v6263_v26  ;;  %v2935_v22 = vpop.f32.mrf.mxu1  ;;  %v3720_v26 = vld [vmem:[%s6663_s0 + $0x180] sm:$0xf]  ;;  %v5239_v42 = vld [vmem:[%s6662_s1 + $0x7c8] sm:$0xff]  ;;  %v3600_v15 = vld [vmem:[%s6663_s0 + $0x78] sm:$0xf] }
  0xe8   :  { %3324 = vmatpush.bf16.msrb.mxu2 %v5236_v37  ;;  %v5215_v37 = vld [vmem:[%s6662_s1 + $0x708] sm:$0xff]  ;;  %v3721_v41 = vor.u32 %v4984_v20, %v3720_v26  ;;  %v4950_v11 = vld [vmem:[%s6663_s0 + $0xfc] sm:$0xf0] }
  0xe9   :  { %3343 = vmatpush.bf16.msrb.mxu3 %v5244_v46  ;;  %v6374_v24 = vadd.f32 %v2971_v18, %v2953_v17  ;;  %v2936_v28 = vadd.f32 %v2935_v22, %v2917_v21  ;;  %v5275_v17 = vld [vmem:[%s6662_s1 + $0x8e8] sm:$0xff]  ;;  %v4933_v18 = vld [vmem:[%s6663_s0 + $0x7c] sm:$0xf] }
  0xea   :  { %3287 = vmatpush.bf16.msrb.mxu0 %v5219_v58  ;;  %v5261_v58 = vld [vmem:[%s6662_s1 + $0x878] sm:$0xff]  ;;  %v3602_v19 = vld [vmem:[%s6663_s0 + $0x108] sm:$0xf0] }
  0xeb   :  { %3306 = vmatpush.bf16.msrb.mxu1 %v5227_v52  ;;  %v3605_v31 = vor.u32 %v4933_v18, %v3602_v19 }
  0xec   :  { %3325 = vmatpush.bf16.msrb.mxu2 %v5235_v39 }
  0xed   :  { %3344 = vmatpush.bf16.msrb.mxu3 %v5243_v62  ;;  %v5268_v62 = vld [vmem:[%s6662_s1 + $0x8b0] sm:$0xff] }
  0xee   :  { %3288 = vmatpush.bf16.msrb.mxu0 %v5218_v9  ;;  %v2954_v40 = vpop.f32.mrf.mxu2  ;;  %v2919_v47 = vpop.f32.mrf.mxu0  ;;  %v3592_v9 = vld [vmem:[%s6663_s0 + $0x70] sm:$0xf] }
  0xef   :  { %3307 = vmatpush.bf16.msrb.mxu1 %v5226_v10  ;;  %v2955_v43 = vadd.f32 %v2954_v40, %v2936_v28  ;;  %v2973_v44 = vpop.f32.mrf.mxu3  ;;  %v2920_v46 = vadd.f32 %v2919_v47, %v6299_v45  ;;  %v2938_v39 = vpop.f32.mrf.mxu1  ;;  %v3593_v22 = vor.u32 %v4950_v11, %v3592_v9  ;;  %v5273_v40 = vld [vmem:[%s6662_s1 + $0x8d8] sm:$0xff] }
  0xf0   :  { %3326 = vmatpush.bf16.msrb.mxu2 %v5234_v7 }
  0xf1   :  { %3345 = vmatpush.bf16.msrb.mxu3 %v5242_v61  ;;  %v6425_v52 = vadd.f32 %v2973_v44, %v2955_v43  ;;  %v2939_v45 = vadd.f32 %v2938_v39, %v2920_v46  ;;  %3222 = vmatmul.bf16.gmra.mxu0 %v3721_v41  ;;  %v5267_v61 = vld [vmem:[%s6662_s1 + $0x8a8] sm:$0xff]  ;;  %v5248_v46 = vld [vmem:[%s6662_s1 + $0x810] sm:$0xff] }
  0xf2   :  { %3289 = vmatpush.bf16.msrb.mxu0 %v5217_v13  ;;  %3241 = vmatmul.bf16.gmra.mxu1 %v3725_v48  ;;  %v5251_v13 = vld [vmem:[%s6662_s1 + $0x828] sm:$0xff] }
  0xf3   :  { %3308 = vmatpush.bf16.msrb.mxu1 %v5225_v14  ;;  %3260 = vmatmul.bf16.gmra.mxu2 %v3729_v49  ;;  %v5259_v14 = vld [vmem:[%s6662_s1 + $0x868] sm:$0xff] }
  0xf4   :  { %3327 = vmatpush.bf16.msrb.mxu2 %v5233_v12  ;;  %3279 = vmatmul.bf16.gmra.mxu3 %v3733_v50  ;;  %v3594_v12 = vld [vmem:[%s6663_s0 + $0x100] sm:$0xf0]  ;;  %v5256_v50 = vld [vmem:[%s6662_s1 + $0x850] sm:$0xff] }
  0xf5   :  { %3346 = vmatpush.bf16.msrb.mxu3 %v5241_v16  ;;  %v4951_v16 = vld [vmem:[%s6663_s0 + $0x104] sm:$0xf0] }
  0xf6   :  { %3290 = vmatpush.bf16.msrb.mxu0 %v5216_v25  ;;  %v2957_v60 = vpop.f32.mrf.mxu2  ;;  %v2921_v1 = vpop.f32.mrf.mxu0  ;;  %v3601_v20 = vor.u32 %v4951_v16, %v3600_v15  ;;  %v5270_v15 = vld [vmem:[%s6662_s1 + $0x8c0] sm:$0xff] }
  0xf7   :  { %3309 = vmatpush.bf16.msrb.mxu1 %v5224_v27  ;;  %v2958_v63 = vadd.f32 %v2957_v60, %v2939_v45  ;;  %v2976_v0 = vpop.f32.mrf.mxu3  ;;  %v2922_v4 = vadd.f32 %v2921_v1, %v6347_v8  ;;  %v2940_v5 = vpop.f32.mrf.mxu1  ;;  %v4932_v8 = vld [vmem:[%s6663_s0 + $0x74] sm:$0xf]  ;;  %v5263_v45 = vld [vmem:[%s6662_s1 + $0x888] sm:$0xff] }
  0xf8   :  { %3328 = vmatpush.bf16.msrb.mxu2 %v5232_v23  ;;  %v5266_v23 = vld [vmem:[%s6662_s1 + $0x8a0] sm:$0xff]  ;;  %v3597_v26 = vor.u32 %v4932_v8, %v3594_v12  ;;  %v5247_v60 = vld [vmem:[%s6662_s1 + $0x808] sm:$0xff] }
  0xf9   :  { %3347 = vmatpush.bf16.msrb.mxu3 %v5240_v29  ;;  %v6461_v7 = vadd.f32 %v2976_v0, %v2958_v63  ;;  %v2941_v10 = vadd.f32 %v2940_v5, %v2922_v4  ;;  %v5255_v63 = vld [vmem:[%s6662_s1 + $0x848] sm:$0xff]  ;;  %v5246_v12 = vld [vmem:[%s6662_s1 + $0x800] sm:$0xff] }
  0xfa   :  { %3291 = vmatpush.bf16.msrb.mxu0 %v5215_v37  ;;  %v5249_v37 = vld [vmem:[%s6662_s1 + $0x818] sm:$0xff]  ;;  %v5271_v0 = vld [vmem:[%s6662_s1 + $0x8c8] sm:$0xff] }
  0xfb   :  { %3310 = vmatpush.bf16.msrb.mxu1 %v5223_v38  ;;  %v5257_v38 = vld [vmem:[%s6662_s1 + $0x858] sm:$0xff] }
  0xfc   :  { %3329 = vmatpush.bf16.msrb.mxu2 %v5231_v35  ;;  %v5274_v35 = vld [vmem:[%s6662_s1 + $0x8e0] sm:$0xff] }
  0xfd   :  { %3348 = vmatpush.bf16.msrb.mxu3 %v5239_v42  ;;  %v5264_v42 = vld [vmem:[%s6662_s1 + $0x890] sm:$0xff] }
  0xfe   :  { %3292 = vmatpush.bf16.msrb.mxu0 %v5214_v53  ;;  %v2959_v21 = vpop.f32.mrf.mxu2  ;;  %v2990_v28 = vpop.f32.mrf.mxu0 }
  0xff   :  { %3311 = vmatpush.bf16.msrb.mxu1 %v5222_v54  ;;  %v2960_v25 = vadd.f32 %v2959_v21, %v2941_v10  ;;  %v2978_v27 = vpop.f32.mrf.mxu3  ;;  %v2991_v29 = vadd.f32 %v2990_v28, %v6374_v24  ;;  %v3009_v30 = vpop.f32.mrf.mxu1  ;;  %v5265_v24 = vld [vmem:[%s6662_s1 + $0x898] sm:$0xff]  ;;  %v4986_v54 = vld [vmem:[%s6663_s0 + $0x21c] sm:$0xf0]  ;;  %v4952_v28 = vld [vmem:[%s6663_s0 + $0x10c] sm:$0xf0] }
 0x100   :  { %3330 = vmatpush.bf16.msrb.mxu2 %v5230_v51  ;;  %v5272_v51 = vld [vmem:[%s6662_s1 + $0x8d0] sm:$0xff] }
 0x101   :  { %3349 = vmatpush.bf16.msrb.mxu3 %v5238_v55  ;;  %v6506_v33 = vadd.f32 %v2978_v27, %v2960_v25  ;;  %v3010_v36 = vadd.f32 %v3009_v30, %v2991_v29  ;;  %3293 = vmatmul.bf16.vlgmr.msrb.gmra.mxu0 %v3593_v22  ;;  %v4968_v55 = vld [vmem:[%s6663_s0 + $0x194] sm:$0xf]  ;;  %v3608_v27 = vld [vmem:[%s6663_s0 + $0x80] sm:$0xf]  ;;  %v3616_v29 = vld [vmem:[%s6663_s0 + $0x88] sm:$0xf] }
 0x102   :  { %3361 = vmatpush.bf16.msra.mxu0 %v5253_v57  ;;  %3312 = vmatmul.bf16.vlgmr.msrb.gmra.mxu1 %v3597_v26  ;;  %v3744_v57 = vld [vmem:[%s6663_s0 + $0x198] sm:$0xf]  ;;  %v4934_v26 = vld [vmem:[%s6663_s0 + $0x84] sm:$0xf] }
 0x103   :  { %3380 = vmatpush.bf16.msra.mxu1 %v5261_v58  ;;  %3331 = vmatmul.bf16.vlgmr.msrb.gmra.mxu2 %v3601_v20  ;;  %v4987_v58 = vld [vmem:[%s6663_s0 + $0x224] sm:$0xf0]  ;;  %v3610_v20 = vld [vmem:[%s6663_s0 + $0x110] sm:$0xf0]  ;;  %v4953_v30 = vld [vmem:[%s6663_s0 + $0x114] sm:$0xf0] }
 0x104   :  { %3399 = vmatpush.bf16.msra.mxu2 %v5269_v56  ;;  %3350 = vmatmul.bf16.vlgmr.msrb.gmra.mxu3 %v3605_v31  ;;  %v3738_v56 = vld [vmem:[%s6663_s0 + $0x220] sm:$0xf0]  ;;  %v3745_v10 = vor.u32 %v4987_v58, %v3744_v57  ;;  %v4935_v31 = vld [vmem:[%s6663_s0 + $0x8c] sm:$0xf]  ;;  %v4989_v57 = vld [vmem:[%s6663_s0 + $0x234] sm:$0xf0] }
 0x105   :  { %3418 = vmatpush.bf16.msra.mxu3 %v5277_v59  ;;  %v4969_v59 = vld [vmem:[%s6663_s0 + $0x19c] sm:$0xf]  ;;  %v3741_v9 = vor.u32 %v4968_v55, %v3738_v56  ;;  %v3754_v55 = vld [vmem:[%s6663_s0 + $0x230] sm:$0xf0]  ;;  %v3760_v56 = vld [vmem:[%s6663_s0 + $0x1a8] sm:$0xf] }
 0x106   :  { %3362 = vmatpush.bf16.msra.mxu0 %v5252_v2  ;;  %v3028_v41 = vpop.f32.mrf.mxu2  ;;  %v2992_v47 = vpop.f32.mrf.mxu0  ;;  %v4971_v58 = vld [vmem:[%s6663_s0 + $0x1ac] sm:$0xf] }
 0x107   :  { %3381 = vmatpush.bf16.msra.mxu1 %v5260_v3  ;;  %v3029_v43 = vadd.f32 %v3028_v41, %v3010_v36  ;;  %v3047_v44 = vpop.f32.mrf.mxu3  ;;  %v2993_v48 = vadd.f32 %v2992_v47, %v6425_v52  ;;  %v3011_v49 = vpop.f32.mrf.mxu1  ;;  %v3736_v52 = vld [vmem:[%s6663_s0 + $0x190] sm:$0xf]  ;;  %v5262_v3 = vld [vmem:[%s6662_s1 + $0x880] sm:$0xff] }
 0x108   :  { %3400 = vmatpush.bf16.msra.mxu2 %v5268_v62  ;;  %v3746_v62 = vld [vmem:[%s6663_s0 + $0x228] sm:$0xf0]  ;;  %v3737_v2 = vor.u32 %v4986_v54, %v3736_v52  ;;  %v4988_v54 = vld [vmem:[%s6663_s0 + $0x22c] sm:$0xf0] }
 0x109   :  { %3419 = vmatpush.bf16.msra.mxu3 %v5276_v6  ;;  %v6533_v39 = vadd.f32 %v3047_v44, %v3029_v43  ;;  %v3012_v53 = vadd.f32 %v3011_v49, %v2993_v48 }
 0x10a   :  { %3363 = vmatpush.bf16.msra.mxu0 %v5251_v13 }
 0x10b   :  { %3382 = vmatpush.bf16.msra.mxu1 %v5259_v14  ;;  %v5254_v14 = vld [vmem:[%s6662_s1 + $0x840] sm:$0xff] }
 0x10c   :  { %3401 = vmatpush.bf16.msra.mxu2 %v5267_v61  ;;  %v3749_v61 = vor.u32 %v4969_v59, %v3746_v62  ;;  %v3762_v59 = vld [vmem:[%s6663_s0 + $0x238] sm:$0xf0] }
 0x10d   :  { %3420 = vmatpush.bf16.msra.mxu3 %v5275_v17 }
 0x10e   :  { %3364 = vmatpush.bf16.msra.mxu0 %v5250_v32  ;;  %v3030_v1 = vpop.f32.mrf.mxu2  ;;  %v2995_v6 = vpop.f32.mrf.mxu0  ;;  %v3618_v32 = vld [vmem:[%s6663_s0 + $0x118] sm:$0xf0] }
 0x10f   :  { %3383 = vmatpush.bf16.msra.mxu1 %v5258_v34  ;;  %v3031_v4 = vadd.f32 %v3030_v1, %v3012_v53  ;;  %v3049_v5 = vpop.f32.mrf.mxu3  ;;  %v2996_v11 = vadd.f32 %v2995_v6, %v6461_v7  ;;  %v3014_v8 = vpop.f32.mrf.mxu1  ;;  %v3609_v34 = vor.u32 %v4952_v28, %v3608_v27  ;;  %v3765_v6 = vor.u32 %v4971_v58, %v3762_v59 }
 0x110   :  { %3402 = vmatpush.bf16.msra.mxu2 %v5266_v23 }
 0x111   :  { %3421 = vmatpush.bf16.msra.mxu3 %v5274_v35  ;;  %v3050_v13 = vadd.f32 %v3049_v5, %v3031_v4  ;;  %v3015_v16 = vadd.f32 %v3014_v8, %v2996_v11  ;;  %3298 = vmatmul.bf16.gmra.mxu0 %v3737_v2 }
 0x112   :  { %3365 = vmatpush.bf16.msra.mxu0 %v5249_v37  ;;  %3317 = vmatmul.bf16.gmra.mxu1 %v3741_v9  ;;  %v3613_v37 = vor.u32 %v4934_v26, %v3610_v20 }
 0x113   :  { %3384 = vmatpush.bf16.msra.mxu1 %v5257_v38  ;;  %3336 = vmatmul.bf16.gmra.mxu2 %v3745_v10  ;;  %v3617_v38 = vor.u32 %v4953_v30, %v3616_v29 }
 0x114   :  { %3403 = vmatpush.bf16.msra.mxu2 %v5265_v24  ;;  %3355 = vmatmul.bf16.gmra.mxu3 %v3749_v61 }
 0x115   :  { %3422 = vmatpush.bf16.msra.mxu3 %v5273_v40 }
 0x116   :  { %3366 = vmatpush.bf16.msra.mxu0 %v5248_v46  ;;  %v3033_v7 = vpop.f32.mrf.mxu2  ;;  %v2997_v19 = vpop.f32.mrf.mxu0 }
 0x117   :  { %3385 = vmatpush.bf16.msra.mxu1 %v5256_v50  ;;  %v3034_v17 = vadd.f32 %v3033_v7, %v3015_v16  ;;  %v3052_v18 = vpop.f32.mrf.mxu3  ;;  %v2998_v21 = vadd.f32 %v2997_v19, %v6506_v33  ;;  %v3016_v22 = vpop.f32.mrf.mxu1 }
 0x118   :  { %3404 = vmatpush.bf16.msra.mxu2 %v5264_v42  ;;  %v3621_v42 = vor.u32 %v4935_v31, %v3618_v32 }
 0x119   :  { %3423 = vmatpush.bf16.msra.mxu3 %v5272_v51  ;;  %v3053_v23 = vadd.f32 %v3052_v18, %v3034_v17  ;;  %v3017_v25 = vadd.f32 %v3016_v22, %v2998_v21 }
 0x11a   :  { %3367 = vmatpush.bf16.msra.mxu0 %v5247_v60 }
 0x11b   :  { %3386 = vmatpush.bf16.msra.mxu1 %v5255_v63 }
 0x11c   :  { %3405 = vmatpush.bf16.msra.mxu2 %v5263_v45  ;;  %v4970_v45 = vld [vmem:[%s6663_s0 + $0x1a4] sm:$0xf] }
 0x11d   :  { %3424 = vmatpush.bf16.msra.mxu3 %v5271_v0  ;;  %v3757_v2 = vor.u32 %v4970_v45, %v3754_v55 }
 0x11e   :  { %3368 = vmatpush.bf16.msra.mxu0 %v5246_v12  ;;  %v3035_v33 = vpop.f32.mrf.mxu2  ;;  %v3066_v24 = vpop.f32.mrf.mxu0 }
 0x11f   :  { %3387 = vmatpush.bf16.msra.mxu1 %v5254_v14  ;;  %v3036_v35 = vadd.f32 %v3035_v33, %v3017_v25  ;;  %v3054_v36 = vpop.f32.mrf.mxu3  ;;  %v3067_v40 = vadd.f32 %v3066_v24, %v6533_v39  ;;  %v3085_v41 = vpop.f32.mrf.mxu1  ;;  %v3752_v39 = vld [vmem:[%s6663_s0 + $0x1a0] sm:$0xf] }
 0x120   :  { %3406 = vmatpush.bf16.msra.mxu2 %v5262_v3  ;;  %v3753_v62 = vor.u32 %v4988_v54, %v3752_v39  ;;  %v3761_v3 = vor.u32 %v4989_v57, %v3760_v56 }
 0x121   :  { %3425 = vmatpush.bf16.msra.mxu3 %v5270_v15  ;;  %v3055_v43 = vadd.f32 %v3054_v36, %v3036_v35  ;;  %v3086_v44 = vadd.f32 %v3085_v41, %v3067_v40  ;;  %3369 = vmatmul.bf16.vlgmr.msra.gmra.mxu0 %v3609_v34 }
 0x122   :  { %3388 = vmatmul.bf16.vlgmr.msra.gmra.mxu1 %v3613_v37 }
 0x123   :  { %3407 = vmatmul.bf16.vlgmr.msra.gmra.mxu2 %v3617_v38 }
 0x124   :  { %3426 = vmatmul.bf16.vlgmr.msra.gmra.mxu3 %v3621_v42 }
 0x126   :  { %v3104_v47 = vpop.f32.mrf.mxu2  ;;  %v3068_v46 = vpop.f32.mrf.mxu0 }
 0x127   :  { %v3105_v48 = vadd.f32 %v3104_v47, %v3086_v44  ;;  %v3123_v49 = vpop.f32.mrf.mxu3  ;;  %v3069_v50 = vadd.f32 %v3068_v46, %v3050_v13  ;;  %v3087_v51 = vpop.f32.mrf.mxu1 }
 0x129   :  { %v3124_v53 = vadd.f32 %v3123_v49, %v3105_v48  ;;  %v3088_v52 = vadd.f32 %v3087_v51, %v3069_v50 }
 0x12e   :  { %v3106_v60 = vpop.f32.mrf.mxu2  ;;  %v3071_v1 = vpop.f32.mrf.mxu0 }
 0x12f   :  { %v3107_v63 = vadd.f32 %v3106_v60, %v3088_v52  ;;  %v3125_v0 = vpop.f32.mrf.mxu3  ;;  %v3072_v4 = vadd.f32 %v3071_v1, %v3053_v23  ;;  %v3090_v5 = vpop.f32.mrf.mxu1 }
 0x131   :  { %v3126_v9 = vadd.f32 %v3125_v0, %v3107_v63  ;;  %v3091_v10 = vadd.f32 %v3090_v5, %v3072_v4  ;;  %3374 = vmatmul.bf16.gmra.mxu0 %v3753_v62 }
 0x132   :  { %3393 = vmatmul.bf16.gmra.mxu1 %v3757_v2 }
 0x133   :  { %3412 = vmatmul.bf16.gmra.mxu2 %v3761_v3 }
 0x134   :  { %3431 = vmatmul.bf16.gmra.mxu3 %v3765_v6 }
 0x136   :  { %v3109_v11 = vpop.f32.mrf.mxu2  ;;  %v3073_v12 = vpop.f32.mrf.mxu0 }
 0x137   :  { %v3110_v8 = vadd.f32 %v3109_v11, %v3091_v10  ;;  %v3128_v61 = vpop.f32.mrf.mxu3  ;;  %v3074_v13 = vadd.f32 %v3073_v12, %v3055_v43  ;;  %v3092_v14 = vpop.f32.mrf.mxu1 }
 0x139   :  { %v3129_v15 = vadd.f32 %v3128_v61, %v3110_v8  ;;  %v3093_v16 = vadd.f32 %v3092_v14, %v3074_v13 }
 0x13e   :  { %v3111_v7 = vpop.f32.mrf.mxu2  ;;  %v3142_v19 = vpop.f32.mrf.mxu0 }
 0x13f   :  { %v3112_v17 = vadd.f32 %v3111_v7, %v3093_v16  ;;  %v3130_v18 = vpop.f32.mrf.mxu3  ;;  %v3143_v21 = vadd.f32 %v3142_v19, %v3124_v53  ;;  %v3161_v22 = vpop.f32.mrf.mxu1 }
 0x141   :  { %v3131_v23 = vadd.f32 %v3130_v18, %v3112_v17  ;;  %v3162_v25 = vadd.f32 %v3161_v22, %v3143_v21 }
 0x146   :  { %v3180_v27 = vpop.f32.mrf.mxu2  ;;  %v3144_v20 = vpop.f32.mrf.mxu0 }
 0x147   :  { %v3181_v28 = vadd.f32 %v3180_v27, %v3162_v25  ;;  %v3199_v26 = vpop.f32.mrf.mxu3  ;;  %v3145_v29 = vadd.f32 %v3144_v20, %v3126_v9  ;;  %v3163_v30 = vpop.f32.mrf.mxu1 }
 0x149   :  { %v3200_v31 = vadd.f32 %v3199_v26, %v3181_v28  ;;  %v3164_v32 = vadd.f32 %v3163_v30, %v3145_v29 }
 0x14e   :  { %v3182_v33 = vpop.f32.mrf.mxu2  ;;  %v3147_v36 = vpop.f32.mrf.mxu0 }
 0x14f   :  { %v3183_v34 = vadd.f32 %v3182_v33, %v3164_v32  ;;  %v3201_v35 = vpop.f32.mrf.mxu3  ;;  %v3148_v24 = vadd.f32 %v3147_v36, %v3129_v15  ;;  %v3166_v37 = vpop.f32.mrf.mxu1 }
 0x151   :  { %v3202_v38 = vadd.f32 %v3201_v35, %v3183_v34  ;;  %v3167_v40 = vadd.f32 %v3166_v37, %v3148_v24 }
 0x156   :  { %v3185_v41 = vpop.f32.mrf.mxu2  ;;  %v3149_v44 = vpop.f32.mrf.mxu0 }
 0x157   :  { %v3186_v42 = vadd.f32 %v3185_v41, %v3167_v40  ;;  %v3204_v43 = vpop.f32.mrf.mxu3  ;;  %v3150_v47 = vadd.f32 %v3149_v44, %v3131_v23  ;;  %v3168_v48 = vpop.f32.mrf.mxu1 }
 0x159   :  { %v3205_v49 = vadd.f32 %v3204_v43, %v3186_v42  ;;  %v3169_v46 = vadd.f32 %v3168_v48, %v3150_v47 }
 0x15e   :  { %v3187_v50 = vpop.f32.mrf.mxu2  ;;  %v3218_v52 = vpop.f32.mrf.mxu0 }
 0x15f   :  { %v3188_v51 = vadd.f32 %v3187_v50, %v3169_v46  ;;  %v3206_v53 = vpop.f32.mrf.mxu3  ;;  %v3237_v39 = vpop.f32.mrf.mxu1  ;;  %v3219_v61 = vadd.f32 %v3218_v52, %v3200_v31  ;;  %v5278_v52 = vld [vmem:[%s6664_s2] ss:$0 sm:$0xff] }
 0x161   :  { %v3207_v54 = vadd.f32 %v3206_v53, %v3188_v51  ;;  %v3238_v12 = vadd.f32 %v3237_v39, %v3219_v61 }
 0x166   :  { %v3256_v45 = vpop.f32.mrf.mxu2  ;;  %v3220_v56 = vpop.f32.mrf.mxu0 }
 0x167   :  { %v3275_v55 = vpop.f32.mrf.mxu3  ;;  %v3239_v57 = vpop.f32.mrf.mxu1  ;;  %v3257_v14 = vadd.f32 %v3256_v45, %v3238_v12  ;;  %v3221_v17 = vadd.f32 %v3220_v56, %v3202_v38  ;;  %v5279_v56 = vld [vmem:[%s6665_s3] ss:$0 sm:$0xff] }
 0x169   :  { %v3276_v18 = vadd.f32 %v3275_v55, %v3257_v14  ;;  %v3240_v19 = vadd.f32 %v3239_v57, %v3221_v17 }
 0x16e   :  { %v3258_v58 = vpop.f32.mrf.mxu2  ;;  %v3223_v60 = vpop.f32.mrf.mxu0 }
 0x16f   :  { %v3277_v59 = vpop.f32.mrf.mxu3  ;;  %v3242_v62 = vpop.f32.mrf.mxu1  ;;  %v3259_v23 = vadd.f32 %v3258_v58, %v3240_v19  ;;  %v3224_v26 = vadd.f32 %v3223_v60, %v3205_v49 }
 0x171   :  { %v3278_v29 = vadd.f32 %v3277_v59, %v3259_v23  ;;  %v3243_v31 = vadd.f32 %v3242_v62, %v3224_v26 }
 0x176   :  { %v3261_v63 = vpop.f32.mrf.mxu2  ;;  %v3225_v1 = vpop.f32.mrf.mxu0 }
 0x177   :  { %v3280_v0 = vpop.f32.mrf.mxu3  ;;  %v3244_v2 = vpop.f32.mrf.mxu1  ;;  %v3262_v34 = vadd.f32 %v3261_v63, %v3243_v31  ;;  %v3226_v38 = vadd.f32 %v3225_v1, %v3207_v54 }
 0x179   :  { %v3281_v42 = vadd.f32 %v3280_v0, %v3262_v34  ;;  %v3245_v44 = vadd.f32 %v3244_v2, %v3226_v38 }
 0x17e   :  { %v3263_v3 = vpop.f32.mrf.mxu2  ;;  %v3294_v5 = vpop.f32.mrf.mxu0 }
 0x17f   :  { %v3282_v4 = vpop.f32.mrf.mxu3  ;;  %v3313_v6 = vpop.f32.mrf.mxu1  ;;  %v3295_v21 = vadd.f32 %v3294_v5, %v3276_v18  ;;  %v3264_v46 = vadd.f32 %v3263_v3, %v3245_v44 }
 0x181   :  { %v3314_v20 = vadd.f32 %v3313_v6, %v3295_v21  ;;  %v3283_v58 = vadd.f32 %v3282_v4, %v3264_v46 }
 0x186   :  { %v3332_v9 = vpop.f32.mrf.mxu2  ;;  %v3296_v11 = vpop.f32.mrf.mxu0 }
 0x187   :  { %v3351_v10 = vpop.f32.mrf.mxu3  ;;  %v3315_v8 = vpop.f32.mrf.mxu1  ;;  %v3333_v30 = vadd.f32 %v3332_v9, %v3314_v20  ;;  %v3297_v32 = vadd.f32 %v3296_v11, %v3278_v29 }
 0x189   :  { %v3352_v35 = vadd.f32 %v3351_v10, %v3333_v30  ;;  %v3316_v40 = vadd.f32 %v3315_v8, %v3297_v32 }
 0x18e   :  { %v3334_v13 = vpop.f32.mrf.mxu2  ;;  %v3299_v16 = vpop.f32.mrf.mxu0 }
 0x18f   :  { %v3353_v15 = vpop.f32.mrf.mxu3  ;;  %v3318_v7 = vpop.f32.mrf.mxu1  ;;  %v3335_v43 = vadd.f32 %v3334_v13, %v3316_v40  ;;  %v3300_v47 = vadd.f32 %v3299_v16, %v3281_v42 }
 0x191   :  { %v3354_v50 = vadd.f32 %v3353_v15, %v3335_v43  ;;  %v3319_v55 = vadd.f32 %v3318_v7, %v3300_v47 }
 0x196   :  { %v3337_v22 = vpop.f32.mrf.mxu2  ;;  %v3301_v27 = vpop.f32.mrf.mxu0 }
 0x197   :  { %v3356_v25 = vpop.f32.mrf.mxu3  ;;  %v3320_v28 = vpop.f32.mrf.mxu1  ;;  %v3338_v59 = vadd.f32 %v3337_v22, %v3319_v55  ;;  %v3302_v62 = vadd.f32 %v3301_v27, %v3283_v58 }
 0x199   :  { %v3357_v2 = vadd.f32 %v3356_v25, %v3338_v59  ;;  %v3321_v10 = vadd.f32 %v3320_v28, %v3302_v62 }
 0x19e   :  { %v3339_v33 = vpop.f32.mrf.mxu2  ;;  %v3370_v24 = vpop.f32.mrf.mxu0 }
 0x19f   :  { %v3358_v36 = vpop.f32.mrf.mxu3  ;;  %v3389_v37 = vpop.f32.mrf.mxu1  ;;  %v3371_v41 = vadd.f32 %v3370_v24, %v3352_v35  ;;  %v3340_v4 = vadd.f32 %v3339_v33, %v3321_v10 }
 0x1a1   :  { %v3390_v48 = vadd.f32 %v3389_v37, %v3371_v41  ;;  %v3359_v17 = vadd.f32 %v3358_v36, %v3340_v4 }
 0x1a6   :  { %v3408_v49 = vpop.f32.mrf.mxu2  ;;  %v3372_v39 = vpop.f32.mrf.mxu0 }
 0x1a7   :  { %v3409_v51 = vadd.f32 %v3408_v49, %v3390_v48  ;;  %v3427_v53 = vpop.f32.mrf.mxu3  ;;  %v3391_v45 = vpop.f32.mrf.mxu1  ;;  %v3373_v57 = vadd.f32 %v3372_v39, %v3354_v50 }
 0x1a9   :  { %v3428_v54 = vadd.f32 %v3427_v53, %v3409_v51  ;;  %v3392_v0 = vadd.f32 %v3391_v45, %v3373_v57 }
 0x1ab   :  { %v3441_v60 = vmul.f32 %v5278_v52, %v3428_v54 }
 0x1ad   :  { %v3449_v63 = vadd.f32 %v5279_v56, %v3441_v60 }
 0x1ae   :  { %v3410_v1 = vpop.f32.mrf.mxu2  ;;  %v3375_v9 = vpop.f32.mrf.mxu0 }
 0x1af   :  { %vm3453_vm0 = vcmp.ge.f32.partialorder %v3449_v63, 0.0  ;;  %v3457_v3 = vmul.f32 0.01, %v3449_v63  ;;  %v3411_v5 = vadd.f32 %v3410_v1, %v3392_v0  ;;  %v3429_v6 = vpop.f32.mrf.mxu3  ;;  %v3376_v61 = vadd.f32 %v3375_v9, %v3357_v2  ;;  %v3394_v13 = vpop.f32.mrf.mxu1 }
 0x1b1   :  { %v3461_v11 = vsel %vm3453_vm0, %v3449_v63, %v3457_v3  ;;  %v3430_v8 = vadd.f32 %v3429_v6, %v3411_v5  ;;  %v3395_v16 = vadd.f32 %v3394_v13, %v3376_v61 }
 0x1b2   :  { %v3465_v12 = vpack.c.bf16 %v3461_v11, %v3461_v11 }
 0x1b3   :  { %v3442_v14 = vmul.f32 %v5278_v52, %v3430_v8 }
 0x1b4   :  { %3470 = vst.msk [vmem:[%s6666_s4] sm:$0xf] %vm3469_vm1, %v3465_v12 }
 0x1b5   :  { %v3450_v15 = vadd.f32 %v5279_v56, %v3442_v14 }
 0x1b6   :  { %v3413_v7 = vpop.f32.mrf.mxu2  ;;  %v3377_v22 = vpop.f32.mrf.mxu0 }
 0x1b7   :  { %vm3454_vm2 = vcmp.ge.f32.partialorder %v3450_v15, 0.0  ;;  %v3458_v18 = vmul.f32 0.01, %v3450_v15  ;;  %v3414_v19 = vadd.f32 %v3413_v7, %v3395_v16  ;;  %v3432_v21 = vpop.f32.mrf.mxu3  ;;  %v3378_v27 = vadd.f32 %v3377_v22, %v3359_v17  ;;  %v3396_v20 = vpop.f32.mrf.mxu1 }
 0x1b9   :  { %v3462_v23 = vsel %vm3454_vm2, %v3450_v15, %v3458_v18  ;;  %v3433_v25 = vadd.f32 %v3432_v21, %v3414_v19  ;;  %v3397_v30 = vadd.f32 %v3396_v20, %v3378_v27 }
 0x1ba   :  { %v3466_v28 = vpack.c.bf16 %v3462_v23, %v3462_v23 }
 0x1bb   :  { %v3443_v26 = vmul.f32 %v5278_v52, %v3433_v25 }
 0x1bc   :  { %3471 = vst.msk [vmem:[%s6666_s4 + $0x4] sm:$0xf] %vm3469_vm1, %v3466_v28 }
 0x1bd   :  { %v3451_v29 = vadd.f32 %v5279_v56, %v3443_v26 }
 0x1be   :  { %v3415_v31 = vpop.f32.mrf.mxu2 }
 0x1bf   :  { %vm3455_vm3 = vcmp.ge.f32.partialorder %v3451_v29, 0.0  ;;  %v3459_v32 = vmul.f32 0.01, %v3451_v29  ;;  %v3416_v33 = vadd.f32 %v3415_v31, %v3397_v30  ;;  %v3434_v34 = vpop.f32.mrf.mxu3 }
 0x1c1   :  { %v3463_v35 = vsel %vm3455_vm3, %v3451_v29, %v3459_v32  ;;  %v3435_v36 = vadd.f32 %v3434_v34, %v3416_v33 }
 0x1c2   :  { %v3467_v24 = vpack.c.bf16 %v3463_v35, %v3463_v35 }
 0x1c3   :  { %v3444_v37 = vmul.f32 %v5278_v52, %v3435_v36 }
 0x1c4   :  { %3472 = vst.msk [vmem:[%s6666_s4 + $0x8] sm:$0xf] %vm3469_vm1, %v3467_v24 }
 0x1c5   :  { %v3452_v38 = vadd.f32 %v5279_v56, %v3444_v37 }
 0x1c7   :  { %vm3456_vm4 = vcmp.ge.f32.partialorder %v3452_v38, 0.0  ;;  %v3460_v40 = vmul.f32 0.01, %v3452_v38 }
 0x1c9   :  { %v3464_v41 = vsel %vm3456_vm4, %v3452_v38, %v3460_v40 }
 0x1ca   :  { %v3468_v42 = vpack.c.bf16 %v3464_v41, %v3464_v41 }
 0x1cc   :  { %3473 = vst.msk [vmem:[%s6666_s4 + $0xc] sm:$0xf] %vm3469_vm1, %v3468_v42 }

// kernel: circle_detector_forward.13
= control target key start
LH: loop header
LB: loop body
LE: loop exit
PB: predicated region body
PF: predicated region fallthrough
CT: control target
= control target key end

     0   :  { %s3881_s0 = inlined_call_operand.vmem [shape: bf16[2,256], index: 0, kind: input, shape index: {}]   ;;  %s3882_s1 = inlined_call_operand.vmem [shape: bf16[256,1024], index: 1, kind: input, shape index: {}]   ;;  %s3883_s2 = inlined_call_operand.vmem [shape: f32[1,1024], index: 2, kind: input, shape index: {}]   ;;  %s3884_s3 = inlined_call_operand.vmem [shape: bf16[1024,128], index: 3, kind: input, shape index: {}]   ;;  %s3885_s4 = inlined_call_operand.vmem [shape: f32[1,128], index: 4, kind: input, shape index: {}]   ;;  %s3886_s5 = inlined_call_operand.vmem [shape: bf16[128,128], index: 5, kind: input, shape index: {}]   ;;  %s3887_s6 = inlined_call_operand.vmem [shape: f32[1,128], index: 6, kind: input, shape index: {}]   ;;  %s3888_s7 = inlined_call_operand.hbm [shape: f32[2,128], index: 7, kind: output, shape index: {}]  }
   0x1   :  { %v2008_v0 = vld [vmem:[%s3882_s1 + $0x1c0] sm:$0xf]  ;;  %v2638_v5 = vld [vmem:[%s3882_s1 + $0x1c4] sm:$0xf] }
   0x2   :  { %v2642_v1 = vld [vmem:[%s3882_s1 + $0x1dc] sm:$0xf0]  ;;  %v2010_v6 = vld [vmem:[%s3882_s1 + $0x1e0] sm:$0xf0] }
   0x3   :  { %v2264_v2 = vld [vmem:[%s3882_s1 + $0x3c0] sm:$0xf]  ;;  %v2009_v3 = vor.u32 %v2642_v1, %v2008_v0  ;;  %v2013_v8 = vor.u32 %v2638_v5, %v2010_v6  ;;  %v2702_v9 = vld [vmem:[%s3882_s1 + $0x3c4] sm:$0xf] }
   0x4   :  { %v2706_v4 = vld [vmem:[%s3882_s1 + $0x3dc] sm:$0xf0]  ;;  %v2266_v10 = vld [vmem:[%s3882_s1 + $0x3e0] sm:$0xf0] }
   0x5   :  { %v2265_v7 = vor.u32 %v2706_v4, %v2264_v2  ;;  %v1976_v11 = vld [vmem:[%s3882_s1 + $0x180] sm:$0xf]  ;;  %820 = vmatpush.bf16.msra.mxu0 %v2009_v3  ;;  %v2269_v12 = vor.u32 %v2702_v9, %v2266_v10  ;;  %846 = vmatpush.bf16.msra.mxu2 %v2013_v8  ;;  %v2630_v18 = vld [vmem:[%s3882_s1 + $0x184] sm:$0xf] }
   0x6   :  { %v2634_v13 = vld [vmem:[%s3882_s1 + $0x19c] sm:$0xf0]  ;;  %v1978_v19 = vld [vmem:[%s3882_s1 + $0x1a0] sm:$0xf0] }
   0x7   :  { %v2232_v14 = vld [vmem:[%s3882_s1 + $0x380] sm:$0xf]  ;;  %833 = vmatpush.bf16.msra.mxu1 %v2265_v7  ;;  %v1977_v16 = vor.u32 %v2634_v13, %v1976_v11  ;;  %v2694_v20 = vld [vmem:[%s3882_s1 + $0x384] sm:$0xf]  ;;  %859 = vmatpush.bf16.msra.mxu3 %v2269_v12  ;;  %v1981_v21 = vor.u32 %v2630_v18, %v1978_v19 }
   0x8   :  { %v2698_v15 = vld [vmem:[%s3882_s1 + $0x39c] sm:$0xf0]  ;;  %v2234_v22 = vld [vmem:[%s3882_s1 + $0x3a0] sm:$0xf0] }
   0x9   :  { %v2233_v17 = vor.u32 %v2698_v15, %v2232_v14  ;;  %v1944_v23 = vld [vmem:[%s3882_s1 + $0x140] sm:$0xf]  ;;  %v2237_v25 = vor.u32 %v2694_v20, %v2234_v22  ;;  %v2622_v28 = vld [vmem:[%s3882_s1 + $0x144] sm:$0xf]  ;;  %821 = vmatpush.bf16.msra.mxu0 %v1977_v16  ;;  %847 = vmatpush.bf16.msra.mxu2 %v1981_v21 }
   0xa   :  { %v2626_v24 = vld [vmem:[%s3882_s1 + $0x15c] sm:$0xf0]  ;;  %v1946_v30 = vld [vmem:[%s3882_s1 + $0x160] sm:$0xf0] }
   0xb   :  { %v2200_v26 = vld [vmem:[%s3882_s1 + $0x340] sm:$0xf]  ;;  %v1945_v29 = vor.u32 %v2626_v24, %v1944_v23  ;;  %v2686_v31 = vld [vmem:[%s3882_s1 + $0x344] sm:$0xf]  ;;  %834 = vmatpush.bf16.msra.mxu1 %v2233_v17  ;;  %v1949_v34 = vor.u32 %v2622_v28, %v1946_v30  ;;  %860 = vmatpush.bf16.msra.mxu3 %v2237_v25  ;;  %v2016_v28 = vld [vmem:[%s3882_s1 + $0x1c8] sm:$0xf] }
   0xc   :  { %v2690_v27 = vld [vmem:[%s3882_s1 + $0x35c] sm:$0xf0]  ;;  %v2202_v32 = vld [vmem:[%s3882_s1 + $0x360] sm:$0xf0]  ;;  %v2272_v30 = vld [vmem:[%s3882_s1 + $0x3c8] sm:$0xf] }
   0xd   :  { %v2201_v33 = vor.u32 %v2690_v27, %v2200_v26  ;;  %v1912_v35 = vld [vmem:[%s3882_s1 + $0x100] sm:$0xf]  ;;  %v2205_v38 = vor.u32 %v2686_v31, %v2202_v32  ;;  %v2614_v40 = vld [vmem:[%s3882_s1 + $0x104] sm:$0xf]  ;;  %822 = vmatpush.bf16.msra.mxu0 %v1945_v29  ;;  %848 = vmatpush.bf16.msra.mxu2 %v1949_v34  ;;  %v2643_v29 = vld [vmem:[%s3882_s1 + $0x1e4] sm:$0xf0] }
   0xe   :  { %v2618_v36 = vld [vmem:[%s3882_s1 + $0x11c] sm:$0xf0]  ;;  %v1914_v41 = vld [vmem:[%s3882_s1 + $0x120] sm:$0xf0]  ;;  %v2707_v32 = vld [vmem:[%s3882_s1 + $0x3e4] sm:$0xf0] }
   0xf   :  { %v2168_v37 = vld [vmem:[%s3882_s1 + $0x300] sm:$0xf]  ;;  %v2678_v42 = vld [vmem:[%s3882_s1 + $0x304] sm:$0xf]  ;;  %v1913_v44 = vor.u32 %v2618_v36, %v1912_v35  ;;  %835 = vmatpush.bf16.msra.mxu1 %v2201_v33  ;;  %v1917_v46 = vor.u32 %v2614_v40, %v1914_v41  ;;  %861 = vmatpush.bf16.msra.mxu3 %v2205_v38  ;;  %v2639_v33 = vld [vmem:[%s3882_s1 + $0x1cc] sm:$0xf]  ;;  %v2017_v40 = vor.u32 %v2643_v29, %v2016_v28 }
  0x10   :  { %v2682_v39 = vld [vmem:[%s3882_s1 + $0x31c] sm:$0xf0]  ;;  %v2170_v43 = vld [vmem:[%s3882_s1 + $0x320] sm:$0xf0]  ;;  %v2018_v34 = vld [vmem:[%s3882_s1 + $0x1e8] sm:$0xf0]  ;;  %v2273_v41 = vor.u32 %v2707_v32, %v2272_v30 }
  0x11   :  { %v2169_v45 = vor.u32 %v2682_v39, %v2168_v37  ;;  %v1880_v47 = vld [vmem:[%s3882_s1 + $0xc0] sm:$0xf]  ;;  %v2173_v50 = vor.u32 %v2678_v42, %v2170_v43  ;;  %v2606_v52 = vld [vmem:[%s3882_s1 + $0xc4] sm:$0xf]  ;;  %823 = vmatpush.bf16.msra.mxu0 %v1913_v44  ;;  %849 = vmatpush.bf16.msra.mxu2 %v1917_v46  ;;  %v2703_v37 = vld [vmem:[%s3882_s1 + $0x3cc] sm:$0xf]  ;;  %v2021_v42 = vor.u32 %v2639_v33, %v2018_v34 }
  0x12   :  { %v2610_v48 = vld [vmem:[%s3882_s1 + $0xdc] sm:$0xf0]  ;;  %v1882_v53 = vld [vmem:[%s3882_s1 + $0xe0] sm:$0xf0]  ;;  %v2274_v38 = vld [vmem:[%s3882_s1 + $0x3e8] sm:$0xf0] }
  0x13   :  { %v2136_v49 = vld [vmem:[%s3882_s1 + $0x2c0] sm:$0xf]  ;;  %v2670_v54 = vld [vmem:[%s3882_s1 + $0x2c4] sm:$0xf]  ;;  %v1881_v56 = vor.u32 %v2610_v48, %v1880_v47  ;;  %836 = vmatpush.bf16.msra.mxu1 %v2169_v45  ;;  %v1885_v58 = vor.u32 %v2606_v52, %v1882_v53  ;;  %862 = vmatpush.bf16.msra.mxu3 %v2173_v50  ;;  %v1984_v43 = vld [vmem:[%s3882_s1 + $0x188] sm:$0xf]  ;;  %v2277_v46 = vor.u32 %v2703_v37, %v2274_v38 }
  0x14   :  { %v2674_v51 = vld [vmem:[%s3882_s1 + $0x2dc] sm:$0xf0]  ;;  %v2138_v55 = vld [vmem:[%s3882_s1 + $0x2e0] sm:$0xf0]  ;;  %v2635_v44 = vld [vmem:[%s3882_s1 + $0x1a4] sm:$0xf0] }
  0x15   :  { %v2137_v57 = vor.u32 %v2674_v51, %v2136_v49  ;;  %v1848_v59 = vld [vmem:[%s3882_s1 + $0x80] sm:$0xf]  ;;  %v2141_v62 = vor.u32 %v2670_v54, %v2138_v55  ;;  %v2598_v0 = vld [vmem:[%s3882_s1 + $0x84] sm:$0xf]  ;;  %824 = vmatpush.bf16.msra.mxu0 %v1881_v56  ;;  %850 = vmatpush.bf16.msra.mxu2 %v1885_v58  ;;  %v2240_v45 = vld [vmem:[%s3882_s1 + $0x388] sm:$0xf]  ;;  %v1985_v53 = vor.u32 %v2635_v44, %v1984_v43 }
  0x16   :  { %v2602_v60 = vld [vmem:[%s3882_s1 + $0x9c] sm:$0xf0]  ;;  %v1850_v1 = vld [vmem:[%s3882_s1 + $0xa0] sm:$0xf0]  ;;  %v2699_v47 = vld [vmem:[%s3882_s1 + $0x3a4] sm:$0xf0] }
  0x17   :  { %v2104_v61 = vld [vmem:[%s3882_s1 + $0x280] sm:$0xf]  ;;  %v2662_v2 = vld [vmem:[%s3882_s1 + $0x284] sm:$0xf]  ;;  %v1849_v4 = vor.u32 %v2602_v60, %v1848_v59  ;;  %837 = vmatpush.bf16.msra.mxu1 %v2137_v57  ;;  %v1853_v6 = vor.u32 %v2598_v0, %v1850_v1  ;;  %863 = vmatpush.bf16.msra.mxu3 %v2141_v62  ;;  %v2631_v48 = vld [vmem:[%s3882_s1 + $0x18c] sm:$0xf]  ;;  %v2241_v54 = vor.u32 %v2699_v47, %v2240_v45 }
  0x18   :  { %v2666_v63 = vld [vmem:[%s3882_s1 + $0x29c] sm:$0xf0]  ;;  %v2106_v3 = vld [vmem:[%s3882_s1 + $0x2a0] sm:$0xf0]  ;;  %v1986_v49 = vld [vmem:[%s3882_s1 + $0x1a8] sm:$0xf0] }
  0x19   :  { %v2105_v5 = vor.u32 %v2666_v63, %v2104_v61  ;;  %v1816_v7 = vld [vmem:[%s3882_s1 + $0x40] sm:$0xf]  ;;  %v2109_v10 = vor.u32 %v2662_v2, %v2106_v3  ;;  %v2590_v12 = vld [vmem:[%s3882_s1 + $0x44] sm:$0xf]  ;;  %825 = vmatpush.bf16.msra.mxu0 %v1849_v4  ;;  %851 = vmatpush.bf16.msra.mxu2 %v1853_v6  ;;  %v2695_v50 = vld [vmem:[%s3882_s1 + $0x38c] sm:$0xf]  ;;  %v1989_v55 = vor.u32 %v2631_v48, %v1986_v49 }
  0x1a   :  { %v2594_v8 = vld [vmem:[%s3882_s1 + $0x5c] sm:$0xf0]  ;;  %v1818_v13 = vld [vmem:[%s3882_s1 + $0x60] sm:$0xf0]  ;;  %v2242_v51 = vld [vmem:[%s3882_s1 + $0x3a8] sm:$0xf0] }
  0x1b   :  { %v2072_v9 = vld [vmem:[%s3882_s1 + $0x240] sm:$0xf]  ;;  %v2654_v14 = vld [vmem:[%s3882_s1 + $0x244] sm:$0xf]  ;;  %v1817_v16 = vor.u32 %v2594_v8, %v1816_v7  ;;  %838 = vmatpush.bf16.msra.mxu1 %v2105_v5  ;;  %v1821_v20 = vor.u32 %v2590_v12, %v1818_v13  ;;  %864 = vmatpush.bf16.msra.mxu3 %v2109_v10  ;;  %v1952_v56 = vld [vmem:[%s3882_s1 + $0x148] sm:$0xf]  ;;  %v2245_v59 = vor.u32 %v2695_v50, %v2242_v51 }
  0x1c   :  { %v2658_v11 = vld [vmem:[%s3882_s1 + $0x25c] sm:$0xf0]  ;;  %v2074_v15 = vld [vmem:[%s3882_s1 + $0x260] sm:$0xf0]  ;;  %v2627_v57 = vld [vmem:[%s3882_s1 + $0x164] sm:$0xf0] }
  0x1d   :  { %v1784_v17 = vld [vmem:[%s3882_s1] sm:$0xf]  ;;  %v2073_v19 = vor.u32 %v2658_v11, %v2072_v9  ;;  %v2582_v23 = vld [vmem:[%s3882_s1 + $0x4] sm:$0xf]  ;;  %v2077_v24 = vor.u32 %v2654_v14, %v2074_v15  ;;  %826 = vmatpush.bf16.msra.mxu0 %v1817_v16  ;;  %852 = vmatpush.bf16.msra.mxu2 %v1821_v20  ;;  %v2208_v58 = vld [vmem:[%s3882_s1 + $0x348] sm:$0xf]  ;;  %v1953_v1 = vor.u32 %v2627_v57, %v1952_v56 }
  0x1e   :  { %v2586_v18 = vld [vmem:[%s3882_s1 + $0x1c] sm:$0xf0]  ;;  %v1786_v25 = vld [vmem:[%s3882_s1 + $0x20] sm:$0xf0]  ;;  %v2691_v60 = vld [vmem:[%s3882_s1 + $0x364] sm:$0xf0] }
  0x1f   :  { %v2040_v21 = vld [vmem:[%s3882_s1 + $0x200] sm:$0xf]  ;;  %v2646_v26 = vld [vmem:[%s3882_s1 + $0x204] sm:$0xf]  ;;  %v1785_v31 = vor.u32 %v2586_v18, %v1784_v17  ;;  %839 = vmatpush.bf16.msra.mxu1 %v2073_v19  ;;  %v1789_v36 = vor.u32 %v2582_v23, %v1786_v25  ;;  %865 = vmatpush.bf16.msra.mxu3 %v2077_v24  ;;  %v2623_v61 = vld [vmem:[%s3882_s1 + $0x14c] sm:$0xf]  ;;  %v2209_v2 = vor.u32 %v2691_v60, %v2208_v58 }
  0x20   :  { %v2650_v22 = vld [vmem:[%s3882_s1 + $0x21c] sm:$0xf0]  ;;  %v2042_v27 = vld [vmem:[%s3882_s1 + $0x220] sm:$0xf0]  ;;  %v1954_v62 = vld [vmem:[%s3882_s1 + $0x168] sm:$0xf0] }
  0x21   :  { %v2041_v35 = vor.u32 %v2650_v22, %v2040_v21  ;;  %v2045_v39 = vor.u32 %v2646_v26, %v2042_v27  ;;  %827 = vmatpush.bf16.msra.mxu0 %v1785_v31  ;;  %853 = vmatpush.bf16.msra.mxu2 %v1789_v36  ;;  %v27_v52 = vld [vmem:[%s3881_s0] sm:$0x3]  ;;  %v2687_v63 = vld [vmem:[%s3882_s1 + $0x34c] sm:$0xf]  ;;  %v1957_v3 = vor.u32 %v2623_v61, %v1954_v62  ;;  %v1920_v4 = vld [vmem:[%s3882_s1 + $0x108] sm:$0xf] }
  0x22   :  { %175 = vst [vmem:[#allocation1] ss:$9 sm:$0xff] %v27_v52  ;;  %v2210_v0 = vld [vmem:[%s3882_s1 + $0x368] sm:$0xf0]  ;;  %v2619_v5 = vld [vmem:[%s3882_s1 + $0x124] sm:$0xf0] }
  0x23   :  { %840 = vmatpush.bf16.msra.mxu1 %v2041_v35  ;;  %866 = vmatpush.bf16.msra.mxu3 %v2045_v39  ;;  %v2176_v6 = vld [vmem:[%s3882_s1 + $0x308] sm:$0xf]  ;;  %v2213_v7 = vor.u32 %v2687_v63, %v2210_v0  ;;  %v2615_v9 = vld [vmem:[%s3882_s1 + $0x10c] sm:$0xf]  ;;  %v1921_v14 = vor.u32 %v2619_v5, %v1920_v4  ;;  %v2024_v63 = vld [vmem:[%s3882_s1 + $0x1d0] sm:$0xf] }
  0x24   :  { %v2683_v8 = vld [vmem:[%s3882_s1 + $0x324] sm:$0xf0]  ;;  %v1922_v10 = vld [vmem:[%s3882_s1 + $0x128] sm:$0xf0]  ;;  %v2644_v0 = vld [vmem:[%s3882_s1 + $0x1ec] sm:$0xf0] }
  0x25   :  { %872 = vmatpush.bf16.msrb.mxu0 %v2017_v40  ;;  %898 = vmatpush.bf16.msrb.mxu2 %v2021_v42  ;;  %v2679_v11 = vld [vmem:[%s3882_s1 + $0x30c] sm:$0xf]  ;;  %v2177_v16 = vor.u32 %v2683_v8, %v2176_v6  ;;  %v1925_v17 = vor.u32 %v2615_v9, %v1922_v10  ;;  %v1888_v18 = vld [vmem:[%s3882_s1 + $0xc8] sm:$0xf]  ;;  %v2640_v4 = vld [vmem:[%s3882_s1 + $0x1d4] sm:$0xf] }
  0x26   :  { %v2178_v12 = vld [vmem:[%s3882_s1 + $0x328] sm:$0xf0]  ;;  %v2611_v19 = vld [vmem:[%s3882_s1 + $0xe4] sm:$0xf0]  ;;  %v2026_v5 = vld [vmem:[%s3882_s1 + $0x1f0] sm:$0xf0] }
  0x27   :  { %885 = vmatpush.bf16.msrb.mxu1 %v2273_v41  ;;  %911 = vmatpush.bf16.msrb.mxu3 %v2277_v46  ;;  %v2144_v20 = vld [vmem:[%s3882_s1 + $0x2c8] sm:$0xf]  ;;  %v2181_v21 = vor.u32 %v2679_v11, %v2178_v12  ;;  %v2607_v23 = vld [vmem:[%s3882_s1 + $0xcc] sm:$0xf]  ;;  %v1889_v27 = vor.u32 %v2611_v19, %v1888_v18  ;;  %v2704_v8 = vld [vmem:[%s3882_s1 + $0x3d4] sm:$0xf]  ;;  %v2025_v11 = vor.u32 %v2644_v0, %v2024_v63 }
  0x28   :  { %v2675_v22 = vld [vmem:[%s3882_s1 + $0x2e4] sm:$0xf0]  ;;  %v1890_v24 = vld [vmem:[%s3882_s1 + $0xe8] sm:$0xf0]  ;;  %v2282_v9 = vld [vmem:[%s3882_s1 + $0x3f0] sm:$0xf0] }
  0x29   :  { %873 = vmatpush.bf16.msrb.mxu0 %v1985_v53  ;;  %899 = vmatpush.bf16.msrb.mxu2 %v1989_v55  ;;  %v3143_v13 = vld [vmem:[#allocation1] sm:$0xff]  ;;  %v3146_v15 = vld [vmem:[#allocation1 + $0x9] sm:$0xff]  ;;  %v2145_v28 = vor.u32 %v2675_v22, %v2144_v20  ;;  %v1893_v29 = vor.u32 %v2607_v23, %v1890_v24  ;;  %v2285_v19 = vor.u32 %v2704_v8, %v2282_v9  ;;  %v1994_v22 = vld [vmem:[%s3882_s1 + $0x1b0] sm:$0xf0] }
  0x2a   :  { %854 = vmatmul.bf16.vlgmr.msra.gmra.mxu2 %v3143_v13  ;;  %828 = vmatmul.bf16.vlgmr.msra.gmra.mxu0 %v3143_v13  ;;  %v2671_v25 = vld [vmem:[%s3882_s1 + $0x2cc] sm:$0xf]  ;;  %v1856_v30 = vld [vmem:[%s3882_s1 + $0x88] sm:$0xf]  ;;  %v2248_v18 = vld [vmem:[%s3882_s1 + $0x390] sm:$0xf] }
  0x2b   :  { %886 = vmatpush.bf16.msrb.mxu1 %v2241_v54  ;;  %912 = vmatpush.bf16.msrb.mxu3 %v2245_v59  ;;  %v2146_v26 = vld [vmem:[%s3882_s1 + $0x2e8] sm:$0xf0]  ;;  %v2603_v31 = vld [vmem:[%s3882_s1 + $0xa4] sm:$0xf0]  ;;  %v2700_v20 = vld [vmem:[%s3882_s1 + $0x3ac] sm:$0xf0] }
  0x2c   :  { %841 = vmatmul.bf16.vlgmr.msra.gmra.mxu1 %v3146_v15  ;;  %867 = vmatmul.bf16.vlgmr.msra.gmra.mxu3 %v3146_v15  ;;  %v2112_v32 = vld [vmem:[%s3882_s1 + $0x288] sm:$0xf]  ;;  %v2149_v33 = vor.u32 %v2671_v25, %v2146_v26  ;;  %v2599_v35 = vld [vmem:[%s3882_s1 + $0x8c] sm:$0xf]  ;;  %v1857_v39 = vor.u32 %v2603_v31, %v1856_v30  ;;  %v2696_v23 = vld [vmem:[%s3882_s1 + $0x394] sm:$0xf]  ;;  %v2249_v26 = vor.u32 %v2700_v20, %v2248_v18 }
  0x2d   :  { %874 = vmatpush.bf16.msrb.mxu0 %v1953_v1  ;;  %900 = vmatpush.bf16.msrb.mxu2 %v1957_v3  ;;  %v2667_v34 = vld [vmem:[%s3882_s1 + $0x2a4] sm:$0xf0]  ;;  %v1858_v36 = vld [vmem:[%s3882_s1 + $0xa8] sm:$0xf0]  ;;  %v2280_v1 = vld [vmem:[%s3882_s1 + $0x3d0] sm:$0xf] }
  0x2e   :  { %v2663_v37 = vld [vmem:[%s3882_s1 + $0x28c] sm:$0xf]  ;;  %v2113_v40 = vor.u32 %v2667_v34, %v2112_v32  ;;  %v1861_v41 = vor.u32 %v2599_v35, %v1858_v36  ;;  %v1824_v42 = vld [vmem:[%s3882_s1 + $0x48] sm:$0xf]  ;;  %v2708_v3 = vld [vmem:[%s3882_s1 + $0x3ec] sm:$0xf0] }
  0x2f   :  { %887 = vmatpush.bf16.msrb.mxu1 %v2209_v2  ;;  %913 = vmatpush.bf16.msrb.mxu3 %v2213_v7  ;;  %v2114_v38 = vld [vmem:[%s3882_s1 + $0x2a8] sm:$0xf0]  ;;  %v2595_v43 = vld [vmem:[%s3882_s1 + $0x64] sm:$0xf0]  ;;  %v2281_v12 = vor.u32 %v2708_v3, %v2280_v1  ;;  %v2250_v24 = vld [vmem:[%s3882_s1 + $0x3b0] sm:$0xf0] }
  0x30   :  { %v2080_v44 = vld [vmem:[%s3882_s1 + $0x248] sm:$0xf]  ;;  %v2117_v45 = vor.u32 %v2663_v37, %v2114_v38  ;;  %v2591_v47 = vld [vmem:[%s3882_s1 + $0x4c] sm:$0xf]  ;;  %v1825_v51 = vor.u32 %v2595_v43, %v1824_v42  ;;  %v2216_v30 = vld [vmem:[%s3882_s1 + $0x350] sm:$0xf]  ;;  %v2253_v31 = vor.u32 %v2696_v23, %v2250_v24 }
  0x31   :  { %875 = vmatpush.bf16.msrb.mxu0 %v1921_v14  ;;  %901 = vmatpush.bf16.msrb.mxu2 %v1925_v17  ;;  %v2659_v46 = vld [vmem:[%s3882_s1 + $0x264] sm:$0xf0]  ;;  %v1826_v48 = vld [vmem:[%s3882_s1 + $0x68] sm:$0xf0]  ;;  %v2029_v14 = vor.u32 %v2640_v4, %v2026_v5  ;;  %v2636_v17 = vld [vmem:[%s3882_s1 + $0x1ac] sm:$0xf0] }
  0x32   :  { %v2655_v49 = vld [vmem:[%s3882_s1 + $0x24c] sm:$0xf]  ;;  %v1792_v52 = vld [vmem:[%s3882_s1 + $0x8] sm:$0xf]  ;;  %v2081_v54 = vor.u32 %v2659_v46, %v2080_v44  ;;  %v1829_v55 = vor.u32 %v2591_v47, %v1826_v48  ;;  %v2692_v32 = vld [vmem:[%s3882_s1 + $0x36c] sm:$0xf0] }
  0x33   :  { %888 = vmatpush.bf16.msrb.mxu1 %v2177_v16  ;;  %914 = vmatpush.bf16.msrb.mxu3 %v2181_v21  ;;  %v2082_v50 = vld [vmem:[%s3882_s1 + $0x268] sm:$0xf0]  ;;  %v2587_v53 = vld [vmem:[%s3882_s1 + $0x24] sm:$0xf0]  ;;  %v1992_v16 = vld [vmem:[%s3882_s1 + $0x190] sm:$0xf]  ;;  %v2217_v38 = vor.u32 %v2692_v32, %v2216_v30 }
  0x34   :  { %v2048_v56 = vld [vmem:[%s3882_s1 + $0x208] sm:$0xf]  ;;  %v2583_v58 = vld [vmem:[%s3882_s1 + $0xc] sm:$0xf]  ;;  %v2085_v59 = vor.u32 %v2655_v49, %v2082_v50  ;;  %v1793_v2 = vor.u32 %v2587_v53, %v1792_v52  ;;  %v2632_v21 = vld [vmem:[%s3882_s1 + $0x194] sm:$0xf]  ;;  %v1993_v25 = vor.u32 %v2636_v17, %v1992_v16 }
  0x35   :  { %876 = vmatpush.bf16.msrb.mxu0 %v1889_v27  ;;  %902 = vmatpush.bf16.msrb.mxu2 %v1893_v29  ;;  %v2651_v57 = vld [vmem:[%s3882_s1 + $0x224] sm:$0xf0]  ;;  %v1794_v60 = vld [vmem:[%s3882_s1 + $0x28] sm:$0xf0]  ;;  %v1997_v27 = vor.u32 %v2632_v21, %v1994_v22  ;;  %v2628_v29 = vld [vmem:[%s3882_s1 + $0x16c] sm:$0xf0] }
  0x36   :  { %v2647_v61 = vld [vmem:[%s3882_s1 + $0x20c] sm:$0xf]  ;;  %v2049_v6 = vor.u32 %v2651_v57, %v2048_v56  ;;  %v1797_v7 = vor.u32 %v2583_v58, %v1794_v60  ;;  %v1962_v34 = vld [vmem:[%s3882_s1 + $0x170] sm:$0xf0]  ;;  %v2184_v42 = vld [vmem:[%s3882_s1 + $0x310] sm:$0xf] }
  0x37   :  { %889 = vmatpush.bf16.msrb.mxu1 %v2145_v28  ;;  %915 = vmatpush.bf16.msrb.mxu3 %v2149_v33  ;;  %v2050_v62 = vld [vmem:[%s3882_s1 + $0x228] sm:$0xf0]  ;;  %v1960_v28 = vld [vmem:[%s3882_s1 + $0x150] sm:$0xf]  ;;  %v2624_v33 = vld [vmem:[%s3882_s1 + $0x154] sm:$0xf] }
  0x38   :  { %v2053_v10 = vor.u32 %v2647_v61, %v2050_v62  ;;  %v2688_v35 = vld [vmem:[%s3882_s1 + $0x354] sm:$0xf]  ;;  %v1961_v37 = vor.u32 %v2628_v29, %v1960_v28  ;;  %v2684_v44 = vld [vmem:[%s3882_s1 + $0x32c] sm:$0xf0] }
  0x39   :  { %877 = vmatpush.bf16.msrb.mxu0 %v1857_v39  ;;  %903 = vmatpush.bf16.msrb.mxu2 %v1861_v41  ;;  %v2218_v36 = vld [vmem:[%s3882_s1 + $0x370] sm:$0xf0]  ;;  %v1965_v39 = vor.u32 %v2624_v33, %v1962_v34  ;;  %v2620_v41 = vld [vmem:[%s3882_s1 + $0x12c] sm:$0xf0]  ;;  %v2185_v50 = vor.u32 %v2684_v44, %v2184_v42 }
  0x3a   :  { %v2221_v43 = vor.u32 %v2688_v35, %v2218_v36  ;;  %v1930_v46 = vld [vmem:[%s3882_s1 + $0x130] sm:$0xf0]  ;;  %v1896_v52 = vld [vmem:[%s3882_s1 + $0xd0] sm:$0xf] }
  0x3b   :  { %890 = vmatpush.bf16.msrb.mxu1 %v2113_v40  ;;  %916 = vmatpush.bf16.msrb.mxu3 %v2117_v45  ;;  %v1928_v40 = vld [vmem:[%s3882_s1 + $0x110] sm:$0xf]  ;;  %v2616_v45 = vld [vmem:[%s3882_s1 + $0x114] sm:$0xf] }
  0x3c   :  { %v2680_v47 = vld [vmem:[%s3882_s1 + $0x314] sm:$0xf]  ;;  %v1929_v49 = vor.u32 %v2620_v41, %v1928_v40  ;;  %v2612_v53 = vld [vmem:[%s3882_s1 + $0xec] sm:$0xf0] }
  0x3d   :  { %878 = vmatpush.bf16.msrb.mxu0 %v1825_v51  ;;  %904 = vmatpush.bf16.msrb.mxu2 %v1829_v55  ;;  %v2186_v48 = vld [vmem:[%s3882_s1 + $0x330] sm:$0xf0]  ;;  %v1933_v51 = vor.u32 %v2616_v45, %v1930_v46  ;;  %v2676_v56 = vld [vmem:[%s3882_s1 + $0x2ec] sm:$0xf0]  ;;  %v1897_v61 = vor.u32 %v2612_v53, %v1896_v52 }
  0x3e   :  { %v2189_v55 = vor.u32 %v2680_v47, %v2186_v48  ;;  %v2608_v57 = vld [vmem:[%s3882_s1 + $0xd4] sm:$0xf]  ;;  %v1864_v0 = vld [vmem:[%s3882_s1 + $0x90] sm:$0xf] }
  0x3f   :  { %891 = vmatpush.bf16.msrb.mxu1 %v2081_v54  ;;  %917 = vmatpush.bf16.msrb.mxu3 %v2085_v59  ;;  %v2152_v54 = vld [vmem:[%s3882_s1 + $0x2d0] sm:$0xf]  ;;  %v1898_v58 = vld [vmem:[%s3882_s1 + $0xf0] sm:$0xf0] }
  0x40   :  { %v2672_v59 = vld [vmem:[%s3882_s1 + $0x2d4] sm:$0xf]  ;;  %v2153_v62 = vor.u32 %v2676_v56, %v2152_v54  ;;  %v1901_v63 = vor.u32 %v2608_v57, %v1898_v58  ;;  %v2604_v1 = vld [vmem:[%s3882_s1 + $0xac] sm:$0xf0] }
  0x41   :  { %879 = vmatpush.bf16.msrb.mxu0 %v1793_v2  ;;  %905 = vmatpush.bf16.msrb.mxu2 %v1797_v7  ;;  %v2154_v60 = vld [vmem:[%s3882_s1 + $0x2f0] sm:$0xf0]  ;;  %v2120_v2 = vld [vmem:[%s3882_s1 + $0x290] sm:$0xf]  ;;  %v1865_v9 = vor.u32 %v2604_v1, %v1864_v0 }
  0x42   :  { %v2157_v3 = vor.u32 %v2672_v59, %v2154_v60  ;;  %v2668_v4 = vld [vmem:[%s3882_s1 + $0x2ac] sm:$0xf0]  ;;  %v2600_v5 = vld [vmem:[%s3882_s1 + $0x94] sm:$0xf] }
  0x43   :  { %892 = vmatpush.bf16.msrb.mxu1 %v2049_v6  ;;  %918 = vmatpush.bf16.msrb.mxu3 %v2053_v10  ;;  %v1866_v6 = vld [vmem:[%s3882_s1 + $0xb0] sm:$0xf0]  ;;  %v2121_v10 = vor.u32 %v2668_v4, %v2120_v2  ;;  %v2088_v16 = vld [vmem:[%s3882_s1 + $0x250] sm:$0xf] }
  0x44   :  { %880 = vmatmul.bf16.vlgmr.msrb.gmra.mxu0 %v3143_v13  ;;  %906 = vmatmul.bf16.vlgmr.msrb.gmra.mxu2 %v3143_v13  ;;  %v2664_v7 = vld [vmem:[%s3882_s1 + $0x294] sm:$0xf]  ;;  %v2660_v18 = vld [vmem:[%s3882_s1 + $0x26c] sm:$0xf0] }
  0x45   :  { %924 = vmatpush.bf16.msra.mxu0 %v2025_v11  ;;  %950 = vmatpush.bf16.msra.mxu2 %v2029_v14  ;;  %v2122_v8 = vld [vmem:[%s3882_s1 + $0x2b0] sm:$0xf0]  ;;  %v1869_v11 = vor.u32 %v2600_v5, %v1866_v6  ;;  %v2596_v14 = vld [vmem:[%s3882_s1 + $0x6c] sm:$0xf0] }
  0x46   :  { %893 = vmatmul.bf16.vlgmr.msrb.gmra.mxu1 %v3146_v15  ;;  %919 = vmatmul.bf16.vlgmr.msrb.gmra.mxu3 %v3146_v15  ;;  %v2125_v17 = vor.u32 %v2664_v7, %v2122_v8  ;;  %v1834_v20 = vld [vmem:[%s3882_s1 + $0x70] sm:$0xf0] }
  0x47   :  { %937 = vmatpush.bf16.msra.mxu1 %v2281_v12  ;;  %963 = vmatpush.bf16.msra.mxu3 %v2285_v19  ;;  %v1832_v12 = vld [vmem:[%s3882_s1 + $0x50] sm:$0xf]  ;;  %v2592_v19 = vld [vmem:[%s3882_s1 + $0x54] sm:$0xf] }
  0x48   :  { %v2656_v21 = vld [vmem:[%s3882_s1 + $0x254] sm:$0xf] }
  0x49   :  { %925 = vmatpush.bf16.msra.mxu0 %v1993_v25  ;;  %951 = vmatpush.bf16.msra.mxu2 %v1997_v27  ;;  %v2090_v22 = vld [vmem:[%s3882_s1 + $0x270] sm:$0xf0] }
  0x4b   :  { %938 = vmatpush.bf16.msra.mxu1 %v2249_v26  ;;  %964 = vmatpush.bf16.msra.mxu3 %v2253_v31 }
  0x4d   :  { %926 = vmatpush.bf16.msra.mxu0 %v1961_v37  ;;  %952 = vmatpush.bf16.msra.mxu2 %v1965_v39 }
  0x4f   :  { %939 = vmatpush.bf16.msra.mxu1 %v2217_v38  ;;  %965 = vmatpush.bf16.msra.mxu3 %v2221_v43 }
  0x51   :  { %927 = vmatpush.bf16.msra.mxu0 %v1929_v49  ;;  %953 = vmatpush.bf16.msra.mxu2 %v1933_v51 }
  0x53   :  { %940 = vmatpush.bf16.msra.mxu1 %v2185_v50  ;;  %966 = vmatpush.bf16.msra.mxu3 %v2189_v55 }
  0x55   :  { %928 = vmatpush.bf16.msra.mxu0 %v1897_v61  ;;  %954 = vmatpush.bf16.msra.mxu2 %v1901_v63 }
  0x57   :  { %941 = vmatpush.bf16.msra.mxu1 %v2153_v62  ;;  %967 = vmatpush.bf16.msra.mxu3 %v2157_v3 }
  0x58   :  { %12 = vsyncpa [#allocation3], 0  ;;  %v1833_v23 = vor.u32 %v2596_v14, %v1832_v12  ;;  %v1800_v24 = vld [vmem:[%s3882_s1 + $0x10] sm:$0xf]  ;;  %v2089_v26 = vor.u32 %v2660_v18, %v2088_v16  ;;  %v1837_v27 = vor.u32 %v2592_v19, %v1834_v20  ;;  %v2584_v30 = vld [vmem:[%s3882_s1 + $0x14] sm:$0xf]  ;;  %v2093_v31 = vor.u32 %v2656_v21, %v2090_v22 }
  0x59   :  { %929 = vmatpush.bf16.msra.mxu0 %v1865_v9  ;;  %v2588_v25 = vld [vmem:[%s3882_s1 + $0x2c] sm:$0xf0]  ;;  %955 = vmatpush.bf16.msra.mxu2 %v1869_v11  ;;  %v1802_v32 = vld [vmem:[%s3882_s1 + $0x30] sm:$0xf0]  ;;  %v2032_v35 = vld [vmem:[%s3882_s1 + $0x1d8] sm:$0xf] }
  0x5a   :  { %v2056_v28 = vld [vmem:[%s3882_s1 + $0x210] sm:$0xf]  ;;  %v2648_v33 = vld [vmem:[%s3882_s1 + $0x214] sm:$0xf]  ;;  %v2645_v36 = vld [vmem:[%s3882_s1 + $0x1f4] sm:$0xf0]  ;;  %v1801_v38 = vor.u32 %v2588_v25, %v1800_v24  ;;  %v1805_v43 = vor.u32 %v2584_v30, %v1802_v32 }
  0x5b   :  { %942 = vmatpush.bf16.msra.mxu1 %v2121_v10  ;;  %v2652_v29 = vld [vmem:[%s3882_s1 + $0x22c] sm:$0xf0]  ;;  %968 = vmatpush.bf16.msra.mxu3 %v2125_v17  ;;  %v2058_v34 = vld [vmem:[%s3882_s1 + $0x230] sm:$0xf0]  ;;  %v2288_v37 = vld [vmem:[%s3882_s1 + $0x3d8] sm:$0xf]  ;;  %v2033_v47 = vor.u32 %v2645_v36, %v2032_v35 }
  0x5c   :  { %v2709_v39 = vld [vmem:[%s3882_s1 + $0x3f4] sm:$0xf0]  ;;  %v2641_v40 = vld [vmem:[%s3882_s1 + $0x1dc] sm:$0xf]  ;;  %v2057_v42 = vor.u32 %v2652_v29, %v2056_v28  ;;  %v2061_v46 = vor.u32 %v2648_v33, %v2058_v34  ;;  %s1773_s14 = sshll.u32 %s3888_s7, 4  ;;  %s1774_s14 = int_to_ptr.hbm [resolvable:$true] %s1773_s14 }
  0x5d   :  { %930 = vmatpush.bf16.msra.mxu0 %v1833_v23  ;;  %v2034_v41 = vld [vmem:[%s3882_s1 + $0x1f8] sm:$0xf0]  ;;  %956 = vmatpush.bf16.msra.mxu2 %v1837_v27  ;;  %v2289_v48 = vor.u32 %v2709_v39, %v2288_v37  ;;  %v2000_v50 = vld [vmem:[%s3882_s1 + $0x198] sm:$0xf] }
  0x5e   :  { %v2705_v44 = vld [vmem:[%s3882_s1 + $0x3dc] sm:$0xf]  ;;  %v2037_v49 = vor.u32 %v2641_v40, %v2034_v41  ;;  %v2637_v51 = vld [vmem:[%s3882_s1 + $0x1b4] sm:$0xf0] }
  0x5f   :  { %943 = vmatpush.bf16.msra.mxu1 %v2089_v26  ;;  %v2290_v45 = vld [vmem:[%s3882_s1 + $0x3f8] sm:$0xf0]  ;;  %969 = vmatpush.bf16.msra.mxu3 %v2093_v31  ;;  %v2256_v52 = vld [vmem:[%s3882_s1 + $0x398] sm:$0xf]  ;;  %v2001_v59 = vor.u32 %v2637_v51, %v2000_v50 }
  0x60   :  { %v2293_v53 = vor.u32 %v2705_v44, %v2290_v45  ;;  %v2701_v54 = vld [vmem:[%s3882_s1 + $0x3b4] sm:$0xf0]  ;;  %v2633_v55 = vld [vmem:[%s3882_s1 + $0x19c] sm:$0xf] }
  0x61   :  { %931 = vmatpush.bf16.msra.mxu0 %v1801_v38  ;;  %v2002_v56 = vld [vmem:[%s3882_s1 + $0x1b8] sm:$0xf0]  ;;  %957 = vmatpush.bf16.msra.mxu2 %v1805_v43  ;;  %v2257_v60 = vor.u32 %v2701_v54, %v2256_v52  ;;  %v1968_v62 = vld [vmem:[%s3882_s1 + $0x158] sm:$0xf] }
  0x62   :  { %v2697_v57 = vld [vmem:[%s3882_s1 + $0x39c] sm:$0xf]  ;;  %v2005_v61 = vor.u32 %v2633_v55, %v2002_v56  ;;  %v2629_v63 = vld [vmem:[%s3882_s1 + $0x174] sm:$0xf0] }
  0x63   :  { %944 = vmatpush.bf16.msra.mxu1 %v2057_v42  ;;  %v2258_v58 = vld [vmem:[%s3882_s1 + $0x3b8] sm:$0xf0]  ;;  %970 = vmatpush.bf16.msra.mxu3 %v2061_v46  ;;  %v2224_v0 = vld [vmem:[%s3882_s1 + $0x358] sm:$0xf]  ;;  %v1969_v7 = vor.u32 %v2629_v63, %v1968_v62 }
  0x64   :  { %932 = vmatmul.bf16.vlgmr.msra.gmra.mxu0 %v3143_v13  ;;  %v2261_v1 = vor.u32 %v2697_v57, %v2258_v58  ;;  %v2693_v2 = vld [vmem:[%s3882_s1 + $0x374] sm:$0xf0]  ;;  %v2625_v3 = vld [vmem:[%s3882_s1 + $0x15c] sm:$0xf]  ;;  %958 = vmatmul.bf16.vlgmr.msra.gmra.mxu2 %v3143_v13 }
  0x65   :  { %976 = vmatpush.bf16.msrb.mxu0 %v2033_v47  ;;  %1002 = vmatpush.bf16.msrb.mxu2 %v2037_v49  ;;  %v1970_v4 = vld [vmem:[%s3882_s1 + $0x178] sm:$0xf0]  ;;  %v2225_v8 = vor.u32 %v2693_v2, %v2224_v0  ;;  %v1936_v10 = vld [vmem:[%s3882_s1 + $0x118] sm:$0xf] }
  0x66   :  { %945 = vmatmul.bf16.vlgmr.msra.gmra.mxu1 %v3146_v15  ;;  %v2689_v5 = vld [vmem:[%s3882_s1 + $0x35c] sm:$0xf]  ;;  %971 = vmatmul.bf16.vlgmr.msra.gmra.mxu3 %v3146_v15  ;;  %v1973_v9 = vor.u32 %v2625_v3, %v1970_v4  ;;  %v2621_v11 = vld [vmem:[%s3882_s1 + $0x134] sm:$0xf0] }
  0x67   :  { %989 = vmatpush.bf16.msrb.mxu1 %v2289_v48  ;;  %1015 = vmatpush.bf16.msrb.mxu3 %v2293_v53  ;;  %v2226_v6 = vld [vmem:[%s3882_s1 + $0x378] sm:$0xf0]  ;;  %v2192_v12 = vld [vmem:[%s3882_s1 + $0x318] sm:$0xf]  ;;  %v1937_v21 = vor.u32 %v2621_v11, %v1936_v10 }
  0x68   :  { %v2229_v14 = vor.u32 %v2689_v5, %v2226_v6  ;;  %v2685_v16 = vld [vmem:[%s3882_s1 + $0x334] sm:$0xf0]  ;;  %v2617_v17 = vld [vmem:[%s3882_s1 + $0x11c] sm:$0xf] }
  0x69   :  { %977 = vmatpush.bf16.msrb.mxu0 %v2001_v59  ;;  %1003 = vmatpush.bf16.msrb.mxu2 %v2005_v61  ;;  %v1938_v18 = vld [vmem:[%s3882_s1 + $0x138] sm:$0xf0]  ;;  %v2193_v22 = vor.u32 %v2685_v16, %v2192_v12  ;;  %v1904_v24 = vld [vmem:[%s3882_s1 + $0xd8] sm:$0xf]  ;;  %v2716_v12 = vld [vmem:[%s3884_s3 + $0x30] sm:$0xff] }
  0x6a   :  { %v2681_v19 = vld [vmem:[%s3882_s1 + $0x31c] sm:$0xf]  ;;  %v1941_v23 = vor.u32 %v2617_v17, %v1938_v18  ;;  %v2613_v25 = vld [vmem:[%s3882_s1 + $0xf4] sm:$0xf0]  ;;  %v2732_v16 = vld [vmem:[%s3884_s3 + $0xb0] sm:$0xff] }
  0x6b   :  { %990 = vmatpush.bf16.msrb.mxu1 %v2257_v60  ;;  %1016 = vmatpush.bf16.msrb.mxu3 %v2261_v1  ;;  %v2194_v20 = vld [vmem:[%s3882_s1 + $0x338] sm:$0xf0]  ;;  %v2160_v26 = vld [vmem:[%s3882_s1 + $0x2d8] sm:$0xf]  ;;  %v1905_v33 = vor.u32 %v2613_v25, %v1904_v24  ;;  %v2715_v17 = vld [vmem:[%s3884_s3 + $0x28] sm:$0xff] }
  0x6c   :  { %v2197_v27 = vor.u32 %v2681_v19, %v2194_v20  ;;  %v2677_v28 = vld [vmem:[%s3882_s1 + $0x2f4] sm:$0xf0]  ;;  %v2609_v29 = vld [vmem:[%s3882_s1 + $0xdc] sm:$0xf]  ;;  %v2723_v18 = vld [vmem:[%s3884_s3 + $0x68] sm:$0xff] }
  0x6d   :  { %978 = vmatpush.bf16.msrb.mxu0 %v1969_v7  ;;  %1004 = vmatpush.bf16.msrb.mxu2 %v1973_v9  ;;  %v1906_v30 = vld [vmem:[%s3882_s1 + $0xf8] sm:$0xf0]  ;;  %v2161_v34 = vor.u32 %v2677_v28, %v2160_v26  ;;  %v1872_v36 = vld [vmem:[%s3882_s1 + $0x98] sm:$0xf]  ;;  %v2712_v24 = vld [vmem:[%s3884_s3 + $0x10] sm:$0xff] }
  0x6e   :  { %v2673_v31 = vld [vmem:[%s3882_s1 + $0x2dc] sm:$0xf]  ;;  %v1909_v35 = vor.u32 %v2609_v29, %v1906_v30  ;;  %v2605_v37 = vld [vmem:[%s3882_s1 + $0xb4] sm:$0xf0]  ;;  %v2730_v25 = vld [vmem:[%s3884_s3 + $0xa0] sm:$0xff] }
  0x6f   :  { %991 = vmatpush.bf16.msrb.mxu1 %v2225_v8  ;;  %1017 = vmatpush.bf16.msrb.mxu3 %v2229_v14  ;;  %v2162_v32 = vld [vmem:[%s3882_s1 + $0x2f8] sm:$0xf0]  ;;  %v2128_v38 = vld [vmem:[%s3882_s1 + $0x298] sm:$0xf]  ;;  %v1873_v45 = vor.u32 %v2605_v37, %v1872_v36  ;;  %v2724_v14 = vld [vmem:[%s3884_s3 + $0x70] sm:$0xff] }
  0x70   :  { %v2165_v39 = vor.u32 %v2673_v31, %v2162_v32  ;;  %v2669_v40 = vld [vmem:[%s3882_s1 + $0x2b4] sm:$0xf0]  ;;  %v2601_v41 = vld [vmem:[%s3882_s1 + $0x9c] sm:$0xf]  ;;  %v2720_v26 = vld [vmem:[%s3884_s3 + $0x50] sm:$0xff] }
  0x71   :  { %979 = vmatpush.bf16.msrb.mxu0 %v1937_v21  ;;  %1005 = vmatpush.bf16.msrb.mxu2 %v1941_v23  ;;  %v1874_v42 = vld [vmem:[%s3882_s1 + $0xb8] sm:$0xf0]  ;;  %v2129_v46 = vor.u32 %v2669_v40, %v2128_v38  ;;  %v1840_v48 = vld [vmem:[%s3882_s1 + $0x58] sm:$0xf]  ;;  %v2731_v21 = vld [vmem:[%s3884_s3 + $0xa8] sm:$0xff] }
  0x72   :  { %v2665_v43 = vld [vmem:[%s3882_s1 + $0x29c] sm:$0xf]  ;;  %v1877_v47 = vor.u32 %v2601_v41, %v1874_v42  ;;  %v2597_v49 = vld [vmem:[%s3882_s1 + $0x74] sm:$0xf0]  ;;  %v2740_v23 = vld [vmem:[%s3884_s3 + $0xf0] sm:$0xff] }
  0x73   :  { %992 = vmatpush.bf16.msrb.mxu1 %v2193_v22  ;;  %1018 = vmatpush.bf16.msrb.mxu3 %v2197_v27  ;;  %v2130_v44 = vld [vmem:[%s3882_s1 + $0x2b8] sm:$0xf0]  ;;  %v2096_v50 = vld [vmem:[%s3882_s1 + $0x258] sm:$0xf]  ;;  %v1841_v57 = vor.u32 %v2597_v49, %v1840_v48  ;;  %v2739_v27 = vld [vmem:[%s3884_s3 + $0xe8] sm:$0xff] }
  0x74   :  { %v2133_v51 = vor.u32 %v2665_v43, %v2130_v44  ;;  %v2661_v52 = vld [vmem:[%s3882_s1 + $0x274] sm:$0xf0]  ;;  %v2593_v53 = vld [vmem:[%s3882_s1 + $0x5c] sm:$0xf]  ;;  %v2711_v28 = vld [vmem:[%s3884_s3 + $0x8] sm:$0xff] }
  0x75   :  { %980 = vmatpush.bf16.msrb.mxu0 %v1905_v33  ;;  %1006 = vmatpush.bf16.msrb.mxu2 %v1909_v35  ;;  %v1842_v54 = vld [vmem:[%s3882_s1 + $0x78] sm:$0xf0]  ;;  %v2097_v58 = vor.u32 %v2661_v52, %v2096_v50  ;;  %v1808_v60 = vld [vmem:[%s3882_s1 + $0x18] sm:$0xf]  ;;  %v2719_v30 = vld [vmem:[%s3884_s3 + $0x48] sm:$0xff] }
  0x76   :  { %v2657_v55 = vld [vmem:[%s3882_s1 + $0x25c] sm:$0xf]  ;;  %v1845_v59 = vor.u32 %v2593_v53, %v1842_v54  ;;  %v2589_v61 = vld [vmem:[%s3882_s1 + $0x34] sm:$0xf0]  ;;  %v2738_v31 = vld [vmem:[%s3884_s3 + $0xe0] sm:$0xff] }
  0x77   :  { %993 = vmatpush.bf16.msrb.mxu1 %v2161_v34  ;;  %1019 = vmatpush.bf16.msrb.mxu3 %v2165_v39  ;;  %v2098_v56 = vld [vmem:[%s3882_s1 + $0x278] sm:$0xf0]  ;;  %v2064_v62 = vld [vmem:[%s3882_s1 + $0x218] sm:$0xf]  ;;  %v1809_v5 = vor.u32 %v2589_v61, %v1808_v60  ;;  %v2710_v32 = vld [vmem:[%s3884_s3] sm:$0xff] }
  0x78   :  { %v2101_v63 = vor.u32 %v2657_v55, %v2098_v56  ;;  %v2653_v0 = vld [vmem:[%s3882_s1 + $0x234] sm:$0xf0]  ;;  %v2585_v1 = vld [vmem:[%s3882_s1 + $0x1c] sm:$0xf]  ;;  %v2728_v33 = vld [vmem:[%s3884_s3 + $0x90] sm:$0xff] }
  0x79   :  { %981 = vmatpush.bf16.msrb.mxu0 %v1873_v45  ;;  %1007 = vmatpush.bf16.msrb.mxu2 %v1877_v47  ;;  %v1810_v2 = vld [vmem:[%s3882_s1 + $0x38] sm:$0xf0]  ;;  %v2065_v6 = vor.u32 %v2653_v0, %v2064_v62  ;;  %v2718_v34 = vld [vmem:[%s3884_s3 + $0x40] sm:$0xff]  ;;  %v2727_v37 = vld [vmem:[%s3884_s3 + $0x88] sm:$0xff] }
  0x7a   :  { %v2649_v3 = vld [vmem:[%s3882_s1 + $0x21c] sm:$0xf]  ;;  %v1813_v7 = vor.u32 %v2585_v1, %v1810_v2  ;;  %v3727_v36 = vld [vmem:[%s3883_s2] sm:$0xff]  ;;  %v2736_v38 = vld [vmem:[%s3884_s3 + $0xd0] sm:$0xff] }
  0x7b   :  { %994 = vmatpush.bf16.msrb.mxu1 %v2129_v46  ;;  %1020 = vmatpush.bf16.msrb.mxu3 %v2133_v51  ;;  %v2066_v4 = vld [vmem:[%s3882_s1 + $0x238] sm:$0xf0]  ;;  %v158_v39 = vperm.slane %v3727_v36, 0  ;;  %v2726_v40 = vld [vmem:[%s3884_s3 + $0x80] sm:$0xff]  ;;  %v2735_v43 = vld [vmem:[%s3884_s3 + $0xc8] sm:$0xff]  ;;  %v159_v46 = vperm.slane %v3727_v36, 1 }
  0x7c   :  { %v2069_v8 = vor.u32 %v2649_v3, %v2066_v4  ;;  %v2717_v9 = vld [vmem:[%s3884_s3 + $0x38] sm:$0xff]  ;;  %v2748_v48 = vld [vmem:[%s3884_s3 + $0x130] sm:$0xff]  ;;  %v2734_v50 = vld [vmem:[%s3884_s3 + $0xc0] sm:$0xff] }
  0x7d   :  { %982 = vmatpush.bf16.msrb.mxu0 %v1841_v57  ;;  %1008 = vmatpush.bf16.msrb.mxu2 %v1845_v59  ;;  %v2725_v10 = vld [vmem:[%s3884_s3 + $0x78] sm:$0xff]  ;;  %v2747_v56 = vld [vmem:[%s3884_s3 + $0x128] sm:$0xff]  ;;  %v2756_v57 = vld [vmem:[%s3884_s3 + $0x170] sm:$0xff] }
  0x7e   :  { %v2733_v11 = vld [vmem:[%s3884_s3 + $0xb8] sm:$0xff]  ;;  %v2746_v62 = vld [vmem:[%s3884_s3 + $0x120] sm:$0xff]  ;;  %v2755_v2 = vld [vmem:[%s3884_s3 + $0x168] sm:$0xff] }
  0x7f   :  { %995 = vmatpush.bf16.msrb.mxu1 %v2097_v58  ;;  %1021 = vmatpush.bf16.msrb.mxu3 %v2101_v63  ;;  %v2741_v19 = vld [vmem:[%s3884_s3 + $0xf8] sm:$0xff] }
  0x80   :  { %v2713_v20 = vld [vmem:[%s3884_s3 + $0x18] sm:$0xff] }
  0x81   :  { %983 = vmatpush.bf16.msrb.mxu0 %v1809_v5  ;;  %1009 = vmatpush.bf16.msrb.mxu2 %v1813_v7  ;;  %v2721_v22 = vld [vmem:[%s3884_s3 + $0x58] sm:$0xff]  ;;  %v2744_v7 = vld [vmem:[%s3884_s3 + $0x110] sm:$0xff] }
  0x82   :  { %v2729_v29 = vld [vmem:[%s3884_s3 + $0x98] sm:$0xff] }
  0x83   :  { %996 = vmatpush.bf16.msrb.mxu1 %v2065_v6  ;;  %1022 = vmatpush.bf16.msrb.mxu3 %v2069_v8  ;;  %v2737_v35 = vld [vmem:[%s3884_s3 + $0xd8] sm:$0xff]  ;;  %v2754_v6 = vld [vmem:[%s3884_s3 + $0x160] sm:$0xff]  ;;  %v160_v8 = vperm.slane %v3727_v36, 2 }
  0x84   :  { %984 = vmatmul.bf16.vlgmr.msrb.gmra.mxu0 %v3143_v13  ;;  %1010 = vmatmul.bf16.vlgmr.msrb.gmra.mxu2 %v3143_v13  ;;  %v2714_v13 = vld [vmem:[%s3884_s3 + $0x20] sm:$0xff]  ;;  %v2749_v41 = vld [vmem:[%s3884_s3 + $0x138] sm:$0xff] }
  0x85   :  { %1576 = vmatpush.bf16.msra.mxu0 %v2717_v9  ;;  %1602 = vmatpush.bf16.msra.mxu2 %v2733_v11  ;;  %v2757_v53 = vld [vmem:[%s3884_s3 + $0x178] sm:$0xff] }
  0x86   :  { %997 = vmatmul.bf16.vlgmr.msrb.gmra.mxu1 %v3146_v15  ;;  %1023 = vmatmul.bf16.vlgmr.msrb.gmra.mxu3 %v3146_v15  ;;  %v2722_v15 = vld [vmem:[%s3884_s3 + $0x60] sm:$0xff]  ;;  %v2745_v4 = vld [vmem:[%s3884_s3 + $0x118] sm:$0xff] }
  0x87   :  { %1589 = vmatpush.bf16.msra.mxu1 %v2725_v10  ;;  %1615 = vmatpush.bf16.msra.mxu3 %v2741_v19  ;;  %v2753_v9 = vld [vmem:[%s3884_s3 + $0x158] sm:$0xff] }
  0x88   :  { %v2765_v19 = vld [vmem:[%s3884_s3 + $0x1b8] sm:$0xff] }
  0x89   :  { %1577 = vmatpush.bf16.msra.mxu0 %v2716_v12  ;;  %1603 = vmatpush.bf16.msra.mxu2 %v2732_v16 }
  0x8b   :  { %1590 = vmatpush.bf16.msra.mxu1 %v2724_v14  ;;  %1616 = vmatpush.bf16.msra.mxu3 %v2740_v23  ;;  %v2743_v14 = vld [vmem:[%s3884_s3 + $0x108] sm:$0xff] }
  0x8d   :  { %1578 = vmatpush.bf16.msra.mxu0 %v2715_v17  ;;  %1604 = vmatpush.bf16.msra.mxu2 %v2731_v21  ;;  %v2752_v17 = vld [vmem:[%s3884_s3 + $0x150] sm:$0xff] }
  0x8f   :  { %1591 = vmatpush.bf16.msra.mxu1 %v2723_v18  ;;  %1617 = vmatpush.bf16.msra.mxu3 %v2739_v27  ;;  %v161_v18 = vperm.slane %v3727_v36, 3 }
  0x91   :  { %1579 = vmatpush.bf16.msra.mxu0 %v2714_v13  ;;  %1605 = vmatpush.bf16.msra.mxu2 %v2730_v25 }
  0x93   :  { %1592 = vmatpush.bf16.msra.mxu1 %v2722_v15  ;;  %1618 = vmatpush.bf16.msra.mxu3 %v2738_v31  ;;  %v2742_v15 = vld [vmem:[%s3884_s3 + $0x100] sm:$0xff] }
  0x95   :  { %1580 = vmatpush.bf16.msra.mxu0 %v2713_v20  ;;  %1606 = vmatpush.bf16.msra.mxu2 %v2729_v29  ;;  %v2764_v29 = vld [vmem:[%s3884_s3 + $0x1b0] sm:$0xff] }
  0x97   :  { %1593 = vmatpush.bf16.msra.mxu1 %v2721_v22  ;;  %1619 = vmatpush.bf16.msra.mxu3 %v2737_v35  ;;  %v2751_v22 = vld [vmem:[%s3884_s3 + $0x148] sm:$0xff] }
  0x99   :  { %1581 = vmatpush.bf16.msra.mxu0 %v2712_v24  ;;  %1607 = vmatpush.bf16.msra.mxu2 %v2728_v33 }
  0x9b   :  { %1594 = vmatpush.bf16.msra.mxu1 %v2720_v26  ;;  %1620 = vmatpush.bf16.msra.mxu3 %v2736_v38  ;;  %v2772_v38 = vld [vmem:[%s3884_s3 + $0x1f0] sm:$0xff] }
  0x9d   :  { %1582 = vmatpush.bf16.msra.mxu0 %v2711_v28  ;;  %1608 = vmatpush.bf16.msra.mxu2 %v2727_v37 }
  0x9f   :  { %1595 = vmatpush.bf16.msra.mxu1 %v2719_v30  ;;  %1621 = vmatpush.bf16.msra.mxu3 %v2735_v43  ;;  %v2750_v30 = vld [vmem:[%s3884_s3 + $0x140] sm:$0xff] }
  0xa0   :  { %v2770_v43 = vld [vmem:[%s3884_s3 + $0x1e0] sm:$0xff] }
  0xa1   :  { %1583 = vmatpush.bf16.msra.mxu0 %v2710_v32  ;;  %1609 = vmatpush.bf16.msra.mxu2 %v2726_v40  ;;  %v2773_v32 = vld [vmem:[%s3884_s3 + $0x1f8] sm:$0xff]  ;;  %v2762_v40 = vld [vmem:[%s3884_s3 + $0x1a0] sm:$0xff] }
  0xa3   :  { %1596 = vmatpush.bf16.msra.mxu1 %v2718_v34  ;;  %1622 = vmatpush.bf16.msra.mxu3 %v2734_v50  ;;  %v2763_v34 = vld [vmem:[%s3884_s3 + $0x1a8] sm:$0xff] }
  0xa5   :  { %1628 = vmatpush.bf16.msrb.mxu0 %v2749_v41  ;;  %1654 = vmatpush.bf16.msrb.mxu2 %v2765_v19  ;;  %v2771_v41 = vld [vmem:[%s3884_s3 + $0x1e8] sm:$0xff] }
  0xa7   :  { %v829_v42 = vpop.f32.mrf.mxu0  ;;  %1641 = vmatpush.bf16.msrb.mxu1 %v2757_v53  ;;  %1667 = vmatpush.bf16.msrb.mxu3 %v2773_v32  ;;  %v163_v53 = vperm.slane %v3727_v36, 5 }
  0xa8   :  { %v830_v44 = vadd.f32 %v829_v42, %v158_v39  ;;  %v2761_v42 = vld [vmem:[%s3884_s3 + $0x198] sm:$0xff] }
  0xa9   :  { %v842_v45 = vpop.f32.mrf.mxu1  ;;  %1629 = vmatpush.bf16.msrb.mxu0 %v2748_v48  ;;  %1655 = vmatpush.bf16.msrb.mxu2 %v2764_v29  ;;  %v2759_v48 = vld [vmem:[%s3884_s3 + $0x188] sm:$0xff] }
  0xaa   :  { %v843_v47 = vadd.f32 %v842_v45, %v830_v44  ;;  %v2760_v44 = vld [vmem:[%s3884_s3 + $0x190] sm:$0xff]  ;;  %v162_v45 = vperm.slane %v3727_v36, 4 }
  0xab   :  { %1642 = vmatpush.bf16.msrb.mxu1 %v2756_v57  ;;  %1668 = vmatpush.bf16.msrb.mxu3 %v2772_v38  ;;  %v2780_v38 = vld [vmem:[%s3886_s5 + $0x30] sm:$0xff] }
  0xac   :  { %vm1028_vm0 = vcmp.ge.f32.partialorder %v843_v47, 0.0  ;;  %v1036_v51 = vmul.f32 0.01, %v843_v47 }
  0xad   :  { %v855_v49 = vpop.f32.mrf.mxu2  ;;  %1630 = vmatpush.bf16.msrb.mxu0 %v2747_v56  ;;  %1656 = vmatpush.bf16.msrb.mxu2 %v2763_v34  ;;  %v2767_v56 = vld [vmem:[%s3884_s3 + $0x1c8] sm:$0xff] }
  0xae   :  { %v856_v52 = vadd.f32 %v855_v49, %v159_v46  ;;  %v1044_v54 = vsel %vm1028_vm0, %v843_v47, %v1036_v51  ;;  %v2769_v46 = vld [vmem:[%s3884_s3 + $0x1d8] sm:$0xff]  ;;  %v2768_v51 = vld [vmem:[%s3884_s3 + $0x1d0] sm:$0xff] }
  0xaf   :  { %v868_v55 = vpop.f32.mrf.mxu3  ;;  %v1052_v58 = vpack.c.bf16 %v1044_v54, %v1044_v54  ;;  %v831_v59 = vpop.f32.mrf.mxu0  ;;  %1643 = vmatpush.bf16.msrb.mxu1 %v2755_v2  ;;  %1669 = vmatpush.bf16.msrb.mxu3 %v2771_v41  ;;  %v2758_v54 = vld [vmem:[%s3884_s3 + $0x180] sm:$0xff] }
  0xb0   :  { %v869_v60 = vadd.f32 %v868_v55, %v856_v52  ;;  %v2778_v41 = vld [vmem:[%s3886_s5 + $0x20] sm:$0xff] }
  0xb1   :  { %v844_v61 = vpop.f32.mrf.mxu1  ;;  %1584 = vmatmul.bf16.vlgmr.msra.gmra.mxu0 %v1052_v58  ;;  %1657 = vmatpush.bf16.msrb.mxu2 %v2762_v40 }
  0xb2   :  { %vm1029_vm1 = vcmp.ge.f32.partialorder %v869_v60, 0.0  ;;  %v1037_v63 = vmul.f32 0.01, %v869_v60  ;;  %1631 = vmatpush.bf16.msrb.mxu0 %v2746_v62 }
  0xb3   :  { %1644 = vmatpush.bf16.msrb.mxu1 %v2754_v6  ;;  %1670 = vmatpush.bf16.msrb.mxu3 %v2770_v43 }
  0xb4   :  { %v1045_v0 = vsel %vm1029_vm1, %v869_v60, %v1037_v63 }
  0xb5   :  { %v857_v1 = vpop.f32.mrf.mxu2  ;;  %v1053_v3 = vpack.c.bf16 %v1045_v0, %v1045_v0  ;;  %1658 = vmatpush.bf16.msrb.mxu2 %v2761_v42  ;;  %v2777_v42 = vld [vmem:[%s3886_s5 + $0x18] sm:$0xff] }
  0xb6   :  { %1632 = vmatpush.bf16.msrb.mxu0 %v2745_v4  ;;  %v2766_v1 = vld [vmem:[%s3884_s3 + $0x1c0] sm:$0xff] }
  0xb7   :  { %v870_v5 = vpop.f32.mrf.mxu3  ;;  %1597 = vmatmul.bf16.vlgmr.msra.gmra.mxu1 %v1053_v3  ;;  %1671 = vmatpush.bf16.msrb.mxu3 %v2769_v46 }
  0xb8   :  { %1645 = vmatpush.bf16.msrb.mxu1 %v2753_v9 }
  0xb9   :  { %1659 = vmatpush.bf16.msrb.mxu2 %v2760_v44  ;;  %v2776_v44 = vld [vmem:[%s3886_s5 + $0x10] sm:$0xff] }
  0xba   :  { %1633 = vmatpush.bf16.msrb.mxu0 %v2744_v7  ;;  %v164_v7 = vperm.slane %v3727_v36, 6 }
  0xbb   :  { %1672 = vmatpush.bf16.msrb.mxu3 %v2768_v51 }
  0xbc   :  { %1646 = vmatpush.bf16.msrb.mxu1 %v2752_v17 }
  0xbd   :  { %1660 = vmatpush.bf16.msrb.mxu2 %v2759_v48  ;;  %v2774_v48 = vld [vmem:[%s3886_s5] sm:$0xff] }
  0xbe   :  { %1634 = vmatpush.bf16.msrb.mxu0 %v2743_v14 }
  0xbf   :  { %1673 = vmatpush.bf16.msrb.mxu3 %v2767_v56 }
  0xc0   :  { %1647 = vmatpush.bf16.msrb.mxu1 %v2751_v22 }
  0xc1   :  { %v881_v10 = vpop.f32.mrf.mxu0  ;;  %1661 = vmatpush.bf16.msrb.mxu2 %v2758_v54 }
  0xc2   :  { %v882_v11 = vadd.f32 %v881_v10, %v160_v8  ;;  %1635 = vmatpush.bf16.msrb.mxu0 %v2742_v15 }
  0xc3   :  { %v894_v12 = vpop.f32.mrf.mxu1  ;;  %1674 = vmatpush.bf16.msrb.mxu3 %v2766_v1 }
  0xc4   :  { %v895_v16 = vadd.f32 %v894_v12, %v882_v11  ;;  %1648 = vmatpush.bf16.msrb.mxu1 %v2750_v30  ;;  %v165_v12 = vperm.slane %v3727_v36, 7  ;;  %v2783_v36 = vld [vmem:[%s3885_s4] ss:$0 sm:$0xff] }
  0xc6   :  { %vm1030_vm2 = vcmp.ge.f32.partialorder %v895_v16, 0.0  ;;  %v1038_v13 = vmul.f32 0.01, %v895_v16 }
  0xc7   :  { %v907_v21 = vpop.f32.mrf.mxu2 }
  0xc8   :  { %v1046_v20 = vsel %vm1030_vm2, %v895_v16, %v1038_v13  ;;  %v908_v24 = vadd.f32 %v907_v21, %v161_v18 }
  0xc9   :  { %v1054_v23 = vpack.c.bf16 %v1046_v20, %v1046_v20  ;;  %v920_v25 = vpop.f32.mrf.mxu3  ;;  %v883_v26 = vpop.f32.mrf.mxu0 }
  0xca   :  { %v921_v28 = vadd.f32 %v920_v25, %v908_v24 }
  0xcb   :  { %v896_v27 = vpop.f32.mrf.mxu1  ;;  %1610 = vmatmul.bf16.vlgmr.msra.gmra.mxu2 %v1054_v23 }
  0xcc   :  { %vm1031_vm3 = vcmp.ge.f32.partialorder %v921_v28, 0.0  ;;  %v1039_v31 = vmul.f32 0.01, %v921_v28 }
  0xce   :  { %v1047_v33 = vsel %vm1031_vm3, %v921_v28, %v1039_v31 }
  0xcf   :  { %v1055_v35 = vpack.c.bf16 %v1047_v33, %v1047_v33  ;;  %v909_v37 = vpop.f32.mrf.mxu2 }
  0xd1   :  { %v922_v39 = vpop.f32.mrf.mxu3  ;;  %1623 = vmatmul.bf16.vlgmr.msra.gmra.mxu3 %v1055_v35  ;;  %v2781_v35 = vld [vmem:[%s3886_s5 + $0x38] sm:$0xff] }
  0xd2   :  { %1752 = vmatpush.bf16.msra.mxu0 %v2781_v35  ;;  %v2779_v39 = vld [vmem:[%s3886_s5 + $0x28] sm:$0xff] }
  0xd6   :  { %1753 = vmatpush.bf16.msra.mxu0 %v2780_v38 }
  0xda   :  { %1754 = vmatpush.bf16.msra.mxu0 %v2779_v39 }
  0xde   :  { %1755 = vmatpush.bf16.msra.mxu0 %v2778_v41 }
  0xe1   :  { %v933_v47 = vpop.f32.mrf.mxu0 }
  0xe2   :  { %v934_v49 = vadd.f32 %v933_v47, %v162_v45  ;;  %1756 = vmatpush.bf16.msra.mxu0 %v2777_v42  ;;  %v2775_v47 = vld [vmem:[%s3886_s5 + $0x8] sm:$0xff]  ;;  %s2811_s5 = smov [#allocation2]  }
  0xe3   :  { %v946_v50 = vpop.f32.mrf.mxu1  ;;  %s1771_s11 = sshll.u32 %s2811_s5, 4  ;;  %s1772_s11 = int_to_ptr.vmem [resolvable:$true] %s1771_s11 }
  0xe4   :  { %v947_v52 = vadd.f32 %v946_v50, %v934_v49 }
  0xe6   :  { %vm1032_vm4 = vcmp.ge.f32.partialorder %v947_v52, 0.0  ;;  %v1040_v55 = vmul.f32 0.01, %v947_v52  ;;  %1757 = vmatpush.bf16.msra.mxu0 %v2776_v44 }
  0xe7   :  { %v959_v58 = vpop.f32.mrf.mxu2 }
  0xe8   :  { %v1048_v57 = vsel %vm1032_vm4, %v947_v52, %v1040_v55  ;;  %v960_v60 = vadd.f32 %v959_v58, %v163_v53 }
  0xe9   :  { %v1056_v59 = vpack.c.bf16 %v1048_v57, %v1048_v57  ;;  %v972_v61 = vpop.f32.mrf.mxu3  ;;  %v935_v62 = vpop.f32.mrf.mxu0 }
  0xea   :  { %v973_v0 = vadd.f32 %v972_v61, %v960_v60  ;;  %1758 = vmatpush.bf16.msra.mxu0 %v2775_v47 }
  0xeb   :  { %v948_v63 = vpop.f32.mrf.mxu1  ;;  %1636 = vmatmul.bf16.vlgmr.msrb.gmra.mxu0 %v1056_v59 }
  0xec   :  { %vm1033_vm5 = vcmp.ge.f32.partialorder %v973_v0, 0.0  ;;  %v1041_v2 = vmul.f32 0.01, %v973_v0  ;;  %v2784_v63 = vld [vmem:[%s3887_s6] ss:$0 sm:$0xff] }
  0xee   :  { %v1049_v3 = vsel %vm1033_vm5, %v973_v0, %v1041_v2  ;;  %1759 = vmatpush.bf16.msra.mxu0 %v2774_v48 }
  0xef   :  { %v1057_v4 = vpack.c.bf16 %v1049_v3, %v1049_v3  ;;  %v961_v5 = vpop.f32.mrf.mxu2 }
  0xf1   :  { %v974_v6 = vpop.f32.mrf.mxu3  ;;  %1649 = vmatmul.bf16.vlgmr.msrb.gmra.mxu1 %v1057_v4 }
 0x101   :  { %v985_v8 = vpop.f32.mrf.mxu0 }
 0x102   :  { %v986_v9 = vadd.f32 %v985_v8, %v164_v7 }
 0x103   :  { %v998_v10 = vpop.f32.mrf.mxu1 }
 0x104   :  { %v999_v11 = vadd.f32 %v998_v10, %v986_v9 }
 0x106   :  { %vm1034_vm6 = vcmp.ge.f32.partialorder %v999_v11, 0.0  ;;  %v1042_v14 = vmul.f32 0.01, %v999_v11 }
 0x107   :  { %v1011_v17 = vpop.f32.mrf.mxu2 }
 0x108   :  { %v1050_v16 = vsel %vm1034_vm6, %v999_v11, %v1042_v14  ;;  %v1012_v13 = vadd.f32 %v1011_v17, %v165_v12 }
 0x109   :  { %v1058_v18 = vpack.c.bf16 %v1050_v16, %v1050_v16  ;;  %v1024_v15 = vpop.f32.mrf.mxu3  ;;  %v987_v19 = vpop.f32.mrf.mxu0 }
 0x10a   :  { %v1025_v21 = vadd.f32 %v1024_v15, %v1012_v13 }
 0x10b   :  { %v1000_v20 = vpop.f32.mrf.mxu1  ;;  %1662 = vmatmul.bf16.vlgmr.msrb.gmra.mxu2 %v1058_v18 }
 0x10c   :  { %vm1035_vm7 = vcmp.ge.f32.partialorder %v1025_v21, 0.0  ;;  %v1043_v22 = vmul.f32 0.01, %v1025_v21 }
 0x10e   :  { %v1051_v23 = vsel %vm1035_vm7, %v1025_v21, %v1043_v22 }
 0x10f   :  { %v1059_v24 = vpack.c.bf16 %v1051_v23, %v1051_v23  ;;  %v1013_v25 = vpop.f32.mrf.mxu2 }
 0x111   :  { %v1026_v26 = vpop.f32.mrf.mxu3  ;;  %1675 = vmatmul.bf16.vlgmr.msrb.gmra.mxu3 %v1059_v24 }
 0x12e   :  { %v1585_v27 = vpop.f32.mrf.mxu0 }
 0x12f   :  { %v1586_v28 = vadd.f32 %v2783_v36, %v1585_v27 }
 0x134   :  { %v1598_v29 = vpop.f32.mrf.mxu1 }
 0x135   :  { %v1599_v30 = vadd.f32 %v1598_v29, %v1586_v28 }
 0x136   :  { %v1587_v31 = vpop.f32.mrf.mxu0 }
 0x13c   :  { %v1600_v32 = vpop.f32.mrf.mxu1 }
 0x14e   :  { %v1611_v33 = vpop.f32.mrf.mxu2 }
 0x14f   :  { %v1612_v50 = vadd.f32 %v1611_v33, %v1599_v30 }
 0x154   :  { %v1624_v34 = vpop.f32.mrf.mxu3 }
 0x155   :  { %v1625_v51 = vadd.f32 %v1624_v34, %v1612_v50 }
 0x156   :  { %v1613_v37 = vpop.f32.mrf.mxu2 }
 0x15c   :  { %v1626_v40 = vpop.f32.mrf.mxu3 }
 0x168   :  { %v1637_v43 = vpop.f32.mrf.mxu0 }
 0x169   :  { %v1638_v53 = vadd.f32 %v1637_v43, %v1625_v51 }
 0x16e   :  { %v1650_v45 = vpop.f32.mrf.mxu1 }
 0x16f   :  { %v1651_v54 = vadd.f32 %v1650_v45, %v1638_v53 }
 0x170   :  { %v1639_v46 = vpop.f32.mrf.mxu0 }
 0x176   :  { %v1652_v49 = vpop.f32.mrf.mxu1 }
 0x18e   :  { %v1663_v52 = vpop.f32.mrf.mxu2 }
 0x18f   :  { %v1664_v55 = vadd.f32 %v1663_v52, %v1651_v54 }
 0x194   :  { %v1676_v56 = vpop.f32.mrf.mxu3 }
 0x195   :  { %v1677_v57 = vadd.f32 %v1676_v56, %v1664_v55 }
 0x196   :  { %v1665_v58 = vpop.f32.mrf.mxu2 }
 0x197   :  { %vm1680_vm8 = vcmp.ge.f32.partialorder %v1677_v57, 0.0  ;;  %v1681_v59 = vmul.f32 0.01, %v1677_v57 }
 0x199   :  { %v1682_v60 = vsel %vm1680_vm8, %v1677_v57, %v1681_v59 }
 0x19a   :  { %v1683_v61 = vpack.c.bf16 %v1682_v60, %v1682_v60 }
 0x19c   :  { %v1678_v62 = vpop.f32.mrf.mxu3  ;;  %1760 = vmatmul.bf16.vlgmr.msra.gmra.mxu0 %v1683_v61 }
 0x219   :  { %v1761_v0 = vpop.f32.mrf.mxu0 }
 0x21a   :  { %v1762_v1 = vadd.f32 %v2784_v63, %v1761_v0 }
 0x21c   :  { %1765 = vst [vmem:[#allocation2] sm:$0x3] %v1762_v1 }
 0x21d   :  { %1776 = dma.vmem_to_hbm [thread:$0]  %s1772_s11, 32, %s1774_s14, [#allocation3]  }
 0x221   :  { %v1763_v2 = vpop.f32.mrf.mxu0 }
 0x222   :  { %2809 = dma.done.wait [#allocation3], 32  }
 0x223   :  { %2810 = vsyncadd [#allocation3], 4294967264 }
 0x224   :  { %1781 = vsyncpa [#allocation3], 1 }

</bundles_post_ra>
